<compile_context>
chip_gen: v7x
topology: tpu7x:2x2x1
jax: 0.10.0
libtpu: 0.0.40
codegen_flags: <defaults>
</compile_context>

<pallas_src>
import jax
import jax.numpy as jnp
from jax.experimental import pallas as pl
from jax.experimental.pallas import tpu as pltpu


def _round_up(x, m):
    return (x + m - 1) // m * m


# ---------------------------------------------------------------------------
# Wavelet (Haar) pooling
# ---------------------------------------------------------------------------

def _wavelet_pool_kernel(x1_ref, x2_ref, x3_ref, x4_ref, o_ref):
    # x1..x4: (TM, C) samples at (even,even), (odd,even), (even,odd), (odd,odd).
    # o_ref : (TM, 4C) lane-dense [LL | HL | LH | HH].
    C = x1_ref.shape[-1]
    a = x1_ref[...].astype(jnp.float32) * 0.5
    b = x2_ref[...].astype(jnp.float32) * 0.5
    c = x3_ref[...].astype(jnp.float32) * 0.5
    d = x4_ref[...].astype(jnp.float32) * 0.5
    dt = o_ref.dtype
    o_ref[:, 0 * C:1 * C] = (a + b + c + d).astype(dt)      # LL
    o_ref[:, 1 * C:2 * C] = (-a - b + c + d).astype(dt)     # HL
    o_ref[:, 2 * C:3 * C] = (-a + b - c + d).astype(dt)     # LH
    o_ref[:, 3 * C:4 * C] = (a - b - c + d).astype(dt)      # HH


def wavelet_pool(x, out_dtype=jnp.bfloat16):
    """x: (N, H, W, C) -> (N, H/2, W/2, 4C), channel order [LL, HL, LH, HH]."""
    N, H, W, C = x.shape
    Hh, Wh = H // 2, W // 2
    M = N * Hh * Wh
    xr = x.reshape(N, Hh, 2, Wh, 2, C)
    x1 = xr[:, :, 0, :, 0, :].reshape(M, C)
    x2 = xr[:, :, 1, :, 0, :].reshape(M, C)
    x3 = xr[:, :, 0, :, 1, :].reshape(M, C)
    x4 = xr[:, :, 1, :, 1, :].reshape(M, C)

    TM = min(512, _round_up(M, 8))          # row tile (multiple of 8 sublanes)
    Mp = _round_up(M, TM)
    if Mp != M:
        pad = ((0, Mp - M), (0, 0))
        x1, x2, x3, x4 = (jnp.pad(v, pad) for v in (x1, x2, x3, x4))

    out = pl.pallas_call(
        _wavelet_pool_kernel,
        out_shape=jax.ShapeDtypeStruct((Mp, 4 * C), out_dtype),
        grid=(Mp // TM,),
        in_specs=[pl.BlockSpec((TM, C), lambda i: (i, 0))] * 4,
        out_specs=pl.BlockSpec((TM, 4 * C), lambda i: (i, 0)),
        compiler_params=pltpu.CompilerParams(dimension_semantics=("parallel",)),
    )(x1, x2, x3, x4)
    return out[:M].reshape(N, Hh, Wh, 4 * C)


# ---------------------------------------------------------------------------
# Fused 3x3 conv + BatchNorm(eval) + ReLU (in-kernel 9-tap accumulation)
# ---------------------------------------------------------------------------

def _make_conv_bn_relu_kernel(H, Wp):
    Mv = H * Wp  # output rows per frame (includes 2 throwaway border cols per row)

    def kernel(x_ref, w_ref, s_ref, b_ref, o_ref):
        # x_ref: (1, L, Cin) bf16  -- zero-padded frame, row-flattened, +1 halo each end
        # w_ref: (9, Cin, Cout) bf16;  s_ref/b_ref: (1, Cout) f32
        # o_ref: (1, Mv, Cout) bf16
        acc = None
        for dy in range(3):
            for dx in range(3):
                start = dy * Wp + dx                         # static per-tap shift
                lhs = x_ref[0, start:start + Mv, :]          # (Mv, Cin) bf16, in VMEM
                part = jnp.dot(lhs, w_ref[dy * 3 + dx],
                               preferred_element_type=jnp.float32)
                acc = part if acc is None else acc + part
        y = jnp.maximum(acc * s_ref[...] + b_ref[...], 0.0)   # f32 epilogue
        o_ref[0] = y.astype(o_ref.dtype)

    return kernel


def conv_bn_relu(x, w, bn_scale, bn_bias):
    """3x3 conv (stride 1, pad 1, no bias) + folded BN + ReLU. x: (N,H,W,Cin) -> (N,H,W,Cout)."""
    N, H, W, Cin = x.shape
    Cout = w.shape[-1]
    Hp, Wp = H + 2, W + 2
    Mv = H * Wp                  # rows computed per frame
    L = Hp * Wp + 2              # flattened padded frame + 1-element halo at each end

    xp = jnp.pad(x.astype(jnp.bfloat16), ((0, 0), (1, 1), (1, 1), (0, 0)))
    xf = jnp.pad(xp.reshape(N, Hp * Wp, Cin), ((0, 0), (1, 1), (0, 0)))
    wk = w.astype(jnp.bfloat16).reshape(9, Cin, Cout)
    s = bn_scale.astype(jnp.float32).reshape(1, Cout)
    b = bn_bias.astype(jnp.float32).reshape(1, Cout)

    out = pl.pallas_call(
        _make_conv_bn_relu_kernel(H, Wp),
        out_shape=jax.ShapeDtypeStruct((N, Mv, Cout), jnp.bfloat16),
        grid=(N,),                                   # batch-parallel (2 TCs on v7x)
        in_specs=[pl.BlockSpec((1, L, Cin), lambda n: (n, 0, 0)),
                  pl.BlockSpec((9, Cin, Cout), lambda n: (0, 0, 0)),
                  pl.BlockSpec((1, Cout), lambda n: (0, 0)),
                  pl.BlockSpec((1, Cout), lambda n: (0, 0))],
        out_specs=pl.BlockSpec((1, Mv, Cout), lambda n: (n, 0, 0)),
        compiler_params=pltpu.CompilerParams(dimension_semantics=("parallel",)),
    )(xf, wk, s, b)
    # Drop the left/right zero-padding columns that ride along each output row.
    return out.reshape(N, H, Wp, Cout)[:, :, 1:W + 1, :]


# ---------------------------------------------------------------------------
# Global average pool + Linear(C, 1) + Sigmoid
# ---------------------------------------------------------------------------

def _head_kernel(x_ref, w_ref, b_ref, o_ref):
    inv_hw = 1.0 / x_ref.shape[1]
    pooled = jnp.sum(x_ref[...].astype(jnp.float32), axis=1) * inv_hw      # (N, C)
    z = jnp.dot(pooled, w_ref[...], preferred_element_type=jnp.float32) + b_ref[...]
    o_ref[...] = 1.0 / (1.0 + jnp.exp(-z))


def head(x, fc_w, fc_b):
    """AdaptiveAvgPool2d(1) + Linear(C, 1) + Sigmoid. x: (N, H, W, C) -> (N, 1)."""
    N, H, W, C = x.shape
    xf = x.reshape(N, H * W, C)
    return pl.pallas_call(
        _head_kernel,
        out_shape=jax.ShapeDtypeStruct((N, 1), jnp.float32),
        grid=(1,),
        in_specs=[pl.BlockSpec((N, H * W, C), lambda i: (0, 0, 0)),
                  pl.BlockSpec((C, 1), lambda i: (0, 0)),
                  pl.BlockSpec((1, 1), lambda i: (0, 0))],
        out_specs=pl.BlockSpec((N, 1), lambda i: (0, 0)),
        compiler_params=pltpu.CompilerParams(dimension_semantics=("arbitrary",)),
    )(xf, fc_w.astype(jnp.float32).reshape(C, 1),
      fc_b.astype(jnp.float32).reshape(1, 1))


# ---------------------------------------------------------------------------
# Parameter init (deterministic, synthetic) + model forward
# ---------------------------------------------------------------------------

def init_params(key, in_channel):
    out1, out2, out3, out4 = 16, 64, 128, 128
    conv_defs = [
        ("conv1", 4 * in_channel, out1),
        ("conv2", 4 * out1, out2),
        ("conv3", 4 * out2, out3),
        ("conv4", 4 * out3, out4),
        ("conv5", out4, out4),
    ]
    params = {}
    eps = 1e-5
    keys = jax.random.split(key, 5 * len(conv_defs) + 2)
    ki = 0
    for name, cin, cout in conv_defs:
        w = jax.random.normal(keys[ki], (3, 3, cin, cout), jnp.float32) * jnp.sqrt(2.0 / (9 * cin)); ki += 1
        gamma = 1.0 + 0.1 * jax.random.normal(keys[ki], (cout,), jnp.float32); ki += 1
        beta = 0.1 * jax.random.normal(keys[ki], (cout,), jnp.float32); ki += 1
        rmean = 0.1 * jax.random.normal(keys[ki], (cout,), jnp.float32); ki += 1
        rvar = 1.0 + 0.1 * jax.random.uniform(keys[ki], (cout,), jnp.float32); ki += 1
        scale = gamma / jnp.sqrt(rvar + eps)        # fold BN (eval mode)
        bias = beta - rmean * scale
        params[name] = (w.astype(jnp.bfloat16), scale, bias)   # MXU-native bf16 weights
    params["fc_w"] = jax.random.normal(keys[ki], (out4, 1), jnp.float32) / jnp.sqrt(out4); ki += 1
    params["fc_b"] = 0.1 * jax.random.normal(keys[ki], (1,), jnp.float32)
    return params


def wavelet_model_noatt(x, params):
    """x: (N, H, W, Cin) NHWC -> (N, 1) sigmoid outputs."""
    x = wavelet_pool(x)
    x = conv_bn_relu(x, *params["conv1"])
    x = wavelet_pool(x)
    x = conv_bn_relu(x, *params["conv2"])
    x = wavelet_pool(x)
    x = conv_bn_relu(x, *params["conv3"])
    x = wavelet_pool(x)
    x = conv_bn_relu(x, *params["conv4"])
    x = conv_bn_relu(x, *params["conv5"])
    # TODO(synk): conv4+conv5+head could be fused into one pallas_call to cut launch
    # overhead at toy sizes; kept separate for clarity/generality.
    return head(x, params["fc_w"], params["fc_b"])


if __name__ == "__main__":
    key = jax.random.PRNGKey(0)
    k_in, k_par = jax.random.split(key)

    batch, in_channel, spatial = 2, 4, 16
    x_nchw = jax.random.normal(k_in, (batch, in_channel, spatial, spatial), jnp.float32)
    x = jnp.transpose(x_nchw, (0, 2, 3, 1))      # NCHW -> NHWC

    params = init_params(k_par, in_channel)

    out = jax.jit(wavelet_model_noatt)(x, params)
    out = jax.block_until_ready(out)

    assert out.shape == (batch, 1)
    assert bool(jnp.all(jnp.isfinite(out)))
    assert bool(jnp.all((out >= 0.0) & (out <= 1.0)))
    print("KERNEL_OK")
</pallas_src>

<mosaic_0001>
module attributes {stable_mosaic.version = 11 : i64} {
  func.func @_wavelet_pool_kernel(%arg0: i32, %arg1: memref<128x4xf32, #tpu.memory_space<vmem>>, %arg2: memref<128x4xf32, #tpu.memory_space<vmem>>, %arg3: memref<128x4xf32, #tpu.memory_space<vmem>>, %arg4: memref<128x4xf32, #tpu.memory_space<vmem>>, %arg5: memref<128x16xbf16, #tpu.memory_space<vmem>>) attributes {dimension_semantics = [#tpu.dimension_semantics<parallel>], iteration_bounds = array<i64: 1>, scalar_prefetch = 0 : i64, scratch_operands = 0 : i64, tpu.core_type = #tpu.core_type<tc>, window_params = [{transform_indices = @transform_0, window_bounds = array<i64: 128, 4>}, {transform_indices = @transform_1, window_bounds = array<i64: 128, 4>}, {transform_indices = @transform_2, window_bounds = array<i64: 128, 4>}, {transform_indices = @transform_3, window_bounds = array<i64: 128, 4>}, {transform_indices = @transform_4, window_bounds = array<i64: 128, 16>}]} {
    %c0 = arith.constant 0 : index
    %c0_0 = arith.constant 0 : index
    %0 = vector.load %arg1[%c0, %c0_0] : memref<128x4xf32, #tpu.memory_space<vmem>>, vector<128x4xf32>
    %cst = arith.constant 5.000000e-01 : f32
    %1 = vector.broadcast %cst : f32 to vector<128x4xf32>
    %2 = arith.mulf %0, %1 : vector<128x4xf32>
    %c0_1 = arith.constant 0 : index
    %c0_2 = arith.constant 0 : index
    %3 = vector.load %arg2[%c0_1, %c0_2] : memref<128x4xf32, #tpu.memory_space<vmem>>, vector<128x4xf32>
    %cst_3 = arith.constant 5.000000e-01 : f32
    %4 = vector.broadcast %cst_3 : f32 to vector<128x4xf32>
    %5 = arith.mulf %3, %4 : vector<128x4xf32>
    %c0_4 = arith.constant 0 : index
    %c0_5 = arith.constant 0 : index
    %6 = vector.load %arg3[%c0_4, %c0_5] : memref<128x4xf32, #tpu.memory_space<vmem>>, vector<128x4xf32>
    %cst_6 = arith.constant 5.000000e-01 : f32
    %7 = vector.broadcast %cst_6 : f32 to vector<128x4xf32>
    %8 = arith.mulf %6, %7 : vector<128x4xf32>
    %c0_7 = arith.constant 0 : index
    %c0_8 = arith.constant 0 : index
    %9 = vector.load %arg4[%c0_7, %c0_8] : memref<128x4xf32, #tpu.memory_space<vmem>>, vector<128x4xf32>
    %cst_9 = arith.constant 5.000000e-01 : f32
    %10 = vector.broadcast %cst_9 : f32 to vector<128x4xf32>
    %11 = arith.mulf %9, %10 : vector<128x4xf32>
    %12 = arith.addf %2, %5 : vector<128x4xf32>
    %13 = arith.addf %12, %8 : vector<128x4xf32>
    %14 = arith.addf %13, %11 : vector<128x4xf32>
    %15 = arith.truncf %14 : vector<128x4xf32> to vector<128x4xbf16>
    %c0_10 = arith.constant 0 : index
    %c0_11 = arith.constant 0 : index
    %16 = vector.load %arg5[%c0_10, %c0_11] : memref<128x16xbf16, #tpu.memory_space<vmem>>, vector<128x4xbf16>
    tpu.vector_store %arg5[%c0_10, %c0_11], %15 {strides = array<i32>} : memref<128x16xbf16, #tpu.memory_space<vmem>>, vector<128x4xbf16>,
    %cst_12 = arith.constant 0.000000e+00 : f32
    %17 = vector.broadcast %cst_12 : f32 to vector<128x4xf32>
    %18 = arith.subf %17, %2 : vector<128x4xf32>
    %19 = arith.subf %18, %5 : vector<128x4xf32>
    %20 = arith.addf %19, %8 : vector<128x4xf32>
    %21 = arith.addf %20, %11 : vector<128x4xf32>
    %22 = arith.truncf %21 : vector<128x4xf32> to vector<128x4xbf16>
    %c0_13 = arith.constant 0 : index
    %c4 = arith.constant 4 : index
    %23 = vector.load %arg5[%c0_13, %c4] : memref<128x16xbf16, #tpu.memory_space<vmem>>, vector<128x4xbf16>
    tpu.vector_store %arg5[%c0_13, %c4], %22 {strides = array<i32>} : memref<128x16xbf16, #tpu.memory_space<vmem>>, vector<128x4xbf16>,
    %cst_14 = arith.constant 0.000000e+00 : f32
    %24 = vector.broadcast %cst_14 : f32 to vector<128x4xf32>
    %25 = arith.subf %24, %2 : vector<128x4xf32>
    %26 = arith.addf %25, %5 : vector<128x4xf32>
    %27 = arith.subf %26, %8 : vector<128x4xf32>
    %28 = arith.addf %27, %11 : vector<128x4xf32>
    %29 = arith.truncf %28 : vector<128x4xf32> to vector<128x4xbf16>
    %c0_15 = arith.constant 0 : index
    %c8 = arith.constant 8 : index
    %30 = vector.load %arg5[%c0_15, %c8] : memref<128x16xbf16, #tpu.memory_space<vmem>>, vector<128x4xbf16>
    tpu.vector_store %arg5[%c0_15, %c8], %29 {strides = array<i32>} : memref<128x16xbf16, #tpu.memory_space<vmem>>, vector<128x4xbf16>,
    %31 = arith.subf %2, %5 : vector<128x4xf32>
    %32 = arith.subf %31, %8 : vector<128x4xf32>
    %33 = arith.addf %32, %11 : vector<128x4xf32>
    %34 = arith.truncf %33 : vector<128x4xf32> to vector<128x4xbf16>
    %c0_16 = arith.constant 0 : index
    %c12 = arith.constant 12 : index
    %35 = vector.load %arg5[%c0_16, %c12] : memref<128x16xbf16, #tpu.memory_space<vmem>>, vector<128x4xbf16>
    tpu.vector_store %arg5[%c0_16, %c12], %34 {strides = array<i32>} : memref<128x16xbf16, #tpu.memory_space<vmem>>, vector<128x4xbf16>,
    return
  }
  func.func @transform_0(%arg0: i32) -> (i32, i32) {
    %c0_i32 = arith.constant 0 : i32
    %c0_i32_0 = arith.constant 0 : i32
    return %arg0, %c0_i32 : i32, i32
  }
  func.func @transform_1(%arg0: i32) -> (i32, i32) {
    %c0_i32 = arith.constant 0 : i32
    %c0_i32_0 = arith.constant 0 : i32
    return %arg0, %c0_i32 : i32, i32
  }
  func.func @transform_2(%arg0: i32) -> (i32, i32) {
    %c0_i32 = arith.constant 0 : i32
    %c0_i32_0 = arith.constant 0 : i32
    return %arg0, %c0_i32 : i32, i32
  }
  func.func @transform_3(%arg0: i32) -> (i32, i32) {
    %c0_i32 = arith.constant 0 : i32
    %c0_i32_0 = arith.constant 0 : i32
    return %arg0, %c0_i32 : i32, i32
  }
  func.func @transform_4(%arg0: i32) -> (i32, i32) {
    %c0_i32 = arith.constant 0 : i32
    %c0_i32_0 = arith.constant 0 : i32
    return %arg0, %c0_i32 : i32, i32
  }
}

module attributes {stable_mosaic.version = 11 : i64} {
  func.func @kernel(%arg0: i32, %arg1: memref<1x102x16xbf16, #tpu.memory_space<vmem>>, %arg2: memref<9x16x16xbf16, #tpu.memory_space<vmem>>, %arg3: memref<1x16xf32, #tpu.memory_space<vmem>>, %arg4: memref<1x16xf32, #tpu.memory_space<vmem>>, %arg5: memref<1x80x16xbf16, #tpu.memory_space<vmem>>) attributes {dimension_semantics = [#tpu.dimension_semantics<parallel>], iteration_bounds = array<i64: 2>, scalar_prefetch = 0 : i64, scratch_operands = 0 : i64, tpu.core_type = #tpu.core_type<tc>, window_params = [{transform_indices = @transform_0, window_bounds = array<i64: 1, 102, 16>}, {pipeline_mode = #tpu.pipeline_mode<synchronous>, transform_indices = @transform_1, window_bounds = array<i64: 9, 16, 16>}, {pipeline_mode = #tpu.pipeline_mode<synchronous>, transform_indices = @transform_2, window_bounds = array<i64: 1, 16>}, {pipeline_mode = #tpu.pipeline_mode<synchronous>, transform_indices = @transform_3, window_bounds = array<i64: 1, 16>}, {transform_indices = @transform_4, window_bounds = array<i64: 1, 80, 16>}]} {
    %c0 = arith.constant 0 : index
    %c0_0 = arith.constant 0 : index
    %c0_1 = arith.constant 0 : index
    %0 = vector.load %arg1[%c0, %c0_0, %c0_1] : memref<1x102x16xbf16, #tpu.memory_space<vmem>>, vector<1x80x16xbf16>
    %1 = vector.shape_cast %0 : vector<1x80x16xbf16> to vector<80x16xbf16>
    %c0_2 = arith.constant 0 : index
    %c0_3 = arith.constant 0 : index
    %c0_4 = arith.constant 0 : index
    %2 = vector.load %arg2[%c0_2, %c0_3, %c0_4] : memref<9x16x16xbf16, #tpu.memory_space<vmem>>, vector<1x16x16xbf16>
    %3 = vector.shape_cast %2 : vector<1x16x16xbf16> to vector<16x16xbf16>
    %cst = arith.constant dense<0.000000e+00> : vector<80x16xf32>
    %4 = tpu.matmul %1, %3, %cst {dimension_numbers = #tpu.dot_dimension_numbers<[1], [0], [0], [1], [0, 0, 1, 1], [], []>} : vector<80x16xbf16>, vector<16x16xbf16>, vector<80x16xf32> -> vector<80x16xf32>
    %c0_5 = arith.constant 0 : index
    %c1 = arith.constant 1 : index
    %c0_6 = arith.constant 0 : index
    %5 = vector.load %arg1[%c0_5, %c1, %c0_6] : memref<1x102x16xbf16, #tpu.memory_space<vmem>>, vector<1x80x16xbf16>
    %6 = vector.shape_cast %5 : vector<1x80x16xbf16> to vector<80x16xbf16>
    %c1_7 = arith.constant 1 : index
    %c0_8 = arith.constant 0 : index
    %c0_9 = arith.constant 0 : index
    %7 = vector.load %arg2[%c1_7, %c0_8, %c0_9] : memref<9x16x16xbf16, #tpu.memory_space<vmem>>, vector<1x16x16xbf16>
    %8 = vector.shape_cast %7 : vector<1x16x16xbf16> to vector<16x16xbf16>
    %cst_10 = arith.constant dense<0.000000e+00> : vector<80x16xf32>
    %9 = tpu.matmul %6, %8, %cst_10 {dimension_numbers = #tpu.dot_dimension_numbers<[1], [0], [0], [1], [0, 0, 1, 1], [], []>} : vector<80x16xbf16>, vector<16x16xbf16>, vector<80x16xf32> -> vector<80x16xf32>
    %10 = arith.addf %4, %9 : vector<80x16xf32>
    %c0_11 = arith.constant 0 : index
    %c2 = arith.constant 2 : index
    %c0_12 = arith.constant 0 : index
    %11 = vector.load %arg1[%c0_11, %c2, %c0_12] : memref<1x102x16xbf16, #tpu.memory_space<vmem>>, vector<1x80x16xbf16>
    %12 = vector.shape_cast %11 : vector<1x80x16xbf16> to vector<80x16xbf16>
    %c2_13 = arith.constant 2 : index
    %c0_14 = arith.constant 0 : index
    %c0_15 = arith.constant 0 : index
    %13 = vector.load %arg2[%c2_13, %c0_14, %c0_15] : memref<9x16x16xbf16, #tpu.memory_space<vmem>>, vector<1x16x16xbf16>
    %14 = vector.shape_cast %13 : vector<1x16x16xbf16> to vector<16x16xbf16>
    %cst_16 = arith.constant dense<0.000000e+00> : vector<80x16xf32>
    %15 = tpu.matmul %12, %14, %cst_16 {dimension_numbers = #tpu.dot_dimension_numbers<[1], [0], [0], [1], [0, 0, 1, 1], [], []>} : vector<80x16xbf16>, vector<16x16xbf16>, vector<80x16xf32> -> vector<80x16xf32>
    %16 = arith.addf %10, %15 : vector<80x16xf32>
    %c0_17 = arith.constant 0 : index
    %c10 = arith.constant 10 : index
    %c0_18 = arith.constant 0 : index
    %17 = vector.load %arg1[%c0_17, %c10, %c0_18] : memref<1x102x16xbf16, #tpu.memory_space<vmem>>, vector<1x80x16xbf16>
    %18 = vector.shape_cast %17 : vector<1x80x16xbf16> to vector<80x16xbf16>
    %c3 = arith.constant 3 : index
    %c0_19 = arith.constant 0 : index
    %c0_20 = arith.constant 0 : index
    %19 = vector.load %arg2[%c3, %c0_19, %c0_20] : memref<9x16x16xbf16, #tpu.memory_space<vmem>>, vector<1x16x16xbf16>
    %20 = vector.shape_cast %19 : vector<1x16x16xbf16> to vector<16x16xbf16>
    %cst_21 = arith.constant dense<0.000000e+00> : vector<80x16xf32>
    %21 = tpu.matmul %18, %20, %cst_21 {dimension_numbers = #tpu.dot_dimension_numbers<[1], [0], [0], [1], [0, 0, 1, 1], [], []>} : vector<80x16xbf16>, vector<16x16xbf16>, vector<80x16xf32> -> vector<80x16xf32>
    %22 = arith.addf %16, %21 : vector<80x16xf32>
    %c0_22 = arith.constant 0 : index
    %c11 = arith.constant 11 : index
    %c0_23 = arith.constant 0 : index
    %23 = vector.load %arg1[%c0_22, %c11, %c0_23] : memref<1x102x16xbf16, #tpu.memory_space<vmem>>, vector<1x80x16xbf16>
    %24 = vector.shape_cast %23 : vector<1x80x16xbf16> to vector<80x16xbf16>
    %c4 = arith.constant 4 : index
    %c0_24 = arith.constant 0 : index
    %c0_25 = arith.constant 0 : index
    %25 = vector.load %arg2[%c4, %c0_24, %c0_25] : memref<9x16x16xbf16, #tpu.memory_space<vmem>>, vector<1x16x16xbf16>
    %26 = vector.shape_cast %25 : vector<1x16x16xbf16> to vector<16x16xbf16>
    %cst_26 = arith.constant dense<0.000000e+00> : vector<80x16xf32>
    %27 = tpu.matmul %24, %26, %cst_26 {dimension_numbers = #tpu.dot_dimension_numbers<[1], [0], [0], [1], [0, 0, 1, 1], [], []>} : vector<80x16xbf16>, vector<16x16xbf16>, vector<80x16xf32> -> vector<80x16xf32>
    %28 = arith.addf %22, %27 : vector<80x16xf32>
    %c0_27 = arith.constant 0 : index
    %c12 = arith.constant 12 : index
    %c0_28 = arith.constant 0 : index
    %29 = vector.load %arg1[%c0_27, %c12, %c0_28] : memref<1x102x16xbf16, #tpu.memory_space<vmem>>, vector<1x80x16xbf16>
    %30 = vector.shape_cast %29 : vector<1x80x16xbf16> to vector<80x16xbf16>
    %c5 = arith.constant 5 : index
    %c0_29 = arith.constant 0 : index
    %c0_30 = arith.constant 0 : index
    %31 = vector.load %arg2[%c5, %c0_29, %c0_30] : memref<9x16x16xbf16, #tpu.memory_space<vmem>>, vector<1x16x16xbf16>
    %32 = vector.shape_cast %31 : vector<1x16x16xbf16> to vector<16x16xbf16>
    %cst_31 = arith.constant dense<0.000000e+00> : vector<80x16xf32>
    %33 = tpu.matmul %30, %32, %cst_31 {dimension_numbers = #tpu.dot_dimension_numbers<[1], [0], [0], [1], [0, 0, 1, 1], [], []>} : vector<80x16xbf16>, vector<16x16xbf16>, vector<80x16xf32> -> vector<80x16xf32>
    %34 = arith.addf %28, %33 : vector<80x16xf32>
    %c0_32 = arith.constant 0 : index
    %c20 = arith.constant 20 : index
    %c0_33 = arith.constant 0 : index
    %35 = vector.load %arg1[%c0_32, %c20, %c0_33] : memref<1x102x16xbf16, #tpu.memory_space<vmem>>, vector<1x80x16xbf16>
    %36 = vector.shape_cast %35 : vector<1x80x16xbf16> to vector<80x16xbf16>
    %c6 = arith.constant 6 : index
    %c0_34 = arith.constant 0 : index
    %c0_35 = arith.constant 0 : index
    %37 = vector.load %arg2[%c6, %c0_34, %c0_35] : memref<9x16x16xbf16, #tpu.memory_space<vmem>>, vector<1x16x16xbf16>
    %38 = vector.shape_cast %37 : vector<1x16x16xbf16> to vector<16x16xbf16>
    %cst_36 = arith.constant dense<0.000000e+00> : vector<80x16xf32>
    %39 = tpu.matmul %36, %38, %cst_36 {dimension_numbers = #tpu.dot_dimension_numbers<[1], [0], [0], [1], [0, 0, 1, 1], [], []>} : vector<80x16xbf16>, vector<16x16xbf16>, vector<80x16xf32> -> vector<80x16xf32>
    %40 = arith.addf %34, %39 : vector<80x16xf32>
    %c0_37 = arith.constant 0 : index
    %c21 = arith.constant 21 : index
    %c0_38 = arith.constant 0 : index
    %41 = vector.load %arg1[%c0_37, %c21, %c0_38] : memref<1x102x16xbf16, #tpu.memory_space<vmem>>, vector<1x80x16xbf16>
    %42 = vector.shape_cast %41 : vector<1x80x16xbf16> to vector<80x16xbf16>
    %c7 = arith.constant 7 : index
    %c0_39 = arith.constant 0 : index
    %c0_40 = arith.constant 0 : index
    %43 = vector.load %arg2[%c7, %c0_39, %c0_40] : memref<9x16x16xbf16, #tpu.memory_space<vmem>>, vector<1x16x16xbf16>
    %44 = vector.shape_cast %43 : vector<1x16x16xbf16> to vector<16x16xbf16>
    %cst_41 = arith.constant dense<0.000000e+00> : vector<80x16xf32>
    %45 = tpu.matmul %42, %44, %cst_41 {dimension_numbers = #tpu.dot_dimension_numbers<[1], [0], [0], [1], [0, 0, 1, 1], [], []>} : vector<80x16xbf16>, vector<16x16xbf16>, vector<80x16xf32> -> vector<80x16xf32>
    %46 = arith.addf %40, %45 : vector<80x16xf32>
    %c0_42 = arith.constant 0 : index
    %c22 = arith.constant 22 : index
    %c0_43 = arith.constant 0 : index
    %47 = vector.load %arg1[%c0_42, %c22, %c0_43] : memref<1x102x16xbf16, #tpu.memory_space<vmem>>, vector<1x80x16xbf16>
    %48 = vector.shape_cast %47 : vector<1x80x16xbf16> to vector<80x16xbf16>
    %c8 = arith.constant 8 : index
    %c0_44 = arith.constant 0 : index
    %c0_45 = arith.constant 0 : index
    %49 = vector.load %arg2[%c8, %c0_44, %c0_45] : memref<9x16x16xbf16, #tpu.memory_space<vmem>>, vector<1x16x16xbf16>
    %50 = vector.shape_cast %49 : vector<1x16x16xbf16> to vector<16x16xbf16>
    %cst_46 = arith.constant dense<0.000000e+00> : vector<80x16xf32>
    %51 = tpu.matmul %48, %50, %cst_46 {dimension_numbers = #tpu.dot_dimension_numbers<[1], [0], [0], [1], [0, 0, 1, 1], [], []>} : vector<80x16xbf16>, vector<16x16xbf16>, vector<80x16xf32> -> vector<80x16xf32>
    %52 = arith.addf %46, %51 : vector<80x16xf32>
    %c0_47 = arith.constant 0 : index
    %c0_48 = arith.constant 0 : index
    %53 = vector.load %arg3[%c0_47, %c0_48] : memref<1x16xf32, #tpu.memory_space<vmem>>, vector<1x16xf32>
    %54 = vector.broadcast %53 : vector<1x16xf32> to vector<80x16xf32>
    %55 = arith.mulf %52, %54 : vector<80x16xf32>
    %c0_49 = arith.constant 0 : index
    %c0_50 = arith.constant 0 : index
    %56 = vector.load %arg4[%c0_49, %c0_50] : memref<1x16xf32, #tpu.memory_space<vmem>>, vector<1x16xf32>
    %57 = vector.broadcast %56 : vector<1x16xf32> to vector<80x16xf32>
    %58 = arith.addf %55, %57 : vector<80x16xf32>
    %cst_51 = arith.constant 0.000000e+00 : f32
    %59 = vector.broadcast %cst_51 : f32 to vector<80x16xf32>
    %60 = arith.maximumf %58, %59 : vector<80x16xf32>
    %61 = arith.truncf %60 : vector<80x16xf32> to vector<80x16xbf16>
    %c0_52 = arith.constant 0 : index
    %c0_53 = arith.constant 0 : index
    %c0_54 = arith.constant 0 : index
    %62 = vector.load %arg5[%c0_52, %c0_53, %c0_54] : memref<1x80x16xbf16, #tpu.memory_space<vmem>>, vector<1x80x16xbf16>
    %63 = vector.shape_cast %62 : vector<1x80x16xbf16> to vector<80x16xbf16>
    %64 = vector.shape_cast %61 : vector<80x16xbf16> to vector<1x80x16xbf16>
    tpu.vector_store %arg5[%c0_52, %c0_53, %c0_54], %64 {strides = array<i32>} : memref<1x80x16xbf16, #tpu.memory_space<vmem>>, vector<1x80x16xbf16>,
    return
  }
  func.func @transform_0(%arg0: i32) -> (i32, i32, i32) {
    %c0_i32 = arith.constant 0 : i32
    %c0_i32_0 = arith.constant 0 : i32
    %c0_i32_1 = arith.constant 0 : i32
    return %arg0, %c0_i32, %c0_i32_0 : i32, i32, i32
  }
  func.func @transform_1(%arg0: i32) -> (i32, i32, i32) {
    %c0_i32 = arith.constant 0 : i32
    %c0_i32_0 = arith.constant 0 : i32
    %c0_i32_1 = arith.constant 0 : i32
    %c0_i32_2 = arith.constant 0 : i32
    return %c0_i32, %c0_i32_0, %c0_i32_1 : i32, i32, i32
  }
  func.func @transform_2(%arg0: i32) -> (i32, i32) {
    %c0_i32 = arith.constant 0 : i32
    %c0_i32_0 = arith.constant 0 : i32
    %c0_i32_1 = arith.constant 0 : i32
    return %c0_i32, %c0_i32_0 : i32, i32
  }
  func.func @transform_3(%arg0: i32) -> (i32, i32) {
    %c0_i32 = arith.constant 0 : i32
    %c0_i32_0 = arith.constant 0 : i32
    %c0_i32_1 = arith.constant 0 : i32
    return %c0_i32, %c0_i32_0 : i32, i32
  }
  func.func @transform_4(%arg0: i32) -> (i32, i32, i32) {
    %c0_i32 = arith.constant 0 : i32
    %c0_i32_0 = arith.constant 0 : i32
    %c0_i32_1 = arith.constant 0 : i32
    return %arg0, %c0_i32, %c0_i32_0 : i32, i32, i32
  }
}

module attributes {stable_mosaic.version = 11 : i64} {
  func.func @_wavelet_pool_kernel(%arg0: i32, %arg1: memref<32x16xbf16, #tpu.memory_space<vmem>>, %arg2: memref<32x16xbf16, #tpu.memory_space<vmem>>, %arg3: memref<32x16xbf16, #tpu.memory_space<vmem>>, %arg4: memref<32x16xbf16, #tpu.memory_space<vmem>>, %arg5: memref<32x64xbf16, #tpu.memory_space<vmem>>) attributes {dimension_semantics = [#tpu.dimension_semantics<parallel>], iteration_bounds = array<i64: 1>, scalar_prefetch = 0 : i64, scratch_operands = 0 : i64, tpu.core_type = #tpu.core_type<tc>, window_params = [{transform_indices = @transform_0, window_bounds = array<i64: 32, 16>}, {transform_indices = @transform_1, window_bounds = array<i64: 32, 16>}, {transform_indices = @transform_2, window_bounds = array<i64: 32, 16>}, {transform_indices = @transform_3, window_bounds = array<i64: 32, 16>}, {transform_indices = @transform_4, window_bounds = array<i64: 32, 64>}]} {
    %c0 = arith.constant 0 : index
    %c0_0 = arith.constant 0 : index
    %0 = vector.load %arg1[%c0, %c0_0] : memref<32x16xbf16, #tpu.memory_space<vmem>>, vector<32x16xbf16>
    %1 = arith.extf %0 : vector<32x16xbf16> to vector<32x16xf32>
    %cst = arith.constant 5.000000e-01 : f32
    %2 = vector.broadcast %cst : f32 to vector<32x16xf32>
    %3 = arith.mulf %1, %2 : vector<32x16xf32>
    %c0_1 = arith.constant 0 : index
    %c0_2 = arith.constant 0 : index
    %4 = vector.load %arg2[%c0_1, %c0_2] : memref<32x16xbf16, #tpu.memory_space<vmem>>, vector<32x16xbf16>
    %5 = arith.extf %4 : vector<32x16xbf16> to vector<32x16xf32>
    %cst_3 = arith.constant 5.000000e-01 : f32
    %6 = vector.broadcast %cst_3 : f32 to vector<32x16xf32>
    %7 = arith.mulf %5, %6 : vector<32x16xf32>
    %c0_4 = arith.constant 0 : index
    %c0_5 = arith.constant 0 : index
    %8 = vector.load %arg3[%c0_4, %c0_5] : memref<32x16xbf16, #tpu.memory_space<vmem>>, vector<32x16xbf16>
    %9 = arith.extf %8 : vector<32x16xbf16> to vector<32x16xf32>
    %cst_6 = arith.constant 5.000000e-01 : f32
    %10 = vector.broadcast %cst_6 : f32 to vector<32x16xf32>
    %11 = arith.mulf %9, %10 : vector<32x16xf32>
    %c0_7 = arith.constant 0 : index
    %c0_8 = arith.constant 0 : index
    %12 = vector.load %arg4[%c0_7, %c0_8] : memref<32x16xbf16, #tpu.memory_space<vmem>>, vector<32x16xbf16>
    %13 = arith.extf %12 : vector<32x16xbf16> to vector<32x16xf32>
    %cst_9 = arith.constant 5.000000e-01 : f32
    %14 = vector.broadcast %cst_9 : f32 to vector<32x16xf32>
    %15 = arith.mulf %13, %14 : vector<32x16xf32>
    %16 = arith.addf %3, %7 : vector<32x16xf32>
    %17 = arith.addf %16, %11 : vector<32x16xf32>
    %18 = arith.addf %17, %15 : vector<32x16xf32>
    %19 = arith.truncf %18 : vector<32x16xf32> to vector<32x16xbf16>
    %c0_10 = arith.constant 0 : index
    %c0_11 = arith.constant 0 : index
    %20 = vector.load %arg5[%c0_10, %c0_11] : memref<32x64xbf16, #tpu.memory_space<vmem>>, vector<32x16xbf16>
    tpu.vector_store %arg5[%c0_10, %c0_11], %19 {strides = array<i32>} : memref<32x64xbf16, #tpu.memory_space<vmem>>, vector<32x16xbf16>,
    %cst_12 = arith.constant 0.000000e+00 : f32
    %21 = vector.broadcast %cst_12 : f32 to vector<32x16xf32>
    %22 = arith.subf %21, %3 : vector<32x16xf32>
    %23 = arith.subf %22, %7 : vector<32x16xf32>
    %24 = arith.addf %23, %11 : vector<32x16xf32>
    %25 = arith.addf %24, %15 : vector<32x16xf32>
    %26 = arith.truncf %25 : vector<32x16xf32> to vector<32x16xbf16>
    %c0_13 = arith.constant 0 : index
    %c16 = arith.constant 16 : index
    %27 = vector.load %arg5[%c0_13, %c16] : memref<32x64xbf16, #tpu.memory_space<vmem>>, vector<32x16xbf16>
    tpu.vector_store %arg5[%c0_13, %c16], %26 {strides = array<i32>} : memref<32x64xbf16, #tpu.memory_space<vmem>>, vector<32x16xbf16>,
    %cst_14 = arith.constant 0.000000e+00 : f32
    %28 = vector.broadcast %cst_14 : f32 to vector<32x16xf32>
    %29 = arith.subf %28, %3 : vector<32x16xf32>
    %30 = arith.addf %29, %7 : vector<32x16xf32>
    %31 = arith.subf %30, %11 : vector<32x16xf32>
    %32 = arith.addf %31, %15 : vector<32x16xf32>
    %33 = arith.truncf %32 : vector<32x16xf32> to vector<32x16xbf16>
    %c0_15 = arith.constant 0 : index
    %c32 = arith.constant 32 : index
    %34 = vector.load %arg5[%c0_15, %c32] : memref<32x64xbf16, #tpu.memory_space<vmem>>, vector<32x16xbf16>
    tpu.vector_store %arg5[%c0_15, %c32], %33 {strides = array<i32>} : memref<32x64xbf16, #tpu.memory_space<vmem>>, vector<32x16xbf16>,
    %35 = arith.subf %3, %7 : vector<32x16xf32>
    %36 = arith.subf %35, %11 : vector<32x16xf32>
    %37 = arith.addf %36, %15 : vector<32x16xf32>
    %38 = arith.truncf %37 : vector<32x16xf32> to vector<32x16xbf16>
    %c0_16 = arith.constant 0 : index
    %c48 = arith.constant 48 : index
    %39 = vector.load %arg5[%c0_16, %c48] : memref<32x64xbf16, #tpu.memory_space<vmem>>, vector<32x16xbf16>
    tpu.vector_store %arg5[%c0_16, %c48], %38 {strides = array<i32>} : memref<32x64xbf16, #tpu.memory_space<vmem>>, vector<32x16xbf16>,
    return
  }
  func.func @transform_0(%arg0: i32) -> (i32, i32) {
    %c0_i32 = arith.constant 0 : i32
    %c0_i32_0 = arith.constant 0 : i32
    return %arg0, %c0_i32 : i32, i32
  }
  func.func @transform_1(%arg0: i32) -> (i32, i32) {
    %c0_i32 = arith.constant 0 : i32
    %c0_i32_0 = arith.constant 0 : i32
    return %arg0, %c0_i32 : i32, i32
  }
  func.func @transform_2(%arg0: i32) -> (i32, i32) {
    %c0_i32 = arith.constant 0 : i32
    %c0_i32_0 = arith.constant 0 : i32
    return %arg0, %c0_i32 : i32, i32
  }
  func.func @transform_3(%arg0: i32) -> (i32, i32) {
    %c0_i32 = arith.constant 0 : i32
    %c0_i32_0 = arith.constant 0 : i32
    return %arg0, %c0_i32 : i32, i32
  }
  func.func @transform_4(%arg0: i32) -> (i32, i32) {
    %c0_i32 = arith.constant 0 : i32
    %c0_i32_0 = arith.constant 0 : i32
    return %arg0, %c0_i32 : i32, i32
  }
}

module attributes {stable_mosaic.version = 11 : i64} {
  func.func @kernel(%arg0: i32, %arg1: memref<1x38x64xbf16, #tpu.memory_space<vmem>>, %arg2: memref<9x64x64xbf16, #tpu.memory_space<vmem>>, %arg3: memref<1x64xf32, #tpu.memory_space<vmem>>, %arg4: memref<1x64xf32, #tpu.memory_space<vmem>>, %arg5: memref<1x24x64xbf16, #tpu.memory_space<vmem>>) attributes {dimension_semantics = [#tpu.dimension_semantics<parallel>], iteration_bounds = array<i64: 2>, scalar_prefetch = 0 : i64, scratch_operands = 0 : i64, tpu.core_type = #tpu.core_type<tc>, window_params = [{transform_indices = @transform_0, window_bounds = array<i64: 1, 38, 64>}, {pipeline_mode = #tpu.pipeline_mode<synchronous>, transform_indices = @transform_1, window_bounds = array<i64: 9, 64, 64>}, {pipeline_mode = #tpu.pipeline_mode<synchronous>, transform_indices = @transform_2, window_bounds = array<i64: 1, 64>}, {pipeline_mode = #tpu.pipeline_mode<synchronous>, transform_indices = @transform_3, window_bounds = array<i64: 1, 64>}, {transform_indices = @transform_4, window_bounds = array<i64: 1, 24, 64>}]} {
    %c0 = arith.constant 0 : index
    %c0_0 = arith.constant 0 : index
    %c0_1 = arith.constant 0 : index
    %0 = vector.load %arg1[%c0, %c0_0, %c0_1] : memref<1x38x64xbf16, #tpu.memory_space<vmem>>, vector<1x24x64xbf16>
    %1 = vector.shape_cast %0 : vector<1x24x64xbf16> to vector<24x64xbf16>
    %c0_2 = arith.constant 0 : index
    %c0_3 = arith.constant 0 : index
    %c0_4 = arith.constant 0 : index
    %2 = vector.load %arg2[%c0_2, %c0_3, %c0_4] : memref<9x64x64xbf16, #tpu.memory_space<vmem>>, vector<1x64x64xbf16>
    %3 = vector.shape_cast %2 : vector<1x64x64xbf16> to vector<64x64xbf16>
    %cst = arith.constant dense<0.000000e+00> : vector<24x64xf32>
    %4 = tpu.matmul %1, %3, %cst {dimension_numbers = #tpu.dot_dimension_numbers<[1], [0], [0], [1], [0, 0, 1, 1], [], []>} : vector<24x64xbf16>, vector<64x64xbf16>, vector<24x64xf32> -> vector<24x64xf32>
    %c0_5 = arith.constant 0 : index
    %c1 = arith.constant 1 : index
    %c0_6 = arith.constant 0 : index
    %5 = vector.load %arg1[%c0_5, %c1, %c0_6] : memref<1x38x64xbf16, #tpu.memory_space<vmem>>, vector<1x24x64xbf16>
    %6 = vector.shape_cast %5 : vector<1x24x64xbf16> to vector<24x64xbf16>
    %c1_7 = arith.constant 1 : index
    %c0_8 = arith.constant 0 : index
    %c0_9 = arith.constant 0 : index
    %7 = vector.load %arg2[%c1_7, %c0_8, %c0_9] : memref<9x64x64xbf16, #tpu.memory_space<vmem>>, vector<1x64x64xbf16>
    %8 = vector.shape_cast %7 : vector<1x64x64xbf16> to vector<64x64xbf16>
    %cst_10 = arith.constant dense<0.000000e+00> : vector<24x64xf32>
    %9 = tpu.matmul %6, %8, %cst_10 {dimension_numbers = #tpu.dot_dimension_numbers<[1], [0], [0], [1], [0, 0, 1, 1], [], []>} : vector<24x64xbf16>, vector<64x64xbf16>, vector<24x64xf32> -> vector<24x64xf32>
    %10 = arith.addf %4, %9 : vector<24x64xf32>
    %c0_11 = arith.constant 0 : index
    %c2 = arith.constant 2 : index
    %c0_12 = arith.constant 0 : index
    %11 = vector.load %arg1[%c0_11, %c2, %c0_12] : memref<1x38x64xbf16, #tpu.memory_space<vmem>>, vector<1x24x64xbf16>
    %12 = vector.shape_cast %11 : vector<1x24x64xbf16> to vector<24x64xbf16>
    %c2_13 = arith.constant 2 : index
    %c0_14 = arith.constant 0 : index
    %c0_15 = arith.constant 0 : index
    %13 = vector.load %arg2[%c2_13, %c0_14, %c0_15] : memref<9x64x64xbf16, #tpu.memory_space<vmem>>, vector<1x64x64xbf16>
    %14 = vector.shape_cast %13 : vector<1x64x64xbf16> to vector<64x64xbf16>
    %cst_16 = arith.constant dense<0.000000e+00> : vector<24x64xf32>
    %15 = tpu.matmul %12, %14, %cst_16 {dimension_numbers = #tpu.dot_dimension_numbers<[1], [0], [0], [1], [0, 0, 1, 1], [], []>} : vector<24x64xbf16>, vector<64x64xbf16>, vector<24x64xf32> -> vector<24x64xf32>
    %16 = arith.addf %10, %15 : vector<24x64xf32>
    %c0_17 = arith.constant 0 : index
    %c6 = arith.constant 6 : index
    %c0_18 = arith.constant 0 : index
    %17 = vector.load %arg1[%c0_17, %c6, %c0_18] : memref<1x38x64xbf16, #tpu.memory_space<vmem>>, vector<1x24x64xbf16>
    %18 = vector.shape_cast %17 : vector<1x24x64xbf16> to vector<24x64xbf16>
    %c3 = arith.constant 3 : index
    %c0_19 = arith.constant 0 : index
    %c0_20 = arith.constant 0 : index
    %19 = vector.load %arg2[%c3, %c0_19, %c0_20] : memref<9x64x64xbf16, #tpu.memory_space<vmem>>, vector<1x64x64xbf16>
    %20 = vector.shape_cast %19 : vector<1x64x64xbf16> to vector<64x64xbf16>
    %cst_21 = arith.constant dense<0.000000e+00> : vector<24x64xf32>
    %21 = tpu.matmul %18, %20, %cst_21 {dimension_numbers = #tpu.dot_dimension_numbers<[1], [0], [0], [1], [0, 0, 1, 1], [], []>} : vector<24x64xbf16>, vector<64x64xbf16>, vector<24x64xf32> -> vector<24x64xf32>
    %22 = arith.addf %16, %21 : vector<24x64xf32>
    %c0_22 = arith.constant 0 : index
    %c7 = arith.constant 7 : index
    %c0_23 = arith.constant 0 : index
    %23 = vector.load %arg1[%c0_22, %c7, %c0_23] : memref<1x38x64xbf16, #tpu.memory_space<vmem>>, vector<1x24x64xbf16>
    %24 = vector.shape_cast %23 : vector<1x24x64xbf16> to vector<24x64xbf16>
    %c4 = arith.constant 4 : index
    %c0_24 = arith.constant 0 : index
    %c0_25 = arith.constant 0 : index
    %25 = vector.load %arg2[%c4, %c0_24, %c0_25] : memref<9x64x64xbf16, #tpu.memory_space<vmem>>, vector<1x64x64xbf16>
    %26 = vector.shape_cast %25 : vector<1x64x64xbf16> to vector<64x64xbf16>
    %cst_26 = arith.constant dense<0.000000e+00> : vector<24x64xf32>
    %27 = tpu.matmul %24, %26, %cst_26 {dimension_numbers = #tpu.dot_dimension_numbers<[1], [0], [0], [1], [0, 0, 1, 1], [], []>} : vector<24x64xbf16>, vector<64x64xbf16>, vector<24x64xf32> -> vector<24x64xf32>
    %28 = arith.addf %22, %27 : vector<24x64xf32>
    %c0_27 = arith.constant 0 : index
    %c8 = arith.constant 8 : index
    %c0_28 = arith.constant 0 : index
    %29 = vector.load %arg1[%c0_27, %c8, %c0_28] : memref<1x38x64xbf16, #tpu.memory_space<vmem>>, vector<1x24x64xbf16>
    %30 = vector.shape_cast %29 : vector<1x24x64xbf16> to vector<24x64xbf16>
    %c5 = arith.constant 5 : index
    %c0_29 = arith.constant 0 : index
    %c0_30 = arith.constant 0 : index
    %31 = vector.load %arg2[%c5, %c0_29, %c0_30] : memref<9x64x64xbf16, #tpu.memory_space<vmem>>, vector<1x64x64xbf16>
    %32 = vector.shape_cast %31 : vector<1x64x64xbf16> to vector<64x64xbf16>
    %cst_31 = arith.constant dense<0.000000e+00> : vector<24x64xf32>
    %33 = tpu.matmul %30, %32, %cst_31 {dimension_numbers = #tpu.dot_dimension_numbers<[1], [0], [0], [1], [0, 0, 1, 1], [], []>} : vector<24x64xbf16>, vector<64x64xbf16>, vector<24x64xf32> -> vector<24x64xf32>
    %34 = arith.addf %28, %33 : vector<24x64xf32>
    %c0_32 = arith.constant 0 : index
    %c12 = arith.constant 12 : index
    %c0_33 = arith.constant 0 : index
    %35 = vector.load %arg1[%c0_32, %c12, %c0_33] : memref<1x38x64xbf16, #tpu.memory_space<vmem>>, vector<1x24x64xbf16>
    %36 = vector.shape_cast %35 : vector<1x24x64xbf16> to vector<24x64xbf16>
    %c6_34 = arith.constant 6 : index
    %c0_35 = arith.constant 0 : index
    %c0_36 = arith.constant 0 : index
    %37 = vector.load %arg2[%c6_34, %c0_35, %c0_36] : memref<9x64x64xbf16, #tpu.memory_space<vmem>>, vector<1x64x64xbf16>
    %38 = vector.shape_cast %37 : vector<1x64x64xbf16> to vector<64x64xbf16>
    %cst_37 = arith.constant dense<0.000000e+00> : vector<24x64xf32>
    %39 = tpu.matmul %36, %38, %cst_37 {dimension_numbers = #tpu.dot_dimension_numbers<[1], [0], [0], [1], [0, 0, 1, 1], [], []>} : vector<24x64xbf16>, vector<64x64xbf16>, vector<24x64xf32> -> vector<24x64xf32>
    %40 = arith.addf %34, %39 : vector<24x64xf32>
    %c0_38 = arith.constant 0 : index
    %c13 = arith.constant 13 : index
    %c0_39 = arith.constant 0 : index
    %41 = vector.load %arg1[%c0_38, %c13, %c0_39] : memref<1x38x64xbf16, #tpu.memory_space<vmem>>, vector<1x24x64xbf16>
    %42 = vector.shape_cast %41 : vector<1x24x64xbf16> to vector<24x64xbf16>
    %c7_40 = arith.constant 7 : index
    %c0_41 = arith.constant 0 : index
    %c0_42 = arith.constant 0 : index
    %43 = vector.load %arg2[%c7_40, %c0_41, %c0_42] : memref<9x64x64xbf16, #tpu.memory_space<vmem>>, vector<1x64x64xbf16>
    %44 = vector.shape_cast %43 : vector<1x64x64xbf16> to vector<64x64xbf16>
    %cst_43 = arith.constant dense<0.000000e+00> : vector<24x64xf32>
    %45 = tpu.matmul %42, %44, %cst_43 {dimension_numbers = #tpu.dot_dimension_numbers<[1], [0], [0], [1], [0, 0, 1, 1], [], []>} : vector<24x64xbf16>, vector<64x64xbf16>, vector<24x64xf32> -> vector<24x64xf32>
    %46 = arith.addf %40, %45 : vector<24x64xf32>
    %c0_44 = arith.constant 0 : index
    %c14 = arith.constant 14 : index
    %c0_45 = arith.constant 0 : index
    %47 = vector.load %arg1[%c0_44, %c14, %c0_45] : memref<1x38x64xbf16, #tpu.memory_space<vmem>>, vector<1x24x64xbf16>
    %48 = vector.shape_cast %47 : vector<1x24x64xbf16> to vector<24x64xbf16>
    %c8_46 = arith.constant 8 : index
    %c0_47 = arith.constant 0 : index
    %c0_48 = arith.constant 0 : index
    %49 = vector.load %arg2[%c8_46, %c0_47, %c0_48] : memref<9x64x64xbf16, #tpu.memory_space<vmem>>, vector<1x64x64xbf16>
    %50 = vector.shape_cast %49 : vector<1x64x64xbf16> to vector<64x64xbf16>
    %cst_49 = arith.constant dense<0.000000e+00> : vector<24x64xf32>
    %51 = tpu.matmul %48, %50, %cst_49 {dimension_numbers = #tpu.dot_dimension_numbers<[1], [0], [0], [1], [0, 0, 1, 1], [], []>} : vector<24x64xbf16>, vector<64x64xbf16>, vector<24x64xf32> -> vector<24x64xf32>
    %52 = arith.addf %46, %51 : vector<24x64xf32>
    %c0_50 = arith.constant 0 : index
    %c0_51 = arith.constant 0 : index
    %53 = vector.load %arg3[%c0_50, %c0_51] : memref<1x64xf32, #tpu.memory_space<vmem>>, vector<1x64xf32>
    %54 = vector.broadcast %53 : vector<1x64xf32> to vector<24x64xf32>
    %55 = arith.mulf %52, %54 : vector<24x64xf32>
    %c0_52 = arith.constant 0 : index
    %c0_53 = arith.constant 0 : index
    %56 = vector.load %arg4[%c0_52, %c0_53] : memref<1x64xf32, #tpu.memory_space<vmem>>, vector<1x64xf32>
    %57 = vector.broadcast %56 : vector<1x64xf32> to vector<24x64xf32>
    %58 = arith.addf %55, %57 : vector<24x64xf32>
    %cst_54 = arith.constant 0.000000e+00 : f32
    %59 = vector.broadcast %cst_54 : f32 to vector<24x64xf32>
    %60 = arith.maximumf %58, %59 : vector<24x64xf32>
    %61 = arith.truncf %60 : vector<24x64xf32> to vector<24x64xbf16>
    %c0_55 = arith.constant 0 : index
    %c0_56 = arith.constant 0 : index
    %c0_57 = arith.constant 0 : index
    %62 = vector.load %arg5[%c0_55, %c0_56, %c0_57] : memref<1x24x64xbf16, #tpu.memory_space<vmem>>, vector<1x24x64xbf16>
    %63 = vector.shape_cast %62 : vector<1x24x64xbf16> to vector<24x64xbf16>
    %64 = vector.shape_cast %61 : vector<24x64xbf16> to vector<1x24x64xbf16>
    tpu.vector_store %arg5[%c0_55, %c0_56, %c0_57], %64 {strides = array<i32>} : memref<1x24x64xbf16, #tpu.memory_space<vmem>>, vector<1x24x64xbf16>,
    return
  }
  func.func @transform_0(%arg0: i32) -> (i32, i32, i32) {
    %c0_i32 = arith.constant 0 : i32
    %c0_i32_0 = arith.constant 0 : i32
    %c0_i32_1 = arith.constant 0 : i32
    return %arg0, %c0_i32, %c0_i32_0 : i32, i32, i32
  }
  func.func @transform_1(%arg0: i32) -> (i32, i32, i32) {
    %c0_i32 = arith.constant 0 : i32
    %c0_i32_0 = arith.constant 0 : i32
    %c0_i32_1 = arith.constant 0 : i32
    %c0_i32_2 = arith.constant 0 : i32
    return %c0_i32, %c0_i32_0, %c0_i32_1 : i32, i32, i32
  }
  func.func @transform_2(%arg0: i32) -> (i32, i32) {
    %c0_i32 = arith.constant 0 : i32
    %c0_i32_0 = arith.constant 0 : i32
    %c0_i32_1 = arith.constant 0 : i32
    return %c0_i32, %c0_i32_0 : i32, i32
  }
  func.func @transform_3(%arg0: i32) -> (i32, i32) {
    %c0_i32 = arith.constant 0 : i32
    %c0_i32_0 = arith.constant 0 : i32
    %c0_i32_1 = arith.constant 0 : i32
    return %c0_i32, %c0_i32_0 : i32, i32
  }
  func.func @transform_4(%arg0: i32) -> (i32, i32, i32) {
    %c0_i32 = arith.constant 0 : i32
    %c0_i32_0 = arith.constant 0 : i32
    %c0_i32_1 = arith.constant 0 : i32
    return %arg0, %c0_i32, %c0_i32_0 : i32, i32, i32
  }
}

module attributes {stable_mosaic.version = 11 : i64} {
  func.func @_wavelet_pool_kernel(%arg0: i32, %arg1: memref<8x64xbf16, #tpu.memory_space<vmem>>, %arg2: memref<8x64xbf16, #tpu.memory_space<vmem>>, %arg3: memref<8x64xbf16, #tpu.memory_space<vmem>>, %arg4: memref<8x64xbf16, #tpu.memory_space<vmem>>, %arg5: memref<8x256xbf16, #tpu.memory_space<vmem>>) attributes {dimension_semantics = [#tpu.dimension_semantics<parallel>], iteration_bounds = array<i64: 1>, scalar_prefetch = 0 : i64, scratch_operands = 0 : i64, tpu.core_type = #tpu.core_type<tc>, window_params = [{transform_indices = @transform_0, window_bounds = array<i64: 8, 64>}, {transform_indices = @transform_1, window_bounds = array<i64: 8, 64>}, {transform_indices = @transform_2, window_bounds = array<i64: 8, 64>}, {transform_indices = @transform_3, window_bounds = array<i64: 8, 64>}, {transform_indices = @transform_4, window_bounds = array<i64: 8, 256>}]} {
    %c0 = arith.constant 0 : index
    %c0_0 = arith.constant 0 : index
    %0 = vector.load %arg1[%c0, %c0_0] : memref<8x64xbf16, #tpu.memory_space<vmem>>, vector<8x64xbf16>
    %1 = arith.extf %0 : vector<8x64xbf16> to vector<8x64xf32>
    %cst = arith.constant 5.000000e-01 : f32
    %2 = vector.broadcast %cst : f32 to vector<8x64xf32>
    %3 = arith.mulf %1, %2 : vector<8x64xf32>
    %c0_1 = arith.constant 0 : index
    %c0_2 = arith.constant 0 : index
    %4 = vector.load %arg2[%c0_1, %c0_2] : memref<8x64xbf16, #tpu.memory_space<vmem>>, vector<8x64xbf16>
    %5 = arith.extf %4 : vector<8x64xbf16> to vector<8x64xf32>
    %cst_3 = arith.constant 5.000000e-01 : f32
    %6 = vector.broadcast %cst_3 : f32 to vector<8x64xf32>
    %7 = arith.mulf %5, %6 : vector<8x64xf32>
    %c0_4 = arith.constant 0 : index
    %c0_5 = arith.constant 0 : index
    %8 = vector.load %arg3[%c0_4, %c0_5] : memref<8x64xbf16, #tpu.memory_space<vmem>>, vector<8x64xbf16>
    %9 = arith.extf %8 : vector<8x64xbf16> to vector<8x64xf32>
    %cst_6 = arith.constant 5.000000e-01 : f32
    %10 = vector.broadcast %cst_6 : f32 to vector<8x64xf32>
    %11 = arith.mulf %9, %10 : vector<8x64xf32>
    %c0_7 = arith.constant 0 : index
    %c0_8 = arith.constant 0 : index
    %12 = vector.load %arg4[%c0_7, %c0_8] : memref<8x64xbf16, #tpu.memory_space<vmem>>, vector<8x64xbf16>
    %13 = arith.extf %12 : vector<8x64xbf16> to vector<8x64xf32>
    %cst_9 = arith.constant 5.000000e-01 : f32
    %14 = vector.broadcast %cst_9 : f32 to vector<8x64xf32>
    %15 = arith.mulf %13, %14 : vector<8x64xf32>
    %16 = arith.addf %3, %7 : vector<8x64xf32>
    %17 = arith.addf %16, %11 : vector<8x64xf32>
    %18 = arith.addf %17, %15 : vector<8x64xf32>
    %19 = arith.truncf %18 : vector<8x64xf32> to vector<8x64xbf16>
    %c0_10 = arith.constant 0 : index
    %c0_11 = arith.constant 0 : index
    %20 = vector.load %arg5[%c0_10, %c0_11] : memref<8x256xbf16, #tpu.memory_space<vmem>>, vector<8x64xbf16>
    tpu.vector_store %arg5[%c0_10, %c0_11], %19 {strides = array<i32>} : memref<8x256xbf16, #tpu.memory_space<vmem>>, vector<8x64xbf16>,
    %cst_12 = arith.constant 0.000000e+00 : f32
    %21 = vector.broadcast %cst_12 : f32 to vector<8x64xf32>
    %22 = arith.subf %21, %3 : vector<8x64xf32>
    %23 = arith.subf %22, %7 : vector<8x64xf32>
    %24 = arith.addf %23, %11 : vector<8x64xf32>
    %25 = arith.addf %24, %15 : vector<8x64xf32>
    %26 = arith.truncf %25 : vector<8x64xf32> to vector<8x64xbf16>
    %c0_13 = arith.constant 0 : index
    %c64 = arith.constant 64 : index
    %27 = vector.load %arg5[%c0_13, %c64] : memref<8x256xbf16, #tpu.memory_space<vmem>>, vector<8x64xbf16>
    tpu.vector_store %arg5[%c0_13, %c64], %26 {strides = array<i32>} : memref<8x256xbf16, #tpu.memory_space<vmem>>, vector<8x64xbf16>,
    %cst_14 = arith.constant 0.000000e+00 : f32
    %28 = vector.broadcast %cst_14 : f32 to vector<8x64xf32>
    %29 = arith.subf %28, %3 : vector<8x64xf32>
    %30 = arith.addf %29, %7 : vector<8x64xf32>
    %31 = arith.subf %30, %11 : vector<8x64xf32>
    %32 = arith.addf %31, %15 : vector<8x64xf32>
    %33 = arith.truncf %32 : vector<8x64xf32> to vector<8x64xbf16>
    %c0_15 = arith.constant 0 : index
    %c128 = arith.constant 128 : index
    %34 = vector.load %arg5[%c0_15, %c128] : memref<8x256xbf16, #tpu.memory_space<vmem>>, vector<8x64xbf16>
    tpu.vector_store %arg5[%c0_15, %c128], %33 {strides = array<i32>} : memref<8x256xbf16, #tpu.memory_space<vmem>>, vector<8x64xbf16>,
    %35 = arith.subf %3, %7 : vector<8x64xf32>
    %36 = arith.subf %35, %11 : vector<8x64xf32>
    %37 = arith.addf %36, %15 : vector<8x64xf32>
    %38 = arith.truncf %37 : vector<8x64xf32> to vector<8x64xbf16>
    %c0_16 = arith.constant 0 : index
    %c192 = arith.constant 192 : index
    %39 = vector.load %arg5[%c0_16, %c192] : memref<8x256xbf16, #tpu.memory_space<vmem>>, vector<8x64xbf16>
    tpu.vector_store %arg5[%c0_16, %c192], %38 {strides = array<i32>} : memref<8x256xbf16, #tpu.memory_space<vmem>>, vector<8x64xbf16>,
    return
  }
  func.func @transform_0(%arg0: i32) -> (i32, i32) {
    %c0_i32 = arith.constant 0 : i32
    %c0_i32_0 = arith.constant 0 : i32
    return %arg0, %c0_i32 : i32, i32
  }
  func.func @transform_1(%arg0: i32) -> (i32, i32) {
    %c0_i32 = arith.constant 0 : i32
    %c0_i32_0 = arith.constant 0 : i32
    return %arg0, %c0_i32 : i32, i32
  }
  func.func @transform_2(%arg0: i32) -> (i32, i32) {
    %c0_i32 = arith.constant 0 : i32
    %c0_i32_0 = arith.constant 0 : i32
    return %arg0, %c0_i32 : i32, i32
  }
  func.func @transform_3(%arg0: i32) -> (i32, i32) {
    %c0_i32 = arith.constant 0 : i32
    %c0_i32_0 = arith.constant 0 : i32
    return %arg0, %c0_i32 : i32, i32
  }
  func.func @transform_4(%arg0: i32) -> (i32, i32) {
    %c0_i32 = arith.constant 0 : i32
    %c0_i32_0 = arith.constant 0 : i32
    return %arg0, %c0_i32 : i32, i32
  }
}

module attributes {stable_mosaic.version = 11 : i64} {
  func.func @kernel(%arg0: i32, %arg1: memref<1x18x256xbf16, #tpu.memory_space<vmem>>, %arg2: memref<9x256x128xbf16, #tpu.memory_space<vmem>>, %arg3: memref<1x128xf32, #tpu.memory_space<vmem>>, %arg4: memref<1x128xf32, #tpu.memory_space<vmem>>, %arg5: memref<1x8x128xbf16, #tpu.memory_space<vmem>>) attributes {dimension_semantics = [#tpu.dimension_semantics<parallel>], iteration_bounds = array<i64: 2>, scalar_prefetch = 0 : i64, scratch_operands = 0 : i64, tpu.core_type = #tpu.core_type<tc>, window_params = [{transform_indices = @transform_0, window_bounds = array<i64: 1, 18, 256>}, {pipeline_mode = #tpu.pipeline_mode<synchronous>, transform_indices = @transform_1, window_bounds = array<i64: 9, 256, 128>}, {pipeline_mode = #tpu.pipeline_mode<synchronous>, transform_indices = @transform_2, window_bounds = array<i64: 1, 128>}, {pipeline_mode = #tpu.pipeline_mode<synchronous>, transform_indices = @transform_3, window_bounds = array<i64: 1, 128>}, {transform_indices = @transform_4, window_bounds = array<i64: 1, 8, 128>}]} {
    %c0 = arith.constant 0 : index
    %c0_0 = arith.constant 0 : index
    %c0_1 = arith.constant 0 : index
    %0 = vector.load %arg1[%c0, %c0_0, %c0_1] : memref<1x18x256xbf16, #tpu.memory_space<vmem>>, vector<1x8x256xbf16>
    %1 = vector.shape_cast %0 : vector<1x8x256xbf16> to vector<8x256xbf16>
    %c0_2 = arith.constant 0 : index
    %c0_3 = arith.constant 0 : index
    %c0_4 = arith.constant 0 : index
    %2 = vector.load %arg2[%c0_2, %c0_3, %c0_4] : memref<9x256x128xbf16, #tpu.memory_space<vmem>>, vector<1x256x128xbf16>
    %3 = vector.shape_cast %2 : vector<1x256x128xbf16> to vector<256x128xbf16>
    %cst = arith.constant dense<0.000000e+00> : vector<8x128xf32>
    %4 = tpu.matmul %1, %3, %cst {dimension_numbers = #tpu.dot_dimension_numbers<[1], [0], [0], [1], [0, 0, 1, 1], [], []>} : vector<8x256xbf16>, vector<256x128xbf16>, vector<8x128xf32> -> vector<8x128xf32>
    %c0_5 = arith.constant 0 : index
    %c1 = arith.constant 1 : index
    %c0_6 = arith.constant 0 : index
    %5 = vector.load %arg1[%c0_5, %c1, %c0_6] : memref<1x18x256xbf16, #tpu.memory_space<vmem>>, vector<1x8x256xbf16>
    %6 = vector.shape_cast %5 : vector<1x8x256xbf16> to vector<8x256xbf16>
    %c1_7 = arith.constant 1 : index
    %c0_8 = arith.constant 0 : index
    %c0_9 = arith.constant 0 : index
    %7 = vector.load %arg2[%c1_7, %c0_8, %c0_9] : memref<9x256x128xbf16, #tpu.memory_space<vmem>>, vector<1x256x128xbf16>
    %8 = vector.shape_cast %7 : vector<1x256x128xbf16> to vector<256x128xbf16>
    %cst_10 = arith.constant dense<0.000000e+00> : vector<8x128xf32>
    %9 = tpu.matmul %6, %8, %cst_10 {dimension_numbers = #tpu.dot_dimension_numbers<[1], [0], [0], [1], [0, 0, 1, 1], [], []>} : vector<8x256xbf16>, vector<256x128xbf16>, vector<8x128xf32> -> vector<8x128xf32>
    %10 = arith.addf %4, %9 : vector<8x128xf32>
    %c0_11 = arith.constant 0 : index
    %c2 = arith.constant 2 : index
    %c0_12 = arith.constant 0 : index
    %11 = vector.load %arg1[%c0_11, %c2, %c0_12] : memref<1x18x256xbf16, #tpu.memory_space<vmem>>, vector<1x8x256xbf16>
    %12 = vector.shape_cast %11 : vector<1x8x256xbf16> to vector<8x256xbf16>
    %c2_13 = arith.constant 2 : index
    %c0_14 = arith.constant 0 : index
    %c0_15 = arith.constant 0 : index
    %13 = vector.load %arg2[%c2_13, %c0_14, %c0_15] : memref<9x256x128xbf16, #tpu.memory_space<vmem>>, vector<1x256x128xbf16>
    %14 = vector.shape_cast %13 : vector<1x256x128xbf16> to vector<256x128xbf16>
    %cst_16 = arith.constant dense<0.000000e+00> : vector<8x128xf32>
    %15 = tpu.matmul %12, %14, %cst_16 {dimension_numbers = #tpu.dot_dimension_numbers<[1], [0], [0], [1], [0, 0, 1, 1], [], []>} : vector<8x256xbf16>, vector<256x128xbf16>, vector<8x128xf32> -> vector<8x128xf32>
    %16 = arith.addf %10, %15 : vector<8x128xf32>
    %c0_17 = arith.constant 0 : index
    %c4 = arith.constant 4 : index
    %c0_18 = arith.constant 0 : index
    %17 = vector.load %arg1[%c0_17, %c4, %c0_18] : memref<1x18x256xbf16, #tpu.memory_space<vmem>>, vector<1x8x256xbf16>
    %18 = vector.shape_cast %17 : vector<1x8x256xbf16> to vector<8x256xbf16>
    %c3 = arith.constant 3 : index
    %c0_19 = arith.constant 0 : index
    %c0_20 = arith.constant 0 : index
    %19 = vector.load %arg2[%c3, %c0_19, %c0_20] : memref<9x256x128xbf16, #tpu.memory_space<vmem>>, vector<1x256x128xbf16>
    %20 = vector.shape_cast %19 : vector<1x256x128xbf16> to vector<256x128xbf16>
    %cst_21 = arith.constant dense<0.000000e+00> : vector<8x128xf32>
    %21 = tpu.matmul %18, %20, %cst_21 {dimension_numbers = #tpu.dot_dimension_numbers<[1], [0], [0], [1], [0, 0, 1, 1], [], []>} : vector<8x256xbf16>, vector<256x128xbf16>, vector<8x128xf32> -> vector<8x128xf32>
    %22 = arith.addf %16, %21 : vector<8x128xf32>
    %c0_22 = arith.constant 0 : index
    %c5 = arith.constant 5 : index
    %c0_23 = arith.constant 0 : index
    %23 = vector.load %arg1[%c0_22, %c5, %c0_23] : memref<1x18x256xbf16, #tpu.memory_space<vmem>>, vector<1x8x256xbf16>
    %24 = vector.shape_cast %23 : vector<1x8x256xbf16> to vector<8x256xbf16>
    %c4_24 = arith.constant 4 : index
    %c0_25 = arith.constant 0 : index
    %c0_26 = arith.constant 0 : index
    %25 = vector.load %arg2[%c4_24, %c0_25, %c0_26] : memref<9x256x128xbf16, #tpu.memory_space<vmem>>, vector<1x256x128xbf16>
    %26 = vector.shape_cast %25 : vector<1x256x128xbf16> to vector<256x128xbf16>
    %cst_27 = arith.constant dense<0.000000e+00> : vector<8x128xf32>
    %27 = tpu.matmul %24, %26, %cst_27 {dimension_numbers = #tpu.dot_dimension_numbers<[1], [0], [0], [1], [0, 0, 1, 1], [], []>} : vector<8x256xbf16>, vector<256x128xbf16>, vector<8x128xf32> -> vector<8x128xf32>
    %28 = arith.addf %22, %27 : vector<8x128xf32>
    %c0_28 = arith.constant 0 : index
    %c6 = arith.constant 6 : index
    %c0_29 = arith.constant 0 : index
    %29 = vector.load %arg1[%c0_28, %c6, %c0_29] : memref<1x18x256xbf16, #tpu.memory_space<vmem>>, vector<1x8x256xbf16>
    %30 = vector.shape_cast %29 : vector<1x8x256xbf16> to vector<8x256xbf16>
    %c5_30 = arith.constant 5 : index
    %c0_31 = arith.constant 0 : index
    %c0_32 = arith.constant 0 : index
    %31 = vector.load %arg2[%c5_30, %c0_31, %c0_32] : memref<9x256x128xbf16, #tpu.memory_space<vmem>>, vector<1x256x128xbf16>
    %32 = vector.shape_cast %31 : vector<1x256x128xbf16> to vector<256x128xbf16>
    %cst_33 = arith.constant dense<0.000000e+00> : vector<8x128xf32>
    %33 = tpu.matmul %30, %32, %cst_33 {dimension_numbers = #tpu.dot_dimension_numbers<[1], [0], [0], [1], [0, 0, 1, 1], [], []>} : vector<8x256xbf16>, vector<256x128xbf16>, vector<8x128xf32> -> vector<8x128xf32>
    %34 = arith.addf %28, %33 : vector<8x128xf32>
    %c0_34 = arith.constant 0 : index
    %c8 = arith.constant 8 : index
    %c0_35 = arith.constant 0 : index
    %35 = vector.load %arg1[%c0_34, %c8, %c0_35] : memref<1x18x256xbf16, #tpu.memory_space<vmem>>, vector<1x8x256xbf16>
    %36 = vector.shape_cast %35 : vector<1x8x256xbf16> to vector<8x256xbf16>
    %c6_36 = arith.constant 6 : index
    %c0_37 = arith.constant 0 : index
    %c0_38 = arith.constant 0 : index
    %37 = vector.load %arg2[%c6_36, %c0_37, %c0_38] : memref<9x256x128xbf16, #tpu.memory_space<vmem>>, vector<1x256x128xbf16>
    %38 = vector.shape_cast %37 : vector<1x256x128xbf16> to vector<256x128xbf16>
    %cst_39 = arith.constant dense<0.000000e+00> : vector<8x128xf32>
    %39 = tpu.matmul %36, %38, %cst_39 {dimension_numbers = #tpu.dot_dimension_numbers<[1], [0], [0], [1], [0, 0, 1, 1], [], []>} : vector<8x256xbf16>, vector<256x128xbf16>, vector<8x128xf32> -> vector<8x128xf32>
    %40 = arith.addf %34, %39 : vector<8x128xf32>
    %c0_40 = arith.constant 0 : index
    %c9 = arith.constant 9 : index
    %c0_41 = arith.constant 0 : index
    %41 = vector.load %arg1[%c0_40, %c9, %c0_41] : memref<1x18x256xbf16, #tpu.memory_space<vmem>>, vector<1x8x256xbf16>
    %42 = vector.shape_cast %41 : vector<1x8x256xbf16> to vector<8x256xbf16>
    %c7 = arith.constant 7 : index
    %c0_42 = arith.constant 0 : index
    %c0_43 = arith.constant 0 : index
    %43 = vector.load %arg2[%c7, %c0_42, %c0_43] : memref<9x256x128xbf16, #tpu.memory_space<vmem>>, vector<1x256x128xbf16>
    %44 = vector.shape_cast %43 : vector<1x256x128xbf16> to vector<256x128xbf16>
    %cst_44 = arith.constant dense<0.000000e+00> : vector<8x128xf32>
    %45 = tpu.matmul %42, %44, %cst_44 {dimension_numbers = #tpu.dot_dimension_numbers<[1], [0], [0], [1], [0, 0, 1, 1], [], []>} : vector<8x256xbf16>, vector<256x128xbf16>, vector<8x128xf32> -> vector<8x128xf32>
    %46 = arith.addf %40, %45 : vector<8x128xf32>
    %c0_45 = arith.constant 0 : index
    %c10 = arith.constant 10 : index
    %c0_46 = arith.constant 0 : index
    %47 = vector.load %arg1[%c0_45, %c10, %c0_46] : memref<1x18x256xbf16, #tpu.memory_space<vmem>>, vector<1x8x256xbf16>
    %48 = vector.shape_cast %47 : vector<1x8x256xbf16> to vector<8x256xbf16>
    %c8_47 = arith.constant 8 : index
    %c0_48 = arith.constant 0 : index
    %c0_49 = arith.constant 0 : index
    %49 = vector.load %arg2[%c8_47, %c0_48, %c0_49] : memref<9x256x128xbf16, #tpu.memory_space<vmem>>, vector<1x256x128xbf16>
    %50 = vector.shape_cast %49 : vector<1x256x128xbf16> to vector<256x128xbf16>
    %cst_50 = arith.constant dense<0.000000e+00> : vector<8x128xf32>
    %51 = tpu.matmul %48, %50, %cst_50 {dimension_numbers = #tpu.dot_dimension_numbers<[1], [0], [0], [1], [0, 0, 1, 1], [], []>} : vector<8x256xbf16>, vector<256x128xbf16>, vector<8x128xf32> -> vector<8x128xf32>
    %52 = arith.addf %46, %51 : vector<8x128xf32>
    %c0_51 = arith.constant 0 : index
    %c0_52 = arith.constant 0 : index
    %53 = vector.load %arg3[%c0_51, %c0_52] : memref<1x128xf32, #tpu.memory_space<vmem>>, vector<1x128xf32>
    %54 = vector.broadcast %53 : vector<1x128xf32> to vector<8x128xf32>
    %55 = arith.mulf %52, %54 : vector<8x128xf32>
    %c0_53 = arith.constant 0 : index
    %c0_54 = arith.constant 0 : index
    %56 = vector.load %arg4[%c0_53, %c0_54] : memref<1x128xf32, #tpu.memory_space<vmem>>, vector<1x128xf32>
    %57 = vector.broadcast %56 : vector<1x128xf32> to vector<8x128xf32>
    %58 = arith.addf %55, %57 : vector<8x128xf32>
    %cst_55 = arith.constant 0.000000e+00 : f32
    %59 = vector.broadcast %cst_55 : f32 to vector<8x128xf32>
    %60 = arith.maximumf %58, %59 : vector<8x128xf32>
    %61 = arith.truncf %60 : vector<8x128xf32> to vector<8x128xbf16>
    %c0_56 = arith.constant 0 : index
    %c0_57 = arith.constant 0 : index
    %c0_58 = arith.constant 0 : index
    %62 = vector.load %arg5[%c0_56, %c0_57, %c0_58] : memref<1x8x128xbf16, #tpu.memory_space<vmem>>, vector<1x8x128xbf16>
    %63 = vector.shape_cast %62 : vector<1x8x128xbf16> to vector<8x128xbf16>
    %64 = vector.shape_cast %61 : vector<8x128xbf16> to vector<1x8x128xbf16>
    tpu.vector_store %arg5[%c0_56, %c0_57, %c0_58], %64 {strides = array<i32>} : memref<1x8x128xbf16, #tpu.memory_space<vmem>>, vector<1x8x128xbf16>,
    return
  }
  func.func @transform_0(%arg0: i32) -> (i32, i32, i32) {
    %c0_i32 = arith.constant 0 : i32
    %c0_i32_0 = arith.constant 0 : i32
    %c0_i32_1 = arith.constant 0 : i32
    return %arg0, %c0_i32, %c0_i32_0 : i32, i32, i32
  }
  func.func @transform_1(%arg0: i32) -> (i32, i32, i32) {
    %c0_i32 = arith.constant 0 : i32
    %c0_i32_0 = arith.constant 0 : i32
    %c0_i32_1 = arith.constant 0 : i32
    %c0_i32_2 = arith.constant 0 : i32
    return %c0_i32, %c0_i32_0, %c0_i32_1 : i32, i32, i32
  }
  func.func @transform_2(%arg0: i32) -> (i32, i32) {
    %c0_i32 = arith.constant 0 : i32
    %c0_i32_0 = arith.constant 0 : i32
    %c0_i32_1 = arith.constant 0 : i32
    return %c0_i32, %c0_i32_0 : i32, i32
  }
  func.func @transform_3(%arg0: i32) -> (i32, i32) {
    %c0_i32 = arith.constant 0 : i32
    %c0_i32_0 = arith.constant 0 : i32
    %c0_i32_1 = arith.constant 0 : i32
    return %c0_i32, %c0_i32_0 : i32, i32
  }
  func.func @transform_4(%arg0: i32) -> (i32, i32, i32) {
    %c0_i32 = arith.constant 0 : i32
    %c0_i32_0 = arith.constant 0 : i32
    %c0_i32_1 = arith.constant 0 : i32
    return %arg0, %c0_i32, %c0_i32_0 : i32, i32, i32
  }
}

module attributes {stable_mosaic.version = 11 : i64} {
  func.func @_wavelet_pool_kernel(%arg0: i32, %arg1: memref<8x128xbf16, #tpu.memory_space<vmem>>, %arg2: memref<8x128xbf16, #tpu.memory_space<vmem>>, %arg3: memref<8x128xbf16, #tpu.memory_space<vmem>>, %arg4: memref<8x128xbf16, #tpu.memory_space<vmem>>, %arg5: memref<8x512xbf16, #tpu.memory_space<vmem>>) attributes {dimension_semantics = [#tpu.dimension_semantics<parallel>], iteration_bounds = array<i64: 1>, scalar_prefetch = 0 : i64, scratch_operands = 0 : i64, tpu.core_type = #tpu.core_type<tc>, window_params = [{transform_indices = @transform_0, window_bounds = array<i64: 8, 128>}, {transform_indices = @transform_1, window_bounds = array<i64: 8, 128>}, {transform_indices = @transform_2, window_bounds = array<i64: 8, 128>}, {transform_indices = @transform_3, window_bounds = array<i64: 8, 128>}, {transform_indices = @transform_4, window_bounds = array<i64: 8, 512>}]} {
    %c0 = arith.constant 0 : index
    %c0_0 = arith.constant 0 : index
    %0 = vector.load %arg1[%c0, %c0_0] : memref<8x128xbf16, #tpu.memory_space<vmem>>, vector<8x128xbf16>
    %1 = arith.extf %0 : vector<8x128xbf16> to vector<8x128xf32>
    %cst = arith.constant 5.000000e-01 : f32
    %2 = vector.broadcast %cst : f32 to vector<8x128xf32>
    %3 = arith.mulf %1, %2 : vector<8x128xf32>
    %c0_1 = arith.constant 0 : index
    %c0_2 = arith.constant 0 : index
    %4 = vector.load %arg2[%c0_1, %c0_2] : memref<8x128xbf16, #tpu.memory_space<vmem>>, vector<8x128xbf16>
    %5 = arith.extf %4 : vector<8x128xbf16> to vector<8x128xf32>
    %cst_3 = arith.constant 5.000000e-01 : f32
    %6 = vector.broadcast %cst_3 : f32 to vector<8x128xf32>
    %7 = arith.mulf %5, %6 : vector<8x128xf32>
    %c0_4 = arith.constant 0 : index
    %c0_5 = arith.constant 0 : index
    %8 = vector.load %arg3[%c0_4, %c0_5] : memref<8x128xbf16, #tpu.memory_space<vmem>>, vector<8x128xbf16>
    %9 = arith.extf %8 : vector<8x128xbf16> to vector<8x128xf32>
    %cst_6 = arith.constant 5.000000e-01 : f32
    %10 = vector.broadcast %cst_6 : f32 to vector<8x128xf32>
    %11 = arith.mulf %9, %10 : vector<8x128xf32>
    %c0_7 = arith.constant 0 : index
    %c0_8 = arith.constant 0 : index
    %12 = vector.load %arg4[%c0_7, %c0_8] : memref<8x128xbf16, #tpu.memory_space<vmem>>, vector<8x128xbf16>
    %13 = arith.extf %12 : vector<8x128xbf16> to vector<8x128xf32>
    %cst_9 = arith.constant 5.000000e-01 : f32
    %14 = vector.broadcast %cst_9 : f32 to vector<8x128xf32>
    %15 = arith.mulf %13, %14 : vector<8x128xf32>
    %16 = arith.addf %3, %7 : vector<8x128xf32>
    %17 = arith.addf %16, %11 : vector<8x128xf32>
    %18 = arith.addf %17, %15 : vector<8x128xf32>
    %19 = arith.truncf %18 : vector<8x128xf32> to vector<8x128xbf16>
    %c0_10 = arith.constant 0 : index
    %c0_11 = arith.constant 0 : index
    %20 = vector.load %arg5[%c0_10, %c0_11] : memref<8x512xbf16, #tpu.memory_space<vmem>>, vector<8x128xbf16>
    tpu.vector_store %arg5[%c0_10, %c0_11], %19 {strides = array<i32>} : memref<8x512xbf16, #tpu.memory_space<vmem>>, vector<8x128xbf16>,
    %cst_12 = arith.constant 0.000000e+00 : f32
    %21 = vector.broadcast %cst_12 : f32 to vector<8x128xf32>
    %22 = arith.subf %21, %3 : vector<8x128xf32>
    %23 = arith.subf %22, %7 : vector<8x128xf32>
    %24 = arith.addf %23, %11 : vector<8x128xf32>
    %25 = arith.addf %24, %15 : vector<8x128xf32>
    %26 = arith.truncf %25 : vector<8x128xf32> to vector<8x128xbf16>
    %c0_13 = arith.constant 0 : index
    %c128 = arith.constant 128 : index
    %27 = vector.load %arg5[%c0_13, %c128] : memref<8x512xbf16, #tpu.memory_space<vmem>>, vector<8x128xbf16>
    tpu.vector_store %arg5[%c0_13, %c128], %26 {strides = array<i32>} : memref<8x512xbf16, #tpu.memory_space<vmem>>, vector<8x128xbf16>,
    %cst_14 = arith.constant 0.000000e+00 : f32
    %28 = vector.broadcast %cst_14 : f32 to vector<8x128xf32>
    %29 = arith.subf %28, %3 : vector<8x128xf32>
    %30 = arith.addf %29, %7 : vector<8x128xf32>
    %31 = arith.subf %30, %11 : vector<8x128xf32>
    %32 = arith.addf %31, %15 : vector<8x128xf32>
    %33 = arith.truncf %32 : vector<8x128xf32> to vector<8x128xbf16>
    %c0_15 = arith.constant 0 : index
    %c256 = arith.constant 256 : index
    %34 = vector.load %arg5[%c0_15, %c256] : memref<8x512xbf16, #tpu.memory_space<vmem>>, vector<8x128xbf16>
    tpu.vector_store %arg5[%c0_15, %c256], %33 {strides = array<i32>} : memref<8x512xbf16, #tpu.memory_space<vmem>>, vector<8x128xbf16>,
    %35 = arith.subf %3, %7 : vector<8x128xf32>
    %36 = arith.subf %35, %11 : vector<8x128xf32>
    %37 = arith.addf %36, %15 : vector<8x128xf32>
    %38 = arith.truncf %37 : vector<8x128xf32> to vector<8x128xbf16>
    %c0_16 = arith.constant 0 : index
    %c384 = arith.constant 384 : index
    %39 = vector.load %arg5[%c0_16, %c384] : memref<8x512xbf16, #tpu.memory_space<vmem>>, vector<8x128xbf16>
    tpu.vector_store %arg5[%c0_16, %c384], %38 {strides = array<i32>} : memref<8x512xbf16, #tpu.memory_space<vmem>>, vector<8x128xbf16>,
    return
  }
  func.func @transform_0(%arg0: i32) -> (i32, i32) {
    %c0_i32 = arith.constant 0 : i32
    %c0_i32_0 = arith.constant 0 : i32
    return %arg0, %c0_i32 : i32, i32
  }
  func.func @transform_1(%arg0: i32) -> (i32, i32) {
    %c0_i32 = arith.constant 0 : i32
    %c0_i32_0 = arith.constant 0 : i32
    return %arg0, %c0_i32 : i32, i32
  }
  func.func @transform_2(%arg0: i32) -> (i32, i32) {
    %c0_i32 = arith.constant 0 : i32
    %c0_i32_0 = arith.constant 0 : i32
    return %arg0, %c0_i32 : i32, i32
  }
  func.func @transform_3(%arg0: i32) -> (i32, i32) {
    %c0_i32 = arith.constant 0 : i32
    %c0_i32_0 = arith.constant 0 : i32
    return %arg0, %c0_i32 : i32, i32
  }
  func.func @transform_4(%arg0: i32) -> (i32, i32) {
    %c0_i32 = arith.constant 0 : i32
    %c0_i32_0 = arith.constant 0 : i32
    return %arg0, %c0_i32 : i32, i32
  }
}

module attributes {stable_mosaic.version = 11 : i64} {
  func.func @kernel(%arg0: i32, %arg1: memref<1x11x512xbf16, #tpu.memory_space<vmem>>, %arg2: memref<9x512x128xbf16, #tpu.memory_space<vmem>>, %arg3: memref<1x128xf32, #tpu.memory_space<vmem>>, %arg4: memref<1x128xf32, #tpu.memory_space<vmem>>, %arg5: memref<1x3x128xbf16, #tpu.memory_space<vmem>>) attributes {dimension_semantics = [#tpu.dimension_semantics<parallel>], iteration_bounds = array<i64: 2>, scalar_prefetch = 0 : i64, scratch_operands = 0 : i64, tpu.core_type = #tpu.core_type<tc>, window_params = [{transform_indices = @transform_0, window_bounds = array<i64: 1, 11, 512>}, {pipeline_mode = #tpu.pipeline_mode<synchronous>, transform_indices = @transform_1, window_bounds = array<i64: 9, 512, 128>}, {pipeline_mode = #tpu.pipeline_mode<synchronous>, transform_indices = @transform_2, window_bounds = array<i64: 1, 128>}, {pipeline_mode = #tpu.pipeline_mode<synchronous>, transform_indices = @transform_3, window_bounds = array<i64: 1, 128>}, {transform_indices = @transform_4, window_bounds = array<i64: 1, 3, 128>}]} {
    %c0 = arith.constant 0 : index
    %c0_0 = arith.constant 0 : index
    %c0_1 = arith.constant 0 : index
    %0 = vector.load %arg1[%c0, %c0_0, %c0_1] : memref<1x11x512xbf16, #tpu.memory_space<vmem>>, vector<1x3x512xbf16>
    %1 = vector.shape_cast %0 : vector<1x3x512xbf16> to vector<3x512xbf16>
    %c0_2 = arith.constant 0 : index
    %c0_3 = arith.constant 0 : index
    %c0_4 = arith.constant 0 : index
    %2 = vector.load %arg2[%c0_2, %c0_3, %c0_4] : memref<9x512x128xbf16, #tpu.memory_space<vmem>>, vector<1x512x128xbf16>
    %3 = vector.shape_cast %2 : vector<1x512x128xbf16> to vector<512x128xbf16>
    %cst = arith.constant dense<0.000000e+00> : vector<3x128xf32>
    %4 = tpu.matmul %1, %3, %cst {dimension_numbers = #tpu.dot_dimension_numbers<[1], [0], [0], [1], [0, 0, 1, 1], [], []>} : vector<3x512xbf16>, vector<512x128xbf16>, vector<3x128xf32> -> vector<3x128xf32>
    %c0_5 = arith.constant 0 : index
    %c1 = arith.constant 1 : index
    %c0_6 = arith.constant 0 : index
    %5 = vector.load %arg1[%c0_5, %c1, %c0_6] : memref<1x11x512xbf16, #tpu.memory_space<vmem>>, vector<1x3x512xbf16>
    %6 = vector.shape_cast %5 : vector<1x3x512xbf16> to vector<3x512xbf16>
    %c1_7 = arith.constant 1 : index
    %c0_8 = arith.constant 0 : index
    %c0_9 = arith.constant 0 : index
    %7 = vector.load %arg2[%c1_7, %c0_8, %c0_9] : memref<9x512x128xbf16, #tpu.memory_space<vmem>>, vector<1x512x128xbf16>
    %8 = vector.shape_cast %7 : vector<1x512x128xbf16> to vector<512x128xbf16>
    %cst_10 = arith.constant dense<0.000000e+00> : vector<3x128xf32>
    %9 = tpu.matmul %6, %8, %cst_10 {dimension_numbers = #tpu.dot_dimension_numbers<[1], [0], [0], [1], [0, 0, 1, 1], [], []>} : vector<3x512xbf16>, vector<512x128xbf16>, vector<3x128xf32> -> vector<3x128xf32>
    %10 = arith.addf %4, %9 : vector<3x128xf32>
    %c0_11 = arith.constant 0 : index
    %c2 = arith.constant 2 : index
    %c0_12 = arith.constant 0 : index
    %11 = vector.load %arg1[%c0_11, %c2, %c0_12] : memref<1x11x512xbf16, #tpu.memory_space<vmem>>, vector<1x3x512xbf16>
    %12 = vector.shape_cast %11 : vector<1x3x512xbf16> to vector<3x512xbf16>
    %c2_13 = arith.constant 2 : index
    %c0_14 = arith.constant 0 : index
    %c0_15 = arith.constant 0 : index
    %13 = vector.load %arg2[%c2_13, %c0_14, %c0_15] : memref<9x512x128xbf16, #tpu.memory_space<vmem>>, vector<1x512x128xbf16>
    %14 = vector.shape_cast %13 : vector<1x512x128xbf16> to vector<512x128xbf16>
    %cst_16 = arith.constant dense<0.000000e+00> : vector<3x128xf32>
    %15 = tpu.matmul %12, %14, %cst_16 {dimension_numbers = #tpu.dot_dimension_numbers<[1], [0], [0], [1], [0, 0, 1, 1], [], []>} : vector<3x512xbf16>, vector<512x128xbf16>, vector<3x128xf32> -> vector<3x128xf32>
    %16 = arith.addf %10, %15 : vector<3x128xf32>
    %c0_17 = arith.constant 0 : index
    %c3 = arith.constant 3 : index
    %c0_18 = arith.constant 0 : index
    %17 = vector.load %arg1[%c0_17, %c3, %c0_18] : memref<1x11x512xbf16, #tpu.memory_space<vmem>>, vector<1x3x512xbf16>
    %18 = vector.shape_cast %17 : vector<1x3x512xbf16> to vector<3x512xbf16>
    %c3_19 = arith.constant 3 : index
    %c0_20 = arith.constant 0 : index
    %c0_21 = arith.constant 0 : index
    %19 = vector.load %arg2[%c3_19, %c0_20, %c0_21] : memref<9x512x128xbf16, #tpu.memory_space<vmem>>, vector<1x512x128xbf16>
    %20 = vector.shape_cast %19 : vector<1x512x128xbf16> to vector<512x128xbf16>
    %cst_22 = arith.constant dense<0.000000e+00> : vector<3x128xf32>
    %21 = tpu.matmul %18, %20, %cst_22 {dimension_numbers = #tpu.dot_dimension_numbers<[1], [0], [0], [1], [0, 0, 1, 1], [], []>} : vector<3x512xbf16>, vector<512x128xbf16>, vector<3x128xf32> -> vector<3x128xf32>
    %22 = arith.addf %16, %21 : vector<3x128xf32>
    %c0_23 = arith.constant 0 : index
    %c4 = arith.constant 4 : index
    %c0_24 = arith.constant 0 : index
    %23 = vector.load %arg1[%c0_23, %c4, %c0_24] : memref<1x11x512xbf16, #tpu.memory_space<vmem>>, vector<1x3x512xbf16>
    %24 = vector.shape_cast %23 : vector<1x3x512xbf16> to vector<3x512xbf16>
    %c4_25 = arith.constant 4 : index
    %c0_26 = arith.constant 0 : index
    %c0_27 = arith.constant 0 : index
    %25 = vector.load %arg2[%c4_25, %c0_26, %c0_27] : memref<9x512x128xbf16, #tpu.memory_space<vmem>>, vector<1x512x128xbf16>
    %26 = vector.shape_cast %25 : vector<1x512x128xbf16> to vector<512x128xbf16>
    %cst_28 = arith.constant dense<0.000000e+00> : vector<3x128xf32>
    %27 = tpu.matmul %24, %26, %cst_28 {dimension_numbers = #tpu.dot_dimension_numbers<[1], [0], [0], [1], [0, 0, 1, 1], [], []>} : vector<3x512xbf16>, vector<512x128xbf16>, vector<3x128xf32> -> vector<3x128xf32>
    %28 = arith.addf %22, %27 : vector<3x128xf32>
    %c0_29 = arith.constant 0 : index
    %c5 = arith.constant 5 : index
    %c0_30 = arith.constant 0 : index
    %29 = vector.load %arg1[%c0_29, %c5, %c0_30] : memref<1x11x512xbf16, #tpu.memory_space<vmem>>, vector<1x3x512xbf16>
    %30 = vector.shape_cast %29 : vector<1x3x512xbf16> to vector<3x512xbf16>
    %c5_31 = arith.constant 5 : index
    %c0_32 = arith.constant 0 : index
    %c0_33 = arith.constant 0 : index
    %31 = vector.load %arg2[%c5_31, %c0_32, %c0_33] : memref<9x512x128xbf16, #tpu.memory_space<vmem>>, vector<1x512x128xbf16>
    %32 = vector.shape_cast %31 : vector<1x512x128xbf16> to vector<512x128xbf16>
    %cst_34 = arith.constant dense<0.000000e+00> : vector<3x128xf32>
    %33 = tpu.matmul %30, %32, %cst_34 {dimension_numbers = #tpu.dot_dimension_numbers<[1], [0], [0], [1], [0, 0, 1, 1], [], []>} : vector<3x512xbf16>, vector<512x128xbf16>, vector<3x128xf32> -> vector<3x128xf32>
    %34 = arith.addf %28, %33 : vector<3x128xf32>
    %c0_35 = arith.constant 0 : index
    %c6 = arith.constant 6 : index
    %c0_36 = arith.constant 0 : index
    %35 = vector.load %arg1[%c0_35, %c6, %c0_36] : memref<1x11x512xbf16, #tpu.memory_space<vmem>>, vector<1x3x512xbf16>
    %36 = vector.shape_cast %35 : vector<1x3x512xbf16> to vector<3x512xbf16>
    %c6_37 = arith.constant 6 : index
    %c0_38 = arith.constant 0 : index
    %c0_39 = arith.constant 0 : index
    %37 = vector.load %arg2[%c6_37, %c0_38, %c0_39] : memref<9x512x128xbf16, #tpu.memory_space<vmem>>, vector<1x512x128xbf16>
    %38 = vector.shape_cast %37 : vector<1x512x128xbf16> to vector<512x128xbf16>
    %cst_40 = arith.constant dense<0.000000e+00> : vector<3x128xf32>
    %39 = tpu.matmul %36, %38, %cst_40 {dimension_numbers = #tpu.dot_dimension_numbers<[1], [0], [0], [1], [0, 0, 1, 1], [], []>} : vector<3x512xbf16>, vector<512x128xbf16>, vector<3x128xf32> -> vector<3x128xf32>
    %40 = arith.addf %34, %39 : vector<3x128xf32>
    %c0_41 = arith.constant 0 : index
    %c7 = arith.constant 7 : index
    %c0_42 = arith.constant 0 : index
    %41 = vector.load %arg1[%c0_41, %c7, %c0_42] : memref<1x11x512xbf16, #tpu.memory_space<vmem>>, vector<1x3x512xbf16>
    %42 = vector.shape_cast %41 : vector<1x3x512xbf16> to vector<3x512xbf16>
    %c7_43 = arith.constant 7 : index
    %c0_44 = arith.constant 0 : index
    %c0_45 = arith.constant 0 : index
    %43 = vector.load %arg2[%c7_43, %c0_44, %c0_45] : memref<9x512x128xbf16, #tpu.memory_space<vmem>>, vector<1x512x128xbf16>
    %44 = vector.shape_cast %43 : vector<1x512x128xbf16> to vector<512x128xbf16>
    %cst_46 = arith.constant dense<0.000000e+00> : vector<3x128xf32>
    %45 = tpu.matmul %42, %44, %cst_46 {dimension_numbers = #tpu.dot_dimension_numbers<[1], [0], [0], [1], [0, 0, 1, 1], [], []>} : vector<3x512xbf16>, vector<512x128xbf16>, vector<3x128xf32> -> vector<3x128xf32>
    %46 = arith.addf %40, %45 : vector<3x128xf32>
    %c0_47 = arith.constant 0 : index
    %c8 = arith.constant 8 : index
    %c0_48 = arith.constant 0 : index
    %47 = vector.load %arg1[%c0_47, %c8, %c0_48] : memref<1x11x512xbf16, #tpu.memory_space<vmem>>, vector<1x3x512xbf16>
    %48 = vector.shape_cast %47 : vector<1x3x512xbf16> to vector<3x512xbf16>
    %c8_49 = arith.constant 8 : index
    %c0_50 = arith.constant 0 : index
    %c0_51 = arith.constant 0 : index
    %49 = vector.load %arg2[%c8_49, %c0_50, %c0_51] : memref<9x512x128xbf16, #tpu.memory_space<vmem>>, vector<1x512x128xbf16>
    %50 = vector.shape_cast %49 : vector<1x512x128xbf16> to vector<512x128xbf16>
    %cst_52 = arith.constant dense<0.000000e+00> : vector<3x128xf32>
    %51 = tpu.matmul %48, %50, %cst_52 {dimension_numbers = #tpu.dot_dimension_numbers<[1], [0], [0], [1], [0, 0, 1, 1], [], []>} : vector<3x512xbf16>, vector<512x128xbf16>, vector<3x128xf32> -> vector<3x128xf32>
    %52 = arith.addf %46, %51 : vector<3x128xf32>
    %c0_53 = arith.constant 0 : index
    %c0_54 = arith.constant 0 : index
    %53 = vector.load %arg3[%c0_53, %c0_54] : memref<1x128xf32, #tpu.memory_space<vmem>>, vector<1x128xf32>
    %54 = vector.broadcast %53 : vector<1x128xf32> to vector<3x128xf32>
    %55 = arith.mulf %52, %54 : vector<3x128xf32>
    %c0_55 = arith.constant 0 : index
    %c0_56 = arith.constant 0 : index
    %56 = vector.load %arg4[%c0_55, %c0_56] : memref<1x128xf32, #tpu.memory_space<vmem>>, vector<1x128xf32>
    %57 = vector.broadcast %56 : vector<1x128xf32> to vector<3x128xf32>
    %58 = arith.addf %55, %57 : vector<3x128xf32>
    %cst_57 = arith.constant 0.000000e+00 : f32
    %59 = vector.broadcast %cst_57 : f32 to vector<3x128xf32>
    %60 = arith.maximumf %58, %59 : vector<3x128xf32>
    %61 = arith.truncf %60 : vector<3x128xf32> to vector<3x128xbf16>
    %c0_58 = arith.constant 0 : index
    %c0_59 = arith.constant 0 : index
    %c0_60 = arith.constant 0 : index
    %62 = vector.load %arg5[%c0_58, %c0_59, %c0_60] : memref<1x3x128xbf16, #tpu.memory_space<vmem>>, vector<1x3x128xbf16>
    %63 = vector.shape_cast %62 : vector<1x3x128xbf16> to vector<3x128xbf16>
    %64 = vector.shape_cast %61 : vector<3x128xbf16> to vector<1x3x128xbf16>
    tpu.vector_store %arg5[%c0_58, %c0_59, %c0_60], %64 {strides = array<i32>} : memref<1x3x128xbf16, #tpu.memory_space<vmem>>, vector<1x3x128xbf16>,
    return
  }
  func.func @transform_0(%arg0: i32) -> (i32, i32, i32) {
    %c0_i32 = arith.constant 0 : i32
    %c0_i32_0 = arith.constant 0 : i32
    %c0_i32_1 = arith.constant 0 : i32
    return %arg0, %c0_i32, %c0_i32_0 : i32, i32, i32
  }
  func.func @transform_1(%arg0: i32) -> (i32, i32, i32) {
    %c0_i32 = arith.constant 0 : i32
    %c0_i32_0 = arith.constant 0 : i32
    %c0_i32_1 = arith.constant 0 : i32
    %c0_i32_2 = arith.constant 0 : i32
    return %c0_i32, %c0_i32_0, %c0_i32_1 : i32, i32, i32
  }
  func.func @transform_2(%arg0: i32) -> (i32, i32) {
    %c0_i32 = arith.constant 0 : i32
    %c0_i32_0 = arith.constant 0 : i32
    %c0_i32_1 = arith.constant 0 : i32
    return %c0_i32, %c0_i32_0 : i32, i32
  }
  func.func @transform_3(%arg0: i32) -> (i32, i32) {
    %c0_i32 = arith.constant 0 : i32
    %c0_i32_0 = arith.constant 0 : i32
    %c0_i32_1 = arith.constant 0 : i32
    return %c0_i32, %c0_i32_0 : i32, i32
  }
  func.func @transform_4(%arg0: i32) -> (i32, i32, i32) {
    %c0_i32 = arith.constant 0 : i32
    %c0_i32_0 = arith.constant 0 : i32
    %c0_i32_1 = arith.constant 0 : i32
    return %arg0, %c0_i32, %c0_i32_0 : i32, i32, i32
  }
}

module attributes {stable_mosaic.version = 11 : i64} {
  func.func @kernel(%arg0: i32, %arg1: memref<1x11x128xbf16, #tpu.memory_space<vmem>>, %arg2: memref<9x128x128xbf16, #tpu.memory_space<vmem>>, %arg3: memref<1x128xf32, #tpu.memory_space<vmem>>, %arg4: memref<1x128xf32, #tpu.memory_space<vmem>>, %arg5: memref<1x3x128xbf16, #tpu.memory_space<vmem>>) attributes {dimension_semantics = [#tpu.dimension_semantics<parallel>], iteration_bounds = array<i64: 2>, scalar_prefetch = 0 : i64, scratch_operands = 0 : i64, tpu.core_type = #tpu.core_type<tc>, window_params = [{transform_indices = @transform_0, window_bounds = array<i64: 1, 11, 128>}, {pipeline_mode = #tpu.pipeline_mode<synchronous>, transform_indices = @transform_1, window_bounds = array<i64: 9, 128, 128>}, {pipeline_mode = #tpu.pipeline_mode<synchronous>, transform_indices = @transform_2, window_bounds = array<i64: 1, 128>}, {pipeline_mode = #tpu.pipeline_mode<synchronous>, transform_indices = @transform_3, window_bounds = array<i64: 1, 128>}, {transform_indices = @transform_4, window_bounds = array<i64: 1, 3, 128>}]} {
    %c0 = arith.constant 0 : index
    %c0_0 = arith.constant 0 : index
    %c0_1 = arith.constant 0 : index
    %0 = vector.load %arg1[%c0, %c0_0, %c0_1] : memref<1x11x128xbf16, #tpu.memory_space<vmem>>, vector<1x3x128xbf16>
    %1 = vector.shape_cast %0 : vector<1x3x128xbf16> to vector<3x128xbf16>
    %c0_2 = arith.constant 0 : index
    %c0_3 = arith.constant 0 : index
    %c0_4 = arith.constant 0 : index
    %2 = vector.load %arg2[%c0_2, %c0_3, %c0_4] : memref<9x128x128xbf16, #tpu.memory_space<vmem>>, vector<1x128x128xbf16>
    %3 = vector.shape_cast %2 : vector<1x128x128xbf16> to vector<128x128xbf16>
    %cst = arith.constant dense<0.000000e+00> : vector<3x128xf32>
    %4 = tpu.matmul %1, %3, %cst {dimension_numbers = #tpu.dot_dimension_numbers<[1], [0], [0], [1], [0, 0, 1, 1], [], []>} : vector<3x128xbf16>, vector<128x128xbf16>, vector<3x128xf32> -> vector<3x128xf32>
    %c0_5 = arith.constant 0 : index
    %c1 = arith.constant 1 : index
    %c0_6 = arith.constant 0 : index
    %5 = vector.load %arg1[%c0_5, %c1, %c0_6] : memref<1x11x128xbf16, #tpu.memory_space<vmem>>, vector<1x3x128xbf16>
    %6 = vector.shape_cast %5 : vector<1x3x128xbf16> to vector<3x128xbf16>
    %c1_7 = arith.constant 1 : index
    %c0_8 = arith.constant 0 : index
    %c0_9 = arith.constant 0 : index
    %7 = vector.load %arg2[%c1_7, %c0_8, %c0_9] : memref<9x128x128xbf16, #tpu.memory_space<vmem>>, vector<1x128x128xbf16>
    %8 = vector.shape_cast %7 : vector<1x128x128xbf16> to vector<128x128xbf16>
    %cst_10 = arith.constant dense<0.000000e+00> : vector<3x128xf32>
    %9 = tpu.matmul %6, %8, %cst_10 {dimension_numbers = #tpu.dot_dimension_numbers<[1], [0], [0], [1], [0, 0, 1, 1], [], []>} : vector<3x128xbf16>, vector<128x128xbf16>, vector<3x128xf32> -> vector<3x128xf32>
    %10 = arith.addf %4, %9 : vector<3x128xf32>
    %c0_11 = arith.constant 0 : index
    %c2 = arith.constant 2 : index
    %c0_12 = arith.constant 0 : index
    %11 = vector.load %arg1[%c0_11, %c2, %c0_12] : memref<1x11x128xbf16, #tpu.memory_space<vmem>>, vector<1x3x128xbf16>
    %12 = vector.shape_cast %11 : vector<1x3x128xbf16> to vector<3x128xbf16>
    %c2_13 = arith.constant 2 : index
    %c0_14 = arith.constant 0 : index
    %c0_15 = arith.constant 0 : index
    %13 = vector.load %arg2[%c2_13, %c0_14, %c0_15] : memref<9x128x128xbf16, #tpu.memory_space<vmem>>, vector<1x128x128xbf16>
    %14 = vector.shape_cast %13 : vector<1x128x128xbf16> to vector<128x128xbf16>
    %cst_16 = arith.constant dense<0.000000e+00> : vector<3x128xf32>
    %15 = tpu.matmul %12, %14, %cst_16 {dimension_numbers = #tpu.dot_dimension_numbers<[1], [0], [0], [1], [0, 0, 1, 1], [], []>} : vector<3x128xbf16>, vector<128x128xbf16>, vector<3x128xf32> -> vector<3x128xf32>
    %16 = arith.addf %10, %15 : vector<3x128xf32>
    %c0_17 = arith.constant 0 : index
    %c3 = arith.constant 3 : index
    %c0_18 = arith.constant 0 : index
    %17 = vector.load %arg1[%c0_17, %c3, %c0_18] : memref<1x11x128xbf16, #tpu.memory_space<vmem>>, vector<1x3x128xbf16>
    %18 = vector.shape_cast %17 : vector<1x3x128xbf16> to vector<3x128xbf16>
    %c3_19 = arith.constant 3 : index
    %c0_20 = arith.constant 0 : index
    %c0_21 = arith.constant 0 : index
    %19 = vector.load %arg2[%c3_19, %c0_20, %c0_21] : memref<9x128x128xbf16, #tpu.memory_space<vmem>>, vector<1x128x128xbf16>
    %20 = vector.shape_cast %19 : vector<1x128x128xbf16> to vector<128x128xbf16>
    %cst_22 = arith.constant dense<0.000000e+00> : vector<3x128xf32>
    %21 = tpu.matmul %18, %20, %cst_22 {dimension_numbers = #tpu.dot_dimension_numbers<[1], [0], [0], [1], [0, 0, 1, 1], [], []>} : vector<3x128xbf16>, vector<128x128xbf16>, vector<3x128xf32> -> vector<3x128xf32>
    %22 = arith.addf %16, %21 : vector<3x128xf32>
    %c0_23 = arith.constant 0 : index
    %c4 = arith.constant 4 : index
    %c0_24 = arith.constant 0 : index
    %23 = vector.load %arg1[%c0_23, %c4, %c0_24] : memref<1x11x128xbf16, #tpu.memory_space<vmem>>, vector<1x3x128xbf16>
    %24 = vector.shape_cast %23 : vector<1x3x128xbf16> to vector<3x128xbf16>
    %c4_25 = arith.constant 4 : index
    %c0_26 = arith.constant 0 : index
    %c0_27 = arith.constant 0 : index
    %25 = vector.load %arg2[%c4_25, %c0_26, %c0_27] : memref<9x128x128xbf16, #tpu.memory_space<vmem>>, vector<1x128x128xbf16>
    %26 = vector.shape_cast %25 : vector<1x128x128xbf16> to vector<128x128xbf16>
    %cst_28 = arith.constant dense<0.000000e+00> : vector<3x128xf32>
    %27 = tpu.matmul %24, %26, %cst_28 {dimension_numbers = #tpu.dot_dimension_numbers<[1], [0], [0], [1], [0, 0, 1, 1], [], []>} : vector<3x128xbf16>, vector<128x128xbf16>, vector<3x128xf32> -> vector<3x128xf32>
    %28 = arith.addf %22, %27 : vector<3x128xf32>
    %c0_29 = arith.constant 0 : index
    %c5 = arith.constant 5 : index
    %c0_30 = arith.constant 0 : index
    %29 = vector.load %arg1[%c0_29, %c5, %c0_30] : memref<1x11x128xbf16, #tpu.memory_space<vmem>>, vector<1x3x128xbf16>
    %30 = vector.shape_cast %29 : vector<1x3x128xbf16> to vector<3x128xbf16>
    %c5_31 = arith.constant 5 : index
    %c0_32 = arith.constant 0 : index
    %c0_33 = arith.constant 0 : index
    %31 = vector.load %arg2[%c5_31, %c0_32, %c0_33] : memref<9x128x128xbf16, #tpu.memory_space<vmem>>, vector<1x128x128xbf16>
    %32 = vector.shape_cast %31 : vector<1x128x128xbf16> to vector<128x128xbf16>
    %cst_34 = arith.constant dense<0.000000e+00> : vector<3x128xf32>
    %33 = tpu.matmul %30, %32, %cst_34 {dimension_numbers = #tpu.dot_dimension_numbers<[1], [0], [0], [1], [0, 0, 1, 1], [], []>} : vector<3x128xbf16>, vector<128x128xbf16>, vector<3x128xf32> -> vector<3x128xf32>
    %34 = arith.addf %28, %33 : vector<3x128xf32>
    %c0_35 = arith.constant 0 : index
    %c6 = arith.constant 6 : index
    %c0_36 = arith.constant 0 : index
    %35 = vector.load %arg1[%c0_35, %c6, %c0_36] : memref<1x11x128xbf16, #tpu.memory_space<vmem>>, vector<1x3x128xbf16>
    %36 = vector.shape_cast %35 : vector<1x3x128xbf16> to vector<3x128xbf16>
    %c6_37 = arith.constant 6 : index
    %c0_38 = arith.constant 0 : index
    %c0_39 = arith.constant 0 : index
    %37 = vector.load %arg2[%c6_37, %c0_38, %c0_39] : memref<9x128x128xbf16, #tpu.memory_space<vmem>>, vector<1x128x128xbf16>
    %38 = vector.shape_cast %37 : vector<1x128x128xbf16> to vector<128x128xbf16>
    %cst_40 = arith.constant dense<0.000000e+00> : vector<3x128xf32>
    %39 = tpu.matmul %36, %38, %cst_40 {dimension_numbers = #tpu.dot_dimension_numbers<[1], [0], [0], [1], [0, 0, 1, 1], [], []>} : vector<3x128xbf16>, vector<128x128xbf16>, vector<3x128xf32> -> vector<3x128xf32>
    %40 = arith.addf %34, %39 : vector<3x128xf32>
    %c0_41 = arith.constant 0 : index
    %c7 = arith.constant 7 : index
    %c0_42 = arith.constant 0 : index
    %41 = vector.load %arg1[%c0_41, %c7, %c0_42] : memref<1x11x128xbf16, #tpu.memory_space<vmem>>, vector<1x3x128xbf16>
    %42 = vector.shape_cast %41 : vector<1x3x128xbf16> to vector<3x128xbf16>
    %c7_43 = arith.constant 7 : index
    %c0_44 = arith.constant 0 : index
    %c0_45 = arith.constant 0 : index
    %43 = vector.load %arg2[%c7_43, %c0_44, %c0_45] : memref<9x128x128xbf16, #tpu.memory_space<vmem>>, vector<1x128x128xbf16>
    %44 = vector.shape_cast %43 : vector<1x128x128xbf16> to vector<128x128xbf16>
    %cst_46 = arith.constant dense<0.000000e+00> : vector<3x128xf32>
    %45 = tpu.matmul %42, %44, %cst_46 {dimension_numbers = #tpu.dot_dimension_numbers<[1], [0], [0], [1], [0, 0, 1, 1], [], []>} : vector<3x128xbf16>, vector<128x128xbf16>, vector<3x128xf32> -> vector<3x128xf32>
    %46 = arith.addf %40, %45 : vector<3x128xf32>
    %c0_47 = arith.constant 0 : index
    %c8 = arith.constant 8 : index
    %c0_48 = arith.constant 0 : index
    %47 = vector.load %arg1[%c0_47, %c8, %c0_48] : memref<1x11x128xbf16, #tpu.memory_space<vmem>>, vector<1x3x128xbf16>
    %48 = vector.shape_cast %47 : vector<1x3x128xbf16> to vector<3x128xbf16>
    %c8_49 = arith.constant 8 : index
    %c0_50 = arith.constant 0 : index
    %c0_51 = arith.constant 0 : index
    %49 = vector.load %arg2[%c8_49, %c0_50, %c0_51] : memref<9x128x128xbf16, #tpu.memory_space<vmem>>, vector<1x128x128xbf16>
    %50 = vector.shape_cast %49 : vector<1x128x128xbf16> to vector<128x128xbf16>
    %cst_52 = arith.constant dense<0.000000e+00> : vector<3x128xf32>
    %51 = tpu.matmul %48, %50, %cst_52 {dimension_numbers = #tpu.dot_dimension_numbers<[1], [0], [0], [1], [0, 0, 1, 1], [], []>} : vector<3x128xbf16>, vector<128x128xbf16>, vector<3x128xf32> -> vector<3x128xf32>
    %52 = arith.addf %46, %51 : vector<3x128xf32>
    %c0_53 = arith.constant 0 : index
    %c0_54 = arith.constant 0 : index
    %53 = vector.load %arg3[%c0_53, %c0_54] : memref<1x128xf32, #tpu.memory_space<vmem>>, vector<1x128xf32>
    %54 = vector.broadcast %53 : vector<1x128xf32> to vector<3x128xf32>
    %55 = arith.mulf %52, %54 : vector<3x128xf32>
    %c0_55 = arith.constant 0 : index
    %c0_56 = arith.constant 0 : index
    %56 = vector.load %arg4[%c0_55, %c0_56] : memref<1x128xf32, #tpu.memory_space<vmem>>, vector<1x128xf32>
    %57 = vector.broadcast %56 : vector<1x128xf32> to vector<3x128xf32>
    %58 = arith.addf %55, %57 : vector<3x128xf32>
    %cst_57 = arith.constant 0.000000e+00 : f32
    %59 = vector.broadcast %cst_57 : f32 to vector<3x128xf32>
    %60 = arith.maximumf %58, %59 : vector<3x128xf32>
    %61 = arith.truncf %60 : vector<3x128xf32> to vector<3x128xbf16>
    %c0_58 = arith.constant 0 : index
    %c0_59 = arith.constant 0 : index
    %c0_60 = arith.constant 0 : index
    %62 = vector.load %arg5[%c0_58, %c0_59, %c0_60] : memref<1x3x128xbf16, #tpu.memory_space<vmem>>, vector<1x3x128xbf16>
    %63 = vector.shape_cast %62 : vector<1x3x128xbf16> to vector<3x128xbf16>
    %64 = vector.shape_cast %61 : vector<3x128xbf16> to vector<1x3x128xbf16>
    tpu.vector_store %arg5[%c0_58, %c0_59, %c0_60], %64 {strides = array<i32>} : memref<1x3x128xbf16, #tpu.memory_space<vmem>>, vector<1x3x128xbf16>,
    return
  }
  func.func @transform_0(%arg0: i32) -> (i32, i32, i32) {
    %c0_i32 = arith.constant 0 : i32
    %c0_i32_0 = arith.constant 0 : i32
    %c0_i32_1 = arith.constant 0 : i32
    return %arg0, %c0_i32, %c0_i32_0 : i32, i32, i32
  }
  func.func @transform_1(%arg0: i32) -> (i32, i32, i32) {
    %c0_i32 = arith.constant 0 : i32
    %c0_i32_0 = arith.constant 0 : i32
    %c0_i32_1 = arith.constant 0 : i32
    %c0_i32_2 = arith.constant 0 : i32
    return %c0_i32, %c0_i32_0, %c0_i32_1 : i32, i32, i32
  }
  func.func @transform_2(%arg0: i32) -> (i32, i32) {
    %c0_i32 = arith.constant 0 : i32
    %c0_i32_0 = arith.constant 0 : i32
    %c0_i32_1 = arith.constant 0 : i32
    return %c0_i32, %c0_i32_0 : i32, i32
  }
  func.func @transform_3(%arg0: i32) -> (i32, i32) {
    %c0_i32 = arith.constant 0 : i32
    %c0_i32_0 = arith.constant 0 : i32
    %c0_i32_1 = arith.constant 0 : i32
    return %c0_i32, %c0_i32_0 : i32, i32
  }
  func.func @transform_4(%arg0: i32) -> (i32, i32, i32) {
    %c0_i32 = arith.constant 0 : i32
    %c0_i32_0 = arith.constant 0 : i32
    %c0_i32_1 = arith.constant 0 : i32
    return %arg0, %c0_i32, %c0_i32_0 : i32, i32, i32
  }
}

module attributes {stable_mosaic.version = 11 : i64} {
  func.func @_head_kernel(%arg0: i32, %arg1: memref<2x1x128xbf16, #tpu.memory_space<vmem>>, %arg2: memref<128x1xf32, #tpu.memory_space<vmem>>, %arg3: memref<1x1xf32, #tpu.memory_space<vmem>>, %arg4: memref<2x1xf32, #tpu.memory_space<vmem>>) attributes {dimension_semantics = [#tpu.dimension_semantics<arbitrary>], iteration_bounds = array<i64: 1>, scalar_prefetch = 0 : i64, scratch_operands = 0 : i64, tpu.core_type = #tpu.core_type<tc>, window_params = [{pipeline_mode = #tpu.pipeline_mode<synchronous>, transform_indices = @transform_0, window_bounds = array<i64: 2, 1, 128>}, {pipeline_mode = #tpu.pipeline_mode<synchronous>, transform_indices = @transform_1, window_bounds = array<i64: 128, 1>}, {pipeline_mode = #tpu.pipeline_mode<synchronous>, transform_indices = @transform_2, window_bounds = array<i64: 1, 1>}, {pipeline_mode = #tpu.pipeline_mode<synchronous>, transform_indices = @transform_3, window_bounds = array<i64: 2, 1>}]} {
    %c0 = arith.constant 0 : index
    %c0_0 = arith.constant 0 : index
    %c0_1 = arith.constant 0 : index
    %0 = vector.load %arg1[%c0, %c0_0, %c0_1] : memref<2x1x128xbf16, #tpu.memory_space<vmem>>, vector<2x1x128xbf16>
    %1 = arith.extf %0 : vector<2x1x128xbf16> to vector<2x1x128xf32>
    %cst = arith.constant dense<0.000000e+00> : vector<2x128xf32>
    %2 = vector.multi_reduction <add>, %1, %cst [1] : vector<2x1x128xf32> to vector<2x128xf32>
    %cst_2 = arith.constant 1.000000e+00 : f32
    %3 = vector.broadcast %cst_2 : f32 to vector<2x128xf32>
    %4 = arith.mulf %2, %3 : vector<2x128xf32>
    %c0_3 = arith.constant 0 : index
    %c0_4 = arith.constant 0 : index
    %5 = vector.load %arg2[%c0_3, %c0_4] : memref<128x1xf32, #tpu.memory_space<vmem>>, vector<128x1xf32>
    %cst_5 = arith.constant dense<0.000000e+00> : vector<2x1xf32>
    %6 = tpu.matmul %4, %5, %cst_5 {dimension_numbers = #tpu.dot_dimension_numbers<[1], [0], [0], [1], [0, 0, 1, 1], [], []>} : vector<2x128xf32>, vector<128x1xf32>, vector<2x1xf32> -> vector<2x1xf32>
    %c0_6 = arith.constant 0 : index
    %c0_7 = arith.constant 0 : index
    %7 = vector.load %arg3[%c0_6, %c0_7] : memref<1x1xf32, #tpu.memory_space<vmem>>, vector<1x1xf32>
    %8 = vector.broadcast %7 : vector<1x1xf32> to vector<2x1xf32>
    %9 = arith.addf %6, %8 : vector<2x1xf32>
    %cst_8 = arith.constant 0.000000e+00 : f32
    %10 = vector.broadcast %cst_8 : f32 to vector<2x1xf32>
    %11 = arith.subf %10, %9 : vector<2x1xf32>
    %12 = math.exp %11 : vector<2x1xf32>
    %cst_9 = arith.constant 1.000000e+00 : f32
    %13 = vector.broadcast %cst_9 : f32 to vector<2x1xf32>
    %14 = arith.addf %13, %12 : vector<2x1xf32>
    %cst_10 = arith.constant 1.000000e+00 : f32
    %15 = vector.broadcast %cst_10 : f32 to vector<2x1xf32>
    %16 = arith.divf %15, %14 : vector<2x1xf32>
    %c0_11 = arith.constant 0 : index
    %c0_12 = arith.constant 0 : index
    %17 = vector.load %arg4[%c0_11, %c0_12] : memref<2x1xf32, #tpu.memory_space<vmem>>, vector<2x1xf32>
    tpu.vector_store %arg4[%c0_11, %c0_12], %16 {strides = array<i32>} : memref<2x1xf32, #tpu.memory_space<vmem>>, vector<2x1xf32>,
    return
  }
  func.func @transform_0(%arg0: i32) -> (i32, i32, i32) {
    %c0_i32 = arith.constant 0 : i32
    %c0_i32_0 = arith.constant 0 : i32
    %c0_i32_1 = arith.constant 0 : i32
    %c0_i32_2 = arith.constant 0 : i32
    return %c0_i32, %c0_i32_0, %c0_i32_1 : i32, i32, i32
  }
  func.func @transform_1(%arg0: i32) -> (i32, i32) {
    %c0_i32 = arith.constant 0 : i32
    %c0_i32_0 = arith.constant 0 : i32
    %c0_i32_1 = arith.constant 0 : i32
    return %c0_i32, %c0_i32_0 : i32, i32
  }
  func.func @transform_2(%arg0: i32) -> (i32, i32) {
    %c0_i32 = arith.constant 0 : i32
    %c0_i32_0 = arith.constant 0 : i32
    %c0_i32_1 = arith.constant 0 : i32
    return %c0_i32, %c0_i32_0 : i32, i32
  }
  func.func @transform_3(%arg0: i32) -> (i32, i32) {
    %c0_i32 = arith.constant 0 : i32
    %c0_i32_0 = arith.constant 0 : i32
    %c0_i32_1 = arith.constant 0 : i32
    return %c0_i32, %c0_i32_0 : i32, i32
  }
}

</mosaic_0001>

<bundles_post_ra>
// kernel: wavelet_model_noatt.10
= control target key start
LH: loop header
LB: loop body
LE: loop exit
PB: predicated region body
PF: predicated region fallthrough
CT: control target
= control target key end

     0   :  { %s908_s23 = smov 4   ;;  %vm257_vm0 = vcmask 27648   ;;  %s910_s20 = smov 12   ;;  %vm434_vm1 = vcmask 60448   ;;  %vm595_vm2 = vcmask 93248   ;;  %vm756_vm3 = vcmask 126048   ;;  %s1964_s0 = inlined_call_operand.vmem [shape: f32[128,4], index: 0, kind: input, shape index: {}]   ;;  %s1965_s1 = inlined_call_operand.vmem [shape: f32[128,4], index: 1, kind: input, shape index: {}]   ;;  %s1966_s2 = inlined_call_operand.vmem [shape: f32[128,4], index: 2, kind: input, shape index: {}]   ;;  %s1967_s3 = inlined_call_operand.vmem [shape: f32[128,4], index: 3, kind: input, shape index: {}]   ;;  %s1968_s4 = inlined_call_operand.vmem [shape: bf16[128,16], index: 4, kind: output, shape index: {}]  }
   0x1   :  { %v19_v0 = vld [vmem:[%s1964_s0 + $0x10] sm:$0xff]  ;;  %v17_v7 = vld [vmem:[%s1964_s0] sm:$0xff]  ;;  %v20_v14 = vld [vmem:[%s1964_s0 + $0x18] sm:$0xff] }
   0x2   :  { %v51_v1 = vld [vmem:[%s1965_s1 + $0x10] sm:$0xff]  ;;  %v945_v3 = vmul.f32 0.5, %v19_v0  ;;  %v49_v8 = vld [vmem:[%s1965_s1] sm:$0xff]  ;;  %v962_v10 = vmul.f32 0.5, %v17_v7  ;;  %v980_v18 = vmul.f32 0.5, %v20_v14  ;;  %v52_v19 = vld [vmem:[%s1965_s1 + $0x18] sm:$0xff] }
   0x3   :  { %v83_v2 = vld [vmem:[%s1966_s2 + $0x10] sm:$0xff]  ;;  %v947_v4 = vmul.f32 0.5, %v51_v1  ;;  %v964_v11 = vmul.f32 0.5, %v49_v8  ;;  %v81_v12 = vld [vmem:[%s1966_s2] sm:$0xff]  ;;  %v84_v20 = vld [vmem:[%s1966_s2 + $0x18] sm:$0xff]  ;;  %v989_v22 = vmul.f32 0.5, %v52_v19 }
   0x4   :  { %v949_v5 = vmul.f32 0.5, %v83_v2  ;;  %v115_v6 = vld [vmem:[%s1967_s3 + $0x10] sm:$0xff]  ;;  %v113_v13 = vld [vmem:[%s1967_s3] sm:$0xff]  ;;  %v1974_v15 = vsub.f32 0.0, %v945_v3  ;;  %v976_v16 = vmul.f32 0.5, %v81_v12  ;;  %v1977_v21 = vsub.f32 0.0, %v962_v10 }
   0x5   :  { %v960_v9 = vmul.f32 0.5, %v115_v6  ;;  %v978_v17 = vmul.f32 0.5, %v113_v13  ;;  %v991_v23 = vmul.f32 0.5, %v84_v20  ;;  %v116_v24 = vld [vmem:[%s1967_s3 + $0x18] sm:$0xff]  ;;  %v18_v25 = vld [vmem:[%s1964_s0 + $0x8] sm:$0xff]  ;;  %v1976_v30 = vsub.f32 0.0, %v980_v18 }
   0x6   :  { %2063 = vst [vmem:[#allocation3_spill] sm:$0xff] %v976_v16  ;;  %v50_v26 = vld [vmem:[%s1965_s1 + $0x8] sm:$0xff]  ;;  %v292_v28 = vsub.f32 %v1974_v15, %v947_v4  ;;  %v1007_v29 = vmul.f32 0.5, %v116_v24  ;;  %v1010_v31 = vmul.f32 0.5, %v18_v25  ;;  %v290_v35 = vsub.f32 %v1977_v21, %v964_v11  ;;  %v21_v46 = vld [vmem:[%s1964_s0 + $0x20] sm:$0xff]  ;;  %v24_v58 = vld [vmem:[%s1964_s0 + $0x38] sm:$0xff] }
   0x7   :  { %2062 = vst [vmem:[#allocation2_spill] sm:$0xff] %v960_v9  ;;  %2064 = vst [vmem:[#allocation4_spill] sm:$0xff] %v978_v17  ;;  %v82_v32 = vld [vmem:[%s1966_s2 + $0x8] sm:$0xff]  ;;  %v1024_v36 = vmul.f32 0.5, %v50_v26  ;;  %v293_v43 = vsub.f32 %v1976_v30, %v989_v22  ;;  %v53_v47 = vld [vmem:[%s1965_s1 + $0x20] sm:$0xff]  ;;  %v1075_v60 = vmul.f32 0.5, %v21_v46 }
   0x8   :  { %2065 = vst [vmem:[#allocation5_spill] sm:$0xff] %v1007_v29  ;;  %2066 = vst [vmem:[#allocation6_spill] sm:$0xff] %v1010_v31  ;;  %v114_v33 = vld [vmem:[%s1967_s3 + $0x8] sm:$0xff]  ;;  %v1026_v37 = vmul.f32 0.5, %v82_v32  ;;  %v308_v42 = vadd.f32 %v292_v28, %v949_v5  ;;  %v1978_v44 = vsub.f32 0.0, %v1010_v31  ;;  %v85_v48 = vld [vmem:[%s1966_s2 + $0x20] sm:$0xff]  ;;  %v306_v49 = vadd.f32 %v290_v35, %v976_v16 }
   0x9   :  { %v22_v34 = vld [vmem:[%s1964_s0 + $0x28] sm:$0xff]  ;;  %2067 = vst [vmem:[#allocation7_spill] sm:$0xff] %v1024_v36  ;;  %v1028_v38 = vmul.f32 0.5, %v114_v33  ;;  %v309_v54 = vadd.f32 %v293_v43, %v991_v23  ;;  %v117_v57 = vld [vmem:[%s1967_s3 + $0x20] sm:$0xff]  ;;  %2073 = vst [vmem:[#allocation13_spill] sm:$0xff] %v1075_v60  ;;  %v1077_v61 = vmul.f32 0.5, %v53_v47 }
   0xa   :  { %2068 = vst [vmem:[#allocation8_spill] sm:$0xff] %v1026_v37  ;;  %v54_v39 = vld [vmem:[%s1965_s1 + $0x28] sm:$0xff]  ;;  %v1044_v45 = vmul.f32 0.5, %v22_v34  ;;  %v324_v53 = vadd.f32 %v308_v42, %v960_v9  ;;  %v291_v55 = vsub.f32 %v1978_v44, %v1024_v36  ;;  %v322_v59 = vadd.f32 %v306_v49, %v978_v17  ;;  %v56_v63 = vld [vmem:[%s1965_s1 + $0x38] sm:$0xff]  ;;  %v23_v20 = vld [vmem:[%s1964_s0 + $0x30] sm:$0xff] }
   0xb   :  { %2069 = vst [vmem:[#allocation9_spill] sm:$0xff] %v1028_v38  ;;  %v86_v40 = vld [vmem:[%s1966_s2 + $0x28] sm:$0xff]  ;;  %v1056_v50 = vmul.f32 0.5, %v54_v39  ;;  %2074 = vst [vmem:[#allocation14_spill] sm:$0xff] %v1077_v61  ;;  %v1079_v62 = vmul.f32 0.5, %v85_v48  ;;  %v325_v1 = vadd.f32 %v309_v54, %v1007_v29  ;;  %v88_v7 = vld [vmem:[%s1966_s2 + $0x38] sm:$0xff] }
   0xc   :  { %v118_v41 = vld [vmem:[%s1967_s3 + $0x28] sm:$0xff]  ;;  %v1058_v51 = vmul.f32 0.5, %v86_v40  ;;  %v1973_v56 = vsub.f32 0.0, %v1044_v45  ;;  %v859_v0 = vpack.c.bf16 %v324_v53, %v324_v53  ;;  %v307_v2 = vadd.f32 %v291_v55, %v1026_v37  ;;  %v120_v8 = vld [vmem:[%s1967_s3 + $0x38] sm:$0xff]  ;;  %v55_v24 = vld [vmem:[%s1965_s1 + $0x30] sm:$0xff] }
   0xd   :  { %2070 = vst [vmem:[#allocation10_spill] sm:$0xff] %v1056_v50  ;;  %v1060_v52 = vmul.f32 0.5, %v118_v41  ;;  %2075 = vst [vmem:[#allocation15_spill] sm:$0xff] %v1079_v62  ;;  %v857_v12 = vpack.c.bf16 %v322_v59, %v322_v59  ;;  %v1095_v13 = vmul.f32 0.5, %v117_v57  ;;  %v1972_v14 = vsub.f32 0.0, %v1075_v60  ;;  %v87_v33 = vld [vmem:[%s1966_s2 + $0x30] sm:$0xff] }
   0xe   :  { %2071 = vst [vmem:[#allocation11_spill] sm:$0xff] %v1058_v51  ;;  %v295_v6 = vsub.f32 %v1973_v56, %v1056_v50  ;;  %v1098_v19 = vmul.f32 0.5, %v24_v58  ;;  %390 = vrot.lane.b32.xlu1 %v859_v0, %s908_s23  ;;  %v860_v25 = vpack.c.bf16 %v325_v1, %v325_v1  ;;  %v323_v26 = vadd.f32 %v307_v2, %v1028_v38  ;;  %v119_v34 = vld [vmem:[%s1967_s3 + $0x30] sm:$0xff]  ;;  %v26_v42 = vld [vmem:[%s1964_s0 + $0x48] sm:$0xff]  ;;  %v57_v0 = vld [vmem:[%s1965_s1 + $0x40] sm:$0xff] }
   0xf   :  { %2072 = vst [vmem:[#allocation12_spill] sm:$0xff] %v1060_v52  ;;  %2076 = vst [vmem:[#allocation16_spill] sm:$0xff] %v1095_v13  ;;  %v1109_v32 = vmul.f32 0.5, %v56_v63  ;;  %386 = vrot.lane.b32.xlu0 %v857_v12, %s908_s23  ;;  %v294_v35 = vsub.f32 %v1972_v14, %v1077_v61  ;;  %v1121_v39 = vmul.f32 0.5, %v88_v7  ;;  %v1123_v40 = vmul.f32 0.5, %v120_v8  ;;  %v58_v43 = vld [vmem:[%s1965_s1 + $0x48] sm:$0xff] }
  0x10   :  { %2077 = vst [vmem:[#allocation17_spill] sm:$0xff] %v1098_v19  ;;  %v311_v28 = vadd.f32 %v295_v6, %v1058_v51  ;;  %v1971_v41 = vsub.f32 0.0, %v1098_v19  ;;  %v858_v46 = vpack.c.bf16 %v323_v26, %v323_v26  ;;  %v1133_v48 = vmul.f32 0.5, %v23_v20  ;;  %v90_v53 = vld [vmem:[%s1966_s2 + $0x48] sm:$0xff]  ;;  %v25_v63 = vld [vmem:[%s1964_s0 + $0x40] sm:$0xff] }
  0x11   :  { %2078 = vst [vmem:[#allocation18_spill] sm:$0xff] %v1109_v32  ;;  %2079 = vst [vmem:[#allocation19_spill] sm:$0xff] %v1123_v40  ;;  %v1135_v49 = vmul.f32 0.5, %v55_v24  ;;  %v122_v54 = vld [vmem:[%s1967_s3 + $0x48] sm:$0xff]  ;;  %v310_v55 = vadd.f32 %v294_v35, %v1079_v62  ;;  %v1147_v58 = vmul.f32 0.5, %v87_v33  ;;  %v1149_v59 = vmul.f32 0.5, %v119_v34 }
  0x12   :  { %v327_v47 = vadd.f32 %v311_v28, %v1060_v52  ;;  %v297_v57 = vsub.f32 %v1971_v41, %v1109_v32  ;;  %392 = vrot.lane.b32.xlu1 %v860_v25, %s908_s23  ;;  %v1969_v2 = vsub.f32 0.0, %v1133_v48  ;;  %v1159_v6 = vmul.f32 0.5, %v26_v42  ;;  %v89_v8 = vld [vmem:[%s1966_s2 + $0x40] sm:$0xff]  ;;  %v28_v28 = vld [vmem:[%s1964_s0 + $0x58] sm:$0xff] }
  0x13   :  { %2080 = vst [vmem:[#allocation20_spill] sm:$0xff] %v1135_v49  ;;  %2081 = vst [vmem:[#allocation21_spill] sm:$0xff] %v1147_v58  ;;  %v1161_v7 = vmul.f32 0.5, %v58_v43  ;;  %v121_v12 = vld [vmem:[%s1967_s3 + $0x40] sm:$0xff]  ;;  %388 = vrot.lane.b32.xlu0 %v858_v46, %s908_s23  ;;  %v326_v20 = vadd.f32 %v310_v55, %v1095_v13  ;;  %v1172_v25 = vmul.f32 0.5, %v90_v53  ;;  %v1174_v26 = vmul.f32 0.5, %v122_v54 }
  0x14   :  { %2082 = vst [vmem:[#allocation22_spill] sm:$0xff] %v1149_v59  ;;  %v862_v1 = vpack.c.bf16 %v327_v47, %v327_v47  ;;  %2083 = vst [vmem:[#allocation23_spill] sm:$0xff] %v1159_v6  ;;  %v313_v24 = vadd.f32 %v297_v57, %v1121_v39  ;;  %v296_v33 = vsub.f32 %v1969_v2, %v1135_v49  ;;  %v1970_v34 = vsub.f32 0.0, %v1159_v6  ;;  %v60_v43 = vld [vmem:[%s1965_s1 + $0x58] sm:$0xff]  ;;  %v31_v13 = vld [vmem:[%s1964_s0 + $0x70] sm:$0xff] }
  0x15   :  { %2084 = vst [vmem:[#allocation24_spill] sm:$0xff] %v1161_v7  ;;  %2085 = vst [vmem:[#allocation25_spill] sm:$0xff] %v1172_v25  ;;  %v1183_v35 = vmul.f32 0.5, %v25_v63  ;;  %v1185_v42 = vmul.f32 0.5, %v57_v0  ;;  %v92_v46 = vld [vmem:[%s1966_s2 + $0x58] sm:$0xff]  ;;  %v861_v53 = vpack.c.bf16 %v326_v20, %v326_v20  ;;  %v1197_v55 = vmul.f32 0.5, %v89_v8 }
  0x16   :  { %2086 = vst [vmem:[#allocation26_spill] sm:$0xff] %v1174_v26  ;;  %v124_v47 = vld [vmem:[%s1967_s3 + $0x58] sm:$0xff]  ;;  %v329_v54 = vadd.f32 %v313_v24, %v1123_v40  ;;  %v1199_v57 = vmul.f32 0.5, %v121_v12  ;;  %v27_v63 = vld [vmem:[%s1964_s0 + $0x50] sm:$0xff]  ;;  %396 = vrot.lane.b32.xlu1 %v862_v1, %s908_s23  ;;  %v312_v0 = vadd.f32 %v296_v33, %v1147_v58  ;;  %v299_v27 = vsub.f32 %v1970_v34, %v1161_v7 }
  0x17   :  { %2087 = vst [vmem:[#allocation27_spill] sm:$0xff] %v1183_v35  ;;  %2088 = vst [vmem:[#allocation28_spill] sm:$0xff] %v1185_v42  ;;  %v1975_v20 = vsub.f32 0.0, %v1183_v35  ;;  %v1210_v2 = vmul.f32 0.5, %v28_v28  ;;  %v59_v8 = vld [vmem:[%s1965_s1 + $0x50] sm:$0xff]  ;;  %394 = vrot.lane.b32.xlu0 %v861_v53, %s908_s23  ;;  %v1222_v33 = vmul.f32 0.5, %v60_v43 }
  0x18   :  { %2089 = vst [vmem:[#allocation29_spill] sm:$0xff] %v1197_v55  ;;  %2090 = vst [vmem:[#allocation30_spill] sm:$0xff] %v1199_v57  ;;  %v91_v12 = vld [vmem:[%s1966_s2 + $0x50] sm:$0xff]  ;;  %v864_v24 = vpack.c.bf16 %v329_v54, %v329_v54  ;;  %v1224_v34 = vmul.f32 0.5, %v92_v46  ;;  %v1226_v28 = vmul.f32 0.5, %v124_v47  ;;  %v328_v41 = vadd.f32 %v312_v0, %v1149_v59  ;;  %v30_v53 = vld [vmem:[%s1964_s0 + $0x68] sm:$0xff] }
  0x19   :  { %2091 = vst [vmem:[#allocation31_spill] sm:$0xff] %v1210_v2  ;;  %v123_v1 = vld [vmem:[%s1967_s3 + $0x50] sm:$0xff]  ;;  %2092 = vst [vmem:[#allocation32_spill] sm:$0xff] %v1222_v33  ;;  %v315_v14 = vadd.f32 %v299_v27, %v1172_v25  ;;  %v298_v56 = vsub.f32 %v1975_v20, %v1185_v42  ;;  %v1979_v15 = vsub.f32 0.0, %v1210_v2  ;;  %v62_v43 = vld [vmem:[%s1965_s1 + $0x68] sm:$0xff]  ;;  %v1243_v47 = vmul.f32 0.5, %v27_v63 }
  0x1a   :  { %2093 = vst [vmem:[#allocation33_spill] sm:$0xff] %v1224_v34  ;;  %2094 = vst [vmem:[#allocation34_spill] sm:$0xff] %v1226_v28  ;;  %v94_v46 = vld [vmem:[%s1966_s2 + $0x68] sm:$0xff]  ;;  %v1245_v27 = vmul.f32 0.5, %v59_v8  ;;  %v1247_v54 = vmul.f32 0.5, %v91_v12  ;;  %v1249_v0 = vmul.f32 0.5, %v123_v1  ;;  %400 = vrot.lane.b32.xlu1 %v864_v24, %s908_s23  ;;  %v863_v30 = vpack.c.bf16 %v328_v41, %v328_v41 }
  0x1b   :  { %2095 = vst [vmem:[#allocation35_spill] sm:$0xff] %v1243_v47  ;;  %v126_v20 = vld [vmem:[%s1967_s3 + $0x68] sm:$0xff]  ;;  %v331_v21 = vadd.f32 %v315_v14, %v1174_v26  ;;  %v314_v44 = vadd.f32 %v298_v56, %v1197_v55  ;;  %v301_v63 = vsub.f32 %v1979_v15, %v1222_v33  ;;  %v29_v8 = vld [vmem:[%s1964_s0 + $0x60] sm:$0xff]  ;;  %v1267_v24 = vmul.f32 0.5, %v30_v53 }
  0x1c   :  { %2096 = vst [vmem:[#allocation36_spill] sm:$0xff] %v1245_v27  ;;  %2097 = vst [vmem:[#allocation37_spill] sm:$0xff] %v1247_v54  ;;  %v61_v12 = vld [vmem:[%s1965_s1 + $0x60] sm:$0xff]  ;;  %v1269_v41 = vmul.f32 0.5, %v62_v43  ;;  %v1271_v14 = vmul.f32 0.5, %v94_v46  ;;  %398 = vrot.lane.b32.xlu0 %v863_v30, %s908_s23  ;;  %v1282_v1 = vmul.f32 0.5, %v126_v20 }
  0x1d   :  { %2098 = vst [vmem:[#allocation38_spill] sm:$0xff] %v1249_v0  ;;  %2099 = vst [vmem:[#allocation39_spill] sm:$0xff] %v1267_v24  ;;  %v93_v56 = vld [vmem:[%s1966_s2 + $0x60] sm:$0xff]  ;;  %v866_v26 = vpack.c.bf16 %v331_v21, %v331_v21  ;;  %v330_v59 = vadd.f32 %v314_v44, %v1199_v57  ;;  %v317_v53 = vadd.f32 %v301_v63, %v1224_v34  ;;  %v32_v43 = vld [vmem:[%s1964_s0 + $0x78] sm:$0xff]  ;;  %v2101_v46 = vsub.f32 0.0, %v1243_v47 }
  0x1e   :  { %2100 = vst [vmem:[#allocation40_spill] sm:$0xff] %v1269_v41  ;;  %v125_v15 = vld [vmem:[%s1967_s3 + $0x60] sm:$0xff]  ;;  %v1291_v55 = vmul.f32 0.5, %v29_v8  ;;  %v1293_v30 = vmul.f32 0.5, %v61_v12  ;;  %v64_v21 = vld [vmem:[%s1965_s1 + $0x78] sm:$0xff]  ;;  %v2103_v34 = vsub.f32 0.0, %v1267_v24 }
  0x1f   :  { %v300_v40 = vsub.f32 %v2101_v46, %v1245_v27  ;;  %v96_v44 = vld [vmem:[%s1966_s2 + $0x78] sm:$0xff]  ;;  %404 = vrot.lane.b32.xlu1 %v866_v26, %s908_s23  ;;  %v865_v63 = vpack.c.bf16 %v330_v59, %v330_v59  ;;  %v333_v8 = vadd.f32 %v317_v53, %v1226_v28  ;;  %v1306_v46 = vmul.f32 0.5, %v93_v56  ;;  %v63_v59 = vld [vmem:[%s1965_s1 + $0x70] sm:$0xff]  ;;  %s909_s1 = smov 8  }
  0x20   :  { %2102 = vst [vmem:[#allocation41_spill] sm:$0xff] %v1291_v55  ;;  %v128_v20 = vld [vmem:[%s1967_s3 + $0x78] sm:$0xff]  ;;  %v1308_v12 = vmul.f32 0.5, %v125_v15  ;;  %v303_v52 = vsub.f32 %v2103_v34, %v1269_v41  ;;  %v1318_v26 = vmul.f32 0.5, %v32_v43  ;;  %v95_v15 = vld [vmem:[%s1966_s2 + $0x70] sm:$0xff]  ;;  %v1330_v34 = vmul.f32 0.5, %v64_v21 }
  0x21   :  { %v316_v57 = vadd.f32 %v300_v40, %v1247_v54  ;;  %v127_v40 = vld [vmem:[%s1967_s3 + $0x70] sm:$0xff]  ;;  %402 = vrot.lane.b32.xlu0 %v865_v63, %s908_s23  ;;  %v868_v56 = vpack.c.bf16 %v333_v8, %v333_v8  ;;  %v1332_v53 = vmul.f32 0.5, %v96_v44  ;;  %v1334_v43 = vmul.f32 0.5, %v128_v20 }
  0x22   :  { %2104 = vst [vmem:[#allocation42_spill] sm:$0xff] %v1318_v26  ;;  %v319_v28 = vadd.f32 %v303_v52, %v1271_v14  ;;  %v2107_v54 = vsub.f32 0.0, %v1291_v55  ;;  %v2008_v41 = vsub.f32 0.0, %v1318_v26  ;;  %v1343_v63 = vmul.f32 0.5, %v31_v13 }
  0x23   :  { %2105 = vst [vmem:[#allocation43_spill] sm:$0xff] %v1332_v53  ;;  %2106 = vst [vmem:[#allocation44_spill] sm:$0xff] %v1334_v43  ;;  %v332_v47 = vadd.f32 %v316_v57, %v1249_v0  ;;  %408 = vrot.lane.b32.xlu1 %v868_v56, %s908_s23  ;;  %v1345_v21 = vmul.f32 0.5, %v63_v59  ;;  %v1347_v44 = vmul.f32 0.5, %v95_v15  ;;  %v1349_v20 = vmul.f32 0.5, %v127_v40 }
  0x24   :  { %v302_v24 = vsub.f32 %v2107_v54, %v1293_v30  ;;  %v335_v57 = vadd.f32 %v319_v28, %v1282_v1  ;;  %v305_v54 = vsub.f32 %v2008_v41, %v1330_v34  ;;  %v2109_v13 = vsub.f32 0.0, %v1010_v31 }
  0x25   :  { %2108 = vst [vmem:[#allocation45_spill] sm:$0xff] %v1349_v20  ;;  %v867_v8 = vpack.c.bf16 %v332_v47, %v332_v47  ;;  %v2110_v15 = vsub.f32 0.0, %v962_v10  ;;  %v2111_v47 = vsub.f32 0.0, %v980_v18  ;;  %v2112_v0 = vsub.f32 0.0, %v945_v3 }
  0x26   :  { %v318_v52 = vadd.f32 %v302_v24, %v1306_v46  ;;  %v452_v59 = vadd.f32 %v2109_v13, %v1024_v36  ;;  %v870_v24 = vpack.c.bf16 %v335_v57, %v335_v57  ;;  %v321_v41 = vadd.f32 %v305_v54, %v1332_v53 }
  0x27   :  { %v451_v40 = vadd.f32 %v2110_v15, %v964_v11  ;;  %v454_v28 = vadd.f32 %v2111_v47, %v989_v22  ;;  %406 = vrot.lane.b32.xlu0 %v867_v8, %s908_s23  ;;  %v453_v31 = vadd.f32 %v2112_v0, %v947_v4  ;;  %v2113_v13 = vsub.f32 0.0, %v1343_v63 }
  0x28   :  { %v334_v56 = vadd.f32 %v318_v52, %v1308_v12  ;;  %v468_v15 = vsub.f32 %v452_v59, %v1026_v37  ;;  %412 = vrot.lane.b32.xlu1 %v870_v24, %s908_s23  ;;  %v337_v57 = vadd.f32 %v321_v41, %v1334_v43  ;;  %v2114_v52 = vsub.f32 0.0, %v1044_v45 }
  0x29   :  { %v304_v36 = vsub.f32 %v2113_v13, %v1345_v21  ;;  %v467_v26 = vsub.f32 %v451_v40, %v976_v16  ;;  %v470_v47 = vsub.f32 %v454_v28, %v991_v23  ;;  %v469_v40 = vsub.f32 %v453_v31, %v949_v5 }
  0x2a   :  { %v869_v8 = vpack.c.bf16 %v334_v56, %v334_v56  ;;  %v456_v54 = vadd.f32 %v2114_v52, %v1056_v50  ;;  %v484_v53 = vadd.f32 %v468_v15, %v1028_v38  ;;  %v872_v59 = vpack.c.bf16 %v337_v57, %v337_v57 }
  0x2b   :  { %v320_v0 = vadd.f32 %v304_v36, %v1347_v44  ;;  %v2115_v28 = vsub.f32 0.0, %v1075_v60  ;;  %v483_v41 = vadd.f32 %v467_v26, %v978_v17  ;;  %v486_v13 = vadd.f32 %v470_v47, %v1007_v29 }
  0x2c   :  { %410 = vrot.lane.b32.xlu0 %v869_v8, %s908_s23  ;;  %416 = vrot.lane.b32.xlu1 %v872_v59, %s908_s23  ;;  %v874_v36 = vpack.c.bf16 %v484_v53, %v484_v53  ;;  %v472_v15 = vsub.f32 %v456_v54, %v1058_v51  ;;  %v2116_v31 = vsub.f32 0.0, %v1098_v19  ;;  %v2118_v26 = vsub.f32 0.0, %v1159_v6 }
  0x2d   :  { %v455_v24 = vadd.f32 %v2115_v28, %v1077_v61  ;;  %v336_v56 = vadd.f32 %v320_v0, %v1349_v20  ;;  %v2117_v28 = vsub.f32 0.0, %v1133_v48  ;;  %v2119_v53 = vsub.f32 0.0, %v1183_v35  ;;  %v2124_v35 = vld [vmem:[#allocation29_spill] sm:$0xff] }
  0x2e   :  { %v458_v57 = vadd.f32 %v2116_v31, %v1109_v32  ;;  %v460_v47 = vadd.f32 %v2118_v26, %v1161_v7  ;;  %v485_v54 = vadd.f32 %v469_v40, %v960_v9  ;;  %v2120_v31 = vsub.f32 0.0, %v1210_v2  ;;  %v2121_v26 = vld [vmem:[#allocation35_spill] sm:$0xff] }
  0x2f   :  { %v471_v8 = vsub.f32 %v455_v24, %v1079_v62  ;;  %v871_v52 = vpack.c.bf16 %v336_v56, %v336_v56  ;;  %v457_v0 = vadd.f32 %v2117_v28, %v1135_v49  ;;  %v459_v59 = vadd.f32 %v2119_v53, %v1185_v42  ;;  %v2128_v42 = vld [vmem:[#allocation16_spill] sm:$0xff] }
  0x30   :  { %v474_v24 = vsub.f32 %v458_v57, %v1121_v39  ;;  %v462_v56 = vadd.f32 %v2120_v31, %v1222_v33  ;;  %v873_v38 = vpack.c.bf16 %v483_v41, %v483_v41  ;;  %v476_v20 = vsub.f32 %v460_v47, %v1172_v25  ;;  %549 = vrot.lane.b32.xlu1 %v874_v36, %s909_s1  ;;  %v2123_v57 = vld [vmem:[#allocation12_spill] sm:$0xff]  ;;  %v2126_v33 = vld [vmem:[#allocation39_spill] sm:$0xff]  ;;  %v2130_v25 = vld [vmem:[#allocation37_spill] sm:$0xff] }
  0x31   :  { %414 = vrot.lane.b32.xlu0 %v871_v52, %s908_s23  ;;  %v473_v28 = vsub.f32 %v457_v0, %v1147_v58  ;;  %v2122_v43 = vsub.f32 0.0, %v2121_v26  ;;  %v876_v40 = vpack.c.bf16 %v486_v13, %v486_v13  ;;  %v488_v53 = vadd.f32 %v472_v15, %v2123_v57  ;;  %v2125_v31 = vld [vmem:[#allocation40_spill] sm:$0xff]  ;;  %v2129_v58 = vld [vmem:[#allocation33_spill] sm:$0xff]  ;;  %v2131_v26 = vld [vmem:[#allocation19_spill] sm:$0xff] }
  0x32   :  { %v475_v2 = vsub.f32 %v459_v59, %v2124_v35  ;;  %v2127_v52 = vsub.f32 0.0, %v2126_v33  ;;  %v487_v0 = vadd.f32 %v471_v8, %v2128_v42  ;;  %v478_v47 = vsub.f32 %v462_v56, %v2129_v58  ;;  %v2133_v36 = vld [vmem:[#allocation26_spill] sm:$0xff] }
  0x33   :  { %v461_v37 = vadd.f32 %v2122_v43, %v1245_v27  ;;  %v490_v43 = vadd.f32 %v474_v24, %v2131_v26  ;;  %v2132_v27 = vld [vmem:[#allocation22_spill] sm:$0xff]  ;;  %v492_v13 = vadd.f32 %v476_v20, %v2133_v36  ;;  %v875_v15 = vpack.c.bf16 %v485_v54, %v485_v54 }
  0x34   :  { %v464_v41 = vadd.f32 %v2127_v52, %v2125_v31  ;;  %v489_v7 = vadd.f32 %v473_v28, %v2132_v27  ;;  %v2134_v52 = vsub.f32 0.0, %v1291_v55  ;;  %553 = vrot.lane.b32.xlu1 %v876_v40, %s909_s1  ;;  %v878_v8 = vpack.c.bf16 %v488_v53, %v488_v53  ;;  %v2135_v56 = vld [vmem:[#allocation30_spill] sm:$0xff] }
  0x35   :  { %v477_v6 = vsub.f32 %v461_v37, %v2130_v25  ;;  %547 = vrot.lane.b32.xlu0 %v873_v38, %s909_s1  ;;  %v1438_v37 = vadd.f32 %v475_v2, %v2135_v56  ;;  %v877_v24 = vpack.c.bf16 %v487_v0, %v487_v0  ;;  %v2136_v25 = vld [vmem:[#allocation34_spill] sm:$0xff]  ;;  %v2138_v38 = vsub.f32 %v962_v10, %v964_v11 }
  0x36   :  { %v480_v59 = vsub.f32 %v464_v41, %v1271_v14  ;;  %v463_v33 = vadd.f32 %v2134_v52, %v1293_v30  ;;  %v1441_v28 = vadd.f32 %v478_v47, %v2136_v25  ;;  %v2137_v20 = vld [vmem:[#allocation38_spill] sm:$0xff]  ;;  %v880_v41 = vpack.c.bf16 %v490_v43, %v490_v43 }
  0x37   :  { %v1444_v36 = vadd.f32 %v477_v6, %v2137_v20  ;;  %v628_v54 = vsub.f32 %v2138_v38, %v976_v16  ;;  %v879_v52 = vpack.c.bf16 %v489_v7, %v489_v7  ;;  %v882_v55 = vpack.c.bf16 %v492_v13, %v492_v13  ;;  %v2139_v47 = vld [vmem:[#allocation42_spill] sm:$0xff] }
  0x38   :  { %v615_v40 = vsub.f32 %v980_v18, %v989_v22  ;;  %v1454_v2 = vadd.f32 %v480_v59, %v1282_v1  ;;  %v479_v53 = vsub.f32 %v463_v33, %v1306_v46  ;;  %v614_v0 = vsub.f32 %v945_v3, %v947_v4  ;;  %557 = vrot.lane.b32.xlu1 %v878_v8, %s909_s1  ;;  %v2143_v16 = vld [vmem:[#allocation6_spill] sm:$0xff] }
  0x39   :  { %551 = vrot.lane.b32.xlu0 %v875_v15, %s909_s1  ;;  %v1458_v6 = vadd.f32 %v628_v54, %v978_v17  ;;  %v881_v7 = vpack.c.bf16 %v1438_v37, %v1438_v37  ;;  %v2140_v43 = vsub.f32 0.0, %v2139_v47  ;;  %v617_v33 = vsub.f32 %v1044_v45, %v1056_v50  ;;  %v2142_v17 = vld [vmem:[#allocation7_spill] sm:$0xff] }
  0x3a   :  { %v631_v15 = vsub.f32 %v615_v40, %v991_v23  ;;  %v884_v59 = vpack.c.bf16 %v1441_v28, %v1441_v28  ;;  %v883_v38 = vpack.c.bf16 %v1444_v36, %v1444_v36  ;;  %v2141_v8 = vsub.f32 0.0, %v1343_v63 }
  0x3b   :  { %v466_v13 = vadd.f32 %v2140_v43, %v1330_v34  ;;  %v630_v37 = vsub.f32 %v614_v0, %v949_v5  ;;  %v613_v43 = vsub.f32 %v2143_v16, %v2142_v17  ;;  %v633_v50 = vsub.f32 %v617_v33, %v1058_v51  ;;  %v2145_v33 = vld [vmem:[#allocation43_spill] sm:$0xff] }
  0x3c   :  { %v465_v54 = vadd.f32 %v2141_v8, %v1345_v21  ;;  %v1482_v40 = vadd.f32 %v631_v15, %v1007_v29  ;;  %v616_v28 = vsub.f32 %v1075_v60, %v1077_v61  ;;  %v886_v36 = vpack.c.bf16 %v1454_v2, %v1454_v2  ;;  %561 = vrot.lane.b32.xlu1 %v880_v41, %s909_s1  ;;  %v2147_v60 = vld [vmem:[#allocation24_spill] sm:$0xff]  ;;  %v2148_v29 = vld [vmem:[#allocation23_spill] sm:$0xff] }
  0x3d   :  { %555 = vrot.lane.b32.xlu0 %v877_v24, %s909_s1  ;;  %v1491_v8 = vadd.f32 %v479_v53, %v1308_v12  ;;  %v1494_v0 = vadd.f32 %v630_v37, %v960_v9  ;;  %v619_v15 = vsub.f32 %v1098_v19, %v1109_v32  ;;  %v482_v51 = vsub.f32 %v466_v13, %v2145_v33  ;;  %v2149_v32 = vld [vmem:[#allocation28_spill] sm:$0xff]  ;;  %v2150_v19 = vld [vmem:[#allocation27_spill] sm:$0xff] }
  0x3e   :  { %v1501_v61 = vadd.f32 %v633_v50, %v2123_v57  ;;  %v632_v24 = vsub.f32 %v616_v28, %v1079_v62  ;;  %v618_v2 = vsub.f32 %v1133_v48, %v1135_v49  ;;  %v481_v53 = vsub.f32 %v465_v54, %v1347_v44  ;;  %v2153_v57 = vld [vmem:[#allocation21_spill] sm:$0xff]  ;;  %v2154_v62 = vld [vmem:[#allocation32_spill] sm:$0xff] }
  0x3f   :  { %2144 = vst [vmem:[#allocation40_spill] sm:$0xff] %v1494_v0  ;;  %v635_v37 = vsub.f32 %v619_v15, %v1121_v39  ;;  %v621_v9 = vsub.f32 %v2148_v29, %v2147_v60  ;;  %v620_v41 = vsub.f32 %v2150_v19, %v2149_v32  ;;  %v2151_v0 = vld [vmem:[#allocation8_spill] sm:$0xff]  ;;  %v2157_v15 = vld [vmem:[#allocation25_spill] sm:$0xff]  ;;  %v2159_v19 = vld [vmem:[#allocation35_spill] sm:$0xff] }
  0x40   :  { %2146 = vst [vmem:[#allocation16_spill] sm:$0xff] %v1501_v61  ;;  %v629_v13 = vsub.f32 %v613_v43, %v2151_v0  ;;  %v1514_v50 = vadd.f32 %v632_v24, %v2128_v42  ;;  %v634_v28 = vsub.f32 %v618_v2, %v2153_v57  ;;  %v2155_v61 = vld [vmem:[#allocation31_spill] sm:$0xff]  ;;  %v2158_v32 = vld [vmem:[#allocation36_spill] sm:$0xff]  ;;  %565 = vrot.lane.b32.xlu1 %v882_v55, %s909_s1  ;;  %v2165_v55 = vld [vmem:[#allocation37_spill] sm:$0xff] }
  0x41   :  { %v623_v49 = vsub.f32 %v2155_v61, %v2154_v62  ;;  %559 = vrot.lane.b32.xlu0 %v879_v52, %s909_s1  ;;  %v1521_v54 = vadd.f32 %v635_v37, %v2131_v26  ;;  %v637_v60 = vsub.f32 %v621_v9, %v2157_v15  ;;  %v636_v29 = vsub.f32 %v620_v41, %v2124_v35  ;;  %v2160_v24 = vld [vmem:[#allocation44_spill] sm:$0xff]  ;;  %v2162_v52 = vld [vmem:[#allocation39_spill] sm:$0xff]  ;;  %v2164_v9 = vld [vmem:[#allocation26_spill] sm:$0xff] }
  0x42   :  { %2152 = vst [vmem:[#allocation33_spill] sm:$0xff] %v1514_v50  ;;  %v622_v43 = vsub.f32 %v2159_v19, %v2158_v32  ;;  %v498_v50 = vadd.f32 %v482_v51, %v2160_v24  ;;  %v1530_v2 = vadd.f32 %v634_v28, %v2132_v27  ;;  %v625_v37 = vsub.f32 %v2162_v52, %v2125_v31  ;;  %v2166_v51 = vld [vmem:[#allocation9_spill] sm:$0xff] }
  0x43   :  { %2156 = vst [vmem:[#allocation22_spill] sm:$0xff] %v1521_v54  ;;  %v639_v62 = vsub.f32 %v623_v49, %v2129_v58  ;;  %v2163_v54 = vld [vmem:[#allocation45_spill] sm:$0xff]  ;;  %v1539_v41 = vadd.f32 %v637_v60, %v2164_v9  ;;  %v1542_v32 = vadd.f32 %v636_v29, %v2135_v56  ;;  %v1546_v35 = vadd.f32 %v629_v13, %v2166_v51 }
  0x44   :  { %2161 = vst [vmem:[#allocation30_spill] sm:$0xff] %v1530_v2  ;;  %v1536_v26 = vadd.f32 %v481_v53, %v2163_v54  ;;  %v638_v19 = vsub.f32 %v622_v43, %v2165_v55  ;;  %v641_v49 = vsub.f32 %v625_v37, %v1271_v14  ;;  %v2167_v2 = vld [vmem:[#allocation41_spill] sm:$0xff]  ;;  %v885_v29 = vpack.c.bf16 %v1491_v8, %v1491_v8 }
  0x45   :  { %v1549_v28 = vadd.f32 %v639_v62, %v2136_v25  ;;  %v624_v53 = vsub.f32 %v2167_v2, %v1293_v30  ;;  %563 = vrot.lane.b32.xlu0 %v881_v7, %s909_s1  ;;  %v627_v62 = vsub.f32 %v2139_v47, %v1330_v34  ;;  %569 = vrot.lane.b32.xlu1 %v884_v59, %s909_s1 }
  0x46   :  { %v1560_v13 = vadd.f32 %v638_v19, %v2137_v20  ;;  %v888_v43 = vpack.c.bf16 %v498_v50, %v498_v50  ;;  %v1566_v37 = vadd.f32 %v641_v49, %v1282_v1  ;;  %v626_v8 = vsub.f32 %v1343_v63, %v1345_v21 }
  0x47   :  { %v640_v7 = vsub.f32 %v624_v53, %v1306_v46  ;;  %v887_v60 = vpack.c.bf16 %v1536_v26, %v1536_v26  ;;  %v643_v19 = vsub.f32 %v627_v62, %v2145_v33  ;;  %v145_v59 = vadd.f32 %v964_v11, %v962_v10 }
  0x48   :  { %2168 = vst [vmem:[#allocation34_spill] sm:$0xff] %v1560_v13  ;;  %2169 = vst [vmem:[#allocation38_spill] sm:$0xff] %v1566_v37  ;;  %v147_v13 = vadd.f32 %v947_v4, %v945_v3  ;;  %v890_v50 = vpack.c.bf16 %v1546_v35, %v1546_v35  ;;  %v642_v53 = vsub.f32 %v626_v8, %v1347_v44  ;;  %v2171_v4 = vld [vmem:[#allocation3_spill] sm:$0xff] }
  0x49   :  { %v1581_v49 = vadd.f32 %v640_v7, %v1308_v12  ;;  %v148_v37 = vadd.f32 %v989_v22, %v980_v18  ;;  %567 = vrot.lane.b32.xlu0 %v883_v38, %s909_s1  ;;  %v1588_v26 = vadd.f32 %v643_v19, %v2160_v24  ;;  %v161_v10 = vadd.f32 %v145_v59, %v2171_v4  ;;  %v2173_v22 = vld [vmem:[#allocation10_spill] sm:$0xff]  ;;  %v2174_v7 = vld [vmem:[#allocation40_spill] sm:$0xff]  ;;  %v2178_v59 = vld [vmem:[#allocation5_spill] sm:$0xff] }
  0x4a   :  { %v163_v3 = vadd.f32 %v147_v13, %v949_v5  ;;  %v146_v11 = vadd.f32 %v2142_v17, %v2143_v16  ;;  %573 = vrot.lane.b32.xlu1 %v886_v36, %s909_s1  ;;  %v892_v35 = vpack.c.bf16 %v1482_v40, %v1482_v40  ;;  %v1598_v62 = vadd.f32 %v642_v53, %v2163_v54  ;;  %v2175_v13 = vld [vmem:[#allocation2_spill] sm:$0xff]  ;;  %v2176_v19 = vld [vmem:[#allocation4_spill] sm:$0xff]  ;;  %v2179_v4 = vld [vmem:[#allocation11_spill] sm:$0xff] }
  0x4b   :  { %2170 = vst [vmem:[#allocation42_spill] sm:$0xff] %v1588_v26  ;;  %v164_v18 = vadd.f32 %v148_v37, %v991_v23  ;;  %v150_v38 = vadd.f32 %v2173_v22, %v1044_v45  ;;  %v891_v5 = vpack.c.bf16 %v2174_v7, %v2174_v7  ;;  %v177_v16 = vadd.f32 %v161_v10, %v2176_v19  ;;  %v2177_v36 = vld [vmem:[#allocation16_spill] sm:$0xff]  ;;  %v2180_v23 = vld [vmem:[#allocation13_spill] sm:$0xff]  ;;  %v2181_v37 = vld [vmem:[#allocation14_spill] sm:$0xff] }
  0x4c   :  { %2172 = vst [vmem:[#allocation7_spill] sm:$0xff] %v1598_v62  ;;  %v179_v8 = vadd.f32 %v163_v3, %v2175_v13  ;;  %v162_v17 = vadd.f32 %v146_v11, %v2151_v0  ;;  %v149_v26 = vadd.f32 %v2181_v37, %v2180_v23  ;;  %v2182_v13 = vld [vmem:[#allocation17_spill] sm:$0xff]  ;;  %v2183_v10 = vld [vmem:[#allocation18_spill] sm:$0xff]  ;;  %v2184_v11 = vld [vmem:[#allocation12_spill] sm:$0xff] }
  0x4d   :  { %v180_v53 = vadd.f32 %v164_v18, %v2178_v59  ;;  %v166_v62 = vadd.f32 %v150_v38, %v2179_v4  ;;  %571 = vrot.lane.b32.xlu0 %v885_v29, %s909_s1  ;;  %v841_v22 = vpack.c.bf16 %v177_v16, %v177_v16  ;;  %v152_v19 = vadd.f32 %v2183_v10, %v2182_v13  ;;  %v2185_v18 = vld [vmem:[#allocation15_spill] sm:$0xff]  ;;  %v2186_v38 = vld [vmem:[#allocation20_spill] sm:$0xff]  ;;  %v2193_v13 = vld [vmem:[#allocation29_spill] sm:$0xff] }
  0x4e   :  { %v843_v45 = vpack.c.bf16 %v179_v8, %v179_v8  ;;  %v178_v3 = vadd.f32 %v162_v17, %v2166_v51  ;;  %577 = vrot.lane.b32.xlu1 %v888_v43, %s909_s1  ;;  %v165_v59 = vadd.f32 %v149_v26, %v2185_v18  ;;  %v151_v4 = vadd.f32 %v2186_v38, %v1133_v48  ;;  %v2187_v43 = vld [vmem:[#allocation23_spill] sm:$0xff]  ;;  %v2190_v16 = vld [vmem:[#allocation28_spill] sm:$0xff] }
  0x4f   :  { %v844_v0 = vpack.c.bf16 %v180_v53, %v180_v53  ;;  %v182_v40 = vadd.f32 %v166_v62, %v2184_v11  ;;  %258 = vst.msk [vmem:[%s1968_s4] sm:$0xf] %vm257_vm0, %v841_v22  ;;  %v168_v29 = vadd.f32 %v152_v19, %v1121_v39  ;;  %v2188_v62 = vld [vmem:[#allocation24_spill] sm:$0xff]  ;;  %v2189_v26 = vld [vmem:[#allocation27_spill] sm:$0xff] }
  0x50   :  { %260 = vst.msk [vmem:[%s1968_s4 + $0x8] sm:$0xf] %vm257_vm0, %v843_v45  ;;  %v842_v51 = vpack.c.bf16 %v178_v3, %v178_v3  ;;  %v154_v8 = vadd.f32 %v2188_v62, %v2187_v43  ;;  %v153_v17 = vadd.f32 %v2190_v16, %v2189_v26  ;;  %v181_v53 = vadd.f32 %v165_v59, %v2128_v42  ;;  %v2191_v37 = vld [vmem:[#allocation32_spill] sm:$0xff]  ;;  %v2192_v39 = vld [vmem:[#allocation19_spill] sm:$0xff]  ;;  %v2201_v43 = vld [vmem:[#allocation34_spill] sm:$0xff] }
  0x51   :  { %261 = vst.msk [vmem:[%s1968_s4 + $0xc] sm:$0xf] %vm257_vm0, %v844_v0  ;;  %v846_v48 = vpack.c.bf16 %v182_v40, %v182_v40  ;;  %v167_v23 = vadd.f32 %v151_v4, %v2153_v57  ;;  %v156_v45 = vadd.f32 %v2191_v37, %v2155_v61  ;;  %575 = vrot.lane.b32.xlu0 %v887_v60, %s909_s1  ;;  %v2194_v10 = vld [vmem:[#allocation35_spill] sm:$0xff]  ;;  %v2195_v42 = vld [vmem:[#allocation36_spill] sm:$0xff]  ;;  %v2202_v62 = vld [vmem:[#allocation38_spill] sm:$0xff] }
  0x52   :  { %259 = vst.msk [vmem:[%s1968_s4 + $0x4] sm:$0xf] %vm257_vm0, %v842_v51  ;;  %v184_v22 = vadd.f32 %v168_v29, %v2192_v39  ;;  %v170_v3 = vadd.f32 %v154_v8, %v2157_v15  ;;  %v169_v40 = vadd.f32 %v153_v17, %v2193_v13  ;;  %v155_v19 = vadd.f32 %v2195_v42, %v2194_v10  ;;  %v2203_v26 = vld [vmem:[#allocation42_spill] sm:$0xff] }
  0x53   :  { %710 = vrot.lane.b32.xlu1 %v890_v50, %s910_s20  ;;  %263 = vst.msk [vmem:[%s1968_s4 + $0x14] sm:$0xf] %vm257_vm0, %v846_v48  ;;  %v845_v61 = vpack.c.bf16 %v181_v53, %v181_v53  ;;  %v183_v57 = vadd.f32 %v167_v23, %v2132_v27  ;;  %v172_v60 = vadd.f32 %v156_v45, %v2129_v58  ;;  %v2204_v16 = vld [vmem:[#allocation7_spill] sm:$0xff] }
  0x54   :  { %v158_v15 = vadd.f32 %v2125_v31, %v2162_v52  ;;  %v848_v0 = vpack.c.bf16 %v184_v22, %v184_v22  ;;  %v186_v11 = vadd.f32 %v170_v3, %v2164_v9  ;;  %v185_v18 = vadd.f32 %v169_v40, %v2135_v56 }
  0x55   :  { %v171_v50 = vadd.f32 %v155_v19, %v2165_v55  ;;  %262 = vst.msk [vmem:[%s1968_s4 + $0x10] sm:$0xf] %vm257_vm0, %v845_v61  ;;  %v847_v59 = vpack.c.bf16 %v183_v57, %v183_v57  ;;  %v188_v27 = vadd.f32 %v172_v60, %v2136_v25  ;;  %v157_v31 = vadd.f32 %v1293_v30, %v2167_v2 }
  0x56   :  { %v174_v58 = vadd.f32 %v158_v15, %v1271_v14  ;;  %v2196_v52 = vpack.c.bf16 %v1458_v6, %v1458_v6  ;;  %265 = vst.msk [vmem:[%s1968_s4 + $0x1c] sm:$0xf] %vm257_vm0, %v848_v0  ;;  %v850_v56 = vpack.c.bf16 %v186_v11, %v186_v11  ;;  %v849_v9 = vpack.c.bf16 %v185_v18, %v185_v18 }
  0x57   :  { %v187_v55 = vadd.f32 %v171_v50, %v2137_v20  ;;  %v160_v25 = vadd.f32 %v1330_v34, %v2139_v47  ;;  %714 = vrot.lane.b32.xlu1 %v892_v35, %s910_s20  ;;  %264 = vst.msk [vmem:[%s1968_s4 + $0x18] sm:$0xf] %vm257_vm0, %v847_v59  ;;  %v852_v14 = vpack.c.bf16 %v188_v27, %v188_v27 }
  0x58   :  { %708 = vrot.lane.b32.xlu0 %v2196_v52, %s910_s20  ;;  %v190_v30 = vadd.f32 %v174_v58, %v1282_v1  ;;  %v173_v6 = vadd.f32 %v157_v31, %v1306_v46  ;;  %v159_v2 = vadd.f32 %v1345_v21, %v1343_v63  ;;  %267 = vst.msk [vmem:[%s1968_s4 + $0x24] sm:$0xf] %vm257_vm0, %v850_v56  ;;  %266 = vst.msk [vmem:[%s1968_s4 + $0x20] sm:$0xf] %vm257_vm0, %v849_v9  ;;  %v2197_v21 = vld [vmem:[#allocation33_spill] sm:$0xff] }
  0x59   :  { %v851_v34 = vpack.c.bf16 %v187_v55, %v187_v55  ;;  %v176_v20 = vadd.f32 %v160_v25, %v2145_v33  ;;  %269 = vst.msk [vmem:[%s1968_s4 + $0x2c] sm:$0xf] %vm257_vm0, %v852_v14  ;;  %v893_v47 = vpack.c.bf16 %v2197_v21, %v2197_v21  ;;  %v897_v51 = vpack.c.bf16 %v1542_v32, %v1542_v32 }
  0x5a   :  { %v854_v1 = vpack.c.bf16 %v190_v30, %v190_v30  ;;  %v189_v46 = vadd.f32 %v173_v6, %v1308_v12  ;;  %v175_v63 = vadd.f32 %v159_v2, %v1347_v44  ;;  %v2198_v12 = vpack.c.bf16 %v2177_v36, %v2177_v36  ;;  %v2199_v44 = vld [vmem:[#allocation22_spill] sm:$0xff] }
  0x5b   :  { %268 = vst.msk [vmem:[%s1968_s4 + $0x28] sm:$0xf] %vm257_vm0, %v851_v34  ;;  %v192_v33 = vadd.f32 %v176_v20, %v2160_v24  ;;  %v896_v35 = vpack.c.bf16 %v2199_v44, %v2199_v44  ;;  %v2200_v36 = vld [vmem:[#allocation30_spill] sm:$0xff]  ;;  %v900_v29 = vpack.c.bf16 %v1549_v28, %v1549_v28  ;;  %v902_v8 = vpack.c.bf16 %v2202_v62, %v2202_v62 }
  0x5c   :  { %712 = vrot.lane.b32.xlu0 %v891_v5, %s910_s20  ;;  %718 = vrot.lane.b32.xlu1 %v2198_v12, %s910_s20  ;;  %271 = vst.msk [vmem:[%s1968_s4 + $0x34] sm:$0xf] %vm257_vm0, %v854_v1  ;;  %v853_v7 = vpack.c.bf16 %v189_v46, %v189_v46  ;;  %v191_v5 = vadd.f32 %v175_v63, %v2163_v54 }
  0x5d   :  { %v856_v38 = vpack.c.bf16 %v192_v33, %v192_v33  ;;  %v895_v4 = vpack.c.bf16 %v2200_v36, %v2200_v36  ;;  %v898_v54 = vpack.c.bf16 %v1539_v41, %v1539_v41  ;;  %v899_v41 = vpack.c.bf16 %v2201_v43, %v2201_v43 }
  0x5e   :  { %270 = vst.msk [vmem:[%s1968_s4 + $0x30] sm:$0xf] %vm257_vm0, %v853_v7  ;;  %v855_v24 = vpack.c.bf16 %v191_v5, %v191_v5  ;;  %v901_v32 = vpack.c.bf16 %v1581_v49, %v1581_v49  ;;  %v904_v28 = vpack.c.bf16 %v2203_v26, %v2203_v26  ;;  %v903_v17 = vpack.c.bf16 %v2204_v16, %v2204_v16 }
  0x5f   :  { %273 = vst.msk [vmem:[%s1968_s4 + $0x3c] sm:$0xf] %vm257_vm0, %v856_v38 }
  0x60   :  { %716 = vrot.lane.b32.xlu0 %v893_v47, %s910_s20  ;;  %722 = vrot.lane.b32.xlu1 %v896_v35, %s910_s20  ;;  %272 = vst.msk [vmem:[%s1968_s4 + $0x38] sm:$0xf] %vm257_vm0, %v855_v24 }
  0x64   :  { %720 = vrot.lane.b32.xlu0 %v895_v4, %s910_s20  ;;  %726 = vrot.lane.b32.xlu1 %v898_v54, %s910_s20 }
  0x68   :  { %724 = vrot.lane.b32.xlu0 %v897_v51, %s910_s20  ;;  %730 = vrot.lane.b32.xlu1 %v900_v29, %s910_s20 }
  0x6c   :  { %728 = vrot.lane.b32.xlu0 %v899_v41, %s910_s20  ;;  %734 = vrot.lane.b32.xlu1 %v902_v8, %s910_s20 }
  0x70   :  { %732 = vrot.lane.b32.xlu0 %v901_v32, %s910_s20  ;;  %738 = vrot.lane.b32.xlu1 %v904_v28, %s910_s20 }
  0x74   :  { %736 = vrot.lane.b32.xlu0 %v903_v17, %s910_s20 }
  0x80   :  { %v391_v48 = vpop.permute.xlu1 %390 }
  0x81   :  { %437 = vst.msk [vmem:[%s1968_s4 + $0x8] sm:$0xf] %vm434_vm1, %v391_v48  ;;  %v387_v49 = vpop.permute.xlu0 %386 }
  0x82   :  { %435 = vst.msk [vmem:[%s1968_s4] sm:$0xf] %vm434_vm1, %v387_v49 }
  0x84   :  { %v393_v53 = vpop.permute.xlu1 %392 }
  0x85   :  { %438 = vst.msk [vmem:[%s1968_s4 + $0xc] sm:$0xf] %vm434_vm1, %v393_v53  ;;  %v389_v23 = vpop.permute.xlu0 %388 }
  0x86   :  { %436 = vst.msk [vmem:[%s1968_s4 + $0x4] sm:$0xf] %vm434_vm1, %v389_v23 }
  0x88   :  { %v397_v37 = vpop.permute.xlu1 %396 }
  0x89   :  { %440 = vst.msk [vmem:[%s1968_s4 + $0x14] sm:$0xf] %vm434_vm1, %v397_v37  ;;  %v395_v45 = vpop.permute.xlu0 %394 }
  0x8a   :  { %439 = vst.msk [vmem:[%s1968_s4 + $0x10] sm:$0xf] %vm434_vm1, %v395_v45 }
  0x8c   :  { %v401_v39 = vpop.permute.xlu1 %400 }
  0x8d   :  { %442 = vst.msk [vmem:[%s1968_s4 + $0x1c] sm:$0xf] %vm434_vm1, %v401_v39 }
  0x8e   :  { %v399_v22 = vpop.permute.xlu0 %398 }
  0x8f   :  { %441 = vst.msk [vmem:[%s1968_s4 + $0x18] sm:$0xf] %vm434_vm1, %v399_v22 }
  0x91   :  { %v405_v3 = vpop.permute.xlu1 %404 }
  0x92   :  { %444 = vst.msk [vmem:[%s1968_s4 + $0x24] sm:$0xf] %vm434_vm1, %v405_v3 }
  0x93   :  { %v403_v13 = vpop.permute.xlu0 %402 }
  0x94   :  { %443 = vst.msk [vmem:[%s1968_s4 + $0x20] sm:$0xf] %vm434_vm1, %v403_v13 }
  0x95   :  { %v409_v40 = vpop.permute.xlu1 %408 }
  0x96   :  { %446 = vst.msk [vmem:[%s1968_s4 + $0x2c] sm:$0xf] %vm434_vm1, %v409_v40 }
  0x99   :  { %v407_v10 = vpop.permute.xlu0 %406 }
  0x9a   :  { %445 = vst.msk [vmem:[%s1968_s4 + $0x28] sm:$0xf] %vm434_vm1, %v407_v10  ;;  %v413_v42 = vpop.permute.xlu1 %412 }
  0x9b   :  { %448 = vst.msk [vmem:[%s1968_s4 + $0x34] sm:$0xf] %vm434_vm1, %v413_v42 }
  0x9e   :  { %v411_v19 = vpop.permute.xlu0 %410  ;;  %v417_v61 = vpop.permute.xlu1 %416 }
  0x9f   :  { %447 = vst.msk [vmem:[%s1968_s4 + $0x30] sm:$0xf] %vm434_vm1, %v411_v19  ;;  %450 = vst.msk [vmem:[%s1968_s4 + $0x3c] sm:$0xf] %vm434_vm1, %v417_v61 }
  0xa2   :  { %v550_v60 = vpop.permute.xlu1 %549 }
  0xa3   :  { %v415_v57 = vpop.permute.xlu0 %414  ;;  %597 = vst.msk [vmem:[%s1968_s4 + $0x4] sm:$0xf] %vm595_vm2, %v550_v60 }
  0xa4   :  { %449 = vst.msk [vmem:[%s1968_s4 + $0x38] sm:$0xf] %vm434_vm1, %v415_v57 }
  0xa6   :  { %v554_v0 = vpop.permute.xlu1 %553 }
  0xa7   :  { %v548_v15 = vpop.permute.xlu0 %547  ;;  %599 = vst.msk [vmem:[%s1968_s4 + $0xc] sm:$0xf] %vm595_vm2, %v554_v0 }
  0xa8   :  { %596 = vst.msk [vmem:[%s1968_s4] sm:$0xf] %vm595_vm2, %v548_v15 }
  0xaa   :  { %v558_v18 = vpop.permute.xlu1 %557 }
  0xab   :  { %v552_v11 = vpop.permute.xlu0 %551  ;;  %601 = vst.msk [vmem:[%s1968_s4 + $0x14] sm:$0xf] %vm595_vm2, %v558_v18 }
  0xac   :  { %598 = vst.msk [vmem:[%s1968_s4 + $0x8] sm:$0xf] %vm595_vm2, %v552_v11 }
  0xae   :  { %v562_v59 = vpop.permute.xlu1 %561 }
  0xaf   :  { %v556_v50 = vpop.permute.xlu0 %555  ;;  %603 = vst.msk [vmem:[%s1968_s4 + $0x1c] sm:$0xf] %vm595_vm2, %v562_v59 }
  0xb0   :  { %600 = vst.msk [vmem:[%s1968_s4 + $0x10] sm:$0xf] %vm595_vm2, %v556_v50 }
  0xb2   :  { %v566_v58 = vpop.permute.xlu1 %565 }
  0xb3   :  { %v560_v27 = vpop.permute.xlu0 %559  ;;  %605 = vst.msk [vmem:[%s1968_s4 + $0x24] sm:$0xf] %vm595_vm2, %v566_v58 }
  0xb4   :  { %602 = vst.msk [vmem:[%s1968_s4 + $0x18] sm:$0xf] %vm595_vm2, %v560_v27 }
  0xb7   :  { %v564_v31 = vpop.permute.xlu0 %563  ;;  %v570_v52 = vpop.permute.xlu1 %569 }
  0xb8   :  { %604 = vst.msk [vmem:[%s1968_s4 + $0x20] sm:$0xf] %vm595_vm2, %v564_v31  ;;  %607 = vst.msk [vmem:[%s1968_s4 + $0x2c] sm:$0xf] %vm595_vm2, %v570_v52 }
  0xbb   :  { %v568_v56 = vpop.permute.xlu0 %567 }
  0xbc   :  { %606 = vst.msk [vmem:[%s1968_s4 + $0x28] sm:$0xf] %vm595_vm2, %v568_v56  ;;  %v574_v9 = vpop.permute.xlu1 %573 }
  0xbd   :  { %609 = vst.msk [vmem:[%s1968_s4 + $0x34] sm:$0xf] %vm595_vm2, %v574_v9 }
  0xbf   :  { %v572_v55 = vpop.permute.xlu0 %571 }
  0xc0   :  { %608 = vst.msk [vmem:[%s1968_s4 + $0x30] sm:$0xf] %vm595_vm2, %v572_v55  ;;  %v578_v25 = vpop.permute.xlu1 %577 }
  0xc1   :  { %611 = vst.msk [vmem:[%s1968_s4 + $0x3c] sm:$0xf] %vm595_vm2, %v578_v25 }
  0xc3   :  { %v576_v14 = vpop.permute.xlu0 %575 }
  0xc4   :  { %610 = vst.msk [vmem:[%s1968_s4 + $0x38] sm:$0xf] %vm595_vm2, %v576_v14 }
  0xc5   :  { %v711_v30 = vpop.permute.xlu1 %710 }
  0xc6   :  { %758 = vst.msk [vmem:[%s1968_s4 + $0x4] sm:$0xf] %vm756_vm3, %v711_v30 }
  0xc9   :  { %v715_v2 = vpop.permute.xlu1 %714 }
  0xca   :  { %v709_v6 = vpop.permute.xlu0 %708  ;;  %760 = vst.msk [vmem:[%s1968_s4 + $0xc] sm:$0xf] %vm756_vm3, %v715_v2 }
  0xcb   :  { %757 = vst.msk [vmem:[%s1968_s4] sm:$0xf] %vm756_vm3, %v709_v6 }
  0xce   :  { %v713_v34 = vpop.permute.xlu0 %712  ;;  %v719_v20 = vpop.permute.xlu1 %718 }
  0xcf   :  { %759 = vst.msk [vmem:[%s1968_s4 + $0x8] sm:$0xf] %vm756_vm3, %v713_v34  ;;  %762 = vst.msk [vmem:[%s1968_s4 + $0x14] sm:$0xf] %vm756_vm3, %v719_v20 }
  0xd2   :  { %v717_v1 = vpop.permute.xlu0 %716  ;;  %v723_v46 = vpop.permute.xlu1 %722 }
  0xd3   :  { %761 = vst.msk [vmem:[%s1968_s4 + $0x10] sm:$0xf] %vm756_vm3, %v717_v1  ;;  %764 = vst.msk [vmem:[%s1968_s4 + $0x1c] sm:$0xf] %vm756_vm3, %v723_v46 }
  0xd6   :  { %v721_v63 = vpop.permute.xlu0 %720  ;;  %v727_v21 = vpop.permute.xlu1 %726 }
  0xd7   :  { %763 = vst.msk [vmem:[%s1968_s4 + $0x18] sm:$0xf] %vm756_vm3, %v721_v63  ;;  %766 = vst.msk [vmem:[%s1968_s4 + $0x24] sm:$0xf] %vm756_vm3, %v727_v21 }
  0xda   :  { %v725_v47 = vpop.permute.xlu0 %724  ;;  %v731_v33 = vpop.permute.xlu1 %730 }
  0xdb   :  { %765 = vst.msk [vmem:[%s1968_s4 + $0x20] sm:$0xf] %vm756_vm3, %v725_v47  ;;  %768 = vst.msk [vmem:[%s1968_s4 + $0x2c] sm:$0xf] %vm756_vm3, %v731_v33 }
  0xde   :  { %v729_v12 = vpop.permute.xlu0 %728  ;;  %v735_v44 = vpop.permute.xlu1 %734 }
  0xdf   :  { %767 = vst.msk [vmem:[%s1968_s4 + $0x28] sm:$0xf] %vm756_vm3, %v729_v12  ;;  %770 = vst.msk [vmem:[%s1968_s4 + $0x34] sm:$0xf] %vm756_vm3, %v735_v44 }
  0xe2   :  { %v733_v35 = vpop.permute.xlu0 %732  ;;  %v739_v7 = vpop.permute.xlu1 %738 }
  0xe3   :  { %769 = vst.msk [vmem:[%s1968_s4 + $0x30] sm:$0xf] %vm756_vm3, %v733_v35  ;;  %772 = vst.msk [vmem:[%s1968_s4 + $0x3c] sm:$0xf] %vm756_vm3, %v739_v7 }
  0xe6   :  { %v737_v5 = vpop.permute.xlu0 %736 }
  0xe7   :  { %771 = vst.msk [vmem:[%s1968_s4 + $0x38] sm:$0xf] %vm756_vm3, %v737_v5 }

// kernel: wavelet_model_noatt.12
= control target key start
LH: loop header
LB: loop body
LE: loop exit
PB: predicated region body
PF: predicated region fallthrough
CT: control target
= control target key end

     0   :  { %vm93_vm0 = vcmask 125952   ;;  %vm138_vm1 = vcmask 257152   ;;  %vm179_vm2 = vcmask 388352   ;;  %vm220_vm3 = vcmask 519552   ;;  %s449_s0 = inlined_call_operand.vmem [shape: bf16[32,16], index: 0, kind: input, shape index: {}]   ;;  %s450_s1 = inlined_call_operand.vmem [shape: bf16[32,16], index: 1, kind: input, shape index: {}]   ;;  %s451_s2 = inlined_call_operand.vmem [shape: bf16[32,16], index: 2, kind: input, shape index: {}]   ;;  %s452_s3 = inlined_call_operand.vmem [shape: bf16[32,16], index: 3, kind: input, shape index: {}]   ;;  %s453_s4 = inlined_call_operand.vmem [shape: bf16[32,64], index: 4, kind: output, shape index: {}]  }
   0x1   :  { %v262_v0 = vld [vmem:[%s449_s0] sm:$0xff]   ;;  %v293_v1 = vld [vmem:[%s449_s0 + $0x8] sm:$0xff]  }
   0x2   :  { %v270_v2 = vld [vmem:[%s450_s1] sm:$0xff]   ;;  %v264_v3 = vunpack.c.h.bf16 %v262_v0  ;;  %v267_v4 = vunpack.c.l.bf16 %v293_v1  ;;  %v268_v5 = vunpack.c.h.bf16 %v293_v1  ;;  %v263_v10 = vunpack.c.l.bf16 %v262_v0  ;;  %v294_v14 = vld [vmem:[%s450_s1 + $0x8] sm:$0xff]   ;;  %s300_s1 = smov 48  }
   0x3   :  { %v272_v6 = vunpack.c.h.bf16 %v270_v2  ;;  %v278_v7 = vld [vmem:[%s451_s2] sm:$0xff]   ;;  %v271_v11 = vunpack.c.l.bf16 %v270_v2  ;;  %v295_v18 = vld [vmem:[%s451_s2 + $0x8] sm:$0xff]   ;;  %v275_v29 = vunpack.c.l.bf16 %v294_v14  ;;  %v276_v44 = vunpack.c.h.bf16 %v294_v14  ;;  %s301_s2 = smov 16  }
   0x4   :  { %v280_v8 = vunpack.c.h.bf16 %v278_v7  ;;  %v286_v9 = vld [vmem:[%s452_s3] sm:$0xff]   ;;  %v279_v12 = vunpack.c.l.bf16 %v278_v7  ;;  %v26_v13 = vmul.f32 0.5, %v264_v3  ;;  %v296_v20 = vld [vmem:[%s452_s3 + $0x8] sm:$0xff]   ;;  %v25_v21 = vmul.f32 0.5, %v263_v10  ;;  %s302_s3 = smov 32  }
   0x5   :  { %v38_v15 = vmul.f32 0.5, %v272_v6  ;;  %v288_v16 = vunpack.c.h.bf16 %v286_v9  ;;  %v287_v17 = vunpack.c.l.bf16 %v286_v9  ;;  %v37_v22 = vmul.f32 0.5, %v271_v11 }
   0x6   :  { %v349_v19 = vmul.f32 0.5, %v280_v8  ;;  %v354_v23 = vmul.f32 0.5, %v279_v12  ;;  %v360_v28 = vmul.f32 0.5, %v267_v4  ;;  %v283_v31 = vunpack.c.l.bf16 %v295_v18 }
   0x7   :  { %v356_v24 = vmul.f32 0.5, %v288_v16  ;;  %v185_v25 = vsub.f32 %v26_v13, %v38_v15  ;;  %v358_v26 = vmul.f32 0.5, %v287_v17  ;;  %v184_v27 = vsub.f32 %v25_v21, %v37_v22 }
   0x8   :  { %v291_v32 = vunpack.c.l.bf16 %v296_v20  ;;  %v98_v33 = vsub.f32 0.0, %v25_v21  ;;  %v364_v35 = vmul.f32 0.5, %v275_v29  ;;  %v100_v36 = vsub.f32 0.0, %v360_v28 }
   0x9   :  { %v189_v30 = vsub.f32 %v185_v25, %v349_v19  ;;  %v188_v34 = vsub.f32 %v184_v27, %v354_v23  ;;  %v28_v37 = vmul.f32 0.5, %v268_v5  ;;  %v51_v39 = vmul.f32 0.5, %v283_v31 }
   0xa   :  { %v368_v40 = vmul.f32 0.5, %v291_v32  ;;  %v102_v41 = vsub.f32 %v98_v33, %v37_v22  ;;  %v104_v43 = vsub.f32 %v100_v36, %v364_v35  ;;  %v284_v45 = vunpack.c.h.bf16 %v295_v18 }
   0xb   :  { %v193_v38 = vadd.f32 %v189_v30, %v356_v24  ;;  %v192_v42 = vadd.f32 %v188_v34, %v358_v26  ;;  %v292_v48 = vunpack.c.h.bf16 %v296_v20  ;;  %v101_v49 = vsub.f32 0.0, %v28_v37 }
   0xc   :  { %v106_v47 = vadd.f32 %v102_v41, %v354_v23  ;;  %v108_v51 = vadd.f32 %v104_v43, %v51_v39  ;;  %v40_v52 = vmul.f32 0.5, %v276_v44  ;;  %v52_v53 = vmul.f32 0.5, %v284_v45 }
   0xd   :  { %v258_v46 = vpack.c.bf16 %v193_v38, %v193_v38  ;;  %v257_v50 = vpack.c.bf16 %v192_v42, %v192_v42  ;;  %v64_v55 = vmul.f32 0.5, %v292_v48  ;;  %v99_v56 = vsub.f32 0.0, %v26_v13 }
   0xe   :  { %v110_v54 = vadd.f32 %v106_v47, %v358_v26  ;;  %v143_v57 = vadd.f32 %v98_v33, %v37_v22  ;;  %v112_v58 = vadd.f32 %v108_v51, %v368_v40  ;;  %v105_v59 = vsub.f32 %v101_v49, %v40_v52 }
   0xf   :  { %210 = vrot.lane.b32.xlu1 %v258_v46, %s300_s1  ;;  %208 = vrot.lane.b32.xlu0 %v257_v50, %s300_s1  ;;  %v146_v60 = vadd.f32 %v101_v49, %v40_v52  ;;  %v145_v61 = vadd.f32 %v100_v36, %v364_v35  ;;  %v103_v63 = vsub.f32 %v99_v56, %v38_v15 }
  0x10   :  { %v249_v62 = vpack.c.bf16 %v110_v54, %v110_v54  ;;  %v144_v0 = vadd.f32 %v99_v56, %v38_v15  ;;  %v147_v1 = vsub.f32 %v143_v57, %v354_v23  ;;  %v251_v2 = vpack.c.bf16 %v112_v58, %v112_v58 }
  0x11   :  { %v109_v3 = vadd.f32 %v105_v59, %v52_v53  ;;  %v107_v4 = vadd.f32 %v103_v63, %v349_v19  ;;  %v150_v6 = vsub.f32 %v146_v60, %v52_v53  ;;  %v187_v7 = vsub.f32 %v28_v37, %v40_v52 }
  0x12   :  { %v148_v5 = vsub.f32 %v144_v0, %v349_v19  ;;  %v66_v8 = vadd.f32 %v38_v15, %v26_v13  ;;  %v65_v9 = vadd.f32 %v37_v22, %v25_v21  ;;  %v151_v14 = vadd.f32 %v147_v1, %v358_v26 }
  0x13   :  { %130 = vrot.lane.b32.xlu1 %v251_v2, %s301_s2  ;;  %126 = vrot.lane.b32.xlu0 %v249_v62, %s301_s2  ;;  %v113_v10 = vadd.f32 %v109_v3, %v64_v55  ;;  %v111_v11 = vadd.f32 %v107_v4, %v356_v24  ;;  %v149_v16 = vsub.f32 %v145_v61, %v51_v39 }
  0x14   :  { %v152_v12 = vadd.f32 %v148_v5, %v356_v24  ;;  %v186_v18 = vsub.f32 %v360_v28, %v364_v35  ;;  %v154_v25 = vadd.f32 %v150_v6, %v64_v55  ;;  %v191_v27 = vsub.f32 %v187_v7, %v52_v53 }
  0x15   :  { %v252_v17 = vpack.c.bf16 %v113_v10, %v113_v10  ;;  %v250_v20 = vpack.c.bf16 %v111_v11, %v111_v11  ;;  %v67_v13 = vadd.f32 %v364_v35, %v360_v28  ;;  %v69_v21 = vadd.f32 %v65_v9, %v354_v23 }
  0x16   :  { %v254_v15 = vpack.c.bf16 %v152_v12, %v152_v12  ;;  %v68_v22 = vadd.f32 %v40_v52, %v28_v37  ;;  %v70_v29 = vadd.f32 %v66_v8, %v349_v19  ;;  %v253_v30 = vpack.c.bf16 %v151_v14, %v151_v14 }
  0x17   :  { %132 = vrot.lane.b32.xlu1 %v252_v17, %s301_s2  ;;  %128 = vrot.lane.b32.xlu0 %v250_v20, %s301_s2  ;;  %v153_v31 = vadd.f32 %v149_v16, %v368_v40  ;;  %v190_v32 = vsub.f32 %v186_v18, %v51_v39  ;;  %v71_v33 = vadd.f32 %v67_v13, %v51_v39 }
  0x18   :  { %v73_v34 = vadd.f32 %v69_v21, %v358_v26  ;;  %v72_v36 = vadd.f32 %v68_v22, %v52_v53  ;;  %v74_v38 = vadd.f32 %v70_v29, %v356_v24  ;;  %v256_v41 = vpack.c.bf16 %v154_v25, %v154_v25 }
  0x19   :  { %v75_v28 = vadd.f32 %v71_v33, %v368_v40  ;;  %v195_v23 = vadd.f32 %v191_v27, %v64_v55  ;;  %v255_v42 = vpack.c.bf16 %v153_v31, %v153_v31  ;;  %v194_v43 = vadd.f32 %v190_v32, %v368_v40 }
  0x1a   :  { %v245_v35 = vpack.c.bf16 %v73_v34, %v73_v34  ;;  %v76_v19 = vadd.f32 %v72_v36, %v64_v55  ;;  %v246_v37 = vpack.c.bf16 %v74_v38, %v74_v38 }
  0x1b   :  { %169 = vrot.lane.b32.xlu1 %v254_v15, %s302_s3  ;;  %167 = vrot.lane.b32.xlu0 %v253_v30, %s302_s3  ;;  %v247_v39 = vpack.c.bf16 %v75_v28, %v75_v28  ;;  %v260_v26 = vpack.c.bf16 %v195_v23, %v195_v23  ;;  %v259_v40 = vpack.c.bf16 %v194_v43, %v194_v43 }
  0x1c   :  { %94 = vst.msk [vmem:[%s453_s4] sm:$0xf] %vm93_vm0, %v245_v35  ;;  %v248_v24 = vpack.c.bf16 %v76_v19, %v76_v19  ;;  %95 = vst.msk [vmem:[%s453_s4 + $0x4] sm:$0xf] %vm93_vm0, %v246_v37 }
  0x1d   :  { %96 = vst.msk [vmem:[%s453_s4 + $0x8] sm:$0xf] %vm93_vm0, %v247_v39 }
  0x1e   :  { %97 = vst.msk [vmem:[%s453_s4 + $0xc] sm:$0xf] %vm93_vm0, %v248_v24 }
  0x1f   :  { %173 = vrot.lane.b32.xlu1 %v256_v41, %s302_s3  ;;  %171 = vrot.lane.b32.xlu0 %v255_v42, %s302_s3 }
  0x23   :  { %214 = vrot.lane.b32.xlu1 %v260_v26, %s300_s1  ;;  %212 = vrot.lane.b32.xlu0 %v259_v40, %s300_s1 }
  0x81   :  { %v211_v44 = vpop.permute.xlu1 %210  ;;  %v209_v45 = vpop.permute.xlu0 %208 }
  0x85   :  { %v131_v46 = vpop.permute.xlu1 %130  ;;  %v127_v47 = vpop.permute.xlu0 %126 }
  0x86   :  { %141 = vst.msk [vmem:[%s453_s4 + $0x8] sm:$0xf] %vm138_vm1, %v131_v46  ;;  %139 = vst.msk [vmem:[%s453_s4] sm:$0xf] %vm138_vm1, %v127_v47 }
  0x89   :  { %v133_v48 = vpop.permute.xlu1 %132  ;;  %v129_v49 = vpop.permute.xlu0 %128 }
  0x8a   :  { %142 = vst.msk [vmem:[%s453_s4 + $0xc] sm:$0xf] %vm138_vm1, %v133_v48  ;;  %140 = vst.msk [vmem:[%s453_s4 + $0x4] sm:$0xf] %vm138_vm1, %v129_v49 }
  0x8d   :  { %v170_v50 = vpop.permute.xlu1 %169  ;;  %v168_v51 = vpop.permute.xlu0 %167 }
  0x8e   :  { %181 = vst.msk [vmem:[%s453_s4 + $0x4] sm:$0xf] %vm179_vm2, %v170_v50  ;;  %180 = vst.msk [vmem:[%s453_s4] sm:$0xf] %vm179_vm2, %v168_v51 }
  0x8f   :  { %222 = vst.msk [vmem:[%s453_s4 + $0x4] sm:$0xf] %vm220_vm3, %v211_v44  ;;  %221 = vst.msk [vmem:[%s453_s4] sm:$0xf] %vm220_vm3, %v209_v45 }
  0x91   :  { %v174_v52 = vpop.permute.xlu1 %173  ;;  %v172_v53 = vpop.permute.xlu0 %171 }
  0x92   :  { %183 = vst.msk [vmem:[%s453_s4 + $0xc] sm:$0xf] %vm179_vm2, %v174_v52  ;;  %182 = vst.msk [vmem:[%s453_s4 + $0x8] sm:$0xf] %vm179_vm2, %v172_v53 }
  0x95   :  { %v215_v54 = vpop.permute.xlu1 %214  ;;  %v213_v55 = vpop.permute.xlu0 %212 }
  0x96   :  { %224 = vst.msk [vmem:[%s453_s4 + $0xc] sm:$0xf] %vm220_vm3, %v215_v54  ;;  %223 = vst.msk [vmem:[%s453_s4 + $0x8] sm:$0xf] %vm220_vm3, %v213_v55 }

// kernel: wavelet_model_noatt.11
= control target key start
LH: loop header
LB: loop body
LE: loop exit
PB: predicated region body
PF: predicated region fallthrough
CT: control target
= control target key end

     0   :  { %s2242_s15 = smov 0   ;;  %s2725_s0 = inlined_call_operand.vmem [shape: bf16[2,102,16], index: 0, kind: input, shape index: {}]   ;;  %s2726_s1 = inlined_call_operand.vmem [shape: bf16[9,16,16], index: 1, kind: input, shape index: {}]   ;;  %s2727_s2 = inlined_call_operand.vmem [shape: f32[1,16], index: 2, kind: input, shape index: {}]   ;;  %s2728_s3 = inlined_call_operand.vmem [shape: f32[1,16], index: 3, kind: input, shape index: {}]   ;;  %s2729_s4 = inlined_call_operand.vmem [shape: bf16[2,80,16], index: 4, kind: output, shape index: {}]  }
   0x1 LB: > { %s1635_s16 = sadd.s32 4294967295, %s2213_s15   ;;  %p1639_p0 = scmp.ge.s32.totalorder %s2213_s15, 1  ;;  %s2213_s15 = sphi %s2242_s15, %s14_s15  }
   0x2   : > { %p162_p1 = scmp.lt.s32.totalorder %s2213_s15, 3 }
   0x4   : > { %p163_p2 = pnand %p1639_p0, %p162_p1 }
   0x5   : > { %v2253_v0 = vld [vmem:[%s2726_s1 + $0x20] sm:$0xff] (!%p163_p2)   ;;  %v2215_v1 = vmov (!%p163_p2), 0.0   ;;  %v2176_v2 = vld [vmem:[%s2726_s1 + $0x8] sm:$0xff] (!%p163_p2)   ;;  %vm2216_vm0 = vmmov (!%p163_p2), 0   ;;  %p188_p3 = scmp.lt.s32.totalorder (!%p163_p2), %s1635_s16, 1  ;;  %vm294_vm3 = vcmask (!%p163_p2), 130048  }
   0x6   : > { %166 = sbr.rel (%p163_p2) target bundleno = 430 (0x1ae), region = 36  ;;  %1901 = vmatprep.subr.bf16.mxu0 (!%p163_p2), %v2215_v1  ;;  %1813 = vmatprep.subr.bf16.mxu1 (!%p163_p2), %v2215_v1  ;;  %vm243_vm1 = vsmask.f32 (!%p163_p2), 7424  ;;  %vm759_vm2 = vsmask.f32 (!%p163_p2), 6400  ;;  %v2183_v27 = vld [vmem:[%s2726_s1] sm:$0xff] (!%p163_p2)  }
   0x7   : > { %1902 = vmatpush3.bf16.msra.mxu0 (!%p163_p2), %v2253_v0  ;;  %1815 = vmatprep.mubr.msk.bf16.mxu1 (!%p163_p2), %vm2216_vm0, %v2215_v1  ;;  %v2181_v36 = vld [vmem:[%s2726_s1 + $0x28] sm:$0xff] (!%p163_p2)   ;;  %vm924_vm4 = vcmask (!%p163_p2), 1045504   ;;  %vm479_vm5 = vcmask (!%p163_p2), 1046528   ;;  %vm1369_vm6 = vcmask (!%p163_p2), 1044480   ;;  %vm1204_vm7 = vsmask.f32 (!%p163_p2), 5376 }
   0x8   : > { %1814 = vmatpush3.bf16.msra.mxu1 (!%p163_p2), %v2176_v2  ;;  %1903 = vmatprep.mubr.msk.bf16.mxu0 (!%p163_p2), %vm2216_vm0, %v2215_v1  ;;  %vm1569_vm8 = vcmask (!%p163_p2), 125952  }
   0x9   : > { %1923 = vmatprep.subr.bf16.mxu0 (!%p163_p2), %v2215_v1  ;;  %1835 = vmatprep.subr.bf16.mxu1 (!%p163_p2), %v2215_v1 }
   0xd   : > { %s2731_s16 = smov (!%p188_p3, %s1635_s16), 1 }
   0xe   : > { %s2163_s21 = smul.u32 52, %s2731_s16 }
   0xf   : > { %s2164_s19 = smul.u32 40, %s2731_s16 }
  0x10   : > { %s2273_s24 = scalar_lea.vmem %s2725_s0, %s2163_s21 }
  0x11   : > { %v199_v3 = vld [vmem:[%s2273_s24] sm:$0xf]  ;;  %v2277_v4 = vld [vmem:[%s2273_s24 + $0x4] sm:$0xf]  ;;  %v2283_v6 = vld [vmem:[%s2273_s24 + $0x8] sm:$0xff]   ;;  %s2684_s22 = scalar_lea.vmem %s2729_s4, %s2164_s19 }
  0x12   : > { %v2280_v5 = vcombine.low %v199_v3, %v2277_v4  ;;  %v595_v7 = vld [vmem:[%s2273_s24 + $0x4] sm:$0xe]  ;;  %v2287_v8 = vld [vmem:[%s2273_s24 + $0x8] sm:$0xf]  ;;  %v252_v11 = vshll.u32 %v2283_v6, 16  ;;  %v2296_v13 = vld [vmem:[%s2273_s24 + $0xc] sm:$0xff]  }
  0x13   : > { %v2293_v12 = vcombine.low %v595_v7, %v2287_v8  ;;  %v2299_v14 = vld [vmem:[%s2273_s24 + $0x10] sm:$0xff]   ;;  %v769_v19 = vshrl.u32 %v2296_v13, 16  ;;  %v772_v20 = vshll.u32 %v2296_v13, 16  ;;  %v256_v21 = vshrl.u32 %v2283_v6, 16  ;;  %v2317_v34 = vld [vmem:[%s2273_s24 + $0x1c] sm:$0xff]   ;;  %v2345_v53 = vld [vmem:[%s2273_s24 + $0x28] sm:$0xff]  }
  0x14   : > { %v245_v9 = vshrl.u32 %v2280_v5, 16  ;;  %v247_v10 = vshll.u32 %v2280_v5, 16  ;;  %v254_v16 = vrot.slane %v252_v11, 1  ;;  %v2307_v22 = vld [vmem:[%s2273_s24 + $0x14] sm:$0xff]   ;;  %v260_v26 = vshll.u32 %v2299_v14, 16  ;;  %v2340_v51 = vld [vmem:[%s2273_s24 + $0x20] sm:$0xff]  }
  0x15   : > { %v761_v17 = vshrl.u32 %v2293_v12, 16  ;;  %v764_v18 = vshll.u32 %v2293_v12, 16  ;;  %v771_v28 = vrot.slane %v769_v19, 1  ;;  %v774_v29 = vrot.slane %v772_v20, 2  ;;  %v2326_v41 = vld [vmem:[%s2273_s24 + $0x18] sm:$0xff]   ;;  %v2350_v56 = vld [vmem:[%s2273_s24 + $0x20] sm:$0xff]  }
  0x16   : > { %v249_v15 = vrot.slane %v247_v10, 1  ;;  %v778_v30 = vshrl.u32 %v2307_v22, 16  ;;  %v781_v33 = vshll.u32 %v2307_v22, 16  ;;  %v258_v38 = vor.u32 %v256_v21, %v254_v16  ;;  %v472_v57 = vld [vmem:[%s2273_s24] sm:$0xe] }
  0x17   : > { %v763_v24 = vrot.slane %v761_v17, 1  ;;  %v766_v25 = vrot.slane %v764_v18, 2  ;;  %v775_v35 = vor.u32 %v774_v29, %v771_v28  ;;  %v262_v39 = vrot.slane %v260_v26, 1  ;;  %v917_v62 = vld [vmem:[%s2273_s24 + $0x4] sm:$0xc] }
  0x18   : > { %v250_v23 = vor.u32 %v249_v15, %v245_v9  ;;  %v780_v37 = vrot.slane %v778_v30, 1  ;;  %v783_v40 = vrot.slane %v781_v33, 2  ;;  %v787_v43 = vshrl.u32 %v2317_v34, 16  ;;  %v2202_v15 = vld [vmem:[%s2273_s24 + $0x30] ss:$0 sps:$4 sm:$0x33]  }
  0x19   : > { %v767_v32 = vor.u32 %v766_v25, %v763_v24  ;;  %v790_v44 = vshll.u32 %v2317_v34, 16  ;;  %v263_v46 = vsel %vm243_vm1, %v258_v38, %v262_v39  ;;  %v264_v47 = vshrl.u32 %v2299_v14, 16  ;;  %v2392_v25 = vld [vmem:[%s2273_s24 + $0x28] ss:$0 sps:$4 sm:$0x11]  }
  0x1a   : > { %v255_v31 = vsel %vm243_vm1, %v250_v23, %v254_v16  ;;  %v784_v45 = vor.u32 %v783_v40, %v780_v37  ;;  %v268_v48 = vshll.u32 %v2326_v41, 16  ;;  %v789_v49 = vrot.slane %v787_v43, 1 }
  0x1b   : > { %1816 = vmatmul.mubr.msk.bf16.vlgmr.msra.gmra.mrb[0].mxu1 %vm294_vm3, %v255_v31  ;;  %v776_v42 = vsel %vm759_vm2, %v767_v32, %v775_v35  ;;  %v792_v50 = vrot.slane %v790_v44, 2  ;;  %v266_v54 = vor.u32 %v264_v47, %v262_v39  ;;  %v1664_v58 = vcombine.low %v472_v57, %v2277_v4  ;;  %v2206_v39 = vld [vmem:[%s2273_s24 + $0x2c] ss:$0 sps:$4 sm:$0x11]   ;;  %v2432_v47 = vld [vmem:[%s2273_s24 + $0x10] sm:$0xff]  }
  0x1c   : > { %1819 = vmatprep.mubr.msk.bf16.mxu1 %vm2216_vm0, %v2215_v1  ;;  %1836 = vmatpush3.bf16.msra.mxu1 %v2183_v27  ;;  %v785_v52 = vsel %vm759_vm2, %v775_v35, %v784_v45  ;;  %v270_v55 = vrot.slane %v268_v48, 1  ;;  %v481_v59 = vrot.slane %v2283_v6, 1  ;;  %v272_v61 = vshrl.u32 %v2326_v41, 16  ;;  %v1362_v35 = vld [vmem:[%s2273_s24 + $0x8] sm:$0x8]  ;;  %v2435_v48 = vld [vmem:[%s2273_s24 + $0x18] sm:$0xff]  }
  0x1d   : > { %1857 = vmatprep.subr.bf16.mxu1 %v2215_v1  ;;  %1904 = vmatmul.mubr.msk.bf16.vlgmr.msra.gmra.mrb[0].mxu0 %vm294_vm3, %v776_v42  ;;  %v2356_v60 = vor.u32 %v792_v50, %v789_v49  ;;  %v483_v63 = vrot.slane %v2299_v14, 1  ;;  %v480_v2 = vrot.slane %v1664_v58, 1  ;;  %v1087_v3 = vrot.slane %v2340_v51, 2  ;;  %v2189_v42 = vld [vmem:[%s2726_s1 + $0x30] sm:$0xff]  }
  0x1e   : > { %1924 = vmatpush3.bf16.msra.mxu0 %v2181_v36  ;;  %1907 = vmatprep.mubr.msk.bf16.mxu0 %vm2216_vm0, %v2215_v1  ;;  %v1089_v4 = vrot.slane %v2345_v53, 2  ;;  %v485_v7 = vrot.slane %v2326_v41, 1  ;;  %v271_v9 = vsel %vm243_vm1, %v266_v54, %v270_v55  ;;  %v276_v10 = vshll.u32 %v2350_v56, 16  ;;  %v2412_v36 = vld [vmem:[%s2273_s24 + $0x24] sm:$0xff]  }
  0x1f   : > { %1945 = vmatprep.subr.bf16.mxu0 %v2215_v1  ;;  %v2369_v11 = vsel %vm479_vm5, %v481_v59, %v483_v63  ;;  %v2373_v16 = vsel %vm479_vm5, %v480_v2, %v481_v59  ;;  %v1091_v19 = vrot.slane %v2202_v15, 2  ;;  %v794_v20 = vsel %vm759_vm2, %v784_v45, %v2356_v60 }
  0x20   : > { %v2378_v17 = vsel %vm924_vm4, %v1087_v3, %v1089_v4  ;;  %v2383_v18 = vsel %vm479_vm5, %v483_v63, %v485_v7  ;;  %v1696_v21 = vcombine.low %v917_v62, %v2287_v8  ;;  %v274_v23 = vor.u32 %v272_v61, %v270_v55 }
  0x21   : > { %v278_v24 = vrot.slane %v276_v10, 1  ;;  %v2395_v26 = vsel %vm924_vm4, %v1089_v4, %v1091_v19  ;;  %v637_v27 = vrot.slane %v2293_v12, 1  ;;  %v638_v8 = vrot.slane %v2296_v13, 1 }
  0x22   : > { %v925_v28 = vrot.slane %v1696_v21, 2  ;;  %v926_v29 = vrot.slane %v2296_v13, 2  ;;  %v640_v30 = vrot.slane %v2307_v22, 1  ;;  %v280_v32 = vshrl.u32 %v2350_v56, 16  ;;  %v2418_v13 = vld [vmem:[%s2273_s24 + $0xc] sm:$0xf] }
  0x23   : > { %1820 = vmatmul.mubr.msk.bf16.gmra.mrb[4].mxu1 %vm294_vm3, %v263_v46  ;;  %v279_v31 = vsel %vm243_vm1, %v274_v23, %v278_v24  ;;  %v284_v33 = vshll.u32 %v2392_v25, 16  ;;  %v2408_v12 = vsel %vm479_vm5, %v637_v27, %v638_v8  ;;  %v642_v38 = vrot.slane %v2317_v34, 1 }
  0x24   : > { %1823 = vmatprep.mubr.msk.bf16.mxu1 %vm2216_vm0, %v2215_v1  ;;  %v2415_v37 = vsel %vm479_vm5, %v638_v8, %v640_v30  ;;  %v927_v40 = vsel %vm924_vm4, %v925_v28, %v926_v29  ;;  %v644_v43 = vrot.slane %v2412_v36, 1  ;;  %v1728_v44 = vcombine.low %v1362_v35, %v2418_v13  ;;  %v2191_v28 = vld [vmem:[%s2726_s1 + $0x10] sm:$0xff]  }
  0x25   : > { %1908 = vmatmul.mubr.msk.bf16.gmra.mrb[4].mxu0 %vm294_vm3, %v785_v52  ;;  %v282_v45 = vor.u32 %v280_v32, %v278_v24  ;;  %v286_v46 = vrot.slane %v284_v33, 1  ;;  %v2438_v49 = vsel %vm479_vm5, %v640_v30, %v642_v38  ;;  %v1371_v54 = vrot.slane %v2432_v47, 3 }
  0x26   : > { %1911 = vmatprep.mubr.msk.bf16.mxu0 %vm2216_vm0, %v2215_v1  ;;  %v2441_v50 = vsel %vm479_vm5, %v642_v38, %v644_v43  ;;  %v1370_v52 = vrot.slane %v1728_v44, 3  ;;  %v646_v55 = vrot.slane %v2206_v39, 1  ;;  %v1373_v57 = vrot.slane %v2435_v48, 3 }
  0x27   : > { %v928_v58 = vrot.slane %v2307_v22, 2  ;;  %v796_v59 = vshrl.u32 %v2412_v36, 16  ;;  %v799_v61 = vshll.u32 %v2412_v36, 16  ;;  %v287_v62 = vsel %vm243_vm1, %v282_v45, %v286_v46 }
  0x28   : > { %v2454_v63 = vsel %vm1369_vm6, %v1370_v52, %v1371_v54  ;;  %v2457_v2 = vsel %vm479_vm5, %v644_v43, %v646_v55  ;;  %v2460_v4 = vsel %vm1369_vm6, %v1371_v54, %v1373_v57  ;;  %v1375_v19 = vrot.slane %v2340_v51, 3  ;;  %v2200_v54 = vld [vmem:[%s2726_s1 + $0x18] sm:$0xff]  }
  0x29   : > { %v801_v10 = vrot.slane %v799_v61, 2  ;;  %v929_v22 = vsel %vm924_vm4, %v926_v29, %v928_v58  ;;  %v930_v24 = vrot.slane %v2317_v34, 2  ;;  %v1377_v32 = vrot.slane %v2345_v53, 3  ;;  %v2490_v34 = vld [vmem:[%s2273_s24 + $0x30] ss:$0 sps:$4 sm:$0x77]  }
  0x2a   : > { %v2473_v23 = vsel %vm1369_vm6, %v1373_v57, %v1375_v19  ;;  %v1379_v38 = vrot.slane %v2490_v34, 3  ;;  %v1083_v45 = vrot.slane %v2432_v47, 2  ;;  %v1085_v46 = vrot.slane %v2435_v48, 2 }
  0x2b   : > { %1824 = vmatmul.mubr.msk.bf16.gmra.mrb[8].mxu1 %vm294_vm3, %v271_v9  ;;  %v798_v9 = vrot.slane %v796_v59, 1  ;;  %v931_v30 = vsel %vm924_vm4, %v928_v58, %v930_v24  ;;  %v2496_v35 = vsel %vm1369_vm6, %v1375_v19, %v1377_v32  ;;  %v1214_v57 = vshrl.u32 %v2432_v47, 16 }
  0x2c   : > { %1827 = vmatprep.mubr.msk.bf16.mxu1 %vm2216_vm0, %v2215_v1  ;;  %v2504_v39 = vsel %vm1369_vm6, %v1377_v32, %v1379_v38  ;;  %v1086_v52 = vsel %vm924_vm4, %v1083_v45, %v1085_v46  ;;  %v1088_v55 = vsel %vm924_vm4, %v1085_v46, %v1087_v3  ;;  %v1217_v58 = vshll.u32 %v2432_v47, 16 }
  0x2d   : > { %1912 = vmatmul.mubr.msk.bf16.gmra.mrb[8].mxu0 %vm294_vm3, %v794_v20  ;;  %v802_v15 = vor.u32 %v801_v10, %v798_v9  ;;  %v2193_v20 = vld [vmem:[%s2273_s24 + $0x2c] ss:$0 sps:$4 sm:$0x33]   ;;  %v1216_v61 = vrot.slane %v1214_v57, 2  ;;  %v1223_v10 = vshrl.u32 %v2435_v48, 16 }
  0x2e   : > { %1925 = vmatprep.mubr.msk.bf16.mxu0 %vm2216_vm0, %v2215_v1  ;;  %v805_v27 = vshrl.u32 %v2193_v20, 16  ;;  %v808_v8 = vshll.u32 %v2193_v20, 16 }
  0x2f   : > { %v2470_v21 = vsel %vm759_vm2, %v2356_v60, %v802_v15 }
  0x30   : > { %v807_v29 = vrot.slane %v805_v27, 1  ;;  %v810_v60 = vrot.slane %v808_v8, 2 }
  0x33   : > { %1828 = vmatmul.mubr.msk.bf16.gmra.mrb[12].mxu1 %vm294_vm3, %v279_v31  ;;  %v811_v31 = vor.u32 %v810_v60, %v807_v29  ;;  %v1241_v29 = vshrl.u32 %v2345_v53, 16 }
  0x34   : > { %1831 = vmatprep.mubr.msk.bf16.mxu1 %vm2216_vm0, %v2215_v1 }
  0x35   : > { %1926 = vmatmul.mubr.msk.bf16.vlgmr.msra.gmra.mrb[0].mxu0 %vm294_vm3, %v927_v40  ;;  %v2493_v33 = vsel %vm759_vm2, %v802_v15, %v811_v31  ;;  %v1225_v15 = vrot.slane %v1223_v10, 2 }
  0x36   : > { %1946 = vmatpush3.bf16.msra.mxu0 %v2189_v42  ;;  %1929 = vmatprep.mubr.msk.bf16.mxu0 %vm2216_vm0, %v2215_v1  ;;  %v934_v42 = vrot.slane %v2193_v20, 2  ;;  %v1235_v20 = vshll.u32 %v2340_v51, 16 }
  0x37   : > { %1967 = vmatprep.subr.bf16.mxu0 %v2215_v1 }
  0x3b   : > { %1832 = vmatmul.mubr.msk.bf16.gmra.mrb[16].mxu1 %vm294_vm3, %v287_v62  ;;  %v1219_v62 = vrot.slane %v1217_v58, 3 }
  0x3c   : > { %1837 = vmatprep.mubr.msk.bf16.mxu1 %vm2216_vm0, %v2215_v1 }
  0x3d   : > { %1930 = vmatmul.mubr.msk.bf16.gmra.mrb[4].mxu0 %vm294_vm3, %v929_v22  ;;  %v1220_v47 = vor.u32 %v1219_v62, %v1216_v61 }
  0x3e   : > { %1933 = vmatprep.mubr.msk.bf16.mxu0 %vm2216_vm0, %v2215_v1 }
  0x43   : > { %1838 = vmatmul.mubr.msk.bf16.vlgmr.msra.gmra.mrb[0].mxu1 %vm294_vm3, %v2280_v5  ;;  %v932_v5 = vrot.slane %v2412_v36, 2  ;;  %v1040_v36 = vld [vmem:[%s2273_s24 + $0x8] sm:$0xc] }
  0x44   : > { %1841 = vmatprep.mubr.msk.bf16.mxu1 %vm2216_vm0, %v2215_v1  ;;  %1858 = vmatpush3.bf16.msra.mxu1 %v2191_v28  ;;  %v1705_v44 = vcombine.low %v1040_v36, %v2418_v13  ;;  %v2196_v13 = vld [vmem:[%s2726_s1 + $0x38] sm:$0xff]   ;;  %v1237_v28 = vrot.slane %v1235_v20, 3 }
  0x45   : > { %1879 = vmatprep.subr.bf16.mxu1 %v2215_v1  ;;  %1934 = vmatmul.mubr.msk.bf16.gmra.mrb[8].mxu0 %vm294_vm3, %v931_v30  ;;  %v933_v40 = vsel %vm924_vm4, %v930_v24, %v932_v5  ;;  %v935_v43 = vsel %vm924_vm4, %v932_v5, %v934_v42  ;;  %v1243_v30 = vrot.slane %v1241_v29, 2  ;;  %v1253_v5 = vshll.u32 %v2490_v34, 16 }
  0x46   : > { %1937 = vmatprep.mubr.msk.bf16.mxu0 %vm2216_vm0, %v2215_v1  ;;  %v1206_v3 = vshrl.u32 %v1705_v44, 16 }
  0x48   : > { %v1208_v59 = vrot.slane %v1206_v3, 2 }
  0x4b   : > { %1842 = vmatmul.mubr.msk.bf16.gmra.mrb[4].mxu1 %vm294_vm3, %v2283_v6  ;;  %v1082_v6 = vrot.slane %v1705_v44, 2 }
  0x4c   : > { %1845 = vmatprep.mubr.msk.bf16.mxu1 %vm2216_vm0, %v2215_v1 }
  0x4d   : > { %1938 = vmatmul.mubr.msk.bf16.gmra.mrb[12].mxu0 %vm294_vm3, %v933_v40  ;;  %v1255_v40 = vrot.slane %v1253_v5, 3 }
  0x4e   : > { %1941 = vmatprep.mubr.msk.bf16.mxu0 %vm2216_vm0, %v2215_v1 }
  0x53   : > { %1846 = vmatmul.mubr.msk.bf16.gmra.mrb[8].mxu1 %vm294_vm3, %v2299_v14  ;;  %v1084_v14 = vsel %vm924_vm4, %v1082_v6, %v1083_v45  ;;  %v2674_v6 = vld [vmem:[%s2728_s3] ss:$0 sm:$0xff] }
  0x54   : > { %1849 = vmatprep.mubr.msk.bf16.mxu1 %vm2216_vm0, %v2215_v1 }
  0x55   : > { %1942 = vmatmul.mubr.msk.bf16.gmra.mrb[16].mxu0 %vm294_vm3, %v935_v43 }
  0x56   : > { %1947 = vmatprep.mubr.msk.bf16.mxu0 %vm2216_vm0, %v2215_v1 }
  0x5b   : > { %1850 = vmatmul.mubr.msk.bf16.gmra.mrb[12].mxu1 %vm294_vm3, %v2326_v41 }
  0x5c   : > { %1853 = vmatprep.mubr.msk.bf16.mxu1 %vm2216_vm0, %v2215_v1 }
  0x5d   : > { %1948 = vmatmul.mubr.msk.bf16.vlgmr.msra.gmra.mrb[0].mxu0 %vm294_vm3, %v1084_v14 }
  0x5e   : > { %1968 = vmatpush3.bf16.msra.mxu0 %v2196_v13  ;;  %1951 = vmatprep.mubr.msk.bf16.mxu0 %vm2216_vm0, %v2215_v1 }
  0x5f   : > { %1989 = vmatprep.subr.bf16.mxu0 %v2215_v1 }
  0x63   : > { %1854 = vmatmul.mubr.msk.bf16.gmra.mrb[16].mxu1 %vm294_vm3, %v2350_v56 }
  0x64   : > { %1859 = vmatprep.mubr.msk.bf16.mxu1 %vm2216_vm0, %v2215_v1 }
  0x65   : > { %1952 = vmatmul.mubr.msk.bf16.gmra.mrb[4].mxu0 %vm294_vm3, %v1086_v52 }
  0x66   : > { %1955 = vmatprep.mubr.msk.bf16.mxu0 %vm2216_vm0, %v2215_v1 }
  0x6b   : > { %1860 = vmatmul.mubr.msk.bf16.vlgmr.msra.gmra.mrb[0].mxu1 %vm294_vm3, %v2373_v16  ;;  %v1209_v16 = vshll.u32 %v1705_v44, 16 }
  0x6c   : > { %1863 = vmatprep.mubr.msk.bf16.mxu1 %vm2216_vm0, %v2215_v1  ;;  %1880 = vmatpush3.bf16.msra.mxu1 %v2200_v54 }
  0x6d   : > { %2011 = vmatprep.subr.bf16.mxu1 %v2215_v1  ;;  %1956 = vmatmul.mubr.msk.bf16.gmra.mrb[8].mxu0 %vm294_vm3, %v1088_v55 }
  0x6e   : > { %1959 = vmatprep.mubr.msk.bf16.mxu0 %vm2216_vm0, %v2215_v1 }
  0x73   : > { %1864 = vmatmul.mubr.msk.bf16.gmra.mrb[4].mxu1 %vm294_vm3, %v2369_v11  ;;  %v1211_v11 = vrot.slane %v1209_v16, 3 }
  0x74   : > { %1867 = vmatprep.mubr.msk.bf16.mxu1 %vm2216_vm0, %v2215_v1 }
  0x75   : > { %1960 = vmatmul.mubr.msk.bf16.gmra.mrb[12].mxu0 %vm294_vm3, %v2378_v17  ;;  %v487_v17 = vrot.slane %v2350_v56, 1  ;;  %v1212_v9 = vor.u32 %v1211_v11, %v1208_v59 }
  0x76   : > { %1963 = vmatprep.mubr.msk.bf16.mxu0 %vm2216_vm0, %v2215_v1 }
  0x77   : > { %v488_v22 = vsel %vm479_vm5, %v485_v7, %v487_v17  ;;  %v1221_v56 = vsel %vm1204_vm7, %v1212_v9, %v1220_v47  ;;  %v1232_v7 = vshrl.u32 %v2340_v51, 16  ;;  %v1244_v51 = vshll.u32 %v2345_v53, 16 }
  0x78   : > { %v1250_v53 = vshrl.u32 %v2490_v34, 16 }
  0x79   : > { %v1234_v8 = vrot.slane %v1232_v7, 2  ;;  %v1246_v31 = vrot.slane %v1244_v51, 3 }
  0x7a   : > { %v1252_v38 = vrot.slane %v1250_v53, 2 }
  0x7b   : > { %1868 = vmatmul.mubr.msk.bf16.gmra.mrb[8].mxu1 %vm294_vm3, %v2383_v18  ;;  %v1226_v18 = vshll.u32 %v2435_v48, 16  ;;  %v489_v48 = vrot.slane %v2392_v25, 1  ;;  %v1238_v25 = vor.u32 %v1237_v28, %v1234_v8  ;;  %v1247_v32 = vor.u32 %v1246_v31, %v1243_v30 }
  0x7c   : > { %1871 = vmatprep.mubr.msk.bf16.mxu1 %vm2216_vm0, %v2215_v1 }
  0x7d   : > { %1964 = vmatmul.mubr.msk.bf16.gmra.mrb[16].mxu0 %vm294_vm3, %v2395_v26  ;;  %v2203_v26 = vld [vmem:[%s2726_s1 + $0x40] sm:$0xff]   ;;  %v1228_v19 = vrot.slane %v1226_v18, 3  ;;  %v490_v24 = vsel %vm479_vm5, %v487_v17, %v489_v48 }
  0x7e   : > { %1969 = vmatprep.mubr.msk.bf16.mxu0 %vm2216_vm0, %v2215_v1 }
  0x7f   : > { %v1229_v41 = vor.u32 %v1228_v19, %v1225_v15 }
  0x81   : > { %v1230_v27 = vsel %vm1204_vm7, %v1220_v47, %v1229_v41  ;;  %v1239_v60 = vsel %vm1204_vm7, %v1229_v41, %v1238_v25 }
  0x83   : > { %1872 = vmatmul.mubr.msk.bf16.gmra.mrb[12].mxu1 %vm294_vm3, %v488_v22 }
  0x84   : > { %1875 = vmatprep.mubr.msk.bf16.mxu1 %vm2216_vm0, %v2215_v1 }
  0x85   : > { %1970 = vmatmul.mubr.msk.bf16.vlgmr.msra.gmra.mrb[0].mxu0 %vm294_vm3, %v1221_v56 }
  0x86   : > { %1990 = vmatpush3.bf16.msra.mxu0 %v2203_v26  ;;  %1973 = vmatprep.mubr.msk.bf16.mxu0 %vm2216_vm0, %v2215_v1 }
  0x8b   : > { %1876 = vmatmul.mubr.msk.bf16.gmra.mrb[16].mxu1 %vm294_vm3, %v490_v24 }
  0x8c   : > { %1881 = vmatprep.mubr.msk.bf16.mxu1 %vm2216_vm0, %v2215_v1 }
  0x8d   : > { %1974 = vmatmul.mubr.msk.bf16.gmra.mrb[4].mxu0 %vm294_vm3, %v1230_v27 }
  0x8e   : > { %1977 = vmatprep.mubr.msk.bf16.mxu0 %vm2216_vm0, %v2215_v1 }
  0x93   : > { %1882 = vmatmul.mubr.msk.bf16.vlgmr.msra.gmra.mrb[0].mxu1 %vm294_vm3, %v2408_v12  ;;  %v1248_v12 = vsel %vm1204_vm7, %v1238_v25, %v1247_v32 }
  0x94   : > { %1885 = vmatprep.mubr.msk.bf16.mxu1 %vm2216_vm0, %v2215_v1  ;;  %2012 = vmatpush3.bf16.msra.mxu1 %v2253_v0  ;;  %v1256_v0 = vor.u32 %v1255_v40, %v1252_v38 }
  0x95   : > { %1978 = vmatmul.mubr.msk.bf16.gmra.mrb[8].mxu0 %vm294_vm3, %v1239_v60 }
  0x96   : > { %1981 = vmatprep.mubr.msk.bf16.mxu0 %vm2216_vm0, %v2215_v1  ;;  %v1257_v34 = vsel %vm1204_vm7, %v1247_v32, %v1256_v0 }
  0x9b   : > { %1886 = vmatmul.mubr.msk.bf16.gmra.mrb[4].mxu1 %vm294_vm3, %v2415_v37 }
  0x9c   : > { %1889 = vmatprep.mubr.msk.bf16.mxu1 %vm2216_vm0, %v2215_v1 }
  0x9d   : > { %1982 = vmatmul.mubr.msk.bf16.gmra.mrb[12].mxu0 %vm294_vm3, %v1248_v12 }
  0x9e   : > { %1985 = vmatprep.mubr.msk.bf16.mxu0 %vm2216_vm0, %v2215_v1 }
  0xa3   : > { %1890 = vmatmul.mubr.msk.bf16.gmra.mrb[8].mxu1 %vm294_vm3, %v2438_v49 }
  0xa4   : > { %1893 = vmatprep.mubr.msk.bf16.mxu1 %vm2216_vm0, %v2215_v1 }
  0xa5   : > { %1986 = vmatmul.mubr.msk.bf16.gmra.mrb[16].mxu0 %vm294_vm3, %v1257_v34 }
  0xa6   : > { %1991 = vmatprep.mubr.msk.bf16.mxu0 %vm2216_vm0, %v2215_v1 }
  0xab   : > { %1894 = vmatmul.mubr.msk.bf16.gmra.mrb[12].mxu1 %vm294_vm3, %v2441_v50 }
  0xac   : > { %1897 = vmatprep.mubr.msk.bf16.mxu1 %vm2216_vm0, %v2215_v1 }
  0xad   : > { %1992 = vmatmul.mubr.msk.bf16.vlgmr.msra.gmra.mrb[0].mxu0 %vm294_vm3, %v2454_v63 }
  0xae   : > { %1995 = vmatprep.mubr.msk.bf16.mxu0 %vm2216_vm0, %v2215_v1 }
  0xb3   : > { %1898 = vmatmul.mubr.msk.bf16.gmra.mrb[16].mxu1 %vm294_vm3, %v2457_v2 }
  0xb4   : > { %1915 = vmatprep.mubr.msk.bf16.mxu1 %vm2216_vm0, %v2215_v1 }
  0xb5   : > { %1996 = vmatmul.mubr.msk.bf16.gmra.mrb[4].mxu0 %vm294_vm3, %v2460_v4 }
  0xb6   : > { %1999 = vmatprep.mubr.msk.bf16.mxu0 %vm2216_vm0, %v2215_v1 }
  0xbb   : > { %1916 = vmatmul.mubr.msk.bf16.vlgmr.msra.gmra.mrb[12].mxu1 %vm294_vm3, %v2470_v21 }
  0xbc   : > { %1919 = vmatprep.mubr.msk.bf16.mxu1 %vm2216_vm0, %v2215_v1 }
  0xbd   : > { %2000 = vmatmul.mubr.msk.bf16.gmra.mrb[8].mxu0 %vm294_vm3, %v2473_v23 }
  0xbe   : > { %2003 = vmatprep.mubr.msk.bf16.mxu0 %vm2216_vm0, %v2215_v1 }
  0xc3   : > { %1920 = vmatmul.mubr.msk.bf16.gmra.mrb[16].mxu1 %vm294_vm3, %v2493_v33 }
  0xc5   : > { %2004 = vmatmul.mubr.msk.bf16.gmra.mrb[12].mxu0 %vm294_vm3, %v2496_v35 }
  0xc6   : > { %2007 = vmatprep.mubr.msk.bf16.mxu0 %vm2216_vm0, %v2215_v1  ;;  %v2669_v1 = vld [vmem:[%s2727_s2] ss:$0 sm:$0xff] }
  0xcd   : > { %2008 = vmatmul.mubr.msk.bf16.gmra.mrb[16].mxu0 %vm294_vm3, %v2504_v39 }
 0x166   : > { %v703_v37 = vpop.f32.mrb[0].mxu1 }
 0x167   : > { %v1883_v49 = vpop.f32.mrb[1].mxu1 }
 0x168   : > { %v706_v50 = vpop.f32.mrb[2].mxu1 }
 0x169   : > { %v1884_v63 = vpop.f32.mrb[3].mxu1 }
 0x16e   : > { %v711_v2 = vpop.f32.mrb[4].mxu1 }
 0x16f   : > { %v1887_v4 = vpop.f32.mrb[5].mxu1 }
 0x170   : > { %v714_v21 = vpop.f32.mrb[6].mxu1 }
 0x171   : > { %v1888_v23 = vpop.f32.mrb[7].mxu1 }
 0x176   : > { %v719_v42 = vpop.f32.mrb[8].mxu1 }
 0x177   : > { %v1891_v33 = vpop.f32.mrb[9].mxu1 }
 0x178   : > { %v722_v36 = vpop.f32.mrb[10].mxu1 }
 0x179   : > { %v1892_v43 = vpop.f32.mrb[11].mxu1 }
 0x180   : > { %v1436_v35 = vpop.f32.mrb[0].mxu0 }
 0x181   : > { %v2013_v39 = vadd.f32 %v1436_v35, %v703_v37  ;;  %v1993_v44 = vpop.f32.mrb[1].mxu0 }
 0x182   : > { %v1439_v45 = vpop.f32.mrb[2].mxu0 }
 0x183   : > { %v1492_v14 = vmul.f32 %v2013_v39, %v2669_v1  ;;  %v2014_v13 = vadd.f32 %v1439_v45, %v706_v50  ;;  %v1994_v46 = vpop.f32.mrb[3].mxu0 }
 0x185   : > { %v1509_v52 = vadd.f32 %v2674_v6, %v1492_v14  ;;  %v1493_v54 = vmul.f32 %v2014_v13, %v2669_v1 }
 0x187   : > { %v1519_v55 = vmax.f32 %v1509_v52, 0.0  ;;  %v1510_v3 = vadd.f32 %v2674_v6, %v1493_v54 }
 0x188   : > { %v1444_v16 = vpop.f32.mrb[4].mxu0 }
 0x189   : > { %v1749_v57 = vpack.c.bf16 %v1519_v55, %v1519_v55  ;;  %v1520_v58 = vmax.f32 %v1510_v3, 0.0  ;;  %v2015_v59 = vadd.f32 %v1444_v16, %v711_v2  ;;  %v1997_v11 = vpop.f32.mrb[5].mxu0 }
 0x18a   : > { %v1447_v61 = vpop.f32.mrb[6].mxu0 }
 0x18b   : > { %1570 = vst.msk [vmem:[%s2684_s22] sm:$0xf] %vm1569_vm8, %v1749_v57  ;;  %v1750_v62 = vpack.c.bf16 %v1520_v58, %v1520_v58  ;;  %v1494_v17 = vmul.f32 %v2015_v59, %v2669_v1  ;;  %v2016_v9 = vadd.f32 %v1447_v61, %v714_v21  ;;  %v1998_v47 = vpop.f32.mrb[7].mxu0 }
 0x18d   : > { %1571 = vst.msk [vmem:[%s2684_s22 + $0x4] sm:$0xf] %vm1569_vm8, %v1750_v62  ;;  %v1511_v10 = vadd.f32 %v2674_v6, %v1494_v17  ;;  %v1495_v18 = vmul.f32 %v2016_v9, %v2669_v1 }
 0x18e   : > { %v892_v22 = vpop.f32.mrb[12].mxu1 }
 0x18f   : > { %v1917_v56 = vpop.f32.mrb[13].mxu1  ;;  %v1521_v26 = vmax.f32 %v1511_v10, 0.0  ;;  %v1512_v15 = vadd.f32 %v2674_v6, %v1495_v18 }
 0x190   : > { %v895_v19 = vpop.f32.mrb[14].mxu1  ;;  %v1452_v48 = vpop.f32.mrb[8].mxu0 }
 0x191   : > { %v1918_v41 = vpop.f32.mrb[15].mxu1  ;;  %v1751_v7 = vpack.c.bf16 %v1521_v26, %v1521_v26  ;;  %v1522_v20 = vmax.f32 %v1512_v15, 0.0  ;;  %v2017_v24 = vadd.f32 %v1452_v48, %v719_v42  ;;  %v2001_v27 = vpop.f32.mrb[9].mxu0 }
 0x192   : > { %v1455_v8 = vpop.f32.mrb[10].mxu0 }
 0x193   : > { %1572 = vst.msk [vmem:[%s2684_s22 + $0x8] sm:$0xf] %vm1569_vm8, %v1751_v7  ;;  %v1752_v28 = vpack.c.bf16 %v1522_v20, %v1522_v20  ;;  %v1496_v25 = vmul.f32 %v2017_v24, %v2669_v1  ;;  %v2018_v29 = vadd.f32 %v1455_v8, %v722_v36  ;;  %v2002_v51 = vpop.f32.mrb[11].mxu0 }
 0x195   : > { %1573 = vst.msk [vmem:[%s2684_s22 + $0xc] sm:$0xf] %vm1569_vm8, %v1752_v28  ;;  %v1513_v60 = vadd.f32 %v2674_v6, %v1496_v25  ;;  %v1497_v30 = vmul.f32 %v2018_v29, %v2669_v1 }
 0x196   : > { %v900_v31 = vpop.f32.mrb[16].mxu1 }
 0x197   : > { %v1921_v32 = vpop.f32.mrb[17].mxu1  ;;  %v1523_v53 = vmax.f32 %v1513_v60, 0.0  ;;  %v1514_v5 = vadd.f32 %v2674_v6, %v1497_v30 }
 0x198   : > { %v903_v12 = vpop.f32.mrb[18].mxu1  ;;  %v1460_v38 = vpop.f32.mrb[12].mxu0 }
 0x199   : > { %v1922_v40 = vpop.f32.mrb[19].mxu1  ;;  %v1753_v0 = vpack.c.bf16 %v1523_v53, %v1523_v53  ;;  %v1524_v34 = vmax.f32 %v1514_v5, 0.0  ;;  %v2019_v37 = vadd.f32 %v1460_v38, %v892_v22  ;;  %v2005_v49 = vpop.f32.mrb[13].mxu0 }
 0x19a   : > { %v1463_v50 = vpop.f32.mrb[14].mxu0 }
 0x19b   : > { %1574 = vst.msk [vmem:[%s2684_s22 + $0x10] sm:$0xf] %vm1569_vm8, %v1753_v0  ;;  %v1754_v63 = vpack.c.bf16 %v1524_v34, %v1524_v34  ;;  %v1498_v2 = vmul.f32 %v2019_v37, %v2669_v1  ;;  %v2020_v4 = vadd.f32 %v1463_v50, %v895_v19  ;;  %v2006_v21 = vpop.f32.mrb[15].mxu0 }
 0x19d   : > { %1575 = vst.msk [vmem:[%s2684_s22 + $0x14] sm:$0xf] %vm1569_vm8, %v1754_v63  ;;  %v1515_v23 = vadd.f32 %v2674_v6, %v1498_v2  ;;  %v1499_v42 = vmul.f32 %v2020_v4, %v2669_v1 }
 0x19f   : > { %v1525_v33 = vmax.f32 %v1515_v23, 0.0  ;;  %v1516_v36 = vadd.f32 %v2674_v6, %v1499_v42 }
 0x1a0   : > { %v1468_v43 = vpop.f32.mrb[16].mxu0 }
 0x1a1   : > { %v1755_v35 = vpack.c.bf16 %v1525_v33, %v1525_v33  ;;  %v1526_v39 = vmax.f32 %v1516_v36, 0.0  ;;  %v2021_v44 = vadd.f32 %v1468_v43, %v900_v31  ;;  %v2009_v45 = vpop.f32.mrb[17].mxu0 }
 0x1a2   : > { %v1471_v14 = vpop.f32.mrb[18].mxu0 }
 0x1a3   : > { %1576 = vst.msk [vmem:[%s2684_s22 + $0x18] sm:$0xf] %vm1569_vm8, %v1755_v35  ;;  %v1756_v13 = vpack.c.bf16 %v1526_v39, %v1526_v39  ;;  %v1500_v46 = vmul.f32 %v2021_v44, %v2669_v1  ;;  %v2022_v52 = vadd.f32 %v1471_v14, %v903_v12  ;;  %v2010_v54 = vpop.f32.mrb[19].mxu0 }
 0x1a5   : > { %1577 = vst.msk [vmem:[%s2684_s22 + $0x1c] sm:$0xf] %vm1569_vm8, %v1756_v13  ;;  %v1517_v55 = vadd.f32 %v2674_v6, %v1500_v46  ;;  %v1501_v3 = vmul.f32 %v2022_v52, %v2669_v1 }
 0x1a7   : > { %v1527_v16 = vmax.f32 %v1517_v55, 0.0  ;;  %v1518_v57 = vadd.f32 %v2674_v6, %v1501_v3 }
 0x1a9   : > { %v1757_v58 = vpack.c.bf16 %v1527_v16, %v1527_v16  ;;  %v1528_v59 = vmax.f32 %v1518_v57, 0.0 }
 0x1ab   : > { %1578 = vst.msk [vmem:[%s2684_s22 + $0x20] sm:$0xf] %vm1569_vm8, %v1757_v58  ;;  %v1758_v11 = vpack.c.bf16 %v1528_v59, %v1528_v59 }
 0x1ad   : > { %1579 = vst.msk [vmem:[%s2684_s22 + $0x24] sm:$0xf] %vm1569_vm8, %v1758_v11 }
 0x1ae PF: > { %s14_s15 = sadd.s32 1, %s2213_s15  }
 0x1af   : > { %p11_p4 = scmp.ge.s32.totalorder %s14_s15, 4  }
 0x1b1   :  { %13 = sbr.rel (!%p11_p4) target bundleno = 1 (0x1), region = 74 }

// kernel: wavelet_model_noatt.13
= control target key start
LH: loop header
LB: loop body
LE: loop exit
PB: predicated region body
PF: predicated region fallthrough
CT: control target
= control target key end

     0   :  { %s1652_s15 = smov 0   ;;  %s1869_s0 = inlined_call_operand.vmem [shape: bf16[2,38,64], index: 0, kind: input, shape index: {}]   ;;  %s1870_s1 = inlined_call_operand.vmem [shape: bf16[9,64,64], index: 1, kind: input, shape index: {}]   ;;  %s1871_s2 = inlined_call_operand.vmem [shape: f32[1,64], index: 2, kind: input, shape index: {}]   ;;  %s1872_s3 = inlined_call_operand.vmem [shape: f32[1,64], index: 3, kind: input, shape index: {}]   ;;  %s1873_s4 = inlined_call_operand.vmem [shape: bf16[2,24,64], index: 4, kind: output, shape index: {}]  }
   0x1 LB: > { %s1219_s16 = sadd.s32 4294967295, %s1625_s15   ;;  %p1223_p0 = scmp.ge.s32.totalorder %s1625_s15, 1  ;;  %s1625_s15 = sphi %s1652_s15, %s14_s15  }
   0x2   : > { %p162_p1 = scmp.lt.s32.totalorder %s1625_s15, 3 }
   0x4   : > { %p163_p2 = pnand %p1223_p0, %p162_p1 }
   0x5   : > { %v1570_v0 = vld [vmem:[%s1870_s1 + $0x20] sm:$0xff] (!%p163_p2)   ;;  %p188_p3 = scmp.lt.s32.totalorder (!%p163_p2), %s1219_s16, 1  ;;  %v1572_v2 = vld [vmem:[%s1870_s1 + $0x28] sm:$0xff] (!%p163_p2)   ;;  %v1574_v4 = vld [vmem:[%s1870_s1 + $0x30] sm:$0xff] (!%p163_p2)   ;;  %vm230_vm0 = vsmask.f32 (!%p163_p2), 7424 }
   0x6   : > { %166 = sbr.rel (%p163_p2) target bundleno = 321 (0x141), region = 36  ;;  %v1571_v1 = vld [vmem:[%s1870_s1 + $0x80] sm:$0xff] (!%p163_p2)   ;;  %1421 = vmatprep.subr.bf16.mxu1 (!%p163_p2), %v1570_v0  ;;  %v1573_v3 = vld [vmem:[%s1870_s1 + $0x88] sm:$0xff] (!%p163_p2)   ;;  %v1575_v5 = vld [vmem:[%s1870_s1 + $0x90] sm:$0xff] (!%p163_p2)   ;;  %vm616_vm1 = vsmask.f32 (!%p163_p2), 4352 }
   0x7   : > { %1469 = vmatprep.subr.bf16.mxu0 (!%p163_p2), %v1571_v1  ;;  %1422 = vmatpush3.bf16.msra.mxu1 (!%p163_p2), %v1570_v0  ;;  %v1576_v6 = vld [vmem:[%s1870_s1 + $0x38] sm:$0xff] (!%p163_p2)   ;;  %v1580_v14 = vld [vmem:[%s1870_s1] sm:$0xff] (!%p163_p2)   ;;  %vm270_vm2 = vcmask (!%p163_p2), 523264   ;;  %v1585_v36 = vld [vmem:[%s1870_s1 + $0x8] sm:$0xff] (!%p163_p2)   ;;  %vm416_vm3 = vcmask (!%p163_p2), 1046528   ;;  %vm830_vm4 = vcmask (!%p163_p2), 1045504  }
   0x8   : > { %1470 = vmatpush3.bf16.msra.mxu0 (!%p163_p2), %v1571_v1  ;;  %1423 = vmatprep.subr.bf16.mxu1 (!%p163_p2), %v1572_v2  ;;  %v1577_v7 = vld [vmem:[%s1870_s1 + $0x98] sm:$0xff] (!%p163_p2)   ;;  %v1584_v26 = vld [vmem:[%s1870_s1 + $0xa0] sm:$0xff] (!%p163_p2)   ;;  %v1586_v42 = vld [vmem:[%s1870_s1 + $0xa8] sm:$0xff] (!%p163_p2)   ;;  %vm518_vm5 = vcmask (!%p163_p2), 1044480   ;;  %vm928_vm6 = vsmask.f32 (!%p163_p2), 5376 }
   0x9   : > { %1471 = vmatprep.subr.bf16.mxu0 (!%p163_p2), %v1573_v3  ;;  %v1587_v43 = vld [vmem:[%s1870_s1 + $0x10] sm:$0xff] (!%p163_p2)   ;;  %v1589_v45 = vld [vmem:[%s1870_s1 + $0x18] sm:$0xff] (!%p163_p2)   ;;  %v1591_v48 = vld [vmem:[%s1870_s1 + $0x40] sm:$0xff] (!%p163_p2)   ;;  %vm1160_vm7 = vcmask (!%p163_p2), 519168  }
   0xa   : > { %v1588_v44 = vld [vmem:[%s1870_s1 + $0xb0] sm:$0xff] (!%p163_p2)   ;;  %v1590_v46 = vld [vmem:[%s1870_s1 + $0xb8] sm:$0xff] (!%p163_p2)   ;;  %v1593_v55 = vld [vmem:[%s1870_s1 + $0xc0] sm:$0xff] (!%p163_p2)  }
   0xb   : > { %1424 = vmatpush3.bf16.msra.mxu1 (!%p163_p2), %v1572_v2  ;;  %v1595_v57 = vld [vmem:[%s1870_s1 + $0x48] sm:$0xff] (!%p163_p2)  }
   0xc   : > { %1472 = vmatpush3.bf16.msra.mxu0 (!%p163_p2), %v1573_v3  ;;  %1425 = vmatprep.subr.bf16.mxu1 (!%p163_p2), %v1574_v4  ;;  %v1596_v2 = vld [vmem:[%s1870_s1 + $0xc8] sm:$0xff] (!%p163_p2)  }
   0xd   : > { %s1875_s16 = smov (!%p188_p3, %s1219_s16), 1  ;;  %1473 = vmatprep.subr.bf16.mxu0 %v1575_v5 }
   0xe   : > { %s1560_s27 = smul.u32 20, %s1875_s16 }
   0xf   : > { %1426 = vmatpush3.bf16.msra.mxu1 %v1574_v4  ;;  %s1561_s26 = smul.u32 12, %s1875_s16 }
  0x10   : > { %s1687_s8 = scalar_lea.vmem %s1869_s0, %s1560_s27  ;;  %1474 = vmatpush3.bf16.msra.mxu0 %v1575_v5  ;;  %1427 = vmatprep.subr.bf16.mxu1 %v1576_v6  ;;  %v1597_v5 = vld [vmem:[%s1870_s1 + $0x50] sm:$0xff]  }
  0x11   : > { %v199_v8 = vld [vmem:[%s1687_s8] sm:$0xf]  ;;  %v1694_v9 = vld [vmem:[%s1687_s8 + $0x4] sm:$0xf]  ;;  %v1697_v10 = vld [vmem:[%s1687_s8 + $0x8] sm:$0xf]  ;;  %1475 = vmatprep.subr.bf16.mxu0 %v1577_v7  ;;  %s197_s29 = scalar_lea.vmem %s1873_s4, %s1561_s26 }
  0x12   : > { %v210_v11 = vld [vmem:[%s1687_s8 + $0xc] sm:$0x1]  ;;  %v1234_v12 = vcombine.low %v199_v8, %v1694_v9  ;;  %v501_v15 = vld [vmem:[%s1687_s8] sm:$0x8]  ;;  %v1303_v40 = vcombine.low %v1694_v9, %v1697_v10  ;;  %v807_v51 = vld [vmem:[%s1687_s8 + $0x4] sm:$0xc]  ;;  %v1242_v56 = vcombine.low %v1697_v10, %v1697_v10 }
  0x13   : > { %v1702_v13 = vcombine.low %v1697_v10, %v210_v11  ;;  %v1709_v18 = vcombine.low %v501_v15, %v1694_v9  ;;  %v1712_v19 = vld [vmem:[%s1687_s8 + $0xc] sm:$0xf]  ;;  %1428 = vmatpush3.bf16.msra.mxu1 %v1576_v6  ;;  %v403_v47 = vld [vmem:[%s1687_s8] sm:$0xe]  ;;  %v1759_v52 = vld [vmem:[%s1687_s8 + $0x8] sm:$0xf] }
  0x14   : > { %v232_v16 = vshrl.u32 %v1234_v12, 16  ;;  %v234_v17 = vshll.u32 %v1234_v12, 16  ;;  %v1288_v22 = vcombine.low %v1697_v10, %v1712_v19  ;;  %1476 = vmatpush3.bf16.msra.mxu0 %v1577_v7  ;;  %1433 = vmatprep.subr.bf16.mxu1 %v1580_v14  ;;  %v1257_v49 = vcombine.low %v403_v47, %v1694_v9  ;;  %v809_v53 = vld [vmem:[%s1687_s8 + $0xc] sm:$0xf]  ;;  %v810_v54 = vld [vmem:[%s1687_s8 + $0x10] sm:$0x3] }
  0x15   : > { %v239_v20 = vshll.u32 %v1702_v13, 16  ;;  %v243_v21 = vshrl.u32 %v1702_v13, 16  ;;  %v618_v24 = vshrl.u32 %v1709_v18, 16  ;;  %v621_v25 = vshll.u32 %v1709_v18, 16  ;;  %1481 = vmatprep.subr.bf16.mxu0 %v1584_v26  ;;  %v915_v63 = vld [vmem:[%s1687_s8 + $0x10] sm:$0x7] }
  0x16   : > { %v236_v23 = vrot.slane %v234_v17, 1  ;;  %v626_v28 = vshrl.u32 %v1288_v22, 16  ;;  %v629_v29 = vshll.u32 %v1288_v22, 16  ;;  %v418_v50 = vrot.slane %v1702_v13, 1  ;;  %v1598_v6 = vld [vmem:[%s1870_s1 + $0xd0] sm:$0xff]   ;;  %v1602_v22 = vld [vmem:[%s1870_s1 + $0x60] sm:$0xff]  }
  0x17   : > { %v241_v27 = vrot.slane %v239_v20, 1  ;;  %v620_v31 = vrot.slane %v618_v24, 3  ;;  %v623_v32 = vrot.slane %v621_v25, 4  ;;  %v417_v58 = vrot.slane %v1257_v49, 1  ;;  %v502_v9 = vld [vmem:[%s1687_s8 + $0xc] sm:$0x7] }
  0x18   : > { %v237_v30 = vor.u32 %v236_v23, %v232_v16  ;;  %v628_v34 = vrot.slane %v626_v28, 3  ;;  %v631_v35 = vrot.slane %v629_v29, 4  ;;  %v1319_v59 = vcombine.low %v807_v51, %v1759_v52  ;;  %v1600_v16 = vld [vmem:[%s1870_s1 + $0xd8] sm:$0xff]   ;;  %v1610_v13 = vld [vmem:[%s1870_s1 + $0xf0] sm:$0xff]   ;;  %v1357_v47 = vld [vmem:[%s1871_s2] ss:$0 sm:$0xff] }
  0x19   : > { %v245_v33 = vor.u32 %v243_v21, %v241_v27  ;;  %v624_v38 = vor.u32 %v623_v32, %v620_v31  ;;  %v1320_v60 = vcombine.low %v809_v53, %v810_v54  ;;  %v1304_v0 = vcombine.low %v1712_v19, %v1712_v19  ;;  %v1611_v31 = vld [vmem:[%s1870_s1 + $0x78] sm:$0xff]   ;;  %v1027_v32 = vld [vmem:[%s1687_s8 + $0x4] sm:$0x8] }
  0x1a   : > { %v242_v37 = vsel %vm230_vm0, %v237_v30, %v241_v27  ;;  %v632_v39 = vor.u32 %v631_v35, %v628_v34  ;;  %v831_v61 = vrot.slane %v1319_v59, 2  ;;  %v419_v1 = vsel %vm416_vm3, %v417_v58, %v418_v50  ;;  %v1607_v27 = vld [vmem:[%s1870_s1 + $0x68] sm:$0xff]   ;;  %v1609_v30 = vld [vmem:[%s1870_s1 + $0x70] sm:$0xff]   ;;  %v1614_v35 = vld [vmem:[%s1870_s1 + $0x100] sm:$0xff]  }
  0x1b   : > { %1429 = vmatprep.mubr.msk.bf16.mxu1 %vm270_vm2, %v242_v37  ;;  %v832_v62 = vrot.slane %v1320_v60, 2  ;;  %v1783_v4 = vcombine.low %v809_v53, %v915_v63  ;;  %v930_v7 = vshrl.u32 %v1319_v59, 16  ;;  %v933_v8 = vshll.u32 %v1319_v59, 16 }
  0x1c   : > { %1430 = vmatmul.mubr.msk.bf16.vlgmr.msra.gmra.mrb[0].mxu1 %vm270_vm2, %v245_v33  ;;  %v633_v41 = vsel %vm616_vm1, %v624_v38, %v632_v39  ;;  %v1273_v15 = vcombine.low %v1697_v10, %v502_v9  ;;  %v519_v23 = vrot.slane %v1709_v18, 3  ;;  %v1606_v10 = vld [vmem:[%s1870_s1 + $0xe0] sm:$0xff]   ;;  %v1608_v18 = vld [vmem:[%s1870_s1 + $0xe8] sm:$0xff]   ;;  %v1612_v33 = vld [vmem:[%s1870_s1 + $0xf8] sm:$0xff]   ;;  %v1350_v34 = vcombine.low %v1027_v32, %v1759_v52 }
  0x1d   : > { %1434 = vmatpush3.bf16.msra.mxu1 %v1580_v14  ;;  %1441 = vmatprep.mubr.msk.bf16.mxu1 %vm270_vm2, %v1234_v12  ;;  %v833_v3 = vsel %vm830_vm4, %v831_v61, %v832_v62  ;;  %v938_v11 = vshrl.u32 %v1783_v4, 16  ;;  %v941_v12 = vshll.u32 %v1783_v4, 16  ;;  %v1599_v14 = vld [vmem:[%s1870_s1 + $0x58] sm:$0xff]   ;;  %v932_v17 = vrot.slane %v930_v7, 2  ;;  %v1615_v38 = vld [vmem:[%s1870_s1 + $0x108] sm:$0xff]  }
  0x1e   : > { %1477 = vmatprep.mubr.msk.bf16.mxu0 %vm270_vm2, %v633_v41  ;;  %1435 = vmatprep.subr.bf16.mxu1 %v1585_v36  ;;  %v935_v19 = vrot.slane %v933_v8, 3  ;;  %v520_v24 = vrot.slane %v1273_v15, 3  ;;  %v1041_v37 = vrot.slane %v1783_v4, 3  ;;  %v1617_v41 = vld [vmem:[%s1870_s1 + $0x118] sm:$0xff]  }
  0x1f   : > { %1478 = vmatmul.mubr.msk.bf16.vlgmr.msra.gmra.mrb[0].mxu0 %vm270_vm2, %v632_v39  ;;  %v940_v20 = vrot.slane %v938_v11, 2  ;;  %v943_v21 = vrot.slane %v941_v12, 3 }
  0x20   : > { %1482 = vmatpush3.bf16.msra.mxu0 %v1584_v26  ;;  %1489 = vmatprep.mubr.msk.bf16.mxu0 %vm270_vm2, %v1303_v40  ;;  %v936_v25 = vor.u32 %v935_v19, %v932_v17  ;;  %v521_v28 = vsel %vm518_vm5, %v519_v23, %v520_v24  ;;  %v1616_v40 = vld [vmem:[%s1870_s1 + $0x110] sm:$0xff]  }
  0x21   : > { %1483 = vmatprep.subr.bf16.mxu0 %v1586_v42  ;;  %1436 = vmatpush3.bf16.msra.mxu1 %v1585_v36  ;;  %v944_v26 = vor.u32 %v943_v21, %v940_v20  ;;  %v1040_v36 = vrot.slane %v1350_v34, 3 }
  0x22   : > { %1437 = vmatprep.subr.bf16.mxu1 %v1587_v43 }
  0x23   : > { %v945_v29 = vsel %vm928_vm6, %v936_v25, %v944_v26  ;;  %v1042_v39 = vsel %vm518_vm5, %v1040_v36, %v1041_v37 }
  0x24   : > { %1484 = vmatpush3.bf16.msra.mxu0 %v1586_v42 }
  0x25   : > { %1485 = vmatprep.subr.bf16.mxu0 %v1588_v44  ;;  %1438 = vmatpush3.bf16.msra.mxu1 %v1587_v43 }
  0x26   : > { %1439 = vmatprep.subr.bf16.mxu1 %v1589_v45 }
  0x28   : > { %1486 = vmatpush3.bf16.msra.mxu0 %v1588_v44 }
  0x29   : > { %1487 = vmatprep.subr.bf16.mxu0 %v1590_v46  ;;  %1440 = vmatpush3.bf16.msra.mxu1 %v1589_v45 }
  0x2a   : > { %1445 = vmatprep.subr.bf16.mxu1 %v1591_v48 }
  0x2c   : > { %1488 = vmatpush3.bf16.msra.mxu0 %v1590_v46  ;;  %1442 = vmatmul.mubr.msk.bf16.vlgmr.msra.gmra.mrb[0].mxu1 %vm270_vm2, %v1242_v56 }
  0x2d   : > { %1493 = vmatprep.subr.bf16.mxu0 %v1593_v55  ;;  %1446 = vmatpush3.bf16.msra.mxu1 %v1591_v48 }
  0x2e   : > { %1447 = vmatprep.subr.bf16.mxu1 %v1595_v57  ;;  %1453 = vmatprep.mubr.msk.bf16.mxu1 %vm270_vm2, %v419_v1 }
  0x2f   : > { %1490 = vmatmul.mubr.msk.bf16.vlgmr.msra.gmra.mrb[0].mxu0 %vm270_vm2, %v1304_v0 }
  0x30   : > { %1494 = vmatpush3.bf16.msra.mxu0 %v1593_v55  ;;  %1501 = vmatprep.mubr.msk.bf16.mxu0 %vm270_vm2, %v833_v3 }
  0x31   : > { %1495 = vmatprep.subr.bf16.mxu0 %v1596_v2  ;;  %1448 = vmatpush3.bf16.msra.mxu1 %v1595_v57 }
  0x32   : > { %1449 = vmatprep.subr.bf16.mxu1 %v1597_v5 }
  0x34   : > { %1496 = vmatpush3.bf16.msra.mxu0 %v1596_v2 }
  0x35   : > { %1497 = vmatprep.subr.bf16.mxu0 %v1598_v6  ;;  %1450 = vmatpush3.bf16.msra.mxu1 %v1597_v5 }
  0x36   : > { %1451 = vmatprep.subr.bf16.mxu1 %v1599_v14 }
  0x38   : > { %1498 = vmatpush3.bf16.msra.mxu0 %v1598_v6 }
  0x39   : > { %1499 = vmatprep.subr.bf16.mxu0 %v1600_v16  ;;  %1452 = vmatpush3.bf16.msra.mxu1 %v1599_v14 }
  0x3a   : > { %1457 = vmatprep.subr.bf16.mxu1 %v1602_v22 }
  0x3c   : > { %1500 = vmatpush3.bf16.msra.mxu0 %v1600_v16  ;;  %1454 = vmatmul.mubr.msk.bf16.vlgmr.msra.gmra.mrb[0].mxu1 %vm270_vm2, %v418_v50  ;;  %v1358_v50 = vld [vmem:[%s1872_s3] ss:$0 sm:$0xff] }
  0x3d   : > { %1505 = vmatprep.subr.bf16.mxu0 %v1606_v10  ;;  %1458 = vmatpush3.bf16.msra.mxu1 %v1602_v22 }
  0x3e   : > { %1459 = vmatprep.subr.bf16.mxu1 %v1607_v27  ;;  %1465 = vmatprep.mubr.msk.bf16.mxu1 %vm270_vm2, %v521_v28 }
  0x3f   : > { %1502 = vmatmul.mubr.msk.bf16.vlgmr.msra.gmra.mrb[0].mxu0 %vm270_vm2, %v832_v62 }
  0x40   : > { %1506 = vmatpush3.bf16.msra.mxu0 %v1606_v10  ;;  %1513 = vmatprep.mubr.msk.bf16.mxu0 %vm270_vm2, %v945_v29 }
  0x41   : > { %1507 = vmatprep.subr.bf16.mxu0 %v1608_v18  ;;  %1460 = vmatpush3.bf16.msra.mxu1 %v1607_v27 }
  0x42   : > { %1461 = vmatprep.subr.bf16.mxu1 %v1609_v30 }
  0x44   : > { %1508 = vmatpush3.bf16.msra.mxu0 %v1608_v18 }
  0x45   : > { %1509 = vmatprep.subr.bf16.mxu0 %v1610_v13  ;;  %1462 = vmatpush3.bf16.msra.mxu1 %v1609_v30 }
  0x46   : > { %1463 = vmatprep.subr.bf16.mxu1 %v1611_v31 }
  0x48   : > { %1510 = vmatpush3.bf16.msra.mxu0 %v1610_v13 }
  0x49   : > { %1511 = vmatprep.subr.bf16.mxu0 %v1612_v33  ;;  %1464 = vmatpush3.bf16.msra.mxu1 %v1611_v31 }
  0x4c   : > { %1512 = vmatpush3.bf16.msra.mxu0 %v1612_v33  ;;  %1466 = vmatmul.mubr.msk.bf16.vlgmr.msra.gmra.mrb[0].mxu1 %vm270_vm2, %v520_v24 }
  0x4d   : > { %1517 = vmatprep.subr.bf16.mxu0 %v1614_v35 }
  0x4f   : > { %1514 = vmatmul.mubr.msk.bf16.vlgmr.msra.gmra.mrb[0].mxu0 %vm270_vm2, %v944_v26 }
  0x50   : > { %1518 = vmatpush3.bf16.msra.mxu0 %v1614_v35  ;;  %1525 = vmatprep.mubr.msk.bf16.mxu0 %vm270_vm2, %v1042_v39 }
  0x51   : > { %1519 = vmatprep.subr.bf16.mxu0 %v1615_v38 }
  0x54   : > { %1520 = vmatpush3.bf16.msra.mxu0 %v1615_v38 }
  0x55   : > { %1521 = vmatprep.subr.bf16.mxu0 %v1616_v40 }
  0x58   : > { %1522 = vmatpush3.bf16.msra.mxu0 %v1616_v40 }
  0x59   : > { %1523 = vmatprep.subr.bf16.mxu0 %v1617_v41 }
  0x5c   : > { %1524 = vmatpush3.bf16.msra.mxu0 %v1617_v41 }
  0x5f   : > { %1526 = vmatmul.mubr.msk.bf16.vlgmr.msra.gmra.mrb[0].mxu0 %vm270_vm2, %v1041_v37 }
 0x11f   : > { %v1467_v42 = vpop.f32.mrb[0].mxu1 }
 0x120   : > { %v586_v43 = vpop.f32.mrb[1].mxu1 }
 0x121   : > { %v1468_v44 = vpop.f32.mrb[2].mxu1 }
 0x122   : > { %v589_v45 = vpop.f32.mrb[3].mxu1 }
 0x132   : > { %v1527_v46 = vpop.f32.mrb[0].mxu0 }
 0x133   : > { %v1529_v48 = vadd.f32 %v1527_v46, %v1467_v42  ;;  %v1107_v49 = vpop.f32.mrb[1].mxu0 }
 0x134   : > { %v1530_v51 = vadd.f32 %v1107_v49, %v586_v43  ;;  %v1528_v52 = vpop.f32.mrb[2].mxu0 }
 0x135   : > { %v1133_v53 = vmul.f32 %v1529_v48, %v1357_v47  ;;  %v1110_v54 = vpop.f32.mrb[3].mxu0 }
 0x136   : > { %v1131_v55 = vmul.f32 %v1530_v51, %v1357_v47  ;;  %v1531_v56 = vadd.f32 %v1110_v54, %v589_v45 }
 0x137   : > { %v1143_v57 = vadd.f32 %v1358_v50, %v1133_v53 }
 0x138   : > { %v1141_v58 = vadd.f32 %v1358_v50, %v1131_v55  ;;  %v1132_v59 = vmul.f32 %v1531_v56, %v1357_v47 }
 0x139   : > { %v1146_v60 = vmax.f32 %v1143_v57, 0.0 }
 0x13a   : > { %v1144_v61 = vmax.f32 %v1141_v58, 0.0  ;;  %v1142_v62 = vadd.f32 %v1358_v50, %v1132_v59 }
 0x13b   : > { %v1366_v63 = vpack.c.bf16 %v1146_v60, %v1146_v60 }
 0x13c   : > { %v1364_v0 = vpack.c.bf16 %v1144_v61, %v1144_v61  ;;  %v1145_v1 = vmax.f32 %v1142_v62, 0.0 }
 0x13d   : > { %1163 = vst.msk [vmem:[%s197_s29 + $0x8] sm:$0xf] %vm1160_vm7, %v1366_v63 }
 0x13e   : > { %1161 = vst.msk [vmem:[%s197_s29] sm:$0xf] %vm1160_vm7, %v1364_v0  ;;  %v1365_v2 = vpack.c.bf16 %v1145_v1, %v1145_v1 }
 0x140   : > { %1162 = vst.msk [vmem:[%s197_s29 + $0x4] sm:$0xf] %vm1160_vm7, %v1365_v2 }
 0x141 PF: > { %s14_s15 = sadd.s32 1, %s1625_s15  }
 0x142   : > { %p11_p4 = scmp.ge.s32.totalorder %s14_s15, 4  }
 0x144   :  { %13 = sbr.rel (!%p11_p4) target bundleno = 1 (0x1), region = 74 }

// kernel: wavelet_model_noatt.14
= control target key start
LH: loop header
LB: loop body
LE: loop exit
PB: predicated region body
PF: predicated region fallthrough
CT: control target
= control target key end

     0   :  { %vm33_vm0 = vcmask 519168   ;;  %vm46_vm1 = vcmask 1043968   ;;  %s123_s0 = inlined_call_operand.vmem [shape: bf16[8,64], index: 0, kind: input, shape index: {}]   ;;  %s124_s1 = inlined_call_operand.vmem [shape: bf16[8,64], index: 1, kind: input, shape index: {}]   ;;  %s125_s2 = inlined_call_operand.vmem [shape: bf16[8,64], index: 2, kind: input, shape index: {}]   ;;  %s126_s3 = inlined_call_operand.vmem [shape: bf16[8,64], index: 3, kind: input, shape index: {}]   ;;  %s127_s4 = inlined_call_operand.vmem [shape: bf16[8,256], index: 4, kind: output, shape index: {}]  }
   0x1   :  { %v17_v0 = vld [vmem:[%s123_s0] sm:$0xf] }
   0x2   :  { %v20_v1 = vld [vmem:[%s124_s1] sm:$0xf]  ;;  %v18_v3 = vunpack.c.l.bf16 %v17_v0 }
   0x3   :  { %v23_v2 = vld [vmem:[%s125_s2] sm:$0xf]  ;;  %v21_v4 = vunpack.c.l.bf16 %v20_v1  ;;  %s73_s2 = smov 64  }
   0x4   :  { %v24_v5 = vunpack.c.l.bf16 %v23_v2  ;;  %v26_v6 = vld [vmem:[%s126_s3] sm:$0xf]  ;;  %v19_v8 = vmul.f32 0.5, %v18_v3 }
   0x5   :  { %v27_v7 = vunpack.c.l.bf16 %v26_v6  ;;  %v22_v9 = vmul.f32 0.5, %v21_v4 }
   0x6   :  { %v25_v10 = vmul.f32 0.5, %v24_v5  ;;  %v35_v11 = vsub.f32 0.0, %v19_v8 }
   0x7   :  { %v53_v12 = vsub.f32 %v19_v8, %v22_v9  ;;  %v29_v13 = vadd.f32 %v22_v9, %v19_v8  ;;  %v28_v14 = vmul.f32 0.5, %v27_v7 }
   0x8   :  { %v36_v15 = vsub.f32 %v35_v11, %v22_v9  ;;  %v48_v16 = vadd.f32 %v35_v11, %v22_v9 }
   0x9   :  { %v54_v17 = vsub.f32 %v53_v12, %v25_v10  ;;  %v30_v18 = vadd.f32 %v29_v13, %v25_v10 }
   0xa   :  { %v37_v19 = vadd.f32 %v36_v15, %v25_v10  ;;  %v49_v20 = vsub.f32 %v48_v16, %v25_v10 }
   0xb   :  { %v31_v21 = vadd.f32 %v30_v18, %v28_v14  ;;  %v55_v23 = vadd.f32 %v54_v17, %v28_v14 }
   0xc   :  { %v38_v22 = vadd.f32 %v37_v19, %v28_v14  ;;  %v50_v25 = vadd.f32 %v49_v20, %v28_v14 }
   0xd   :  { %v32_v24 = vpack.c.bf16 %v31_v21, %v31_v21  ;;  %v71_v28 = vpack.c.bf16 %v55_v23, %v55_v23 }
   0xe   :  { %v70_v26 = vpack.c.bf16 %v38_v22, %v38_v22  ;;  %v51_v27 = vpack.c.bf16 %v50_v25, %v50_v25 }
   0xf   :  { %34 = vst.msk [vmem:[%s127_s4] sm:$0xf] %vm33_vm0, %v32_v24 }
  0x10   :  { %43 = vrot.lane.b32.xlu0 %v70_v26, %s73_s2  ;;  %52 = vst.msk [vmem:[%s127_s4 + $0x4] sm:$0xf] %vm33_vm0, %v51_v27 }
  0x14   :  { %60 = vrot.lane.b32.xlu0 %v71_v28, %s73_s2 }
  0x82   :  { %v44_v29 = vpop.permute.xlu0 %43 }
  0x83   :  { %47 = vst.msk [vmem:[%s127_s4] sm:$0xf] %vm46_vm1, %v44_v29 }
  0x86   :  { %v61_v30 = vpop.permute.xlu0 %60 }
  0x87   :  { %63 = vst.msk [vmem:[%s127_s4 + $0x4] sm:$0xf] %vm46_vm1, %v61_v30 }

// kernel: wavelet_model_noatt.16
= control target key start
LH: loop header
LB: loop body
LE: loop exit
PB: predicated region body
PF: predicated region fallthrough
CT: control target
= control target key end

     0   :  { %s103_s0 = inlined_call_operand.vmem [shape: bf16[8,128], index: 0, kind: input, shape index: {}]   ;;  %s104_s1 = inlined_call_operand.vmem [shape: bf16[8,128], index: 1, kind: input, shape index: {}]   ;;  %s105_s2 = inlined_call_operand.vmem [shape: bf16[8,128], index: 2, kind: input, shape index: {}]   ;;  %s106_s3 = inlined_call_operand.vmem [shape: bf16[8,128], index: 3, kind: input, shape index: {}]   ;;  %s107_s4 = inlined_call_operand.vmem [shape: bf16[8,512], index: 4, kind: output, shape index: {}]  }
   0x1   :  { %v17_v0 = vld [vmem:[%s103_s0] sm:$0xf] }
   0x2   :  { %v20_v1 = vld [vmem:[%s104_s1] sm:$0xf]  ;;  %v18_v3 = vunpack.c.l.bf16 %v17_v0 }
   0x3   :  { %v23_v2 = vld [vmem:[%s105_s2] sm:$0xf]  ;;  %v21_v4 = vunpack.c.l.bf16 %v20_v1 }
   0x4   :  { %v24_v5 = vunpack.c.l.bf16 %v23_v2  ;;  %v26_v6 = vld [vmem:[%s106_s3] sm:$0xf]  ;;  %v19_v8 = vmul.f32 0.5, %v18_v3 }
   0x5   :  { %v27_v7 = vunpack.c.l.bf16 %v26_v6  ;;  %v22_v9 = vmul.f32 0.5, %v21_v4 }
   0x6   :  { %v25_v10 = vmul.f32 0.5, %v24_v5  ;;  %v34_v13 = vsub.f32 0.0, %v19_v8 }
   0x7   :  { %v28_v11 = vmul.f32 0.5, %v27_v7  ;;  %v29_v12 = vadd.f32 %v22_v9, %v19_v8  ;;  %v45_v14 = vsub.f32 %v19_v8, %v22_v9 }
   0x8   :  { %v35_v16 = vsub.f32 %v34_v13, %v22_v9  ;;  %v40_v17 = vadd.f32 %v34_v13, %v22_v9 }
   0x9   :  { %v30_v15 = vadd.f32 %v29_v12, %v25_v10  ;;  %v46_v18 = vsub.f32 %v45_v14, %v25_v10 }
   0xa   :  { %v36_v20 = vadd.f32 %v35_v16, %v25_v10  ;;  %v41_v21 = vsub.f32 %v40_v17, %v25_v10 }
   0xb   :  { %v31_v19 = vadd.f32 %v30_v15, %v28_v11  ;;  %v47_v22 = vadd.f32 %v46_v18, %v28_v11 }
   0xc   :  { %v37_v24 = vadd.f32 %v36_v20, %v28_v11  ;;  %v42_v25 = vadd.f32 %v41_v21, %v28_v11 }
   0xd   :  { %v32_v23 = vpack.c.bf16 %v31_v19, %v31_v19  ;;  %v48_v26 = vpack.c.bf16 %v47_v22, %v47_v22 }
   0xe   :  { %v38_v27 = vpack.c.bf16 %v37_v24, %v37_v24  ;;  %v43_v28 = vpack.c.bf16 %v42_v25, %v42_v25 }
   0xf   :  { %33 = vst [vmem:[%s107_s4] sm:$0xf] %v32_v23  ;;  %49 = vst [vmem:[%s107_s4 + $0xc] sm:$0xf] %v48_v26 }
  0x10   :  { %39 = vst [vmem:[%s107_s4 + $0x4] sm:$0xf] %v38_v27  ;;  %44 = vst [vmem:[%s107_s4 + $0x8] sm:$0xf] %v43_v28 }

// kernel: wavelet_model_noatt.19
= control target key start
LH: loop header
LB: loop body
LE: loop exit
PB: predicated region body
PF: predicated region fallthrough
CT: control target
= control target key end

     0   :  { %v224_v0 = vmov 0.0|0.0   ;;  %vm225_vm0 = vmmov 0   ;;  %v226_v4 = vmov 0.0   ;;  %v47_v18 = vlaneseq  ;;  %s307_s1 = inlined_call_operand.vmem [shape: f32[128,1], index: 1, kind: input, shape index: {}]   ;;  %s308_s2 = inlined_call_operand.<no memory space> [shape: f32[1,1], index: 2, kind: input, shape index: {}]   ;;  %s309_s0 = inlined_call_operand.vmem [shape: bf16[2,1,128], index: 0, kind: input, shape index: {}]   ;;  %s310_s3 = inlined_call_operand.vmem [shape: f32[2,1], index: 3, kind: output, shape index: {}]  }
   0x1   :  { %193 = vmatprep.subr.bf16.mxu0 %v224_v0  ;;  %v22_v1 = vld [vmem:[%s307_s1] sm:$0xff]  ;;  %v23_v2 = vld [vmem:[%s307_s1 + $0x8] sm:$0xff]  ;;  %v24_v3 = vld [vmem:[%s307_s1 + $0x10] sm:$0xff]  ;;  %190 = vmatprep.mubr.msk.f32.mxu0 %vm225_vm0, %v226_v4  ;;  %v8_v5 = vstv %s308_s2  ;;  %vm55_vm1 = vcmask 1041409   ;;  %vm134_vm2 = vcmask 1024  }
   0x2   :  { %v194_v6 = vpack.c.bf16 %v23_v2, %v22_v1  ;;  %v25_v7 = vld [vmem:[%s307_s1 + $0x18] sm:$0xff]  ;;  %9 = vst [vmem:[#allocation2] sm:$0x1] %v8_v5  ;;  %v26_v9 = vld [vmem:[%s307_s1 + $0x20] sm:$0xff]  ;;  %v27_v10 = vld [vmem:[%s307_s1 + $0x28] sm:$0xff]  ;;  %v48_v23 = vshrl.u32 %v47_v18, 7 }
   0x3   :  { %v197_v8 = vpack.c.bf16 %v25_v7, %v24_v3  ;;  %v200_v11 = vpack.c.bf16 %v27_v10, %v26_v9  ;;  %v28_v12 = vld [vmem:[%s307_s1 + $0x30] sm:$0xff]  ;;  %v29_v13 = vld [vmem:[%s307_s1 + $0x38] sm:$0xff]  ;;  %v30_v15 = vld [vmem:[%s307_s1 + $0x40] sm:$0xff] }
   0x4   :  { %195 = vmatpush3.bf16.msra.mxu0 %v194_v6  ;;  %v203_v14 = vpack.c.bf16 %v29_v13, %v28_v12  ;;  %v31_v16 = vld [vmem:[%s307_s1 + $0x48] sm:$0xff]  ;;  %v32_v19 = vld [vmem:[%s307_s1 + $0x50] sm:$0xff]  ;;  %v33_v20 = vld [vmem:[%s307_s1 + $0x58] sm:$0xff]  ;;  %v49_v30 = vsub.s32 0, %v48_v23 }
   0x5   :  { %196 = vmatprep.subr.bf16.mxu0 %v224_v0  ;;  %v206_v17 = vpack.c.bf16 %v31_v16, %v30_v15  ;;  %v209_v21 = vpack.c.bf16 %v33_v20, %v32_v19  ;;  %v34_v22 = vld [vmem:[%s307_s1 + $0x60] sm:$0xff]  ;;  %v35_v24 = vld [vmem:[%s307_s1 + $0x68] sm:$0xff]  ;;  %v36_v31 = vld [vmem:[%s307_s1 + $0x70] sm:$0xff] }
   0x6   :  { %v16_v25 = vld [vmem:[%s309_s0] sm:$0x1]  ;;  %v17_v26 = vld [vmem:[%s309_s0 + $0x1] sm:$0x1]  ;;  %v212_v27 = vpack.c.bf16 %v35_v24, %v34_v22  ;;  %v37_v32 = vld [vmem:[%s307_s1 + $0x78] sm:$0xff] }
   0x7   :  { %v18_v28 = vunpack.c.l.bf16 %v16_v25  ;;  %v19_v29 = vunpack.c.l.bf16 %v17_v26  ;;  %v215_v33 = vpack.c.bf16 %v37_v32, %v36_v31 }
   0x8   :  { %198 = vmatpush3.bf16.msra.mxu0 %v197_v8 }
   0x9   :  { %199 = vmatprep.subr.bf16.mxu0 %v224_v0  ;;  %v50_v34 = vrot.slane %v18_v28, %v49_v30  ;;  %v54_v35 = vrot.slane %v19_v29, %v49_v30  ;;  %v140_v37 = vld [vmem:[#allocation2] ss:$0 sm:$0xff] }
   0xb   :  { %v56_v36 = vsel %vm55_vm1, %v54_v35, %v50_v34 }
   0xc   :  { %201 = vmatpush3.bf16.msra.mxu0 %v200_v11 }
   0xd   :  { %202 = vmatprep.subr.bf16.mxu0 %v224_v0 }
  0x10   :  { %204 = vmatpush3.bf16.msra.mxu0 %v203_v14 }
  0x11   :  { %205 = vmatprep.subr.bf16.mxu0 %v224_v0 }
  0x14   :  { %207 = vmatpush3.bf16.msra.mxu0 %v206_v17 }
  0x15   :  { %208 = vmatprep.subr.bf16.mxu0 %v224_v0 }
  0x18   :  { %210 = vmatpush3.bf16.msra.mxu0 %v209_v21 }
  0x19   :  { %211 = vmatprep.subr.bf16.mxu0 %v224_v0 }
  0x1c   :  { %213 = vmatpush3.bf16.msra.mxu0 %v212_v27 }
  0x1d   :  { %214 = vmatprep.subr.bf16.mxu0 %v224_v0 }
  0x20   :  { %216 = vmatpush3.bf16.msra.mxu0 %v215_v33 }
  0x23   :  { %191 = vmatmul.mubr.f32.vlgmr.msra.gmra.mrb[0].mxu0 %v56_v36 }
  0xf6   :  { %v124_v38 = vpop.f32.mrb[0].mxu0 }
  0xf7   :  { %v125_v39 = vadd.f32 %v140_v37, %v124_v38  ;;  %v192_v40 = vpop.f32.mrb[1].mxu0 }
  0xf9   :  { %v128_v41 = vsub.f32 0.0, %v125_v39 }
  0xfb   :  { %v129_v42 = vmul.f32 1.442695, %v128_v41 }
  0xfd   :  { %220 = vpow2.f32 %v129_v42 }
 0x107   :  { %v221_v43 = vpop.eup %220 }
 0x108   :  { %v131_v44 = vadd.f32 1.0, %v221_v43 }
 0x10a   :  { %222 = vrcp.f32 %v131_v44 }
 0x114   :  { %v223_v45 = vpop.eup %222 }
 0x115   :  { %135 = vst.msk [vmem:[%s310_s3] sm:$0x3] %vm134_vm2, %v223_v45 }

// kernel: wavelet_model_noatt.18
= control target key start
LH: loop header
LB: loop body
LE: loop exit
PB: predicated region body
PF: predicated region fallthrough
CT: control target
= control target key end

     0   :  { %s1914_s15 = smov 0   ;;  %s2259_s0 = inlined_call_operand.vmem [shape: bf16[2,11,128], index: 0, kind: input, shape index: {}]   ;;  %s2260_s1 = inlined_call_operand.vmem [shape: bf16[9,128,128], index: 1, kind: input, shape index: {}]   ;;  %s2261_s2 = inlined_call_operand.vmem [shape: f32[1,128], index: 2, kind: input, shape index: {}]   ;;  %s2262_s3 = inlined_call_operand.vmem [shape: f32[1,128], index: 3, kind: input, shape index: {}]   ;;  %s2263_s4 = inlined_call_operand.vmem [shape: bf16[2,3,128], index: 4, kind: output, shape index: {}]  }
   0x1 LB: > { %s1286_s16 = sadd.s32 4294967295, %s1885_s15   ;;  %p1290_p0 = scmp.ge.s32.totalorder %s1885_s15, 1  ;;  %s1885_s15 = sphi %s1914_s15, %s14_s15  }
   0x2   : > { %p162_p1 = scmp.lt.s32.totalorder %s1885_s15, 3 }
   0x4   : > { %p163_p2 = pnand %p1290_p0, %p162_p1 }
   0x5   : > { %v1803_v0 = vld [vmem:[%s2260_s1 + $0x40] sm:$0xff] (!%p163_p2)   ;;  %v1887_v1 = vmov (!%p163_p2), 0.0   ;;  %v1805_v3 = vld [vmem:[%s2260_s1 + $0x48] sm:$0xff] (!%p163_p2)   ;;  %vm1888_vm0 = vmmov (!%p163_p2), 0   ;;  %p187_p3 = scmp.lt.s32.totalorder (!%p163_p2), %s1286_s16, 1  ;;  %v1807_v5 = vld [vmem:[%s2260_s1 + $0x50] sm:$0xff] (!%p163_p2)  }
   0x6   : > { %166 = sbr.rel (%p163_p2) target bundleno = 391 (0x187), region = 36  ;;  %1584 = vmatprep.subr.bf16.mxu1 (!%p163_p2), %v1887_v1  ;;  %1664 = vmatprep.subr.bf16.mxu0 (!%p163_p2), %v1887_v1  ;;  %v1804_v2 = vld [vmem:[%s2260_s1 + $0x100] sm:$0xff] (!%p163_p2)   ;;  %v1806_v4 = vld [vmem:[%s2260_s1 + $0x108] sm:$0xff] (!%p163_p2)   ;;  %v1808_v6 = vld [vmem:[%s2260_s1 + $0x110] sm:$0xff] (!%p163_p2)   ;;  %vm1227_vm1 = vcmask (!%p163_p2), 1041408  }
   0x7   : > { %1585 = vmatpush3.bf16.msra.mxu1 (!%p163_p2), %v1803_v0  ;;  %1600 = vmatprep.mubr.msk.bf16.mxu1 (!%p163_p2), %vm1888_vm0, %v1887_v1  ;;  %v1809_v7 = vld [vmem:[%s2260_s1 + $0x58] sm:$0xff] (!%p163_p2)   ;;  %v1811_v9 = vld [vmem:[%s2260_s1 + $0x60] sm:$0xff] (!%p163_p2)   ;;  %v1813_v13 = vld [vmem:[%s2260_s1 + $0x68] sm:$0xff] (!%p163_p2)   ;;  %vm1228_vm2 = vsmask.f32 (!%p163_p2), 1280 }
   0x8   : > { %1665 = vmatpush3.bf16.msra.mxu0 (!%p163_p2), %v1804_v2  ;;  %1586 = vmatprep.subr.bf16.mxu1 (!%p163_p2), %v1887_v1  ;;  %v1810_v8 = vld [vmem:[%s2260_s1 + $0x118] sm:$0xff] (!%p163_p2)   ;;  %v1812_v10 = vld [vmem:[%s2260_s1 + $0x120] sm:$0xff] (!%p163_p2)   ;;  %v1814_v14 = vld [vmem:[%s2260_s1 + $0x128] sm:$0xff] (!%p163_p2)  }
   0x9   : > { %1666 = vmatprep.subr.bf16.mxu0 (!%p163_p2), %v1887_v1  ;;  %1680 = vmatprep.mubr.msk.bf16.mxu0 (!%p163_p2), %vm1888_vm0, %v1887_v1  ;;  %v1815_v16 = vld [vmem:[%s2260_s1 + $0x70] sm:$0xff] (!%p163_p2)   ;;  %v1817_v21 = vld [vmem:[%s2260_s1 + $0x78] sm:$0xff] (!%p163_p2)   ;;  %v1820_v24 = vld [vmem:[%s2260_s1] sm:$0xff] (!%p163_p2)  }
   0xa   : > { %v1816_v17 = vld [vmem:[%s2260_s1 + $0x130] sm:$0xff] (!%p163_p2)   ;;  %v1818_v22 = vld [vmem:[%s2260_s1 + $0x138] sm:$0xff] (!%p163_p2)   ;;  %v1822_v26 = vld [vmem:[%s2260_s1 + $0x140] sm:$0xff] (!%p163_p2)  }
   0xb   : > { %1587 = vmatpush3.bf16.msra.mxu1 (!%p163_p2), %v1805_v3  ;;  %v1823_v27 = vld [vmem:[%s2260_s1 + $0x8] sm:$0xff] (!%p163_p2)   ;;  %v1825_v29 = vld [vmem:[%s2260_s1 + $0x10] sm:$0xff] (!%p163_p2)   ;;  %v1827_v31 = vld [vmem:[%s2260_s1 + $0x18] sm:$0xff] (!%p163_p2)  }
   0xc   : > { %1667 = vmatpush3.bf16.msra.mxu0 (!%p163_p2), %v1806_v4  ;;  %1588 = vmatprep.subr.bf16.mxu1 (!%p163_p2), %v1887_v1  ;;  %v1824_v28 = vld [vmem:[%s2260_s1 + $0x148] sm:$0xff] (!%p163_p2)   ;;  %v1826_v30 = vld [vmem:[%s2260_s1 + $0x150] sm:$0xff] (!%p163_p2)   ;;  %v1828_v32 = vld [vmem:[%s2260_s1 + $0x158] sm:$0xff] (!%p163_p2)  }
   0xd   : > { %s2265_s16 = smov (!%p187_p3, %s1286_s16), 1  ;;  %1668 = vmatprep.subr.bf16.mxu0 %v1887_v1  ;;  %v1829_v33 = vld [vmem:[%s2260_s1 + $0x20] sm:$0xff]   ;;  %v1831_v35 = vld [vmem:[%s2260_s1 + $0x28] sm:$0xff]   ;;  %v1833_v38 = vld [vmem:[%s2260_s1 + $0x30] sm:$0xff]  }
   0xe   : > { %s1502_s5 = sshll.u32 %s2265_s16, 3  ;;  %v1830_v34 = vld [vmem:[%s2260_s1 + $0x160] sm:$0xff]   ;;  %v1832_v36 = vld [vmem:[%s2260_s1 + $0x168] sm:$0xff]   ;;  %v1834_v40 = vld [vmem:[%s2260_s1 + $0x170] sm:$0xff]   ;;  %s1293_s28 = sshll.u32 %s2265_s16, 1 }
   0xf   : > { %1589 = vmatpush3.bf16.msra.mxu1 %v1807_v5  ;;  %s1964_s10 = scalar_lea.vmem %s2259_s0, %s1502_s5  ;;  %v1835_v42 = vld [vmem:[%s2260_s1 + $0x38] sm:$0xff]   ;;  %v1837_v45 = vld [vmem:[%s2260_s1 + $0x80] sm:$0xff]   ;;  %v1839_v48 = vld [vmem:[%s2260_s1 + $0x88] sm:$0xff]   ;;  %s195_s6 = scalar_lea.vmem %s2263_s4, %s1293_s28 }
  0x10   : > { %1669 = vmatpush3.bf16.msra.mxu0 %v1808_v6  ;;  %1590 = vmatprep.subr.bf16.mxu1 %v1887_v1  ;;  %v1975_v11 = vld [vmem:[%s1964_s10] sm:$0x3]  ;;  %v1836_v44 = vld [vmem:[%s2260_s1 + $0x178] sm:$0xff]   ;;  %v1840_v49 = vld [vmem:[%s2260_s1 + $0x188] sm:$0xff]  }
  0x11   : > { %1670 = vmatprep.subr.bf16.mxu0 %v1887_v1  ;;  %v1310_v12 = vcombine.low %v1975_v11, %v1975_v11  ;;  %v1821_v18 = vld [vmem:[%s1964_s10] ss:$0 sps:$4 sm:$0xcc]   ;;  %v1841_v50 = vld [vmem:[%s2260_s1 + $0x90] sm:$0xff]   ;;  %v1843_v52 = vld [vmem:[%s2260_s1 + $0x98] sm:$0xff]  }
  0x12   : > { %v666_v25 = vrot.slane %v1821_v18, 2  ;;  %v775_v37 = vshrl.u32 %v1821_v18, 16  ;;  %v778_v39 = vshll.u32 %v1821_v18, 16  ;;  %v1838_v47 = vld [vmem:[%s2260_s1 + $0x180] sm:$0xff]   ;;  %v1842_v51 = vld [vmem:[%s2260_s1 + $0x190] sm:$0xff]   ;;  %v1844_v53 = vld [vmem:[%s2260_s1 + $0x198] sm:$0xff]  }
  0x13   : > { %1591 = vmatpush3.bf16.msra.mxu1 %v1809_v7  ;;  %v237_v15 = vshll.u32 %v1310_v12, 16  ;;  %v235_v19 = vshrl.u32 %v1310_v12, 16  ;;  %v1845_v54 = vld [vmem:[%s2260_s1 + $0xa0] sm:$0xff]   ;;  %v1847_v56 = vld [vmem:[%s2260_s1 + $0xa8] sm:$0xff]   ;;  %v1849_v58 = vld [vmem:[%s2260_s1 + $0xb0] sm:$0xff]  }
  0x14   : > { %1671 = vmatpush3.bf16.msra.mxu0 %v1810_v8  ;;  %1592 = vmatprep.subr.bf16.mxu1 %v1887_v1  ;;  %v777_v41 = vrot.slane %v775_v37, 2  ;;  %v780_v43 = vrot.slane %v778_v39, 3  ;;  %v1846_v55 = vld [vmem:[%s2260_s1 + $0x1a0] sm:$0xff]   ;;  %v1848_v57 = vld [vmem:[%s2260_s1 + $0x1a8] sm:$0xff]   ;;  %v1850_v59 = vld [vmem:[%s2260_s1 + $0x1b0] sm:$0xff]  }
  0x15   : > { %1672 = vmatprep.subr.bf16.mxu0 %v1887_v1  ;;  %v239_v20 = vrot.slane %v237_v15, 1  ;;  %v1853_v60 = vld [vmem:[%s1964_s10] ss:$0 sps:$4 sm:$0x66]   ;;  %v1851_v61 = vld [vmem:[%s2260_s1 + $0xb8] sm:$0xff]   ;;  %v1857_v5 = vld [vmem:[%s2260_s1 + $0xc8] sm:$0xff]  }
  0x16   : > { %v781_v46 = vor.u32 %v780_v43, %v777_v41  ;;  %v1855_v62 = vld [vmem:[%s1964_s10] sm:$0x18]   ;;  %v1852_v63 = vld [vmem:[%s2260_s1 + $0x1b8] sm:$0xff]   ;;  %v439_v0 = vrot.slane %v1853_v60, 1  ;;  %v1858_v6 = vld [vmem:[%s2260_s1 + $0x1c8] sm:$0xff]   ;;  %v548_v15 = vshrl.u32 %v1853_v60, 16 }
  0x17   : > { %1593 = vmatpush3.bf16.msra.mxu1 %v1811_v9  ;;  %v240_v23 = vor.u32 %v239_v20, %v235_v19  ;;  %v1854_v2 = vld [vmem:[%s2260_s1 + $0xc0] sm:$0xff]   ;;  %v896_v3 = vrot.slane %v1855_v62, 3  ;;  %v1859_v7 = vld [vmem:[%s2260_s1 + $0xd0] sm:$0xff]   ;;  %v1861_v9 = vld [vmem:[%s2260_s1 + $0xd8] sm:$0xff]   ;;  %v1005_v18 = vshrl.u32 %v1855_v62, 16  ;;  %v1008_v19 = vshll.u32 %v1855_v62, 16 }
  0x18   : > { %1673 = vmatpush3.bf16.msra.mxu0 %v1812_v10  ;;  %1594 = vmatprep.subr.bf16.mxu1 %v1887_v1  ;;  %v1856_v4 = vld [vmem:[%s2260_s1 + $0x1c0] sm:$0xff]   ;;  %v1860_v8 = vld [vmem:[%s2260_s1 + $0x1d0] sm:$0xff]   ;;  %v1862_v10 = vld [vmem:[%s2260_s1 + $0x1d8] sm:$0xff]  }
  0x19   : > { %1674 = vmatprep.subr.bf16.mxu0 %v1887_v1  ;;  %v1864_v12 = vld [vmem:[%s2260_s1 + $0x1e0] sm:$0xff]   ;;  %v1868_v20 = vld [vmem:[%s2260_s1 + $0x1f0] sm:$0xff]   ;;  %vm1229_vm3 = vmand %vm1227_vm1, %vm1228_vm2 }
  0x1a   : > { %v1102_v37 = vld [vmem:[%s1964_s10 + $0x4] sm:$0x3]  ;;  %v1498_v43 = vld [vmem:[%s2261_s2] ss:$0 sm:$0xff] }
  0x1b   : > { %1595 = vmatpush3.bf16.msra.mxu1 %v1813_v13  ;;  %v1865_v13 = vld [vmem:[%s2260_s1 + $0xe8] sm:$0xff]  }
  0x1c   : > { %1675 = vmatpush3.bf16.msra.mxu0 %v1814_v14  ;;  %1596 = vmatprep.subr.bf16.mxu1 %v1887_v1  ;;  %v1866_v14 = vld [vmem:[%s2260_s1 + $0x1e8] sm:$0xff]  }
  0x1d   : > { %1676 = vmatprep.subr.bf16.mxu0 %v1887_v1 }
  0x1f   : > { %1597 = vmatpush3.bf16.msra.mxu1 %v1815_v16  ;;  %v551_v16 = vshll.u32 %v1853_v60, 16 }
  0x20   : > { %1677 = vmatpush3.bf16.msra.mxu0 %v1816_v17  ;;  %1598 = vmatprep.subr.bf16.mxu1 %v1887_v1  ;;  %v1867_v17 = vld [vmem:[%s2260_s1 + $0xf0] sm:$0xff]  }
  0x21   : > { %1678 = vmatprep.subr.bf16.mxu0 %v1887_v1 }
  0x23   : > { %1599 = vmatpush3.bf16.msra.mxu1 %v1817_v21  ;;  %v550_v21 = vrot.slane %v548_v15, 1 }
  0x24   : > { %1679 = vmatpush3.bf16.msra.mxu0 %v1818_v22  ;;  %1604 = vmatprep.subr.bf16.mxu1 %v1887_v1  ;;  %v553_v22 = vrot.slane %v551_v16, 2 }
  0x25   : > { %1684 = vmatprep.subr.bf16.mxu0 %v1887_v1 }
  0x26   : > { %1601 = vmatmul.mubr.bf16.vlgmr.msra.gmra.mrb[0].mxu1 %v240_v23  ;;  %v1869_v23 = vld [vmem:[%s2260_s1 + $0xf8] sm:$0xff]  }
  0x27   : > { %1605 = vmatpush3.bf16.msra.mxu1 %v1820_v24  ;;  %1681 = vmatmul.mubr.bf16.vlgmr.msra.gmra.mrb[0].mxu0 %v666_v25  ;;  %v1007_v24 = vrot.slane %v1005_v18, 3  ;;  %v1010_v25 = vrot.slane %v1008_v19, 4 }
  0x28   : > { %1685 = vmatpush3.bf16.msra.mxu0 %v1822_v26  ;;  %1606 = vmatprep.subr.bf16.mxu1 %v1887_v1  ;;  %v1870_v26 = vld [vmem:[%s2260_s1 + $0x1f8] sm:$0xff]  }
  0x29   : > { %1686 = vmatprep.subr.bf16.mxu0 %v1887_v1  ;;  %1620 = vmatprep.mubr.msk.bf16.mxu1 %vm1888_vm0, %v1887_v1 }
  0x2a   : > { %1700 = vmatprep.mubr.msk.bf16.mxu0 %vm1888_vm0, %v1887_v1 }
  0x2b   : > { %1607 = vmatpush3.bf16.msra.mxu1 %v1823_v27  ;;  %v554_v27 = vor.u32 %v553_v22, %v550_v21 }
  0x2c   : > { %1687 = vmatpush3.bf16.msra.mxu0 %v1824_v28  ;;  %1608 = vmatprep.subr.bf16.mxu1 %v1887_v1  ;;  %v1011_v28 = vor.u32 %v1010_v25, %v1007_v24 }
  0x2d   : > { %1688 = vmatprep.subr.bf16.mxu0 %v1887_v1 }
  0x2f   : > { %1609 = vmatpush3.bf16.msra.mxu1 %v1825_v29  ;;  %v1871_v29 = vld [vmem:[%s2260_s1 + $0x200] sm:$0xff]  }
  0x30   : > { %1689 = vmatpush3.bf16.msra.mxu0 %v1826_v30  ;;  %1610 = vmatprep.subr.bf16.mxu1 %v1887_v1  ;;  %v1872_v30 = vld [vmem:[%s2260_s1 + $0x208] sm:$0xff]  }
  0x31   : > { %1690 = vmatprep.subr.bf16.mxu0 %v1887_v1 }
  0x33   : > { %1611 = vmatpush3.bf16.msra.mxu1 %v1827_v31  ;;  %v1873_v31 = vld [vmem:[%s2260_s1 + $0x210] sm:$0xff]  }
  0x34   : > { %1691 = vmatpush3.bf16.msra.mxu0 %v1828_v32  ;;  %1612 = vmatprep.subr.bf16.mxu1 %v1887_v1  ;;  %v1874_v32 = vld [vmem:[%s2260_s1 + $0x218] sm:$0xff]  }
  0x35   : > { %1692 = vmatprep.subr.bf16.mxu0 %v1887_v1 }
  0x37   : > { %1613 = vmatpush3.bf16.msra.mxu1 %v1829_v33  ;;  %v1875_v33 = vld [vmem:[%s2260_s1 + $0x220] sm:$0xff]  }
  0x38   : > { %1693 = vmatpush3.bf16.msra.mxu0 %v1830_v34  ;;  %1614 = vmatprep.subr.bf16.mxu1 %v1887_v1  ;;  %v1876_v34 = vld [vmem:[%s2260_s1 + $0x228] sm:$0xff]  }
  0x39   : > { %1694 = vmatprep.subr.bf16.mxu0 %v1887_v1 }
  0x3b   : > { %1615 = vmatpush3.bf16.msra.mxu1 %v1831_v35  ;;  %v1877_v35 = vld [vmem:[%s2260_s1 + $0x230] sm:$0xff]  }
  0x3c   : > { %1695 = vmatpush3.bf16.msra.mxu0 %v1832_v36  ;;  %1616 = vmatprep.subr.bf16.mxu1 %v1887_v1  ;;  %v1878_v36 = vld [vmem:[%s2260_s1 + $0x238] sm:$0xff]  }
  0x3d   : > { %1696 = vmatprep.subr.bf16.mxu0 %v1887_v1 }
  0x3f   : > { %1617 = vmatpush3.bf16.msra.mxu1 %v1833_v38 }
  0x40   : > { %1697 = vmatpush3.bf16.msra.mxu0 %v1834_v40  ;;  %1618 = vmatprep.subr.bf16.mxu1 %v1887_v1 }
  0x41   : > { %1698 = vmatprep.subr.bf16.mxu0 %v1887_v1 }
  0x43   : > { %1619 = vmatpush3.bf16.msra.mxu1 %v1835_v42 }
  0x44   : > { %1699 = vmatpush3.bf16.msra.mxu0 %v1836_v44  ;;  %1624 = vmatprep.subr.bf16.mxu1 %v1887_v1 }
  0x45   : > { %1704 = vmatprep.subr.bf16.mxu0 %v1887_v1 }
  0x46   : > { %1621 = vmatmul.mubr.bf16.vlgmr.msra.gmra.mrb[0].mxu1 %v1975_v11  ;;  %v1863_v11 = vld [vmem:[%s2260_s1 + $0xe0] sm:$0xff]  }
  0x47   : > { %1625 = vmatpush3.bf16.msra.mxu1 %v1837_v45  ;;  %1701 = vmatmul.mubr.bf16.vlgmr.msra.gmra.mrb[0].mxu0 %v781_v46  ;;  %v1499_v46 = vld [vmem:[%s2262_s3] ss:$0 sm:$0xff] }
  0x48   : > { %1705 = vmatpush3.bf16.msra.mxu0 %v1838_v47  ;;  %1626 = vmatprep.subr.bf16.mxu1 %v1887_v1 }
  0x49   : > { %1706 = vmatprep.subr.bf16.mxu0 %v1887_v1  ;;  %1640 = vmatprep.mubr.msk.bf16.mxu1 %vm1888_vm0, %v1887_v1 }
  0x4a   : > { %1720 = vmatprep.mubr.msk.bf16.mxu0 %vm1888_vm0, %v1887_v1 }
  0x4b   : > { %1627 = vmatpush3.bf16.msra.mxu1 %v1839_v48 }
  0x4c   : > { %1707 = vmatpush3.bf16.msra.mxu0 %v1840_v49  ;;  %1628 = vmatprep.subr.bf16.mxu1 %v1887_v1 }
  0x4d   : > { %1708 = vmatprep.subr.bf16.mxu0 %v1887_v1 }
  0x4f   : > { %1629 = vmatpush3.bf16.msra.mxu1 %v1841_v50 }
  0x50   : > { %1709 = vmatpush3.bf16.msra.mxu0 %v1842_v51  ;;  %1630 = vmatprep.subr.bf16.mxu1 %v1887_v1  ;;  %v1230_v51 = vld [vmem:[%s195_s6] sm:$0x3] }
  0x51   : > { %1710 = vmatprep.subr.bf16.mxu0 %v1887_v1 }
  0x53   : > { %1631 = vmatpush3.bf16.msra.mxu1 %v1843_v52 }
  0x54   : > { %1711 = vmatpush3.bf16.msra.mxu0 %v1844_v53  ;;  %1632 = vmatprep.subr.bf16.mxu1 %v1887_v1 }
  0x55   : > { %1712 = vmatprep.subr.bf16.mxu0 %v1887_v1 }
  0x57   : > { %1633 = vmatpush3.bf16.msra.mxu1 %v1845_v54 }
  0x58   : > { %1713 = vmatpush3.bf16.msra.mxu0 %v1846_v55  ;;  %1634 = vmatprep.subr.bf16.mxu1 %v1887_v1 }
  0x59   : > { %1714 = vmatprep.subr.bf16.mxu0 %v1887_v1 }
  0x5b   : > { %1635 = vmatpush3.bf16.msra.mxu1 %v1847_v56 }
  0x5c   : > { %1715 = vmatpush3.bf16.msra.mxu0 %v1848_v57  ;;  %1636 = vmatprep.subr.bf16.mxu1 %v1887_v1 }
  0x5d   : > { %1716 = vmatprep.subr.bf16.mxu0 %v1887_v1 }
  0x5f   : > { %1637 = vmatpush3.bf16.msra.mxu1 %v1849_v58 }
  0x60   : > { %1717 = vmatpush3.bf16.msra.mxu0 %v1850_v59  ;;  %1638 = vmatprep.subr.bf16.mxu1 %v1887_v1 }
  0x61   : > { %1718 = vmatprep.subr.bf16.mxu0 %v1887_v1 }
  0x63   : > { %1639 = vmatpush3.bf16.msra.mxu1 %v1851_v61 }
  0x64   : > { %1719 = vmatpush3.bf16.msra.mxu0 %v1852_v63  ;;  %1644 = vmatprep.subr.bf16.mxu1 %v1887_v1 }
  0x65   : > { %1724 = vmatprep.subr.bf16.mxu0 %v1887_v1 }
  0x66   : > { %1641 = vmatmul.mubr.bf16.vlgmr.msra.gmra.mrb[0].mxu1 %v439_v0 }
  0x67   : > { %1645 = vmatpush3.bf16.msra.mxu1 %v1854_v2  ;;  %1721 = vmatmul.mubr.bf16.vlgmr.msra.gmra.mrb[0].mxu0 %v896_v3 }
  0x68   : > { %1725 = vmatpush3.bf16.msra.mxu0 %v1856_v4  ;;  %1646 = vmatprep.subr.bf16.mxu1 %v1887_v1 }
  0x69   : > { %1726 = vmatprep.subr.bf16.mxu0 %v1887_v1  ;;  %1660 = vmatprep.mubr.msk.bf16.mxu1 %vm1888_vm0, %v1887_v1 }
  0x6a   : > { %1740 = vmatprep.mubr.msk.bf16.mxu0 %vm1888_vm0, %v1887_v1 }
  0x6b   : > { %1647 = vmatpush3.bf16.msra.mxu1 %v1857_v5 }
  0x6c   : > { %1727 = vmatpush3.bf16.msra.mxu0 %v1858_v6  ;;  %1648 = vmatprep.subr.bf16.mxu1 %v1887_v1 }
  0x6d   : > { %1728 = vmatprep.subr.bf16.mxu0 %v1887_v1 }
  0x6f   : > { %1649 = vmatpush3.bf16.msra.mxu1 %v1859_v7 }
  0x70   : > { %1729 = vmatpush3.bf16.msra.mxu0 %v1860_v8  ;;  %1650 = vmatprep.subr.bf16.mxu1 %v1887_v1 }
  0x71   : > { %1730 = vmatprep.subr.bf16.mxu0 %v1887_v1 }
  0x73   : > { %1651 = vmatpush3.bf16.msra.mxu1 %v1861_v9 }
  0x74   : > { %1731 = vmatpush3.bf16.msra.mxu0 %v1862_v10  ;;  %1652 = vmatprep.subr.bf16.mxu1 %v1887_v1 }
  0x75   : > { %1732 = vmatprep.subr.bf16.mxu0 %v1887_v1 }
  0x77   : > { %1653 = vmatpush3.bf16.msra.mxu1 %v1863_v11 }
  0x78   : > { %1733 = vmatpush3.bf16.msra.mxu0 %v1864_v12  ;;  %1654 = vmatprep.subr.bf16.mxu1 %v1887_v1 }
  0x79   : > { %1734 = vmatprep.subr.bf16.mxu0 %v1887_v1 }
  0x7b   : > { %1655 = vmatpush3.bf16.msra.mxu1 %v1865_v13 }
  0x7c   : > { %1735 = vmatpush3.bf16.msra.mxu0 %v1866_v14  ;;  %1656 = vmatprep.subr.bf16.mxu1 %v1887_v1 }
  0x7d   : > { %1736 = vmatprep.subr.bf16.mxu0 %v1887_v1 }
  0x7f   : > { %1657 = vmatpush3.bf16.msra.mxu1 %v1867_v17 }
  0x80   : > { %1737 = vmatpush3.bf16.msra.mxu0 %v1868_v20  ;;  %1658 = vmatprep.subr.bf16.mxu1 %v1887_v1 }
  0x81   : > { %1738 = vmatprep.subr.bf16.mxu0 %v1887_v1 }
  0x83   : > { %1659 = vmatpush3.bf16.msra.mxu1 %v1869_v23 }
  0x84   : > { %1739 = vmatpush3.bf16.msra.mxu0 %v1870_v26 }
  0x85   : > { %1744 = vmatprep.subr.bf16.mxu0 %v1887_v1 }
  0x86   : > { %1661 = vmatmul.mubr.bf16.vlgmr.msra.gmra.mrb[0].mxu1 %v554_v27 }
  0x87   : > { %1741 = vmatmul.mubr.bf16.vlgmr.msra.gmra.mrb[0].mxu0 %v1011_v28 }
  0x88   : > { %1745 = vmatpush3.bf16.msra.mxu0 %v1871_v29  ;;  %1760 = vmatprep.mubr.msk.bf16.mxu0 %vm1888_vm0, %v1887_v1 }
  0x89   : > { %1746 = vmatprep.subr.bf16.mxu0 %v1887_v1 }
  0x8c   : > { %1747 = vmatpush3.bf16.msra.mxu0 %v1872_v30 }
  0x8d   : > { %1748 = vmatprep.subr.bf16.mxu0 %v1887_v1 }
  0x90   : > { %1749 = vmatpush3.bf16.msra.mxu0 %v1873_v31 }
  0x91   : > { %1750 = vmatprep.subr.bf16.mxu0 %v1887_v1 }
  0x94   : > { %1751 = vmatpush3.bf16.msra.mxu0 %v1874_v32 }
  0x95   : > { %1752 = vmatprep.subr.bf16.mxu0 %v1887_v1 }
  0x98   : > { %1753 = vmatpush3.bf16.msra.mxu0 %v1875_v33 }
  0x99   : > { %1754 = vmatprep.subr.bf16.mxu0 %v1887_v1 }
  0x9c   : > { %1755 = vmatpush3.bf16.msra.mxu0 %v1876_v34 }
  0x9d   : > { %1756 = vmatprep.subr.bf16.mxu0 %v1887_v1 }
  0xa0   : > { %1757 = vmatpush3.bf16.msra.mxu0 %v1877_v35 }
  0xa1   : > { %1758 = vmatprep.subr.bf16.mxu0 %v1887_v1 }
  0xa4   : > { %1759 = vmatpush3.bf16.msra.mxu0 %v1878_v36 }
  0xa7   : > { %1761 = vmatmul.mubr.bf16.vlgmr.msra.gmra.mrb[0].mxu0 %v1102_v37 }
 0x159   : > { %v638_v38 = vpop.f32.mrb[0].mxu1 }
 0x15a   : > { %v1662_v39 = vpop.f32.mrb[1].mxu1 }
 0x15b   : > { %v641_v40 = vpop.f32.mrb[2].mxu1 }
 0x15c   : > { %v1663_v41 = vpop.f32.mrb[3].mxu1 }
 0x17a   : > { %v1202_v42 = vpop.f32.mrb[0].mxu0 }
 0x17b   : > { %v1764_v44 = vadd.f32 %v1202_v42, %v638_v38  ;;  %v1762_v45 = vpop.f32.mrb[1].mxu0 }
 0x17c   : > { %v1205_v1 = vpop.f32.mrb[2].mxu0 }
 0x17d   : > { %v1216_v47 = vmul.f32 %v1764_v44, %v1498_v43  ;;  %v1763_v48 = vpop.f32.mrb[3].mxu0 }
 0x17f   : > { %v1224_v49 = vadd.f32 %v1499_v46, %v1216_v47 }
 0x181   : > { %v1225_v50 = vmax.f32 %v1224_v49, 0.0 }
 0x183   : > { %v1226_v52 = vpack.c.bf16 %v1225_v50, %v1225_v50 }
 0x185   : > { %v1231_v53 = vsel %vm1229_vm3, %v1226_v52, %v1230_v51 }
 0x186   : > { %1232 = vst [vmem:[%s195_s6] sm:$0x3] %v1231_v53 }
 0x187 PF: > { %s14_s15 = sadd.s32 1, %s1885_s15  }
 0x188   : > { %p11_p4 = scmp.ge.s32.totalorder %s14_s15, 4  }
 0x18a   :  { %13 = sbr.rel (!%p11_p4) target bundleno = 1 (0x1), region = 74 }

// kernel: wavelet_model_noatt.15
= control target key start
LH: loop header
LB: loop body
LE: loop exit
PB: predicated region body
PF: predicated region fallthrough
CT: control target
= control target key end

     0   :  { %s2759_s15 = smov 0   ;;  %s3246_s0 = inlined_call_operand.vmem [shape: bf16[2,18,256], index: 0, kind: input, shape index: {}]   ;;  %s3247_s1 = inlined_call_operand.vmem [shape: bf16[9,256,128], index: 1, kind: input, shape index: {}]   ;;  %s3248_s2 = inlined_call_operand.vmem [shape: f32[1,128], index: 2, kind: input, shape index: {}]   ;;  %s3249_s3 = inlined_call_operand.vmem [shape: f32[1,128], index: 3, kind: input, shape index: {}]   ;;  %s3250_s4 = inlined_call_operand.vmem [shape: bf16[2,8,128], index: 4, kind: output, shape index: {}]  }
   0x1 LB: > { %s1928_s16 = sadd.s32 4294967295, %s2732_s15   ;;  %p1932_p0 = scmp.ge.s32.totalorder %s2732_s15, 1  ;;  %s2732_s15 = sphi %s2759_s15, %s14_s15  }
   0x2   : > { %p162_p1 = scmp.lt.s32.totalorder %s2732_s15, 3 }
   0x4   : > { %p163_p2 = pnand %p1932_p0, %p162_p1 }
   0x5   : > { %v2564_v0 = vld [vmem:[%s3247_s1 + $0xc0] sm:$0xff] (!%p163_p2)   ;;  %v2568_v4 = vld [vmem:[%s3247_s1 + $0xc8] sm:$0xff] (!%p163_p2)   ;;  %v2572_v8 = vld [vmem:[%s3247_s1 + $0xd0] sm:$0xff] (!%p163_p2)   ;;  %p187_p3 = scmp.lt.s32.totalorder (!%p163_p2), %s1928_s16, 1 }
   0x6   : > { %166 = sbr.rel (%p163_p2) target bundleno = 393 (0x189), region = 36  ;;  %v2565_v1 = vld [vmem:[%s3247_s1 + $0x40] sm:$0xff] (!%p163_p2)   ;;  %2357 = vmatprep.subr.bf16.mxu0 (!%p163_p2), %v2564_v0  ;;  %v2569_v5 = vld [vmem:[%s3247_s1 + $0x48] sm:$0xff] (!%p163_p2)   ;;  %v2573_v9 = vld [vmem:[%s3247_s1 + $0x50] sm:$0xff] (!%p163_p2)  }
   0x7   : > { %v2566_v2 = vld [vmem:[%s3247_s1 + $0x80] sm:$0xff] (!%p163_p2)   ;;  %2379 = vmatprep.subr.bf16.mxu1 (!%p163_p2), %v2565_v1  ;;  %v2570_v6 = vld [vmem:[%s3247_s1 + $0x88] sm:$0xff] (!%p163_p2)   ;;  %v2574_v10 = vld [vmem:[%s3247_s1 + $0x90] sm:$0xff] (!%p163_p2)  }
   0x8   : > { %v2567_v3 = vld [vmem:[%s3247_s1] sm:$0xff] (!%p163_p2)   ;;  %2358 = vmatpush3.bf16.msra.mxu0 (!%p163_p2), %v2566_v2  ;;  %v2571_v7 = vld [vmem:[%s3247_s1 + $0x8] sm:$0xff] (!%p163_p2)   ;;  %v2575_v11 = vld [vmem:[%s3247_s1 + $0x10] sm:$0xff] (!%p163_p2)  }
   0x9   : > { %2380 = vmatpush3.bf16.msra.mxu1 (!%p163_p2), %v2567_v3  ;;  %2359 = vmatprep.subr.bf16.mxu0 (!%p163_p2), %v2568_v4  ;;  %v2576_v12 = vld [vmem:[%s3247_s1 + $0xd8] sm:$0xff] (!%p163_p2)   ;;  %v2580_v16 = vld [vmem:[%s3247_s1 + $0xe0] sm:$0xff] (!%p163_p2)   ;;  %v2584_v20 = vld [vmem:[%s3247_s1 + $0xe8] sm:$0xff] (!%p163_p2)  }
   0xa   : > { %2381 = vmatprep.subr.bf16.mxu1 (!%p163_p2), %v2569_v5  ;;  %v2577_v13 = vld [vmem:[%s3247_s1 + $0x58] sm:$0xff] (!%p163_p2)   ;;  %v2581_v17 = vld [vmem:[%s3247_s1 + $0x60] sm:$0xff] (!%p163_p2)   ;;  %v2585_v21 = vld [vmem:[%s3247_s1 + $0x68] sm:$0xff] (!%p163_p2)  }
   0xb   : > { %v2578_v14 = vld [vmem:[%s3247_s1 + $0x98] sm:$0xff] (!%p163_p2)   ;;  %v2582_v18 = vld [vmem:[%s3247_s1 + $0xa0] sm:$0xff] (!%p163_p2)   ;;  %v2586_v22 = vld [vmem:[%s3247_s1 + $0xa8] sm:$0xff] (!%p163_p2)  }
   0xc   : > { %2360 = vmatpush3.bf16.msra.mxu0 (!%p163_p2), %v2570_v6  ;;  %v2579_v15 = vld [vmem:[%s3247_s1 + $0x18] sm:$0xff] (!%p163_p2)   ;;  %v2583_v19 = vld [vmem:[%s3247_s1 + $0x20] sm:$0xff] (!%p163_p2)   ;;  %v2587_v23 = vld [vmem:[%s3247_s1 + $0x28] sm:$0xff] (!%p163_p2)  }
   0xd   : > { %2382 = vmatpush3.bf16.msra.mxu1 %v2571_v7  ;;  %2361 = vmatprep.subr.bf16.mxu0 %v2572_v8  ;;  %s3252_s16 = smov (!%p187_p3, %s1928_s16), 1  ;;  %v2588_v24 = vld [vmem:[%s3247_s1 + $0xf0] sm:$0xff]   ;;  %v2592_v28 = vld [vmem:[%s3247_s1 + $0xf8] sm:$0xff]   ;;  %v2600_v38 = vld [vmem:[%s3247_s1 + $0x140] sm:$0xff]  }
   0xe   : > { %2383 = vmatprep.subr.bf16.mxu1 %v2573_v9  ;;  %v2589_v25 = vld [vmem:[%s3247_s1 + $0x70] sm:$0xff]   ;;  %s2555_s21 = smul.u32 24, %s3252_s16  ;;  %v2593_v29 = vld [vmem:[%s3247_s1 + $0x78] sm:$0xff]   ;;  %v2602_v43 = vld [vmem:[%s3247_s1 + $0x1c0] sm:$0xff]   ;;  %s1934_s8 = sshll.u32 %s3252_s16, 2 }
   0xf   : > { %v2590_v26 = vld [vmem:[%s3247_s1 + $0xb0] sm:$0xff]   ;;  %v2594_v30 = vld [vmem:[%s3247_s1 + $0xb8] sm:$0xff]   ;;  %v2601_v46 = vld [vmem:[%s3247_s1 + $0x100] sm:$0xff]   ;;  %s195_s11 = scalar_lea.vmem %s3250_s4, %s1934_s8 }
  0x10   : > { %2362 = vmatpush3.bf16.msra.mxu0 %v2574_v10  ;;  %v2591_v27 = vld [vmem:[%s3247_s1 + $0x30] sm:$0xff]   ;;  %s2867_s6 = scalar_lea.vmem %s3246_s0, %s2555_s21  ;;  %v2595_v31 = vld [vmem:[%s3247_s1 + $0x38] sm:$0xff]   ;;  %v2603_v47 = vld [vmem:[%s3247_s1 + $0x180] sm:$0xff]  }
  0x11   : > { %2384 = vmatpush3.bf16.msra.mxu1 %v2575_v11  ;;  %2363 = vmatprep.subr.bf16.mxu0 %v2576_v12  ;;  %v197_v32 = vld [vmem:[%s2867_s6] sm:$0xff]  ;;  %v2877_v33 = vld [vmem:[%s2867_s6 + $0x8] sm:$0x11]  ;;  %v2608_v54 = vld [vmem:[%s3247_s1 + $0x150] sm:$0xff]  }
  0x12   : > { %2385 = vmatprep.subr.bf16.mxu1 %v2577_v13  ;;  %v1968_v34 = vcombine.high %v197_v32, %v2877_v33  ;;  %v1986_v35 = vcombine.high %v197_v32, %v197_v32  ;;  %v1967_v36 = vcombine.low %v197_v32, %v2877_v33  ;;  %v1985_v37 = vcombine.low %v197_v32, %v197_v32  ;;  %v2604_v50 = vld [vmem:[%s3247_s1 + $0x148] sm:$0xff]   ;;  %v2610_v55 = vld [vmem:[%s3247_s1 + $0x1d0] sm:$0xff]   ;;  %v2612_v58 = vld [vmem:[%s3247_s1 + $0x158] sm:$0xff]  }
  0x13   : > { %v2606_v51 = vld [vmem:[%s3247_s1 + $0x1c8] sm:$0xff]   ;;  %v2611_v56 = vld [vmem:[%s3247_s1 + $0x190] sm:$0xff]   ;;  %v2614_v59 = vld [vmem:[%s3247_s1 + $0x1d8] sm:$0xff]  }
  0x14   : > { %2364 = vmatpush3.bf16.msra.mxu0 %v2578_v14  ;;  %v280_v39 = vshrl.u32 %v1968_v34, 16  ;;  %v282_v40 = vshll.u32 %v1968_v34, 16  ;;  %556 = vmatprep.mubr.bf16.mxu1 %v1986_v35  ;;  %v273_v41 = vshrl.u32 %v1967_v36, 16  ;;  %v275_v42 = vshll.u32 %v1967_v36, 16  ;;  %v2607_v52 = vld [vmem:[%s3247_s1 + $0x188] sm:$0xff]   ;;  %v2609_v57 = vld [vmem:[%s3247_s1 + $0x110] sm:$0xff]  }
  0x15   : > { %2386 = vmatpush3.bf16.msra.mxu1 %v2579_v15  ;;  %2365 = vmatprep.subr.bf16.mxu0 %v2580_v16  ;;  %v2605_v53 = vld [vmem:[%s3247_s1 + $0x108] sm:$0xff]   ;;  %v2615_v60 = vld [vmem:[%s3247_s1 + $0x198] sm:$0xff]   ;;  %v2616_v62 = vld [vmem:[%s3247_s1 + $0x160] sm:$0xff]  }
  0x16   : > { %2387 = vmatprep.subr.bf16.mxu1 %v2581_v17  ;;  %v284_v44 = vrot.slane %v282_v40, 1  ;;  %v277_v45 = vrot.slane %v275_v42, 1  ;;  %v2613_v61 = vld [vmem:[%s3247_s1 + $0x118] sm:$0xff]   ;;  %v2618_v63 = vld [vmem:[%s3247_s1 + $0x1e0] sm:$0xff]   ;;  %v2620_v2 = vld [vmem:[%s3247_s1 + $0x168] sm:$0xff]  }
  0x17   : > { %v2619_v0 = vld [vmem:[%s3247_s1 + $0x1a0] sm:$0xff]   ;;  %v2622_v3 = vld [vmem:[%s3247_s1 + $0x1e8] sm:$0xff]   ;;  %v2624_v6 = vld [vmem:[%s3247_s1 + $0x170] sm:$0xff]  }
  0x18   : > { %2366 = vmatpush3.bf16.msra.mxu0 %v2582_v18  ;;  %v285_v48 = vor.u32 %v284_v44, %v280_v39  ;;  %v278_v49 = vor.u32 %v277_v45, %v273_v41  ;;  %v2617_v1 = vld [vmem:[%s3247_s1 + $0x120] sm:$0xff]   ;;  %v2623_v4 = vld [vmem:[%s3247_s1 + $0x1a8] sm:$0xff]   ;;  %v2626_v7 = vld [vmem:[%s3247_s1 + $0x1f0] sm:$0xff]  }
  0x19   : > { %2388 = vmatpush3.bf16.msra.mxu1 %v2583_v19  ;;  %2367 = vmatprep.subr.bf16.mxu0 %v2584_v20  ;;  %v2621_v5 = vld [vmem:[%s3247_s1 + $0x128] sm:$0xff]   ;;  %v2627_v8 = vld [vmem:[%s3247_s1 + $0x1b0] sm:$0xff]   ;;  %v2628_v10 = vld [vmem:[%s3247_s1 + $0x178] sm:$0xff]  }
  0x1a   : > { %2389 = vmatprep.subr.bf16.mxu1 %v2585_v21  ;;  %416 = vmatprep.mubr.bf16.mxu0 %v285_v48  ;;  %v2625_v9 = vld [vmem:[%s3247_s1 + $0x130] sm:$0xff]   ;;  %v2630_v11 = vld [vmem:[%s3247_s1 + $0x1f8] sm:$0xff]   ;;  %v564_v12 = vld [vmem:[%s2867_s6] sm:$0xee] }
  0x1b   : > { %v2035_v13 = vcombine.low %v564_v12, %v2877_v33  ;;  %v2036_v14 = vcombine.high %v564_v12, %v2877_v33  ;;  %v2633_v15 = vld [vmem:[%s3247_s1 + $0x1b8] sm:$0xff]   ;;  %v2978_v16 = vld [vmem:[%s2867_s6] sm:$0xcc]  ;;  %v745_v19 = vld [vmem:[%s2867_s6 + $0x8] sm:$0x33] }
  0x1c   : > { %2368 = vmatpush3.bf16.msra.mxu0 %v2586_v22  ;;  %v2629_v17 = vld [vmem:[%s3247_s1 + $0x138] sm:$0xff]   ;;  %v2634_v20 = vld [vmem:[%s3247_s1 + $0x240] sm:$0xff]   ;;  %v2085_v21 = vcombine.low %v2978_v16, %v745_v19  ;;  %v2086_v22 = vcombine.high %v2978_v16, %v745_v19  ;;  %v2641_v32 = vld [vmem:[%s3247_s1 + $0x208] sm:$0xff]  }
  0x1d   : > { %2390 = vmatpush3.bf16.msra.mxu1 %v2587_v23  ;;  %2369 = vmatprep.subr.bf16.mxu0 %v2588_v24  ;;  %v604_v18 = vrot.slane %v2036_v14, 1  ;;  %v603_v23 = vrot.slane %v2035_v13, 1  ;;  %v2638_v24 = vld [vmem:[%s3247_s1 + $0x2c0] sm:$0xff]   ;;  %v2644_v33 = vld [vmem:[%s3247_s1 + $0x250] sm:$0xff]   ;;  %v2651_v39 = vld [vmem:[%s3247_s1 + $0x298] sm:$0xff]  }
  0x1e   : > { %2391 = vmatprep.subr.bf16.mxu1 %v2589_v25  ;;  %v787_v25 = vrot.slane %v2085_v21, 2  ;;  %v2646_v34 = vld [vmem:[%s3247_s1 + $0x2d0] sm:$0xff]   ;;  %v2649_v40 = vld [vmem:[%s3247_s1 + $0x218] sm:$0xff]   ;;  %v2652_v41 = vld [vmem:[%s3247_s1 + $0x260] sm:$0xff]  }
  0x1f   : > { %v2647_v35 = vld [vmem:[%s3247_s1 + $0x290] sm:$0xff]   ;;  %v2654_v42 = vld [vmem:[%s3247_s1 + $0x2e0] sm:$0xff]   ;;  %v2656_v45 = vld [vmem:[%s3247_s1 + $0x268] sm:$0xff]  }
  0x20   : > { %2370 = vmatpush3.bf16.msra.mxu0 %v2590_v26  ;;  %v788_v26 = vrot.slane %v2086_v22, 2  ;;  %v2645_v36 = vld [vmem:[%s3247_s1 + $0x210] sm:$0xff]   ;;  %v2653_v44 = vld [vmem:[%s3247_s1 + $0x220] sm:$0xff]   ;;  %v2657_v48 = vld [vmem:[%s3247_s1 + $0x228] sm:$0xff]  }
  0x21   : > { %2392 = vmatpush3.bf16.msra.mxu1 %v2591_v27  ;;  %2371 = vmatprep.subr.bf16.mxu0 %v2592_v28  ;;  %v2637_v27 = vld [vmem:[%s3247_s1 + $0x200] sm:$0xff]   ;;  %v2680_v19 = vld [vmem:[%s3247_s1 + $0x350] sm:$0xff]  }
  0x22   : > { %2393 = vmatprep.subr.bf16.mxu1 %v2593_v29  ;;  %v2639_v28 = vld [vmem:[%s3247_s1 + $0x280] sm:$0xff]   ;;  %v2640_v29 = vld [vmem:[%s3247_s1 + $0x248] sm:$0xff]   ;;  %v2682_v21 = vld [vmem:[%s3247_s1 + $0x3d0] sm:$0xff]  }
  0x23   : > { %v2675_v12 = vld [vmem:[%s3247_s1 + $0x380] sm:$0xff]   ;;  %v2683_v22 = vld [vmem:[%s3247_s1 + $0x390] sm:$0xff]  }
  0x24   : > { %2372 = vmatpush3.bf16.msra.mxu0 %v2594_v30  ;;  %v2642_v30 = vld [vmem:[%s3247_s1 + $0x2c8] sm:$0xff]  }
  0x25   : > { %2394 = vmatpush3.bf16.msra.mxu1 %v2595_v31  ;;  %2401 = vmatprep.subr.bf16.mxu0 %v2600_v38  ;;  %v2643_v31 = vld [vmem:[%s3247_s1 + $0x288] sm:$0xff]   ;;  %v2650_v38 = vld [vmem:[%s3247_s1 + $0x2d8] sm:$0xff]  }
  0x26   : > { %2423 = vmatprep.subr.bf16.mxu1 %v2602_v43  ;;  %v2655_v43 = vld [vmem:[%s3247_s1 + $0x2a0] sm:$0xff]  }
  0x27   : > { %417 = vmatmul.mubr.bf16.vlgmr.msra.gmra.mrb[0].mxu0 %v278_v49  ;;  %v2660_v49 = vld [vmem:[%s3247_s1 + $0x270] sm:$0xff]  }
  0x28   : > { %557 = vmatmul.mubr.bf16.vlgmr.msra.gmra.mrb[0].mxu1 %v1985_v37  ;;  %2402 = vmatpush3.bf16.msra.mxu0 %v2601_v46  ;;  %v2648_v37 = vld [vmem:[%s3247_s1 + $0x258] sm:$0xff]   ;;  %v2658_v46 = vld [vmem:[%s3247_s1 + $0x2e8] sm:$0xff]  }
  0x29   : > { %2424 = vmatpush3.bf16.msra.mxu1 %v2603_v47  ;;  %2403 = vmatprep.subr.bf16.mxu0 %v2604_v50  ;;  %v2659_v47 = vld [vmem:[%s3247_s1 + $0x2a8] sm:$0xff]   ;;  %v2662_v50 = vld [vmem:[%s3247_s1 + $0x2f0] sm:$0xff]  }
  0x2a   : > { %2425 = vmatprep.subr.bf16.mxu1 %v2606_v51  ;;  %735 = vmatprep.mubr.bf16.mxu0 %v604_v18  ;;  %v2663_v51 = vld [vmem:[%s3247_s1 + $0x2b0] sm:$0xff]   ;;  %v2679_v18 = vld [vmem:[%s3247_s1 + $0x388] sm:$0xff]  }
  0x2b   : > { %919 = vmatprep.mubr.bf16.mxu1 %v788_v26  ;;  %v2687_v26 = vld [vmem:[%s3247_s1 + $0x398] sm:$0xff]  }
  0x2c   : > { %2404 = vmatpush3.bf16.msra.mxu0 %v2605_v53  ;;  %v2664_v53 = vld [vmem:[%s3247_s1 + $0x278] sm:$0xff]  }
  0x2d   : > { %2426 = vmatpush3.bf16.msra.mxu1 %v2607_v52  ;;  %2405 = vmatprep.subr.bf16.mxu0 %v2608_v54  ;;  %v2661_v52 = vld [vmem:[%s3247_s1 + $0x230] sm:$0xff]   ;;  %v2665_v54 = vld [vmem:[%s3247_s1 + $0x238] sm:$0xff]  }
  0x2e   : > { %2427 = vmatprep.subr.bf16.mxu1 %v2610_v55  ;;  %v2666_v55 = vld [vmem:[%s3247_s1 + $0x2f8] sm:$0xff]  }
  0x30   : > { %2406 = vmatpush3.bf16.msra.mxu0 %v2609_v57 }
  0x31   : > { %2428 = vmatpush3.bf16.msra.mxu1 %v2611_v56  ;;  %2407 = vmatprep.subr.bf16.mxu0 %v2612_v58  ;;  %v928_v56 = vld [vmem:[%s2867_s6 + $0x8] sm:$0x77]  ;;  %v2668_v58 = vld [vmem:[%s3247_s1 + $0x2b8] sm:$0xff]  }
  0x32   : > { %2429 = vmatprep.subr.bf16.mxu1 %v2614_v59  ;;  %v2136_v57 = vcombine.high %v2978_v16, %v928_v56  ;;  %v2135_v59 = vcombine.low %v2978_v16, %v928_v56  ;;  %v2677_v16 = vld [vmem:[%s3247_s1 + $0x308] sm:$0xff]  }
  0x34   : > { %2408 = vmatpush3.bf16.msra.mxu0 %v2613_v61  ;;  %v976_v61 = vshrl.u32 %v2136_v57, 16 }
  0x35   : > { %2430 = vmatpush3.bf16.msra.mxu1 %v2615_v60  ;;  %2409 = vmatprep.subr.bf16.mxu0 %v2616_v62  ;;  %v2670_v60 = vld [vmem:[%s3247_s1 + $0x340] sm:$0xff]   ;;  %v979_v62 = vshll.u32 %v2136_v57, 16 }
  0x36   : > { %2431 = vmatprep.subr.bf16.mxu1 %v2618_v63  ;;  %v968_v63 = vshrl.u32 %v2135_v59, 16 }
  0x38   : > { %2410 = vmatpush3.bf16.msra.mxu0 %v2617_v1  ;;  %v1122_v1 = vld [vmem:[%s2867_s6] sm:$0x88] }
  0x39   : > { %2432 = vmatpush3.bf16.msra.mxu1 %v2619_v0  ;;  %2411 = vmatprep.subr.bf16.mxu0 %v2620_v2  ;;  %v971_v0 = vshll.u32 %v2135_v59, 16  ;;  %v2185_v2 = vcombine.low %v1122_v1, %v928_v56 }
  0x3a   : > { %2433 = vmatprep.subr.bf16.mxu1 %v2622_v3  ;;  %v2186_v3 = vcombine.high %v1122_v1, %v928_v56  ;;  %v2716_v1 = vld [vmem:[%s3247_s1 + $0x460] sm:$0xff]  }
  0x3c   : > { %2412 = vmatpush3.bf16.msra.mxu0 %v2621_v5  ;;  %v981_v5 = vrot.slane %v979_v62, 3  ;;  %v2713_v62 = vld [vmem:[%s3247_s1 + $0x410] sm:$0xff]  }
  0x3d   : > { %2434 = vmatpush3.bf16.msra.mxu1 %v2623_v4  ;;  %2413 = vmatprep.subr.bf16.mxu0 %v2624_v6  ;;  %v978_v4 = vrot.slane %v976_v61, 2  ;;  %v970_v6 = vrot.slane %v968_v63, 2  ;;  %v2712_v61 = vld [vmem:[%s3247_s1 + $0x450] sm:$0xff]   ;;  %v2714_v63 = vld [vmem:[%s3247_s1 + $0x458] sm:$0xff]  }
  0x3e   : > { %2435 = vmatprep.subr.bf16.mxu1 %v2626_v7  ;;  %v973_v7 = vrot.slane %v971_v0, 3  ;;  %v2715_v0 = vld [vmem:[%s3247_s1 + $0x418] sm:$0xff]  }
  0x3f   : > { %v982_v13 = vor.u32 %v981_v5, %v978_v4  ;;  %v2717_v4 = vld [vmem:[%s3247_s1 + $0x420] sm:$0xff]  }
  0x40   : > { %2414 = vmatpush3.bf16.msra.mxu0 %v2625_v9  ;;  %v1161_v9 = vrot.slane %v2185_v2, 3  ;;  %v974_v14 = vor.u32 %v973_v7, %v970_v6  ;;  %v1676_v2 = vld [vmem:[%s2867_s6 + $0x8] sm:$0xee] }
  0x41   : > { %2436 = vmatpush3.bf16.msra.mxu1 %v2627_v8  ;;  %2415 = vmatprep.subr.bf16.mxu0 %v2628_v10  ;;  %v2673_v8 = vld [vmem:[%s3247_s1 + $0x300] sm:$0xff]   ;;  %v1162_v10 = vrot.slane %v2186_v3, 3  ;;  %v2718_v6 = vld [vmem:[%s3247_s1 + $0x468] sm:$0xff]  }
  0x42   : > { %2437 = vmatprep.subr.bf16.mxu1 %v2630_v11  ;;  %v2674_v11 = vld [vmem:[%s3247_s1 + $0x3c0] sm:$0xff]   ;;  %v2719_v7 = vld [vmem:[%s3247_s1 + $0x428] sm:$0xff]  }
  0x44   : > { %2416 = vmatpush3.bf16.msra.mxu0 %v2629_v17  ;;  %v2678_v17 = vld [vmem:[%s3247_s1 + $0x3c8] sm:$0xff]  }
  0x45   : > { %2438 = vmatpush3.bf16.msra.mxu1 %v2633_v15  ;;  %2445 = vmatprep.subr.bf16.mxu0 %v2634_v20  ;;  %v2676_v15 = vld [vmem:[%s3247_s1 + $0x348] sm:$0xff]   ;;  %v2681_v20 = vld [vmem:[%s3247_s1 + $0x310] sm:$0xff]  }
  0x46   : > { %2467 = vmatprep.subr.bf16.mxu1 %v2638_v24  ;;  %v2685_v24 = vld [vmem:[%s3247_s1 + $0x318] sm:$0xff]  }
  0x47   : > { %736 = vmatmul.mubr.bf16.vlgmr.msra.gmra.mrb[4].mxu0 %v603_v23  ;;  %v2684_v23 = vld [vmem:[%s3247_s1 + $0x358] sm:$0xff]  }
  0x48   : > { %920 = vmatmul.mubr.bf16.vlgmr.msra.gmra.mrb[4].mxu1 %v787_v25  ;;  %2446 = vmatpush3.bf16.msra.mxu0 %v2637_v27  ;;  %v2686_v25 = vld [vmem:[%s3247_s1 + $0x3d8] sm:$0xff]   ;;  %v2688_v27 = vld [vmem:[%s3247_s1 + $0x360] sm:$0xff]  }
  0x49   : > { %2468 = vmatpush3.bf16.msra.mxu1 %v2639_v28  ;;  %2447 = vmatprep.subr.bf16.mxu0 %v2640_v29  ;;  %v2689_v28 = vld [vmem:[%s3247_s1 + $0x320] sm:$0xff]  }
  0x4a   : > { %2469 = vmatprep.subr.bf16.mxu1 %v2642_v30  ;;  %1293 = vmatprep.mubr.bf16.mxu1 %v1162_v10  ;;  %v2690_v29 = vld [vmem:[%s3247_s1 + $0x3e0] sm:$0xff]   ;;  %v2722_v10 = vld [vmem:[%s3247_s1 + $0x478] sm:$0xff]  }
  0x4b   : > { %1113 = vmatprep.mubr.bf16.mxu0 %v982_v13  ;;  %v2691_v30 = vld [vmem:[%s3247_s1 + $0x3a0] sm:$0xff]  }
  0x4c   : > { %2448 = vmatpush3.bf16.msra.mxu0 %v2641_v32  ;;  %v2693_v32 = vld [vmem:[%s3247_s1 + $0x328] sm:$0xff]  }
  0x4d   : > { %2470 = vmatpush3.bf16.msra.mxu1 %v2643_v31  ;;  %2449 = vmatprep.subr.bf16.mxu0 %v2644_v33  ;;  %v2692_v31 = vld [vmem:[%s3247_s1 + $0x368] sm:$0xff]  }
  0x4e   : > { %2471 = vmatprep.subr.bf16.mxu1 %v2646_v34  ;;  %v2694_v33 = vld [vmem:[%s3247_s1 + $0x3e8] sm:$0xff]  }
  0x4f   : > { %v2695_v34 = vld [vmem:[%s3247_s1 + $0x3a8] sm:$0xff]  }
  0x50   : > { %2450 = vmatpush3.bf16.msra.mxu0 %v2645_v36  ;;  %v2697_v36 = vld [vmem:[%s3247_s1 + $0x330] sm:$0xff]  }
  0x51   : > { %2472 = vmatpush3.bf16.msra.mxu1 %v2647_v35  ;;  %2451 = vmatprep.subr.bf16.mxu0 %v2648_v37  ;;  %v2696_v35 = vld [vmem:[%s3247_s1 + $0x370] sm:$0xff]  }
  0x52   : > { %2473 = vmatprep.subr.bf16.mxu1 %v2650_v38  ;;  %v2698_v37 = vld [vmem:[%s3247_s1 + $0x3f0] sm:$0xff]  }
  0x53   : > { %v2699_v38 = vld [vmem:[%s3247_s1 + $0x3b0] sm:$0xff]  }
  0x54   : > { %2452 = vmatpush3.bf16.msra.mxu0 %v2649_v40  ;;  %v2701_v40 = vld [vmem:[%s3247_s1 + $0x338] sm:$0xff]  }
  0x55   : > { %2474 = vmatpush3.bf16.msra.mxu1 %v2651_v39  ;;  %2453 = vmatprep.subr.bf16.mxu0 %v2652_v41  ;;  %v2700_v39 = vld [vmem:[%s3247_s1 + $0x378] sm:$0xff]  }
  0x56   : > { %2475 = vmatprep.subr.bf16.mxu1 %v2654_v42  ;;  %v2702_v41 = vld [vmem:[%s3247_s1 + $0x3f8] sm:$0xff]   ;;  %v1302_v42 = vld [vmem:[%s2867_s6 + $0x8] sm:$0xff] }
  0x58   : > { %2454 = vmatpush3.bf16.msra.mxu0 %v2653_v44  ;;  %v2705_v44 = vld [vmem:[%s3247_s1 + $0x3b8] sm:$0xff]  }
  0x59   : > { %2476 = vmatpush3.bf16.msra.mxu1 %v2655_v43  ;;  %2455 = vmatprep.subr.bf16.mxu0 %v2656_v45  ;;  %v2236_v43 = vcombine.high %v1302_v42, %v1302_v42  ;;  %v2706_v45 = vld [vmem:[%s3247_s1 + $0x440] sm:$0xff]  }
  0x5a   : > { %2477 = vmatprep.subr.bf16.mxu1 %v2658_v46  ;;  %v1481_v46 = vld [vmem:[%s2867_s6 + $0x10] sm:$0x11] }
  0x5b   : > { %v2336_v3 = vcombine.high %v1676_v2, %v1481_v46 }
  0x5c   : > { %2456 = vmatpush3.bf16.msra.mxu0 %v2657_v48  ;;  %v2285_v48 = vcombine.low %v1302_v42, %v1481_v46 }
  0x5d   : > { %2478 = vmatpush3.bf16.msra.mxu1 %v2659_v47  ;;  %2457 = vmatprep.subr.bf16.mxu0 %v2660_v49  ;;  %v2235_v47 = vcombine.low %v1302_v42, %v1302_v42  ;;  %v2286_v49 = vcombine.high %v1302_v42, %v1481_v46  ;;  %v1716_v5 = vrot.slane %v2336_v3, 1 }
  0x5e   : > { %2479 = vmatprep.subr.bf16.mxu1 %v2662_v50  ;;  %v2709_v50 = vld [vmem:[%s3247_s1 + $0x400] sm:$0xff]  }
  0x60   : > { %2458 = vmatpush3.bf16.msra.mxu0 %v2661_v52  ;;  %v1533_v52 = vshll.u32 %v2286_v49, 16 }
  0x61   : > { %2480 = vmatpush3.bf16.msra.mxu1 %v2663_v51  ;;  %2459 = vmatprep.subr.bf16.mxu0 %v2664_v53  ;;  %v1531_v51 = vshrl.u32 %v2286_v49, 16  ;;  %v1524_v53 = vshrl.u32 %v2285_v48, 16 }
  0x62   : > { %2481 = vmatprep.subr.bf16.mxu1 %v2666_v55  ;;  %v2710_v55 = vld [vmem:[%s3247_s1 + $0x448] sm:$0xff]   ;;  %v1535_v56 = vrot.slane %v1533_v52, 1 }
  0x64   : > { %2460 = vmatpush3.bf16.msra.mxu0 %v2665_v54  ;;  %v1526_v54 = vshll.u32 %v2285_v48, 16  ;;  %v1536_v59 = vor.u32 %v1535_v56, %v1531_v51 }
  0x65   : > { %2482 = vmatpush3.bf16.msra.mxu1 %v2668_v58  ;;  %2489 = vmatprep.subr.bf16.mxu0 %v2670_v60  ;;  %v2711_v58 = vld [vmem:[%s3247_s1 + $0x408] sm:$0xff]  }
  0x66   : > { %2511 = vmatprep.subr.bf16.mxu1 %v2674_v11  ;;  %v1528_v57 = vrot.slane %v1526_v54, 1  ;;  %v2335_v11 = vcombine.low %v1676_v2, %v1481_v46 }
  0x67   : > { %1114 = vmatmul.mubr.bf16.vlgmr.msra.gmra.mrb[8].mxu0 %v974_v14 }
  0x68   : > { %1294 = vmatmul.mubr.bf16.vlgmr.msra.gmra.mrb[8].mxu1 %v1161_v9  ;;  %2490 = vmatpush3.bf16.msra.mxu0 %v2673_v8  ;;  %v1529_v60 = vor.u32 %v1528_v57, %v1524_v53  ;;  %v2720_v8 = vld [vmem:[%s3247_s1 + $0x470] sm:$0xff]   ;;  %v1715_v13 = vrot.slane %v2335_v11, 1 }
  0x69   : > { %2512 = vmatpush3.bf16.msra.mxu1 %v2675_v12  ;;  %2491 = vmatprep.subr.bf16.mxu0 %v2676_v15  ;;  %v2721_v9 = vld [vmem:[%s3247_s1 + $0x430] sm:$0xff]   ;;  %v2723_v12 = vld [vmem:[%s3247_s1 + $0x438] sm:$0xff]  }
  0x6a   : > { %2513 = vmatprep.subr.bf16.mxu1 %v2678_v17  ;;  %1471 = vmatprep.mubr.bf16.mxu0 %v2236_v43 }
  0x6b   : > { %1667 = vmatprep.mubr.bf16.mxu1 %v1536_v59 }
  0x6c   : > { %2492 = vmatpush3.bf16.msra.mxu0 %v2677_v16 }
  0x6d   : > { %2514 = vmatpush3.bf16.msra.mxu1 %v2679_v18  ;;  %2493 = vmatprep.subr.bf16.mxu0 %v2680_v19 }
  0x6e   : > { %2515 = vmatprep.subr.bf16.mxu1 %v2682_v21 }
  0x70   : > { %2494 = vmatpush3.bf16.msra.mxu0 %v2681_v20 }
  0x71   : > { %2516 = vmatpush3.bf16.msra.mxu1 %v2683_v22  ;;  %2495 = vmatprep.subr.bf16.mxu0 %v2684_v23 }
  0x72   : > { %2517 = vmatprep.subr.bf16.mxu1 %v2686_v25 }
  0x74   : > { %2496 = vmatpush3.bf16.msra.mxu0 %v2685_v24 }
  0x75   : > { %2518 = vmatpush3.bf16.msra.mxu1 %v2687_v26  ;;  %2497 = vmatprep.subr.bf16.mxu0 %v2688_v27 }
  0x76   : > { %2519 = vmatprep.subr.bf16.mxu1 %v2690_v29 }
  0x78   : > { %2498 = vmatpush3.bf16.msra.mxu0 %v2689_v28 }
  0x79   : > { %2520 = vmatpush3.bf16.msra.mxu1 %v2691_v30  ;;  %2499 = vmatprep.subr.bf16.mxu0 %v2692_v31 }
  0x7a   : > { %2521 = vmatprep.subr.bf16.mxu1 %v2694_v33 }
  0x7c   : > { %2500 = vmatpush3.bf16.msra.mxu0 %v2693_v32 }
  0x7d   : > { %2522 = vmatpush3.bf16.msra.mxu1 %v2695_v34  ;;  %2501 = vmatprep.subr.bf16.mxu0 %v2696_v35 }
  0x7e   : > { %2523 = vmatprep.subr.bf16.mxu1 %v2698_v37 }
  0x80   : > { %2502 = vmatpush3.bf16.msra.mxu0 %v2697_v36 }
  0x81   : > { %2524 = vmatpush3.bf16.msra.mxu1 %v2699_v38  ;;  %2503 = vmatprep.subr.bf16.mxu0 %v2700_v39 }
  0x82   : > { %2525 = vmatprep.subr.bf16.mxu1 %v2702_v41 }
  0x84   : > { %2504 = vmatpush3.bf16.msra.mxu0 %v2701_v40 }
  0x85   : > { %2526 = vmatpush3.bf16.msra.mxu1 %v2705_v44  ;;  %2533 = vmatprep.subr.bf16.mxu0 %v2706_v45 }
  0x87   : > { %1472 = vmatmul.mubr.bf16.vlgmr.msra.gmra.mrb[12].mxu0 %v2235_v47 }
  0x88   : > { %2534 = vmatpush3.bf16.msra.mxu0 %v2709_v50  ;;  %1668 = vmatmul.mubr.bf16.vlgmr.msra.gmra.mrb[12].mxu1 %v1529_v60 }
  0x89   : > { %2535 = vmatprep.subr.bf16.mxu0 %v2710_v55  ;;  %1847 = vmatprep.mubr.bf16.mxu0 %v1716_v5 }
  0x8c   : > { %2536 = vmatpush3.bf16.msra.mxu0 %v2711_v58 }
  0x8d   : > { %2537 = vmatprep.subr.bf16.mxu0 %v2712_v61 }
  0x90   : > { %2538 = vmatpush3.bf16.msra.mxu0 %v2713_v62 }
  0x91   : > { %2539 = vmatprep.subr.bf16.mxu0 %v2714_v63 }
  0x94   : > { %2540 = vmatpush3.bf16.msra.mxu0 %v2715_v0 }
  0x95   : > { %2541 = vmatprep.subr.bf16.mxu0 %v2716_v1  ;;  %v2353_v1 = vld [vmem:[%s3248_s2] ss:$0 sm:$0xff] }
  0x98   : > { %2542 = vmatpush3.bf16.msra.mxu0 %v2717_v4  ;;  %v2354_v4 = vld [vmem:[%s3249_s3] ss:$0 sm:$0xff] }
  0x99   : > { %2543 = vmatprep.subr.bf16.mxu0 %v2718_v6 }
  0x9c   : > { %2544 = vmatpush3.bf16.msra.mxu0 %v2719_v7 }
  0x9d   : > { %2545 = vmatprep.subr.bf16.mxu0 %v2720_v8 }
  0xa0   : > { %2546 = vmatpush3.bf16.msra.mxu0 %v2721_v9 }
  0xa1   : > { %2547 = vmatprep.subr.bf16.mxu0 %v2722_v10 }
  0xa4   : > { %2548 = vmatpush3.bf16.msra.mxu0 %v2723_v12 }
  0xa7   : > { %1848 = vmatmul.mubr.bf16.vlgmr.msra.gmra.mrb[16].mxu0 %v1715_v13 }
  0xfa   : > { %v2373_v19 = vpop.f32.mrb[0].mxu0 }
  0xfb   : > { %v2395_v14 = vpop.f32.mrb[0].mxu1  ;;  %v2374_v20 = vpop.f32.mrb[1].mxu0 }
  0xfc   : > { %v2396_v15 = vpop.f32.mrb[1].mxu1  ;;  %v2375_v21 = vadd.f32 %v2374_v20, %v2373_v19  ;;  %v2376_v22 = vpop.f32.mrb[2].mxu0 }
  0xfd   : > { %v2397_v16 = vadd.f32 %v2396_v15, %v2395_v14  ;;  %v2398_v17 = vpop.f32.mrb[2].mxu1  ;;  %v2377_v23 = vpop.f32.mrb[3].mxu0 }
  0xfe   : > { %v2399_v18 = vpop.f32.mrb[3].mxu1 }
  0xff   : > { %v559_v24 = vadd.f32 %v2397_v16, %v2375_v21 }
 0x11a   : > { %v2417_v26 = vpop.f32.mrb[4].mxu0 }
 0x11b   : > { %v2439_v25 = vpop.f32.mrb[4].mxu1  ;;  %v2418_v28 = vpop.f32.mrb[5].mxu0 }
 0x11c   : > { %v2440_v27 = vpop.f32.mrb[5].mxu1  ;;  %v2419_v31 = vadd.f32 %v2418_v28, %v2417_v26  ;;  %v2420_v32 = vpop.f32.mrb[6].mxu0 }
 0x11d   : > { %v2441_v29 = vadd.f32 %v2440_v27, %v2439_v25  ;;  %v2442_v30 = vpop.f32.mrb[6].mxu1  ;;  %v2421_v34 = vpop.f32.mrb[7].mxu0 }
 0x11e   : > { %v2443_v33 = vpop.f32.mrb[7].mxu1  ;;  %v743_v35 = vadd.f32 %v2419_v31, %v559_v24 }
 0x120   : > { %v927_v36 = vadd.f32 %v2441_v29, %v743_v35 }
 0x13a   : > { %v2461_v38 = vpop.f32.mrb[8].mxu0 }
 0x13b   : > { %v2483_v37 = vpop.f32.mrb[8].mxu1  ;;  %v2462_v40 = vpop.f32.mrb[9].mxu0 }
 0x13c   : > { %v2484_v39 = vpop.f32.mrb[9].mxu1  ;;  %v2463_v43 = vadd.f32 %v2462_v40, %v2461_v38  ;;  %v2464_v44 = vpop.f32.mrb[10].mxu0 }
 0x13d   : > { %v2485_v41 = vadd.f32 %v2484_v39, %v2483_v37  ;;  %v2486_v42 = vpop.f32.mrb[10].mxu1  ;;  %v2465_v46 = vpop.f32.mrb[11].mxu0 }
 0x13e   : > { %v2487_v45 = vpop.f32.mrb[11].mxu1  ;;  %v1121_v47 = vadd.f32 %v2463_v43, %v927_v36 }
 0x140   : > { %v1301_v48 = vadd.f32 %v2485_v41, %v1121_v47 }
 0x15a   : > { %v2505_v49 = vpop.f32.mrb[12].mxu0 }
 0x15b   : > { %v2506_v50 = vpop.f32.mrb[13].mxu0  ;;  %v2527_v55 = vpop.f32.mrb[12].mxu1 }
 0x15c   : > { %v2507_v51 = vadd.f32 %v2506_v50, %v2505_v49  ;;  %v2508_v52 = vpop.f32.mrb[14].mxu0  ;;  %v2528_v56 = vpop.f32.mrb[13].mxu1 }
 0x15d   : > { %v2509_v53 = vpop.f32.mrb[15].mxu0  ;;  %v2529_v57 = vadd.f32 %v2528_v56, %v2527_v55  ;;  %v2530_v58 = vpop.f32.mrb[14].mxu1 }
 0x15e   : > { %v1479_v54 = vadd.f32 %v2507_v51, %v1301_v48  ;;  %v2531_v59 = vpop.f32.mrb[15].mxu1 }
 0x160   : > { %v1675_v60 = vadd.f32 %v2529_v57, %v1479_v54 }
 0x17a   : > { %v2549_v61 = vpop.f32.mrb[16].mxu0 }
 0x17b   : > { %v2550_v62 = vpop.f32.mrb[17].mxu0 }
 0x17c   : > { %v2551_v63 = vadd.f32 %v2550_v62, %v2549_v61  ;;  %v2552_v0 = vpop.f32.mrb[18].mxu0 }
 0x17d   : > { %v2553_v2 = vpop.f32.mrb[19].mxu0 }
 0x17e   : > { %v1855_v3 = vadd.f32 %v2551_v63, %v1675_v60 }
 0x180   : > { %v1863_v5 = vmul.f32 %v2353_v1, %v1855_v3 }
 0x182   : > { %v1871_v6 = vadd.f32 %v2354_v4, %v1863_v5 }
 0x184   : > { %v1872_v7 = vmax.f32 %v1871_v6, 0.0 }
 0x186   : > { %v1873_v8 = vpack.c.bf16 %v1872_v7, %v1872_v7 }
 0x188   : > { %1874 = vst [vmem:[%s195_s11] sm:$0xf] %v1873_v8 }
 0x189 PF: > { %s14_s15 = sadd.s32 1, %s2732_s15  }
 0x18a   : > { %p11_p4 = scmp.ge.s32.totalorder %s14_s15, 4  }
 0x18c   :  { %13 = sbr.rel (!%p11_p4) target bundleno = 1 (0x1), region = 74 }

// kernel: wavelet_model_noatt.17
= control target key start
LH: loop header
LB: loop body
LE: loop exit
PB: predicated region body
PF: predicated region fallthrough
CT: control target
= control target key end

     0   :  { %s5133_s15 = smov 0   ;;  %s6085_s0 = inlined_call_operand.vmem [shape: bf16[2,11,512], index: 0, kind: input, shape index: {}]   ;;  %s6086_s1 = inlined_call_operand.vmem [shape: bf16[9,512,128], index: 1, kind: input, shape index: {}]   ;;  %s6087_s2 = inlined_call_operand.vmem [shape: f32[1,128], index: 2, kind: input, shape index: {}]   ;;  %s6088_s3 = inlined_call_operand.vmem [shape: f32[1,128], index: 3, kind: input, shape index: {}]   ;;  %s6089_s4 = inlined_call_operand.vmem [shape: bf16[2,3,128], index: 4, kind: output, shape index: {}]  }
   0x1 LB: > { %s3553_s16 = sadd.s32 4294967295, %s5106_s15   ;;  %p3557_p0 = scmp.ge.s32.totalorder %s5106_s15, 1  ;;  %s5106_s15 = sphi %s5133_s15, %s14_s15  }
   0x2   : > { %p162_p1 = scmp.lt.s32.totalorder %s5106_s15, 3 }
   0x4   : > { %p163_p2 = pnand %p3557_p0, %p162_p1 }
   0x5   : > { %v4790_v0 = vld [vmem:[%s6086_s1 + $0x140] sm:$0xff] (!%p163_p2)   ;;  %v4794_v4 = vld [vmem:[%s6086_s1 + $0x148] sm:$0xff] (!%p163_p2)   ;;  %v4798_v8 = vld [vmem:[%s6086_s1 + $0x150] sm:$0xff] (!%p163_p2)   ;;  %p187_p3 = scmp.lt.s32.totalorder (!%p163_p2), %s3553_s16, 1  ;;  %vm3494_vm0 = vcmask (!%p163_p2), 1041408  }
   0x6   : > { %166 = sbr.rel (%p163_p2) target bundleno = 525 (0x20d), region = 36  ;;  %v4791_v1 = vld [vmem:[%s6086_s1 + $0x1c0] sm:$0xff] (!%p163_p2)   ;;  %4386 = vmatprep.subr.bf16.mxu0 (!%p163_p2), %v4790_v0  ;;  %v4795_v5 = vld [vmem:[%s6086_s1 + $0x1c8] sm:$0xff] (!%p163_p2)   ;;  %v4799_v9 = vld [vmem:[%s6086_s1 + $0x1d0] sm:$0xff] (!%p163_p2)   ;;  %vm3495_vm1 = vsmask.f32 (!%p163_p2), 1280 }
   0x7   : > { %v4792_v2 = vld [vmem:[%s6086_s1 + $0x100] sm:$0xff] (!%p163_p2)   ;;  %4408 = vmatprep.subr.bf16.mxu1 (!%p163_p2), %v4791_v1  ;;  %v4796_v6 = vld [vmem:[%s6086_s1 + $0x108] sm:$0xff] (!%p163_p2)   ;;  %v4800_v10 = vld [vmem:[%s6086_s1 + $0x110] sm:$0xff] (!%p163_p2)  }
   0x8   : > { %v4793_v3 = vld [vmem:[%s6086_s1 + $0x180] sm:$0xff] (!%p163_p2)   ;;  %4387 = vmatpush3.bf16.msra.mxu0 (!%p163_p2), %v4792_v2  ;;  %v4797_v7 = vld [vmem:[%s6086_s1 + $0x188] sm:$0xff] (!%p163_p2)   ;;  %v4801_v11 = vld [vmem:[%s6086_s1 + $0x190] sm:$0xff] (!%p163_p2)  }
   0x9   : > { %4409 = vmatpush3.bf16.msra.mxu1 (!%p163_p2), %v4793_v3  ;;  %4388 = vmatprep.subr.bf16.mxu0 (!%p163_p2), %v4794_v4  ;;  %v4802_v12 = vld [vmem:[%s6086_s1 + $0x158] sm:$0xff] (!%p163_p2)   ;;  %v4806_v16 = vld [vmem:[%s6086_s1 + $0x160] sm:$0xff] (!%p163_p2)   ;;  %v4810_v20 = vld [vmem:[%s6086_s1 + $0x168] sm:$0xff] (!%p163_p2)  }
   0xa   : > { %4410 = vmatprep.subr.bf16.mxu1 (!%p163_p2), %v4795_v5  ;;  %v4803_v13 = vld [vmem:[%s6086_s1 + $0x1d8] sm:$0xff] (!%p163_p2)   ;;  %v4807_v17 = vld [vmem:[%s6086_s1 + $0x1e0] sm:$0xff] (!%p163_p2)   ;;  %v4811_v21 = vld [vmem:[%s6086_s1 + $0x1e8] sm:$0xff] (!%p163_p2)  }
   0xb   : > { %v4804_v14 = vld [vmem:[%s6086_s1 + $0x118] sm:$0xff] (!%p163_p2)   ;;  %v4808_v18 = vld [vmem:[%s6086_s1 + $0x120] sm:$0xff] (!%p163_p2)   ;;  %v4812_v22 = vld [vmem:[%s6086_s1 + $0x128] sm:$0xff] (!%p163_p2)  }
   0xc   : > { %4389 = vmatpush3.bf16.msra.mxu0 (!%p163_p2), %v4796_v6  ;;  %v4805_v15 = vld [vmem:[%s6086_s1 + $0x198] sm:$0xff] (!%p163_p2)   ;;  %v4809_v19 = vld [vmem:[%s6086_s1 + $0x1a0] sm:$0xff] (!%p163_p2)   ;;  %v4813_v23 = vld [vmem:[%s6086_s1 + $0x1a8] sm:$0xff] (!%p163_p2)  }
   0xd   : > { %4411 = vmatpush3.bf16.msra.mxu1 %v4797_v7  ;;  %4390 = vmatprep.subr.bf16.mxu0 %v4798_v8  ;;  %s6091_s16 = smov (!%p187_p3, %s3553_s16), 1  ;;  %v4814_v24 = vld [vmem:[%s6086_s1 + $0x170] sm:$0xff]   ;;  %v4818_v28 = vld [vmem:[%s6086_s1 + $0x178] sm:$0xff]   ;;  %v4826_v38 = vld [vmem:[%s6086_s1 + $0x40] sm:$0xff]  }
   0xe   : > { %4412 = vmatprep.subr.bf16.mxu1 %v4799_v9  ;;  %v4815_v25 = vld [vmem:[%s6086_s1 + $0x1f0] sm:$0xff]   ;;  %s4385_s23 = sshll.u32 %s6091_s16, 5  ;;  %v4819_v29 = vld [vmem:[%s6086_s1 + $0x1f8] sm:$0xff]   ;;  %v4827_v39 = vld [vmem:[%s6086_s1 + $0xc0] sm:$0xff]   ;;  %s3560_s20 = sshll.u32 %s6091_s16, 1 }
   0xf   : > { %v4816_v26 = vld [vmem:[%s6086_s1 + $0x130] sm:$0xff]   ;;  %s5241_s6 = scalar_lea.vmem %s6085_s0, %s4385_s23  ;;  %v4820_v30 = vld [vmem:[%s6086_s1 + $0x138] sm:$0xff]   ;;  %v4828_v50 = vld [vmem:[%s6086_s1] sm:$0xff]   ;;  %s195_s25 = scalar_lea.vmem %s6089_s4, %s3560_s20 }
  0x10   : > { %4391 = vmatpush3.bf16.msra.mxu0 %v4800_v10  ;;  %v4817_v27 = vld [vmem:[%s6086_s1 + $0x1b0] sm:$0xff]   ;;  %v4821_v31 = vld [vmem:[%s6086_s1 + $0x1b8] sm:$0xff]   ;;  %v197_v32 = vld [vmem:[%s5241_s6] sm:$0x33] }
  0x11   : > { %4413 = vmatpush3.bf16.msra.mxu1 %v4801_v11  ;;  %4392 = vmatprep.subr.bf16.mxu0 %v4802_v12  ;;  %v198_v33 = vld [vmem:[%s5241_s6 + $0x8] sm:$0x33]  ;;  %v5251_v34 = vcombine.low %v197_v32, %v197_v32  ;;  %v3626_v35 = vcombine.high %v197_v32, %v197_v32  ;;  %v4829_v51 = vld [vmem:[%s6086_s1 + $0x80] sm:$0xff]   ;;  %v4834_v62 = vld [vmem:[%s6086_s1 + $0x50] sm:$0xff]  }
  0x12   : > { %4414 = vmatprep.subr.bf16.mxu1 %v4803_v13  ;;  %v5253_v36 = vcombine.low %v198_v33, %v198_v33  ;;  %v3628_v37 = vcombine.high %v198_v33, %v198_v33  ;;  %v4830_v56 = vld [vmem:[%s6086_s1 + $0x48] sm:$0xff]   ;;  %v4835_v63 = vld [vmem:[%s6086_s1 + $0xd0] sm:$0xff]   ;;  %v4838_v2 = vld [vmem:[%s6086_s1 + $0x58] sm:$0xff]  }
  0x13   : > { %v346_v40 = vshrl.u32 %v3626_v35, 16  ;;  %v348_v41 = vshll.u32 %v3626_v35, 16  ;;  %v339_v44 = vshrl.u32 %v5251_v34, 16  ;;  %v341_v45 = vshll.u32 %v5251_v34, 16  ;;  %v4831_v59 = vld [vmem:[%s6086_s1 + $0xc8] sm:$0xff]   ;;  %v4836_v0 = vld [vmem:[%s6086_s1 + $0x10] sm:$0xff]   ;;  %vm3496_vm2 = vmand %vm3494_vm0, %vm3495_vm1 }
  0x14   : > { %4393 = vmatpush3.bf16.msra.mxu0 %v4804_v14  ;;  %v360_v42 = vshrl.u32 %v3628_v37, 16  ;;  %v362_v43 = vshll.u32 %v3628_v37, 16  ;;  %v353_v46 = vshrl.u32 %v5253_v36, 16  ;;  %v355_v47 = vshll.u32 %v5253_v36, 16  ;;  %v4832_v60 = vld [vmem:[%s6086_s1 + $0x8] sm:$0xff]   ;;  %v4837_v1 = vld [vmem:[%s6086_s1 + $0x90] sm:$0xff]  }
  0x15   : > { %4415 = vmatpush3.bf16.msra.mxu1 %v4805_v15  ;;  %4394 = vmatprep.subr.bf16.mxu0 %v4806_v16  ;;  %v350_v48 = vrot.slane %v348_v41, 1  ;;  %v343_v52 = vrot.slane %v341_v45, 1  ;;  %v4833_v61 = vld [vmem:[%s6086_s1 + $0x88] sm:$0xff]   ;;  %v4839_v3 = vld [vmem:[%s6086_s1 + $0xd8] sm:$0xff]   ;;  %v4842_v6 = vld [vmem:[%s6086_s1 + $0x60] sm:$0xff]  }
  0x16   : > { %4416 = vmatprep.subr.bf16.mxu1 %v4807_v17  ;;  %v364_v49 = vrot.slane %v362_v43, 1  ;;  %v357_v53 = vrot.slane %v355_v47, 1  ;;  %v4840_v4 = vld [vmem:[%s6086_s1 + $0x18] sm:$0xff]   ;;  %v4843_v7 = vld [vmem:[%s6086_s1 + $0xe0] sm:$0xff]   ;;  %v4846_v10 = vld [vmem:[%s6086_s1 + $0x68] sm:$0xff]  }
  0x17   : > { %v351_v54 = vor.u32 %v350_v48, %v346_v40  ;;  %v344_v57 = vor.u32 %v343_v52, %v339_v44  ;;  %v4841_v5 = vld [vmem:[%s6086_s1 + $0x98] sm:$0xff]   ;;  %v4844_v8 = vld [vmem:[%s6086_s1 + $0x20] sm:$0xff]   ;;  %v4847_v11 = vld [vmem:[%s6086_s1 + $0xe8] sm:$0xff]  }
  0x18   : > { %4395 = vmatpush3.bf16.msra.mxu0 %v4808_v18  ;;  %v365_v55 = vor.u32 %v364_v49, %v360_v42  ;;  %v358_v58 = vor.u32 %v357_v53, %v353_v46  ;;  %v4845_v9 = vld [vmem:[%s6086_s1 + $0xa0] sm:$0xff]   ;;  %v4848_v12 = vld [vmem:[%s6086_s1 + $0x28] sm:$0xff]   ;;  %v4850_v14 = vld [vmem:[%s6086_s1 + $0x70] sm:$0xff]  }
  0x19   : > { %4417 = vmatpush3.bf16.msra.mxu1 %v4809_v19  ;;  %4396 = vmatprep.subr.bf16.mxu0 %v4810_v20  ;;  %v4849_v13 = vld [vmem:[%s6086_s1 + $0xa8] sm:$0xff]   ;;  %v4851_v15 = vld [vmem:[%s6086_s1 + $0xf0] sm:$0xff]   ;;  %v4854_v18 = vld [vmem:[%s6086_s1 + $0x78] sm:$0xff]  }
  0x1a   : > { %4418 = vmatprep.subr.bf16.mxu1 %v4811_v21  ;;  %594 = vmatprep.mubr.bf16.mxu0 %v351_v54  ;;  %v4852_v16 = vld [vmem:[%s6086_s1 + $0x30] sm:$0xff]   ;;  %v4855_v19 = vld [vmem:[%s6086_s1 + $0xf8] sm:$0xff]   ;;  %v4876_v40 = vld [vmem:[%s6086_s1 + $0x220] sm:$0xff]  }
  0x1b   : > { %634 = vmatprep.mubr.bf16.mxu1 %v365_v55  ;;  %v4853_v17 = vld [vmem:[%s6086_s1 + $0xb0] sm:$0xff]   ;;  %v4856_v20 = vld [vmem:[%s6086_s1 + $0x38] sm:$0xff]   ;;  %v4877_v41 = vld [vmem:[%s6086_s1 + $0x2a0] sm:$0xff]  }
  0x1c   : > { %4397 = vmatpush3.bf16.msra.mxu0 %v4812_v22  ;;  %v4857_v21 = vld [vmem:[%s6086_s1 + $0xb8] sm:$0xff]   ;;  %v4858_v22 = vld [vmem:[%s6086_s1 + $0x240] sm:$0xff]   ;;  %v4868_v32 = vld [vmem:[%s6086_s1 + $0x210] sm:$0xff]  }
  0x1d   : > { %4419 = vmatpush3.bf16.msra.mxu1 %v4813_v23  ;;  %4398 = vmatprep.subr.bf16.mxu0 %v4814_v24  ;;  %v4859_v23 = vld [vmem:[%s6086_s1 + $0x2c0] sm:$0xff]   ;;  %v4869_v33 = vld [vmem:[%s6086_s1 + $0x290] sm:$0xff]   ;;  %v4878_v42 = vld [vmem:[%s6086_s1 + $0x268] sm:$0xff]  }
  0x1e   : > { %4420 = vmatprep.subr.bf16.mxu1 %v4815_v25  ;;  %v4860_v24 = vld [vmem:[%s6086_s1 + $0x200] sm:$0xff]   ;;  %v4879_v43 = vld [vmem:[%s6086_s1 + $0x2e8] sm:$0xff]   ;;  %v4882_v46 = vld [vmem:[%s6086_s1 + $0x270] sm:$0xff]  }
  0x1f   : > { %v4861_v25 = vld [vmem:[%s6086_s1 + $0x280] sm:$0xff]   ;;  %v4880_v44 = vld [vmem:[%s6086_s1 + $0x228] sm:$0xff]   ;;  %v4883_v47 = vld [vmem:[%s6086_s1 + $0x2f0] sm:$0xff]  }
  0x20   : > { %4399 = vmatpush3.bf16.msra.mxu0 %v4816_v26  ;;  %v4862_v26 = vld [vmem:[%s6086_s1 + $0x248] sm:$0xff]   ;;  %v4884_v48 = vld [vmem:[%s6086_s1 + $0x230] sm:$0xff]   ;;  %v4888_v52 = vld [vmem:[%s6086_s1 + $0x238] sm:$0xff]  }
  0x21   : > { %4421 = vmatpush3.bf16.msra.mxu1 %v4817_v27  ;;  %4400 = vmatprep.subr.bf16.mxu0 %v4818_v28  ;;  %v4863_v27 = vld [vmem:[%s6086_s1 + $0x2c8] sm:$0xff]   ;;  %v4885_v49 = vld [vmem:[%s6086_s1 + $0x2b0] sm:$0xff]   ;;  %v4889_v53 = vld [vmem:[%s6086_s1 + $0x2b8] sm:$0xff]  }
  0x22   : > { %4422 = vmatprep.subr.bf16.mxu1 %v4819_v29  ;;  %v4864_v28 = vld [vmem:[%s6086_s1 + $0x208] sm:$0xff]   ;;  %v918_v54 = vld [vmem:[%s5241_s6] sm:$0x66] }
  0x23   : > { %v4865_v29 = vld [vmem:[%s6086_s1 + $0x288] sm:$0xff]  }
  0x24   : > { %4401 = vmatpush3.bf16.msra.mxu0 %v4820_v30  ;;  %v4866_v30 = vld [vmem:[%s6086_s1 + $0x250] sm:$0xff]   ;;  %v4881_v45 = vld [vmem:[%s6086_s1 + $0x2a8] sm:$0xff]  }
  0x25   : > { %4423 = vmatpush3.bf16.msra.mxu1 %v4821_v31  ;;  %4430 = vmatprep.subr.bf16.mxu0 %v4826_v38  ;;  %v4867_v31 = vld [vmem:[%s6086_s1 + $0x2d0] sm:$0xff]   ;;  %v4874_v38 = vld [vmem:[%s6086_s1 + $0x260] sm:$0xff]   ;;  %v919_v55 = vld [vmem:[%s5241_s6 + $0x8] sm:$0x66] }
  0x26   : > { %4452 = vmatprep.subr.bf16.mxu1 %v4827_v39  ;;  %v4875_v39 = vld [vmem:[%s6086_s1 + $0x2e0] sm:$0xff]  }
  0x27   : > { %595 = vmatmul.mubr.bf16.vlgmr.msra.gmra.mrb[0].mxu0 %v344_v57  ;;  %v3758_v57 = vcombine.high %v918_v54, %v918_v54 }
  0x28   : > { %635 = vmatmul.mubr.bf16.vlgmr.msra.gmra.mrb[0].mxu1 %v358_v58  ;;  %4431 = vmatpush3.bf16.msra.mxu0 %v4828_v50  ;;  %v4886_v50 = vld [vmem:[%s6086_s1 + $0x278] sm:$0xff]   ;;  %v5457_v58 = vcombine.low %v919_v55, %v919_v55 }
  0x29   : > { %4453 = vmatpush3.bf16.msra.mxu1 %v4829_v51  ;;  %4432 = vmatprep.subr.bf16.mxu0 %v4830_v56  ;;  %v4887_v51 = vld [vmem:[%s6086_s1 + $0x2f8] sm:$0xff]   ;;  %v5455_v56 = vcombine.low %v918_v54, %v918_v54  ;;  %v4928_v54 = vld [vmem:[%s6086_s1 + $0x400] sm:$0xff]  }
  0x2a   : > { %4454 = vmatprep.subr.bf16.mxu1 %v4831_v59  ;;  %870 = vmatprep.mubr.bf16.mxu0 %v3626_v35  ;;  %v4871_v35 = vld [vmem:[%s6086_s1 + $0x2d8] sm:$0xff]   ;;  %v4894_v59 = vld [vmem:[%s6086_s1 + $0x340] sm:$0xff]  }
  0x2b   : > { %910 = vmatprep.mubr.bf16.mxu1 %v3628_v37  ;;  %v4873_v37 = vld [vmem:[%s6086_s1 + $0x298] sm:$0xff]  }
  0x2c   : > { %4433 = vmatpush3.bf16.msra.mxu0 %v4832_v60  ;;  %v3760_v60 = vcombine.high %v919_v55, %v919_v55  ;;  %v4929_v55 = vld [vmem:[%s6086_s1 + $0x480] sm:$0xff]  }
  0x2d   : > { %4455 = vmatpush3.bf16.msra.mxu1 %v4833_v61  ;;  %4434 = vmatprep.subr.bf16.mxu0 %v4834_v62  ;;  %v4895_v61 = vld [vmem:[%s6086_s1 + $0x3c0] sm:$0xff]   ;;  %v996_v62 = vrot.slane %v3758_v57, 1 }
  0x2e   : > { %4456 = vmatprep.subr.bf16.mxu1 %v4835_v63  ;;  %v995_v63 = vrot.slane %v5455_v56, 1 }
  0x30   : > { %4435 = vmatpush3.bf16.msra.mxu0 %v4836_v0  ;;  %v997_v0 = vrot.slane %v5457_v58, 1 }
  0x31   : > { %4457 = vmatpush3.bf16.msra.mxu1 %v4837_v1  ;;  %4436 = vmatprep.subr.bf16.mxu0 %v4838_v2  ;;  %v4896_v1 = vld [vmem:[%s6086_s1 + $0x300] sm:$0xff]   ;;  %v998_v2 = vrot.slane %v3760_v60, 1 }
  0x32   : > { %4458 = vmatprep.subr.bf16.mxu1 %v4839_v3  ;;  %v4897_v3 = vld [vmem:[%s6086_s1 + $0x380] sm:$0xff]  }
  0x34   : > { %4437 = vmatpush3.bf16.msra.mxu0 %v4840_v4  ;;  %v4898_v4 = vld [vmem:[%s6086_s1 + $0x348] sm:$0xff]  }
  0x35   : > { %4459 = vmatpush3.bf16.msra.mxu1 %v4841_v5  ;;  %4438 = vmatprep.subr.bf16.mxu0 %v4842_v6  ;;  %v1350_v5 = vshrl.u32 %v3758_v57, 16  ;;  %v4899_v6 = vld [vmem:[%s6086_s1 + $0x3c8] sm:$0xff]  }
  0x36   : > { %4460 = vmatprep.subr.bf16.mxu1 %v4843_v7  ;;  %v1353_v7 = vshll.u32 %v3758_v57, 16  ;;  %v4931_v57 = vld [vmem:[%s6086_s1 + $0x4c8] sm:$0xff]  }
  0x38   : > { %4439 = vmatpush3.bf16.msra.mxu0 %v4844_v8  ;;  %v4900_v8 = vld [vmem:[%s6086_s1 + $0x308] sm:$0xff]  }
  0x39   : > { %4461 = vmatpush3.bf16.msra.mxu1 %v4845_v9  ;;  %4440 = vmatprep.subr.bf16.mxu0 %v4846_v10  ;;  %v1352_v9 = vrot.slane %v1350_v5, 1  ;;  %v4901_v10 = vld [vmem:[%s6086_s1 + $0x388] sm:$0xff]   ;;  %v4943_v5 = vld [vmem:[%s6086_s1 + $0x4e0] sm:$0xff]  }
  0x3a   : > { %4462 = vmatprep.subr.bf16.mxu1 %v4847_v11  ;;  %v1355_v11 = vrot.slane %v1353_v7, 2  ;;  %v4945_v7 = vld [vmem:[%s6086_s1 + $0x4a0] sm:$0xff]  }
  0x3c   : > { %4441 = vmatpush3.bf16.msra.mxu0 %v4848_v12  ;;  %v4902_v12 = vld [vmem:[%s6086_s1 + $0x350] sm:$0xff]  }
  0x3d   : > { %4463 = vmatpush3.bf16.msra.mxu1 %v4849_v13  ;;  %4442 = vmatprep.subr.bf16.mxu0 %v4850_v14  ;;  %v1366_v13 = vshrl.u32 %v3760_v60, 16  ;;  %v4903_v14 = vld [vmem:[%s6086_s1 + $0x3d0] sm:$0xff]  }
  0x3e   : > { %4464 = vmatprep.subr.bf16.mxu1 %v4851_v15  ;;  %v1356_v15 = vor.u32 %v1355_v11, %v1352_v9  ;;  %v4947_v9 = vld [vmem:[%s6086_s1 + $0x4e8] sm:$0xff]  }
  0x3f   : > { %v4949_v11 = vld [vmem:[%s6086_s1 + $0x4a8] sm:$0xff]  }
  0x40   : > { %4443 = vmatpush3.bf16.msra.mxu0 %v4852_v16  ;;  %v1369_v16 = vshll.u32 %v3760_v60, 16  ;;  %v4934_v60 = vld [vmem:[%s6086_s1 + $0x450] sm:$0xff]  }
  0x41   : > { %4465 = vmatpush3.bf16.msra.mxu1 %v4853_v17  ;;  %4444 = vmatprep.subr.bf16.mxu0 %v4854_v18  ;;  %v4904_v17 = vld [vmem:[%s6086_s1 + $0x310] sm:$0xff]   ;;  %v1368_v18 = vrot.slane %v1366_v13, 1 }
  0x42   : > { %4466 = vmatprep.subr.bf16.mxu1 %v4855_v19  ;;  %v4905_v19 = vld [vmem:[%s6086_s1 + $0x390] sm:$0xff]  }
  0x43   : > { %v4951_v13 = vld [vmem:[%s6086_s1 + $0x4f0] sm:$0xff]  }
  0x44   : > { %4445 = vmatpush3.bf16.msra.mxu0 %v4856_v20  ;;  %v1371_v20 = vrot.slane %v1369_v16, 2  ;;  %v4954_v16 = vld [vmem:[%s6086_s1 + $0x478] sm:$0xff]  }
  0x45   : > { %4467 = vmatpush3.bf16.msra.mxu1 %v4857_v21  ;;  %4474 = vmatprep.subr.bf16.mxu0 %v4858_v22  ;;  %v4906_v21 = vld [vmem:[%s6086_s1 + $0x358] sm:$0xff]  }
  0x46   : > { %4496 = vmatprep.subr.bf16.mxu1 %v4859_v23  ;;  %v4907_v22 = vld [vmem:[%s6086_s1 + $0x3d8] sm:$0xff]   ;;  %v1372_v23 = vor.u32 %v1371_v20, %v1368_v18  ;;  %v1650_v20 = vld [vmem:[%s5241_s6] sm:$0xcc] }
  0x47   : > { %871 = vmatmul.mubr.bf16.vlgmr.msra.gmra.mrb[4].mxu0 %v5251_v34  ;;  %v4870_v34 = vld [vmem:[%s6086_s1 + $0x258] sm:$0xff]  }
  0x48   : > { %911 = vmatmul.mubr.bf16.vlgmr.msra.gmra.mrb[4].mxu1 %v5253_v36  ;;  %4475 = vmatpush3.bf16.msra.mxu0 %v4860_v24  ;;  %v4872_v36 = vld [vmem:[%s6086_s1 + $0x218] sm:$0xff]  }
  0x49   : > { %4497 = vmatpush3.bf16.msra.mxu1 %v4861_v25  ;;  %4476 = vmatprep.subr.bf16.mxu0 %v4862_v26  ;;  %v4908_v24 = vld [vmem:[%s6086_s1 + $0x318] sm:$0xff]   ;;  %v4910_v26 = vld [vmem:[%s6086_s1 + $0x360] sm:$0xff]  }
  0x4a   : > { %4498 = vmatprep.subr.bf16.mxu1 %v4863_v27  ;;  %1227 = vmatprep.mubr.bf16.mxu0 %v996_v62  ;;  %v4909_v25 = vld [vmem:[%s6086_s1 + $0x398] sm:$0xff]   ;;  %v4911_v27 = vld [vmem:[%s6086_s1 + $0x3e0] sm:$0xff]   ;;  %v4936_v62 = vld [vmem:[%s6086_s1 + $0x410] sm:$0xff]  }
  0x4b   : > { %1267 = vmatprep.mubr.bf16.mxu1 %v998_v2  ;;  %v4940_v2 = vld [vmem:[%s6086_s1 + $0x418] sm:$0xff]  }
  0x4c   : > { %4477 = vmatpush3.bf16.msra.mxu0 %v4864_v28  ;;  %v4912_v28 = vld [vmem:[%s6086_s1 + $0x320] sm:$0xff]   ;;  %v4956_v18 = vld [vmem:[%s6086_s1 + $0x438] sm:$0xff]  }
  0x4d   : > { %4499 = vmatpush3.bf16.msra.mxu1 %v4865_v29  ;;  %4478 = vmatprep.subr.bf16.mxu0 %v4866_v30  ;;  %v4913_v29 = vld [vmem:[%s6086_s1 + $0x3a0] sm:$0xff]   ;;  %v4914_v30 = vld [vmem:[%s6086_s1 + $0x368] sm:$0xff]  }
  0x4e   : > { %4500 = vmatprep.subr.bf16.mxu1 %v4867_v31  ;;  %v4915_v31 = vld [vmem:[%s6086_s1 + $0x3e8] sm:$0xff]  }
  0x50   : > { %4479 = vmatpush3.bf16.msra.mxu0 %v4868_v32  ;;  %v4916_v32 = vld [vmem:[%s6086_s1 + $0x328] sm:$0xff]  }
  0x51   : > { %4501 = vmatpush3.bf16.msra.mxu1 %v4869_v33  ;;  %4480 = vmatprep.subr.bf16.mxu0 %v4870_v34  ;;  %v4917_v33 = vld [vmem:[%s6086_s1 + $0x3a8] sm:$0xff]   ;;  %v1342_v34 = vshrl.u32 %v5455_v56, 16 }
  0x52   : > { %4502 = vmatprep.subr.bf16.mxu1 %v4871_v35  ;;  %v4918_v35 = vld [vmem:[%s6086_s1 + $0x370] sm:$0xff]  }
  0x54   : > { %4481 = vmatpush3.bf16.msra.mxu0 %v4872_v36  ;;  %v1345_v36 = vshll.u32 %v5455_v56, 16  ;;  %v4930_v56 = vld [vmem:[%s6086_s1 + $0x448] sm:$0xff]  }
  0x55   : > { %4503 = vmatpush3.bf16.msra.mxu1 %v4873_v37  ;;  %4482 = vmatprep.subr.bf16.mxu0 %v4874_v38  ;;  %v4919_v37 = vld [vmem:[%s6086_s1 + $0x3f0] sm:$0xff]   ;;  %v1358_v38 = vshrl.u32 %v5457_v58, 16 }
  0x56   : > { %4504 = vmatprep.subr.bf16.mxu1 %v4875_v39  ;;  %v4920_v39 = vld [vmem:[%s6086_s1 + $0x330] sm:$0xff]  }
  0x58   : > { %4483 = vmatpush3.bf16.msra.mxu0 %v4876_v40  ;;  %v1361_v40 = vshll.u32 %v5457_v58, 16  ;;  %v4932_v58 = vld [vmem:[%s6086_s1 + $0x408] sm:$0xff]  }
  0x59   : > { %4505 = vmatpush3.bf16.msra.mxu1 %v4877_v41  ;;  %4484 = vmatprep.subr.bf16.mxu0 %v4878_v42  ;;  %v4921_v41 = vld [vmem:[%s6086_s1 + $0x3b0] sm:$0xff]   ;;  %v1344_v42 = vrot.slane %v1342_v34, 1  ;;  %v4966_v34 = vld [vmem:[%s6086_s1 + $0x548] sm:$0xff]  }
  0x5a   : > { %4506 = vmatprep.subr.bf16.mxu1 %v4879_v43  ;;  %v4922_v43 = vld [vmem:[%s6086_s1 + $0x378] sm:$0xff]  }
  0x5c   : > { %4485 = vmatpush3.bf16.msra.mxu0 %v4880_v44  ;;  %v1347_v44 = vrot.slane %v1345_v36, 2  ;;  %v4967_v36 = vld [vmem:[%s6086_s1 + $0x5c8] sm:$0xff]  }
  0x5d   : > { %4507 = vmatpush3.bf16.msra.mxu1 %v4881_v45  ;;  %4486 = vmatprep.subr.bf16.mxu0 %v4882_v46  ;;  %v4923_v45 = vld [vmem:[%s6086_s1 + $0x3f8] sm:$0xff]   ;;  %v1360_v46 = vrot.slane %v1358_v38, 1  ;;  %v4968_v38 = vld [vmem:[%s6086_s1 + $0x508] sm:$0xff]  }
  0x5e   : > { %4508 = vmatprep.subr.bf16.mxu1 %v4883_v47  ;;  %v4924_v47 = vld [vmem:[%s6086_s1 + $0x338] sm:$0xff]  }
  0x60   : > { %4487 = vmatpush3.bf16.msra.mxu0 %v4884_v48  ;;  %v1363_v48 = vrot.slane %v1361_v40, 2  ;;  %v4969_v40 = vld [vmem:[%s6086_s1 + $0x588] sm:$0xff]  }
  0x61   : > { %4509 = vmatpush3.bf16.msra.mxu1 %v4885_v49  ;;  %4488 = vmatprep.subr.bf16.mxu0 %v4886_v50  ;;  %v4925_v49 = vld [vmem:[%s6086_s1 + $0x3b8] sm:$0xff]   ;;  %v4926_v50 = vld [vmem:[%s6086_s1 + $0x440] sm:$0xff]  }
  0x62   : > { %4510 = vmatprep.subr.bf16.mxu1 %v4887_v51  ;;  %v4927_v51 = vld [vmem:[%s6086_s1 + $0x4c0] sm:$0xff]  }
  0x64   : > { %4489 = vmatpush3.bf16.msra.mxu0 %v4888_v52  ;;  %v1348_v52 = vor.u32 %v1347_v44, %v1344_v42  ;;  %v4970_v42 = vld [vmem:[%s6086_s1 + $0x550] sm:$0xff]  }
  0x65   : > { %4511 = vmatpush3.bf16.msra.mxu1 %v4889_v53  ;;  %4518 = vmatprep.subr.bf16.mxu0 %v4894_v59  ;;  %v1364_v53 = vor.u32 %v1363_v48, %v1360_v46  ;;  %v4933_v59 = vld [vmem:[%s6086_s1 + $0x488] sm:$0xff]   ;;  %v4971_v44 = vld [vmem:[%s6086_s1 + $0x5d0] sm:$0xff]  }
  0x66   : > { %4540 = vmatprep.subr.bf16.mxu1 %v4895_v61  ;;  %v4935_v61 = vld [vmem:[%s6086_s1 + $0x4d0] sm:$0xff]  }
  0x67   : > { %1228 = vmatmul.mubr.bf16.vlgmr.msra.gmra.mrb[8].mxu0 %v995_v63  ;;  %v4937_v63 = vld [vmem:[%s6086_s1 + $0x490] sm:$0xff]  }
  0x68   : > { %1268 = vmatmul.mubr.bf16.vlgmr.msra.gmra.mrb[8].mxu1 %v997_v0  ;;  %4519 = vmatpush3.bf16.msra.mxu0 %v4896_v1  ;;  %v4938_v0 = vld [vmem:[%s6086_s1 + $0x458] sm:$0xff]  }
  0x69   : > { %4541 = vmatpush3.bf16.msra.mxu1 %v4897_v3  ;;  %4520 = vmatprep.subr.bf16.mxu0 %v4898_v4  ;;  %v4939_v1 = vld [vmem:[%s6086_s1 + $0x4d8] sm:$0xff]   ;;  %v4942_v4 = vld [vmem:[%s6086_s1 + $0x460] sm:$0xff]  }
  0x6a   : > { %4542 = vmatprep.subr.bf16.mxu1 %v4899_v6  ;;  %1601 = vmatprep.mubr.bf16.mxu0 %v1356_v15  ;;  %v4941_v3 = vld [vmem:[%s6086_s1 + $0x498] sm:$0xff]   ;;  %v4944_v6 = vld [vmem:[%s6086_s1 + $0x420] sm:$0xff]   ;;  %v4953_v15 = vld [vmem:[%s6086_s1 + $0x4b0] sm:$0xff]  }
  0x6b   : > { %1641 = vmatprep.mubr.bf16.mxu1 %v1372_v23  ;;  %v3954_v23 = vcombine.high %v1650_v20, %v1650_v20 }
  0x6c   : > { %4521 = vmatpush3.bf16.msra.mxu0 %v4900_v8  ;;  %v4946_v8 = vld [vmem:[%s6086_s1 + $0x468] sm:$0xff]  }
  0x6d   : > { %4543 = vmatpush3.bf16.msra.mxu1 %v4901_v10  ;;  %4522 = vmatprep.subr.bf16.mxu0 %v4902_v12  ;;  %v4948_v10 = vld [vmem:[%s6086_s1 + $0x428] sm:$0xff]   ;;  %v4950_v12 = vld [vmem:[%s6086_s1 + $0x470] sm:$0xff]  }
  0x6e   : > { %4544 = vmatprep.subr.bf16.mxu1 %v4903_v14  ;;  %v4952_v14 = vld [vmem:[%s6086_s1 + $0x430] sm:$0xff]  }
  0x70   : > { %4523 = vmatpush3.bf16.msra.mxu0 %v4904_v17  ;;  %v4955_v17 = vld [vmem:[%s6086_s1 + $0x4f8] sm:$0xff]  }
  0x71   : > { %4545 = vmatpush3.bf16.msra.mxu1 %v4905_v19  ;;  %4524 = vmatprep.subr.bf16.mxu0 %v4906_v21  ;;  %v4957_v19 = vld [vmem:[%s6086_s1 + $0x4b8] sm:$0xff]   ;;  %v1651_v21 = vld [vmem:[%s5241_s6 + $0x8] sm:$0xcc] }
  0x72   : > { %4546 = vmatprep.subr.bf16.mxu1 %v4907_v22  ;;  %v5659_v22 = vcombine.low %v1650_v20, %v1650_v20  ;;  %v4996_v20 = vld [vmem:[%s6086_s1 + $0x600] sm:$0xff]  }
  0x74   : > { %4525 = vmatpush3.bf16.msra.mxu0 %v4908_v24  ;;  %v5661_v24 = vcombine.low %v1651_v21, %v1651_v21 }
  0x75   : > { %4547 = vmatpush3.bf16.msra.mxu1 %v4909_v25  ;;  %4526 = vmatprep.subr.bf16.mxu0 %v4910_v26  ;;  %v4962_v25 = vld [vmem:[%s6086_s1 + $0x540] sm:$0xff]   ;;  %v3956_v26 = vcombine.high %v1651_v21, %v1651_v21 }
  0x76   : > { %4548 = vmatprep.subr.bf16.mxu1 %v4911_v27  ;;  %v4963_v27 = vld [vmem:[%s6086_s1 + $0x5c0] sm:$0xff]  }
  0x77   : > { %v2101_v46 = vshll.u32 %v3956_v26, 16  ;;  %v4997_v21 = vld [vmem:[%s6086_s1 + $0x680] sm:$0xff]  }
  0x78   : > { %4527 = vmatpush3.bf16.msra.mxu0 %v4912_v28  ;;  %v1728_v28 = vrot.slane %v3954_v23, 2 }
  0x79   : > { %4549 = vmatpush3.bf16.msra.mxu1 %v4913_v29  ;;  %4528 = vmatprep.subr.bf16.mxu0 %v4914_v30  ;;  %v1727_v29 = vrot.slane %v5659_v22, 2  ;;  %v1729_v30 = vrot.slane %v5661_v24, 2 }
  0x7a   : > { %4550 = vmatprep.subr.bf16.mxu1 %v4915_v31  ;;  %v4964_v31 = vld [vmem:[%s6086_s1 + $0x500] sm:$0xff]  }
  0x7c   : > { %4529 = vmatpush3.bf16.msra.mxu0 %v4916_v32  ;;  %v1730_v32 = vrot.slane %v3956_v26, 2 }
  0x7d   : > { %4551 = vmatpush3.bf16.msra.mxu1 %v4917_v33  ;;  %4530 = vmatprep.subr.bf16.mxu0 %v4918_v35  ;;  %v4965_v33 = vld [vmem:[%s6086_s1 + $0x580] sm:$0xff]   ;;  %v2082_v35 = vshrl.u32 %v3954_v23, 16 }
  0x7e   : > { %4552 = vmatprep.subr.bf16.mxu1 %v4919_v37  ;;  %v2085_v37 = vshll.u32 %v3954_v23, 16  ;;  %v4999_v23 = vld [vmem:[%s6086_s1 + $0x6c8] sm:$0xff]  }
  0x80   : > { %4531 = vmatpush3.bf16.msra.mxu0 %v4920_v39  ;;  %v2084_v39 = vrot.slane %v2082_v35, 2  ;;  %v5011_v35 = vld [vmem:[%s6086_s1 + $0x6e0] sm:$0xff]  }
  0x81   : > { %4553 = vmatpush3.bf16.msra.mxu1 %v4921_v41  ;;  %4532 = vmatprep.subr.bf16.mxu0 %v4922_v43  ;;  %v2087_v41 = vrot.slane %v2085_v37, 3  ;;  %v2098_v43 = vshrl.u32 %v3956_v26, 16  ;;  %v5002_v26 = vld [vmem:[%s6086_s1 + $0x650] sm:$0xff]   ;;  %v5013_v37 = vld [vmem:[%s6086_s1 + $0x6a0] sm:$0xff]  }
  0x82   : > { %4554 = vmatprep.subr.bf16.mxu1 %v4923_v45 }
  0x83   : > { %v2088_v45 = vor.u32 %v2087_v41, %v2084_v39  ;;  %v2100_v48 = vrot.slane %v2098_v43, 2  ;;  %v5015_v39 = vld [vmem:[%s6086_s1 + $0x6e8] sm:$0xff]   ;;  %v5019_v43 = vld [vmem:[%s6086_s1 + $0x6f0] sm:$0xff]  }
  0x84   : > { %4533 = vmatpush3.bf16.msra.mxu0 %v4924_v47  ;;  %v4972_v47 = vld [vmem:[%s6086_s1 + $0x510] sm:$0xff]   ;;  %v5017_v41 = vld [vmem:[%s6086_s1 + $0x6a8] sm:$0xff]  }
  0x85   : > { %4555 = vmatpush3.bf16.msra.mxu1 %v4925_v49  ;;  %4562 = vmatprep.subr.bf16.mxu0 %v4926_v50  ;;  %v4973_v49 = vld [vmem:[%s6086_s1 + $0x590] sm:$0xff]   ;;  %v2103_v50 = vrot.slane %v2101_v46, 3  ;;  %v5022_v46 = vld [vmem:[%s6086_s1 + $0x678] sm:$0xff]  }
  0x86   : > { %4584 = vmatprep.subr.bf16.mxu1 %v4927_v51  ;;  %v4974_v51 = vld [vmem:[%s6086_s1 + $0x558] sm:$0xff]  }
  0x87   : > { %1602 = vmatmul.mubr.bf16.vlgmr.msra.gmra.mrb[12].mxu0 %v1348_v52  ;;  %v4975_v52 = vld [vmem:[%s6086_s1 + $0x5d8] sm:$0xff]  }
  0x88   : > { %1642 = vmatmul.mubr.bf16.vlgmr.msra.gmra.mrb[12].mxu1 %v1364_v53  ;;  %4563 = vmatpush3.bf16.msra.mxu0 %v4928_v54  ;;  %v2104_v53 = vor.u32 %v2103_v50, %v2100_v48  ;;  %v4976_v54 = vld [vmem:[%s6086_s1 + $0x518] sm:$0xff]   ;;  %v5862_v50 = vld [vmem:[%s5241_s6] ss:$16 sps:$4 sm:$0x18]  }
  0x89   : > { %4585 = vmatpush3.bf16.msra.mxu1 %v4929_v55  ;;  %4564 = vmatprep.subr.bf16.mxu0 %v4930_v56  ;;  %v4977_v55 = vld [vmem:[%s6086_s1 + $0x598] sm:$0xff]   ;;  %v4978_v56 = vld [vmem:[%s6086_s1 + $0x560] sm:$0xff]  }
  0x8a   : > { %4586 = vmatprep.subr.bf16.mxu1 %v4931_v57  ;;  %1959 = vmatprep.mubr.bf16.mxu0 %v1728_v28  ;;  %v4979_v57 = vld [vmem:[%s6086_s1 + $0x5e0] sm:$0xff]   ;;  %v5004_v28 = vld [vmem:[%s6086_s1 + $0x610] sm:$0xff]   ;;  %v5024_v48 = vld [vmem:[%s6086_s1 + $0x638] sm:$0xff]  }
  0x8b   : > { %1999 = vmatprep.mubr.bf16.mxu1 %v1730_v32  ;;  %v5008_v32 = vld [vmem:[%s6086_s1 + $0x618] sm:$0xff]  }
  0x8c   : > { %4565 = vmatpush3.bf16.msra.mxu0 %v4932_v58  ;;  %v4980_v58 = vld [vmem:[%s6086_s1 + $0x520] sm:$0xff]  }
  0x8d   : > { %4587 = vmatpush3.bf16.msra.mxu1 %v4933_v59  ;;  %4566 = vmatprep.subr.bf16.mxu0 %v4934_v60  ;;  %v4981_v59 = vld [vmem:[%s6086_s1 + $0x5a0] sm:$0xff]   ;;  %v4982_v60 = vld [vmem:[%s6086_s1 + $0x568] sm:$0xff]  }
  0x8e   : > { %4588 = vmatprep.subr.bf16.mxu1 %v4935_v61  ;;  %v4983_v61 = vld [vmem:[%s6086_s1 + $0x5e8] sm:$0xff]  }
  0x90   : > { %4567 = vmatpush3.bf16.msra.mxu0 %v4936_v62  ;;  %v4984_v62 = vld [vmem:[%s6086_s1 + $0x528] sm:$0xff]  }
  0x91   : > { %4589 = vmatpush3.bf16.msra.mxu1 %v4937_v63  ;;  %4568 = vmatprep.subr.bf16.mxu0 %v4938_v0  ;;  %v2074_v63 = vshrl.u32 %v5659_v22, 16  ;;  %v4985_v0 = vld [vmem:[%s6086_s1 + $0x5a8] sm:$0xff]  }
  0x92   : > { %4590 = vmatprep.subr.bf16.mxu1 %v4939_v1  ;;  %v2077_v1 = vshll.u32 %v5659_v22, 16  ;;  %v4998_v22 = vld [vmem:[%s6086_s1 + $0x648] sm:$0xff]  }
  0x94   : > { %4569 = vmatpush3.bf16.msra.mxu0 %v4940_v2  ;;  %v4986_v2 = vld [vmem:[%s6086_s1 + $0x570] sm:$0xff]  }
  0x95   : > { %4591 = vmatpush3.bf16.msra.mxu1 %v4941_v3  ;;  %4570 = vmatprep.subr.bf16.mxu0 %v4942_v4  ;;  %v2090_v3 = vshrl.u32 %v5661_v24, 16  ;;  %v4987_v4 = vld [vmem:[%s6086_s1 + $0x5f0] sm:$0xff]  }
  0x96   : > { %4592 = vmatprep.subr.bf16.mxu1 %v4943_v5  ;;  %v2093_v5 = vshll.u32 %v5661_v24, 16  ;;  %v5000_v24 = vld [vmem:[%s6086_s1 + $0x608] sm:$0xff]  }
  0x98   : > { %4571 = vmatpush3.bf16.msra.mxu0 %v4944_v6  ;;  %v4988_v6 = vld [vmem:[%s6086_s1 + $0x530] sm:$0xff]  }
  0x99   : > { %4593 = vmatpush3.bf16.msra.mxu1 %v4945_v7  ;;  %4572 = vmatprep.subr.bf16.mxu0 %v4946_v8  ;;  %v2076_v7 = vrot.slane %v2074_v63, 2  ;;  %v4989_v8 = vld [vmem:[%s6086_s1 + $0x5b0] sm:$0xff]  }
  0x9a   : > { %4594 = vmatprep.subr.bf16.mxu1 %v4947_v9  ;;  %v2079_v9 = vrot.slane %v2077_v1, 3 }
  0x9c   : > { %4573 = vmatpush3.bf16.msra.mxu0 %v4948_v10  ;;  %v4990_v10 = vld [vmem:[%s6086_s1 + $0x578] sm:$0xff]  }
  0x9d   : > { %4595 = vmatpush3.bf16.msra.mxu1 %v4949_v11  ;;  %4574 = vmatprep.subr.bf16.mxu0 %v4950_v12  ;;  %v2092_v11 = vrot.slane %v2090_v3, 2  ;;  %v4991_v12 = vld [vmem:[%s6086_s1 + $0x5f8] sm:$0xff]  }
  0x9e   : > { %4596 = vmatprep.subr.bf16.mxu1 %v4951_v13  ;;  %v2095_v13 = vrot.slane %v2093_v5, 3 }
  0xa0   : > { %4575 = vmatpush3.bf16.msra.mxu0 %v4952_v14  ;;  %v4992_v14 = vld [vmem:[%s6086_s1 + $0x538] sm:$0xff]  }
  0xa1   : > { %4597 = vmatpush3.bf16.msra.mxu1 %v4953_v15  ;;  %4576 = vmatprep.subr.bf16.mxu0 %v4954_v16  ;;  %v4993_v15 = vld [vmem:[%s6086_s1 + $0x5b8] sm:$0xff]   ;;  %v4994_v16 = vld [vmem:[%s6086_s1 + $0x640] sm:$0xff]  }
  0xa2   : > { %4598 = vmatprep.subr.bf16.mxu1 %v4955_v17  ;;  %v2080_v17 = vor.u32 %v2079_v9, %v2076_v7 }
  0xa4   : > { %4577 = vmatpush3.bf16.msra.mxu0 %v4956_v18  ;;  %v2096_v18 = vor.u32 %v2095_v13, %v2092_v11  ;;  %v5042_v11 = vld [vmem:[%s6086_s1 + $0x710] sm:$0xff]  }
  0xa5   : > { %4599 = vmatpush3.bf16.msra.mxu1 %v4957_v19  ;;  %4606 = vmatprep.subr.bf16.mxu0 %v4962_v25  ;;  %v4995_v19 = vld [vmem:[%s6086_s1 + $0x6c0] sm:$0xff]   ;;  %v5001_v25 = vld [vmem:[%s6086_s1 + $0x688] sm:$0xff]   ;;  %v5043_v13 = vld [vmem:[%s6086_s1 + $0x790] sm:$0xff]  }
  0xa6   : > { %4628 = vmatprep.subr.bf16.mxu1 %v4963_v27  ;;  %v5003_v27 = vld [vmem:[%s6086_s1 + $0x6d0] sm:$0xff]  }
  0xa7   : > { %1960 = vmatmul.mubr.bf16.vlgmr.msra.gmra.mrb[16].mxu0 %v1727_v29  ;;  %v5005_v29 = vld [vmem:[%s6086_s1 + $0x690] sm:$0xff]  }
  0xa8   : > { %2000 = vmatmul.mubr.bf16.vlgmr.msra.gmra.mrb[16].mxu1 %v1729_v30  ;;  %4607 = vmatpush3.bf16.msra.mxu0 %v4964_v31  ;;  %v5006_v30 = vld [vmem:[%s6086_s1 + $0x658] sm:$0xff]  }
  0xa9   : > { %4629 = vmatpush3.bf16.msra.mxu1 %v4965_v33  ;;  %4608 = vmatprep.subr.bf16.mxu0 %v4966_v34  ;;  %v5007_v31 = vld [vmem:[%s6086_s1 + $0x6d8] sm:$0xff]   ;;  %v5010_v34 = vld [vmem:[%s6086_s1 + $0x660] sm:$0xff]  }
  0xaa   : > { %4630 = vmatprep.subr.bf16.mxu1 %v4967_v36  ;;  %2333 = vmatprep.mubr.bf16.mxu0 %v2088_v45  ;;  %v5009_v33 = vld [vmem:[%s6086_s1 + $0x698] sm:$0xff]   ;;  %v5012_v36 = vld [vmem:[%s6086_s1 + $0x620] sm:$0xff]   ;;  %v5021_v45 = vld [vmem:[%s6086_s1 + $0x6b0] sm:$0xff]  }
  0xab   : > { %2373 = vmatprep.mubr.bf16.mxu1 %v2104_v53  ;;  %v5866_v53 = vld [vmem:[%s5241_s6 + $0x8] ss:$16 sps:$4 sm:$0x18]  }
  0xac   : > { %4609 = vmatpush3.bf16.msra.mxu0 %v4968_v38  ;;  %v5014_v38 = vld [vmem:[%s6086_s1 + $0x668] sm:$0xff]  }
  0xad   : > { %4631 = vmatpush3.bf16.msra.mxu1 %v4969_v40  ;;  %4610 = vmatprep.subr.bf16.mxu0 %v4970_v42  ;;  %v5016_v40 = vld [vmem:[%s6086_s1 + $0x628] sm:$0xff]   ;;  %v5018_v42 = vld [vmem:[%s6086_s1 + $0x670] sm:$0xff]  }
  0xae   : > { %4632 = vmatprep.subr.bf16.mxu1 %v4971_v44  ;;  %v5020_v44 = vld [vmem:[%s6086_s1 + $0x630] sm:$0xff]  }
  0xb0   : > { %4611 = vmatpush3.bf16.msra.mxu0 %v4972_v47  ;;  %v5023_v47 = vld [vmem:[%s6086_s1 + $0x6f8] sm:$0xff]  }
  0xb1   : > { %4633 = vmatpush3.bf16.msra.mxu1 %v4973_v49  ;;  %4612 = vmatprep.subr.bf16.mxu0 %v4974_v51  ;;  %v5025_v49 = vld [vmem:[%s6086_s1 + $0x6b8] sm:$0xff]   ;;  %v5028_v51 = vld [vmem:[%s5241_s6 + $0x4] ss:$16 sps:$4 sm:$0x18]  }
  0xb2   : > { %4634 = vmatprep.subr.bf16.mxu1 %v4975_v52  ;;  %v2468_v52 = vrot.slane %v5028_v51, 3  ;;  %v2822_v63 = vshrl.u32 %v5028_v51, 16  ;;  %v2825_v1 = vshll.u32 %v5028_v51, 16 }
  0xb4   : > { %4613 = vmatpush3.bf16.msra.mxu0 %v4976_v54  ;;  %v2467_v54 = vrot.slane %v5862_v50, 3  ;;  %v2824_v3 = vrot.slane %v2822_v63, 3  ;;  %v2827_v5 = vrot.slane %v2825_v1, 4  ;;  %v5070_v63 = vld [vmem:[%s6086_s1 + $0x808] sm:$0xff]   ;;  %v5072_v1 = vld [vmem:[%s6086_s1 + $0x850] sm:$0xff]  }
  0xb5   : > { %4635 = vmatpush3.bf16.msra.mxu1 %v4977_v55  ;;  %4614 = vmatprep.subr.bf16.mxu0 %v4978_v56  ;;  %v5032_v55 = vld [vmem:[%s6086_s1 + $0x740] sm:$0xff]   ;;  %v5031_v56 = vld [vmem:[%s5241_s6 + $0xc] ss:$16 sps:$4 sm:$0x18]  }
  0xb6   : > { %4636 = vmatprep.subr.bf16.mxu1 %v4979_v57  ;;  %v5033_v57 = vld [vmem:[%s6086_s1 + $0x7c0] sm:$0xff]   ;;  %v2838_v7 = vshrl.u32 %v5031_v56, 16  ;;  %v2828_v9 = vor.u32 %v2827_v5, %v2824_v3  ;;  %v5074_v3 = vld [vmem:[%s6086_s1 + $0x810] sm:$0xff]   ;;  %v5076_v5 = vld [vmem:[%s6086_s1 + $0x858] sm:$0xff]  }
  0xb8   : > { %4615 = vmatpush3.bf16.msra.mxu0 %v4980_v58  ;;  %v2469_v58 = vrot.slane %v5866_v53, 3 }
  0xb9   : > { %4637 = vmatpush3.bf16.msra.mxu1 %v4981_v59  ;;  %4616 = vmatprep.subr.bf16.mxu0 %v4982_v60  ;;  %v5034_v59 = vld [vmem:[%s6086_s1 + $0x700] sm:$0xff]   ;;  %v2470_v60 = vrot.slane %v5031_v56, 3 }
  0xba   : > { %4638 = vmatprep.subr.bf16.mxu1 %v4983_v61  ;;  %v5035_v61 = vld [vmem:[%s6086_s1 + $0x780] sm:$0xff]  }
  0xbc   : > { %4617 = vmatpush3.bf16.msra.mxu0 %v4984_v62  ;;  %v5036_v62 = vld [vmem:[%s6086_s1 + $0x748] sm:$0xff]  }
  0xbd   : > { %4639 = vmatpush3.bf16.msra.mxu1 %v4985_v0  ;;  %4618 = vmatprep.subr.bf16.mxu0 %v4986_v2  ;;  %v5037_v0 = vld [vmem:[%s6086_s1 + $0x7c8] sm:$0xff]  }
  0xbe   : > { %4640 = vmatprep.subr.bf16.mxu1 %v4987_v4  ;;  %v5038_v2 = vld [vmem:[%s6086_s1 + $0x708] sm:$0xff]  }
  0xbf   : > { %v5039_v4 = vld [vmem:[%s6086_s1 + $0x788] sm:$0xff]  }
  0xc0   : > { %4619 = vmatpush3.bf16.msra.mxu0 %v4988_v6  ;;  %v5040_v6 = vld [vmem:[%s6086_s1 + $0x750] sm:$0xff]  }
  0xc1   : > { %4641 = vmatpush3.bf16.msra.mxu1 %v4989_v8  ;;  %4620 = vmatprep.subr.bf16.mxu0 %v4990_v10  ;;  %v5041_v8 = vld [vmem:[%s6086_s1 + $0x7d0] sm:$0xff]   ;;  %v2841_v10 = vshll.u32 %v5031_v56, 16 }
  0xc2   : > { %4642 = vmatprep.subr.bf16.mxu1 %v4991_v12  ;;  %v2840_v12 = vrot.slane %v2838_v7, 3  ;;  %v5078_v7 = vld [vmem:[%s6086_s1 + $0x818] sm:$0xff]  }
  0xc4   : > { %4621 = vmatpush3.bf16.msra.mxu0 %v4992_v14  ;;  %v2843_v14 = vrot.slane %v2841_v10, 4  ;;  %v5081_v10 = vld [vmem:[%s6086_s1 + $0x8e0] sm:$0xff]  }
  0xc5   : > { %4643 = vmatpush3.bf16.msra.mxu1 %v4993_v15  ;;  %4650 = vmatprep.subr.bf16.mxu0 %v4994_v16  ;;  %v5044_v15 = vld [vmem:[%s6086_s1 + $0x758] sm:$0xff]  }
  0xc6   : > { %4672 = vmatprep.subr.bf16.mxu1 %v4995_v19  ;;  %v5045_v16 = vld [vmem:[%s6086_s1 + $0x7d8] sm:$0xff]  }
  0xc7   : > { %2334 = vmatmul.mubr.bf16.vlgmr.msra.gmra.mrb[20].mxu0 %v2080_v17  ;;  %v2844_v17 = vor.u32 %v2843_v14, %v2840_v12  ;;  %v5047_v19 = vld [vmem:[%s6086_s1 + $0x798] sm:$0xff]   ;;  %v5083_v12 = vld [vmem:[%s6086_s1 + $0x8a0] sm:$0xff]  }
  0xc8   : > { %2374 = vmatmul.mubr.bf16.vlgmr.msra.gmra.mrb[20].mxu1 %v2096_v18  ;;  %4651 = vmatpush3.bf16.msra.mxu0 %v4996_v20  ;;  %v5046_v18 = vld [vmem:[%s6086_s1 + $0x718] sm:$0xff]   ;;  %v5048_v20 = vld [vmem:[%s6086_s1 + $0x760] sm:$0xff]  }
  0xc9   : > { %4673 = vmatpush3.bf16.msra.mxu1 %v4997_v21  ;;  %4652 = vmatprep.subr.bf16.mxu0 %v4998_v22  ;;  %v5049_v21 = vld [vmem:[%s6086_s1 + $0x7e0] sm:$0xff]   ;;  %v2814_v22 = vshrl.u32 %v5862_v50, 16 }
  0xca   : > { %4674 = vmatprep.subr.bf16.mxu1 %v4999_v23  ;;  %2699 = vmatprep.mubr.bf16.mxu0 %v2468_v52  ;;  %v5050_v23 = vld [vmem:[%s6086_s1 + $0x720] sm:$0xff]   ;;  %v5061_v52 = vld [vmem:[%s6086_s1 + $0x7f8] sm:$0xff]  }
  0xcb   : > { %2739 = vmatprep.mubr.bf16.mxu1 %v2470_v60  ;;  %v5067_v60 = vld [vmem:[%s6086_s1 + $0x880] sm:$0xff]  }
  0xcc   : > { %4653 = vmatpush3.bf16.msra.mxu0 %v5000_v24  ;;  %v2817_v24 = vshll.u32 %v5862_v50, 16  ;;  %v5060_v50 = vld [vmem:[%s6086_s1 + $0x778] sm:$0xff]  }
  0xcd   : > { %4675 = vmatpush3.bf16.msra.mxu1 %v5001_v25  ;;  %4654 = vmatprep.subr.bf16.mxu0 %v5002_v26  ;;  %v5051_v25 = vld [vmem:[%s6086_s1 + $0x7a0] sm:$0xff]   ;;  %v2830_v26 = vshrl.u32 %v5866_v53, 16 }
  0xce   : > { %4676 = vmatprep.subr.bf16.mxu1 %v5003_v27  ;;  %v5052_v27 = vld [vmem:[%s6086_s1 + $0x768] sm:$0xff]  }
  0xd0   : > { %4655 = vmatpush3.bf16.msra.mxu0 %v5004_v28  ;;  %v2833_v28 = vshll.u32 %v5866_v53, 16  ;;  %v5062_v53 = vld [vmem:[%s6086_s1 + $0x738] sm:$0xff]  }
  0xd1   : > { %4677 = vmatpush3.bf16.msra.mxu1 %v5005_v29  ;;  %4656 = vmatprep.subr.bf16.mxu0 %v5006_v30 }
  0xd2   : > { %4678 = vmatprep.subr.bf16.mxu1 %v5007_v31  ;;  %v5053_v31 = vld [vmem:[%s6086_s1 + $0x7e8] sm:$0xff]   ;;  %v2835_v51 = vrot.slane %v2833_v28, 4  ;;  %v5088_v28 = vld [vmem:[%s6086_s1 + $0x870] sm:$0xff]  }
  0xd4   : > { %4657 = vmatpush3.bf16.msra.mxu0 %v5008_v32  ;;  %v5054_v32 = vld [vmem:[%s6086_s1 + $0x728] sm:$0xff]  }
  0xd5   : > { %4679 = vmatpush3.bf16.msra.mxu1 %v5009_v33  ;;  %4658 = vmatprep.subr.bf16.mxu0 %v5010_v34 }
  0xd6   : > { %4680 = vmatprep.subr.bf16.mxu1 %v5011_v35 }
  0xd8   : > { %4659 = vmatpush3.bf16.msra.mxu0 %v5012_v36 }
  0xd9   : > { %4681 = vmatpush3.bf16.msra.mxu1 %v5013_v37  ;;  %4660 = vmatprep.subr.bf16.mxu0 %v5014_v38 }
  0xda   : > { %4682 = vmatprep.subr.bf16.mxu1 %v5015_v39  ;;  %v5055_v39 = vld [vmem:[%s6086_s1 + $0x7a8] sm:$0xff]  }
  0xdc   : > { %4661 = vmatpush3.bf16.msra.mxu0 %v5016_v40 }
  0xdd   : > { %4683 = vmatpush3.bf16.msra.mxu1 %v5017_v41  ;;  %4662 = vmatprep.subr.bf16.mxu0 %v5018_v42  ;;  %v5056_v42 = vld [vmem:[%s6086_s1 + $0x770] sm:$0xff]  }
  0xde   : > { %4684 = vmatprep.subr.bf16.mxu1 %v5019_v43 }
  0xe0   : > { %4663 = vmatpush3.bf16.msra.mxu0 %v5020_v44  ;;  %v5057_v44 = vld [vmem:[%s6086_s1 + $0x7f0] sm:$0xff]  }
  0xe1   : > { %4685 = vmatpush3.bf16.msra.mxu1 %v5021_v45  ;;  %4664 = vmatprep.subr.bf16.mxu0 %v5022_v46  ;;  %v2816_v45 = vrot.slane %v2814_v22, 3  ;;  %v5058_v46 = vld [vmem:[%s6086_s1 + $0x730] sm:$0xff]  }
  0xe2   : > { %4686 = vmatprep.subr.bf16.mxu1 %v5023_v47  ;;  %v2819_v47 = vrot.slane %v2817_v24, 4  ;;  %v5087_v24 = vld [vmem:[%s6086_s1 + $0x8a8] sm:$0xff]  }
  0xe4   : > { %4665 = vmatpush3.bf16.msra.mxu0 %v5024_v48  ;;  %v5059_v48 = vld [vmem:[%s6086_s1 + $0x7b0] sm:$0xff]  }
  0xe5   : > { %4687 = vmatpush3.bf16.msra.mxu1 %v5025_v49  ;;  %4694 = vmatprep.subr.bf16.mxu0 %v5032_v55  ;;  %v2832_v49 = vrot.slane %v2830_v26, 3  ;;  %v2820_v55 = vor.u32 %v2819_v47, %v2816_v45 }
  0xe6   : > { %4716 = vmatprep.subr.bf16.mxu1 %v5033_v57  ;;  %v5064_v57 = vld [vmem:[%s6086_s1 + $0x840] sm:$0xff]  }
  0xe7   : > { %2700 = vmatmul.mubr.bf16.vlgmr.msra.gmra.mrb[24].mxu0 %v2467_v54  ;;  %v5063_v54 = vld [vmem:[%s6086_s1 + $0x7b8] sm:$0xff]   ;;  %v2836_v56 = vor.u32 %v2835_v51, %v2832_v49 }
  0xe8   : > { %4695 = vmatpush3.bf16.msra.mxu0 %v5034_v59  ;;  %2740 = vmatmul.mubr.bf16.vlgmr.msra.gmra.mrb[24].mxu1 %v2469_v58  ;;  %v5065_v58 = vld [vmem:[%s6086_s1 + $0x8c0] sm:$0xff]  }
  0xe9   : > { %4717 = vmatpush3.bf16.msra.mxu1 %v5035_v61  ;;  %4696 = vmatprep.subr.bf16.mxu0 %v5036_v62  ;;  %v5066_v59 = vld [vmem:[%s6086_s1 + $0x800] sm:$0xff]   ;;  %v5068_v61 = vld [vmem:[%s6086_s1 + $0x848] sm:$0xff]  }
  0xea   : > { %4718 = vmatprep.subr.bf16.mxu1 %v5037_v0  ;;  %3073 = vmatprep.mubr.bf16.mxu0 %v2828_v9  ;;  %v5069_v62 = vld [vmem:[%s6086_s1 + $0x8c8] sm:$0xff]   ;;  %v5080_v9 = vld [vmem:[%s6086_s1 + $0x860] sm:$0xff]  }
  0xeb   : > { %3113 = vmatprep.mubr.bf16.mxu1 %v2844_v17  ;;  %v5071_v0 = vld [vmem:[%s6086_s1 + $0x888] sm:$0xff]  }
  0xec   : > { %4697 = vmatpush3.bf16.msra.mxu0 %v5038_v2  ;;  %v5073_v2 = vld [vmem:[%s6086_s1 + $0x8d0] sm:$0xff]  }
  0xed   : > { %4719 = vmatpush3.bf16.msra.mxu1 %v5039_v4  ;;  %4698 = vmatprep.subr.bf16.mxu0 %v5040_v6  ;;  %v5075_v4 = vld [vmem:[%s6086_s1 + $0x890] sm:$0xff]   ;;  %v5077_v6 = vld [vmem:[%s6086_s1 + $0x8d8] sm:$0xff]  }
  0xee   : > { %4720 = vmatprep.subr.bf16.mxu1 %v5041_v8  ;;  %v5079_v8 = vld [vmem:[%s6086_s1 + $0x898] sm:$0xff]  }
  0xf0   : > { %4699 = vmatpush3.bf16.msra.mxu0 %v5042_v11  ;;  %v5082_v11 = vld [vmem:[%s6086_s1 + $0x820] sm:$0xff]  }
  0xf1   : > { %4721 = vmatpush3.bf16.msra.mxu1 %v5043_v13  ;;  %4700 = vmatprep.subr.bf16.mxu0 %v5044_v15  ;;  %v5084_v15 = vld [vmem:[%s6086_s1 + $0x868] sm:$0xff]  }
  0xf2   : > { %4722 = vmatprep.subr.bf16.mxu1 %v5045_v16  ;;  %v5085_v16 = vld [vmem:[%s6086_s1 + $0x8e8] sm:$0xff]  }
  0xf4   : > { %4701 = vmatpush3.bf16.msra.mxu0 %v5046_v18 }
  0xf5   : > { %4723 = vmatpush3.bf16.msra.mxu1 %v5047_v19  ;;  %4702 = vmatprep.subr.bf16.mxu0 %v5048_v20 }
  0xf6   : > { %4724 = vmatprep.subr.bf16.mxu1 %v5049_v21 }
  0xf8   : > { %4703 = vmatpush3.bf16.msra.mxu0 %v5050_v23  ;;  %v5086_v23 = vld [vmem:[%s6086_s1 + $0x828] sm:$0xff]  }
  0xf9   : > { %4725 = vmatpush3.bf16.msra.mxu1 %v5051_v25  ;;  %4704 = vmatprep.subr.bf16.mxu0 %v5052_v27 }
  0xfa   : > { %v4402_v29 = vpop.f32.mrb[0].mxu0  ;;  %4726 = vmatprep.subr.bf16.mxu1 %v5053_v31  ;;  %v5090_v31 = vld [vmem:[%s6086_s1 + $0x830] sm:$0xff]  }
  0xfb   : > { %v4424_v30 = vpop.f32.mrb[0].mxu1  ;;  %v4403_v33 = vpop.f32.mrb[1].mxu0 }
  0xfc   : > { %v4425_v34 = vpop.f32.mrb[1].mxu1  ;;  %v4404_v35 = vadd.f32 %v4403_v33, %v4402_v29  ;;  %v4405_v37 = vpop.f32.mrb[2].mxu0  ;;  %4705 = vmatpush3.bf16.msra.mxu0 %v5054_v32  ;;  %v5089_v29 = vld [vmem:[%s6086_s1 + $0x8f0] sm:$0xff]   ;;  %v5092_v33 = vld [vmem:[%s6086_s1 + $0x878] sm:$0xff]  }
  0xfd   : > { %v4426_v36 = vadd.f32 %v4425_v34, %v4424_v30  ;;  %v4427_v38 = vpop.f32.mrb[2].mxu1  ;;  %v4406_v40 = vpop.f32.mrb[3].mxu0  ;;  %4727 = vmatpush3.bf16.msra.mxu1 %v5055_v39  ;;  %4706 = vmatprep.subr.bf16.mxu0 %v5056_v42  ;;  %v5091_v32 = vld [vmem:[%s6086_s1 + $0x8b0] sm:$0xff]   ;;  %v5093_v34 = vld [vmem:[%s6086_s1 + $0x8f8] sm:$0xff]  }
  0xfe   : > { %v4428_v41 = vpop.f32.mrb[3].mxu1  ;;  %4728 = vmatprep.subr.bf16.mxu1 %v5057_v44  ;;  %v3122_v37 = vld [vmem:[%s5241_s6 + $0x10] sm:$0x33]  ;;  %v3123_v38 = vld [vmem:[%s5241_s6 + $0x18] sm:$0x33] }
  0xff   : > { %v5950_v43 = vadd.f32 %v4426_v36, %v4404_v35  ;;  %v5094_v35 = vld [vmem:[%s6086_s1 + $0x838] sm:$0xff]   ;;  %v4345_v39 = vcombine.low %v3122_v37, %v3122_v37  ;;  %v4346_v40 = vcombine.high %v3122_v37, %v3122_v37  ;;  %v4347_v41 = vcombine.low %v3123_v38, %v3123_v38 }
 0x100   : > { %4707 = vmatpush3.bf16.msra.mxu0 %v5058_v46  ;;  %v5095_v36 = vld [vmem:[%s6086_s1 + $0x8b8] sm:$0xff]   ;;  %v4348_v42 = vcombine.high %v3123_v38, %v3123_v38 }
 0x101   : > { %4729 = vmatpush3.bf16.msra.mxu1 %v5059_v48  ;;  %4708 = vmatprep.subr.bf16.mxu0 %v5060_v50 }
 0x102   : > { %4730 = vmatprep.subr.bf16.mxu1 %v5061_v52 }
 0x104   : > { %4709 = vmatpush3.bf16.msra.mxu0 %v5062_v53 }
 0x105   : > { %4731 = vmatpush3.bf16.msra.mxu1 %v5063_v54  ;;  %4738 = vmatprep.subr.bf16.mxu0 %v5064_v57 }
 0x106   : > { %4760 = vmatprep.subr.bf16.mxu1 %v5065_v58 }
 0x107   : > { %3074 = vmatmul.mubr.bf16.vlgmr.msra.gmra.mrb[28].mxu0 %v2820_v55 }
 0x108   : > { %3114 = vmatmul.mubr.bf16.vlgmr.msra.gmra.mrb[28].mxu1 %v2836_v56  ;;  %4739 = vmatpush3.bf16.msra.mxu0 %v5066_v59 }
 0x109   : > { %4761 = vmatpush3.bf16.msra.mxu1 %v5067_v60  ;;  %4740 = vmatprep.subr.bf16.mxu0 %v5068_v61 }
 0x10a   : > { %4762 = vmatprep.subr.bf16.mxu1 %v5069_v62  ;;  %3427 = vmatprep.mubr.bf16.mxu0 %v4346_v40 }
 0x10b   : > { %3467 = vmatprep.mubr.bf16.mxu1 %v4348_v42 }
 0x10c   : > { %4741 = vmatpush3.bf16.msra.mxu0 %v5070_v63 }
 0x10d   : > { %4763 = vmatpush3.bf16.msra.mxu1 %v5071_v0  ;;  %4742 = vmatprep.subr.bf16.mxu0 %v5072_v1 }
 0x10e   : > { %4764 = vmatprep.subr.bf16.mxu1 %v5073_v2 }
 0x110   : > { %4743 = vmatpush3.bf16.msra.mxu0 %v5074_v3 }
 0x111   : > { %4765 = vmatpush3.bf16.msra.mxu1 %v5075_v4  ;;  %4744 = vmatprep.subr.bf16.mxu0 %v5076_v5 }
 0x112   : > { %4766 = vmatprep.subr.bf16.mxu1 %v5077_v6 }
 0x114   : > { %4745 = vmatpush3.bf16.msra.mxu0 %v5078_v7 }
 0x115   : > { %4767 = vmatpush3.bf16.msra.mxu1 %v5079_v8  ;;  %4746 = vmatprep.subr.bf16.mxu0 %v5080_v9 }
 0x116   : > { %4768 = vmatprep.subr.bf16.mxu1 %v5081_v10 }
 0x118   : > { %4747 = vmatpush3.bf16.msra.mxu0 %v5082_v11 }
 0x119   : > { %4769 = vmatpush3.bf16.msra.mxu1 %v5083_v12  ;;  %4748 = vmatprep.subr.bf16.mxu0 %v5084_v15 }
 0x11a   : > { %v4446_v13 = vpop.f32.mrb[4].mxu0  ;;  %4770 = vmatprep.subr.bf16.mxu1 %v5085_v16 }
 0x11b   : > { %v4468_v14 = vpop.f32.mrb[4].mxu1  ;;  %v4447_v17 = vpop.f32.mrb[5].mxu0 }
 0x11c   : > { %v4469_v18 = vpop.f32.mrb[5].mxu1  ;;  %v4448_v19 = vadd.f32 %v4447_v17, %v4446_v13  ;;  %v4449_v21 = vpop.f32.mrb[6].mxu0  ;;  %4749 = vmatpush3.bf16.msra.mxu0 %v5086_v23 }
 0x11d   : > { %v4470_v20 = vadd.f32 %v4469_v18, %v4468_v14  ;;  %v4471_v22 = vpop.f32.mrb[6].mxu1  ;;  %v4450_v25 = vpop.f32.mrb[7].mxu0  ;;  %4771 = vmatpush3.bf16.msra.mxu1 %v5087_v24  ;;  %4750 = vmatprep.subr.bf16.mxu0 %v5088_v28 }
 0x11e   : > { %v4472_v26 = vpop.f32.mrb[7].mxu1  ;;  %v873_v27 = vadd.f32 %v4448_v19, %v5950_v43  ;;  %4772 = vmatprep.subr.bf16.mxu1 %v5089_v29 }
 0x120   : > { %v913_v30 = vadd.f32 %v4470_v20, %v873_v27  ;;  %4751 = vmatpush3.bf16.msra.mxu0 %v5090_v31 }
 0x121   : > { %4773 = vmatpush3.bf16.msra.mxu1 %v5091_v32  ;;  %4752 = vmatprep.subr.bf16.mxu0 %v5092_v33 }
 0x122   : > { %4774 = vmatprep.subr.bf16.mxu1 %v5093_v34 }
 0x124   : > { %4753 = vmatpush3.bf16.msra.mxu0 %v5094_v35 }
 0x125   : > { %4775 = vmatpush3.bf16.msra.mxu1 %v5095_v36 }
 0x127   : > { %3428 = vmatmul.mubr.bf16.vlgmr.msra.gmra.mrb[32].mxu0 %v4345_v39 }
 0x128   : > { %3468 = vmatmul.mubr.bf16.vlgmr.msra.gmra.mrb[32].mxu1 %v4347_v41 }
 0x13a   : > { %v4490_v43 = vpop.f32.mrb[8].mxu0 }
 0x13b   : > { %v4512_v44 = vpop.f32.mrb[8].mxu1  ;;  %v4491_v45 = vpop.f32.mrb[9].mxu0 }
 0x13c   : > { %v4513_v46 = vpop.f32.mrb[9].mxu1  ;;  %v4492_v47 = vadd.f32 %v4491_v45, %v4490_v43  ;;  %v4493_v49 = vpop.f32.mrb[10].mxu0 }
 0x13d   : > { %v4514_v48 = vadd.f32 %v4513_v46, %v4512_v44  ;;  %v4515_v50 = vpop.f32.mrb[10].mxu1  ;;  %v4494_v51 = vpop.f32.mrb[11].mxu0 }
 0x13e   : > { %v4516_v52 = vpop.f32.mrb[11].mxu1 }
 0x13f   : > { %v1270_v53 = vadd.f32 %v4514_v48, %v4492_v47 }
 0x141   : > { %v1275_v54 = vadd.f32 %v1270_v53, %v913_v30 }
 0x15a   : > { %v4534_v55 = vpop.f32.mrb[12].mxu0 }
 0x15b   : > { %v4556_v56 = vpop.f32.mrb[12].mxu1  ;;  %v4535_v57 = vpop.f32.mrb[13].mxu0 }
 0x15c   : > { %v4557_v58 = vpop.f32.mrb[13].mxu1  ;;  %v4536_v59 = vadd.f32 %v4535_v57, %v4534_v55  ;;  %v4537_v61 = vpop.f32.mrb[14].mxu0 }
 0x15d   : > { %v4558_v60 = vadd.f32 %v4557_v58, %v4556_v56  ;;  %v4559_v62 = vpop.f32.mrb[14].mxu1  ;;  %v4538_v63 = vpop.f32.mrb[15].mxu0 }
 0x15e   : > { %v4560_v0 = vpop.f32.mrb[15].mxu1  ;;  %v4381_v62 = vld [vmem:[%s6087_s2] ss:$0 sm:$0xff] }
 0x15f   : > { %v1644_v1 = vadd.f32 %v4558_v60, %v4536_v59  ;;  %v4382_v0 = vld [vmem:[%s6088_s3] ss:$0 sm:$0xff] }
 0x161   : > { %v1649_v2 = vadd.f32 %v1644_v1, %v1275_v54 }
 0x17a   : > { %v4578_v3 = vpop.f32.mrb[16].mxu0 }
 0x17b   : > { %v4600_v4 = vpop.f32.mrb[16].mxu1  ;;  %v4579_v5 = vpop.f32.mrb[17].mxu0 }
 0x17c   : > { %v4601_v6 = vpop.f32.mrb[17].mxu1  ;;  %v4580_v7 = vadd.f32 %v4579_v5, %v4578_v3  ;;  %v4581_v9 = vpop.f32.mrb[18].mxu0 }
 0x17d   : > { %v4602_v8 = vadd.f32 %v4601_v6, %v4600_v4  ;;  %v4603_v10 = vpop.f32.mrb[18].mxu1  ;;  %v4582_v11 = vpop.f32.mrb[19].mxu0  ;;  %v3497_v4 = vld [vmem:[%s195_s25] sm:$0x3] }
 0x17e   : > { %v4604_v12 = vpop.f32.mrb[19].mxu1 }
 0x17f   : > { %v2002_v13 = vadd.f32 %v4602_v8, %v4580_v7 }
 0x181   : > { %v2007_v14 = vadd.f32 %v2002_v13, %v1649_v2 }
 0x19a   : > { %v4622_v15 = vpop.f32.mrb[20].mxu0 }
 0x19b   : > { %v4644_v16 = vpop.f32.mrb[20].mxu1  ;;  %v4623_v17 = vpop.f32.mrb[21].mxu0 }
 0x19c   : > { %v4645_v18 = vpop.f32.mrb[21].mxu1  ;;  %v4624_v19 = vadd.f32 %v4623_v17, %v4622_v15  ;;  %v4625_v21 = vpop.f32.mrb[22].mxu0 }
 0x19d   : > { %v4646_v20 = vadd.f32 %v4645_v18, %v4644_v16  ;;  %v4647_v22 = vpop.f32.mrb[22].mxu1  ;;  %v4626_v23 = vpop.f32.mrb[23].mxu0 }
 0x19e   : > { %v4648_v24 = vpop.f32.mrb[23].mxu1 }
 0x19f   : > { %v2376_v25 = vadd.f32 %v4646_v20, %v4624_v19 }
 0x1a1   : > { %v2381_v26 = vadd.f32 %v2376_v25, %v2007_v14 }
 0x1ba   : > { %v4666_v27 = vpop.f32.mrb[24].mxu0 }
 0x1bb   : > { %v4667_v28 = vpop.f32.mrb[25].mxu0  ;;  %v4688_v31 = vpop.f32.mrb[24].mxu1 }
 0x1bc   : > { %v4668_v29 = vadd.f32 %v4667_v28, %v4666_v27  ;;  %v4669_v30 = vpop.f32.mrb[26].mxu0  ;;  %v4689_v33 = vpop.f32.mrb[25].mxu1 }
 0x1bd   : > { %v4670_v32 = vpop.f32.mrb[27].mxu0  ;;  %v4690_v34 = vadd.f32 %v4689_v33, %v4688_v31  ;;  %v4691_v35 = vpop.f32.mrb[26].mxu1 }
 0x1be   : > { %v4692_v36 = vpop.f32.mrb[27].mxu1 }
 0x1bf   : > { %v2742_v37 = vadd.f32 %v4690_v34, %v4668_v29 }
 0x1c1   : > { %v2747_v38 = vadd.f32 %v2742_v37, %v2381_v26 }
 0x1da   : > { %v4710_v39 = vpop.f32.mrb[28].mxu0 }
 0x1db   : > { %v4732_v40 = vpop.f32.mrb[28].mxu1  ;;  %v4711_v41 = vpop.f32.mrb[29].mxu0 }
 0x1dc   : > { %v4712_v42 = vadd.f32 %v4711_v41, %v4710_v39  ;;  %v4733_v43 = vpop.f32.mrb[29].mxu1  ;;  %v4713_v44 = vpop.f32.mrb[30].mxu0 }
 0x1dd   : > { %v4734_v45 = vadd.f32 %v4733_v43, %v4732_v40  ;;  %v4735_v46 = vpop.f32.mrb[30].mxu1  ;;  %v4714_v47 = vpop.f32.mrb[31].mxu0 }
 0x1de   : > { %v4736_v48 = vpop.f32.mrb[31].mxu1 }
 0x1df   : > { %v3116_v49 = vadd.f32 %v4734_v45, %v4712_v42 }
 0x1e1   : > { %v3121_v50 = vadd.f32 %v3116_v49, %v2747_v38 }
 0x1fa   : > { %v4754_v51 = vpop.f32.mrb[32].mxu0 }
 0x1fb   : > { %v4776_v52 = vpop.f32.mrb[32].mxu1  ;;  %v4755_v53 = vpop.f32.mrb[33].mxu0 }
 0x1fc   : > { %v4777_v54 = vpop.f32.mrb[33].mxu1  ;;  %v4756_v55 = vadd.f32 %v4755_v53, %v4754_v51  ;;  %v4757_v57 = vpop.f32.mrb[34].mxu0 }
 0x1fd   : > { %v4778_v56 = vadd.f32 %v4777_v54, %v4776_v52  ;;  %v4779_v58 = vpop.f32.mrb[34].mxu1  ;;  %v4758_v59 = vpop.f32.mrb[35].mxu0 }
 0x1fe   : > { %v4780_v60 = vpop.f32.mrb[35].mxu1 }
 0x1ff   : > { %v3470_v61 = vadd.f32 %v4778_v56, %v4756_v55 }
 0x201   : > { %v3475_v63 = vadd.f32 %v3470_v61, %v3121_v50 }
 0x203   : > { %v3483_v1 = vmul.f32 %v4381_v62, %v3475_v63 }
 0x205   : > { %v3491_v2 = vadd.f32 %v4382_v0, %v3483_v1 }
 0x207   : > { %v3492_v3 = vmax.f32 %v3491_v2, 0.0 }
 0x209   : > { %v3493_v5 = vpack.c.bf16 %v3492_v3, %v3492_v3 }
 0x20b   : > { %v3498_v6 = vsel %vm3496_vm2, %v3493_v5, %v3497_v4 }
 0x20c   : > { %3499 = vst [vmem:[%s195_s25] sm:$0x3] %v3498_v6 }
 0x20d PF: > { %s14_s15 = sadd.s32 1, %s5106_s15  }
 0x20e   : > { %p11_p4 = scmp.ge.s32.totalorder %s14_s15, 4  }
 0x210   :  { %13 = sbr.rel (!%p11_p4) target bundleno = 1 (0x1), region = 74 }

</bundles_post_ra>
